<compile_context>
chip_gen: v7x
topology: tpu7x:2x2x1
jax: 0.10.0
libtpu: 0.0.40
codegen_flags: <defaults>
</compile_context>

<pallas_src>
from functools import partial

import jax
import jax.numpy as jnp
from jax.experimental import pallas as pl
from jax.experimental.pallas import tpu as pltpu

EPS = 1e-5


# ---------------------------------------------------------------------------
# Pallas kernels
# ---------------------------------------------------------------------------
def _conv3x3_stats_kernel(x_ref, w_ref, y_ref, stats_ref, xpad_ref, slab_ref):
    """One batch element: 3x3 conv (pad=1, stride=1) + per-channel sum / sumsq.

    x_ref:    (1, H, W, Cin)     f32   NHWC input image
    w_ref:    (9*Cin, Cout)      bf16  taps folded into the contraction dim (kh,kw,cin)
    y_ref:    (1, H*W, Cout)     f32   pre-BN conv output
    stats_ref:(1, 2, Cout)       f32   [sum; sum of squares] per image
    xpad_ref: (H+2, W+2, Cin)    bf16  zero-halo padded activation scratch
    slab_ref: (H, W, 9*Cin)      bf16  fat-K im2col slab scratch
    """
    _, H, W, Cin = x_ref.shape
    Hp, Wp = H + 2, W + 2

    # Re-zero only the 1-pixel halo (cheap); the interior is fully overwritten below.
    zero_row = jnp.zeros((1, Wp, Cin), jnp.bfloat16)
    zero_col = jnp.zeros((Hp, 1, Cin), jnp.bfloat16)
    xpad_ref[0:1, :, :] = zero_row
    xpad_ref[Hp - 1:Hp, :, :] = zero_row
    xpad_ref[:, 0:1, :] = zero_col
    xpad_ref[:, Wp - 1:Wp, :] = zero_col

    # Interior write: single f32 -> bf16 cast (replaces the wrapper-side cast).
    xpad_ref[pl.ds(1, H), pl.ds(1, W), :] = x_ref[0].astype(jnp.bfloat16)

    # Build the fat-K im2col slab: tap k occupies lanes [k*Cin, (k+1)*Cin).
    for k in range(9):                       # static unroll, pure 3-D slice copies
        kh, kw = k // 3, k % 3
        slab_ref[:, :, pl.ds(k * Cin, Cin)] = xpad_ref[pl.ds(kh, H), pl.ds(kw, W), :]

    # One MXU dot with K = 9*Cin instead of 9 shallow K=Cin dots + 8 acc RMW passes.
    slab = slab_ref[...].reshape(H * W, 9 * Cin)
    acc = jnp.dot(slab, w_ref[...], preferred_element_type=jnp.float32)

    y_ref[0] = acc
    # BN statistics ride for free on the accumulator already on-chip.
    s = jnp.sum(acc, axis=0, keepdims=True)
    q = jnp.sum(acc * acc, axis=0, keepdims=True)
    stats_ref[0] = jnp.concatenate([s, q], axis=0)


def _bn_relu_conv3x3_stats_kernel(y1_ref, scale_ref, bias_ref, w_ref,
                                  y2_ref, stats_ref, apad_ref, slab_ref):
    """One batch element: BN1 + ReLU prologue, then 3x3 conv + per-channel stats.

    y1_ref:   (1, H*W, C)   f32    pre-BN conv1 output
    scale_ref:(1, 1, C)     f32    gamma1 / sqrt(var1 + eps)
    bias_ref: (1, 1, C)     f32    beta1 - mean1 * scale1
    w_ref:    (9*C, Cout)   bf16
    y2_ref:   (1, H*W, Cout) f32   pre-BN conv2 output
    stats_ref:(1, 2, Cout)  f32    [sum; sum of squares] per image
    apad_ref: (H+2, W+2, C) bf16   zero-halo padded activation scratch
    slab_ref: (H, W, 9*C)   bf16   fat-K im2col slab scratch
    """
    Hp, Wp, C = apad_ref.shape
    H, W = Hp - 2, Wp - 2

    zero_row = jnp.zeros((1, Wp, C), jnp.bfloat16)
    zero_col = jnp.zeros((Hp, 1, C), jnp.bfloat16)
    apad_ref[0:1, :, :] = zero_row
    apad_ref[Hp - 1:Hp, :, :] = zero_row
    apad_ref[:, 0:1, :] = zero_col
    apad_ref[:, Wp - 1:Wp, :] = zero_col

    # Fused BN1 + ReLU prologue; single cast to bf16 on the pad-buffer write.
    a = jnp.maximum(y1_ref[0] * scale_ref[0] + bias_ref[0], 0.0)        # (H*W, C) f32
    apad_ref[pl.ds(1, H), pl.ds(1, W), :] = a.astype(jnp.bfloat16).reshape(H, W, C)

    for k in range(9):
        kh, kw = k // 3, k % 3
        slab_ref[:, :, pl.ds(k * C, C)] = apad_ref[pl.ds(kh, H), pl.ds(kw, W), :]

    slab = slab_ref[...].reshape(H * W, 9 * C)
    acc = jnp.dot(slab, w_ref[...], preferred_element_type=jnp.float32)

    y2_ref[0] = acc
    s = jnp.sum(acc, axis=0, keepdims=True)
    q = jnp.sum(acc * acc, axis=0, keepdims=True)
    stats_ref[0] = jnp.concatenate([s, q], axis=0)


def _bn_add_relu_kernel(y2_ref, scale_ref, bias_ref, sc_ref, o_ref):
    """Lane-dense elementwise epilogue: BN2 + identity shortcut + ReLU."""
    o_ref[...] = jnp.maximum(
        y2_ref[...] * scale_ref[...] + bias_ref[...] + sc_ref[...], 0.0)


# ---------------------------------------------------------------------------
# pallas_call wrappers
# ---------------------------------------------------------------------------
def conv3x3_with_stats(x_nhwc_f32, w_fatk):
    N, H, W, Cin = x_nhwc_f32.shape
    Cout = w_fatk.shape[1]
    return pl.pallas_call(
        _conv3x3_stats_kernel,
        out_shape=(jax.ShapeDtypeStruct((N, H * W, Cout), jnp.float32),
                   jax.ShapeDtypeStruct((N, 2, Cout), jnp.float32)),
        grid_spec=pltpu.PrefetchScalarGridSpec(
            num_scalar_prefetch=0,
            grid=(N,),
            in_specs=[pl.BlockSpec((1, H, W, Cin), lambda n: (n, 0, 0, 0)),
                      pl.BlockSpec((9 * Cin, Cout), lambda n: (0, 0))],
            out_specs=[pl.BlockSpec((1, H * W, Cout), lambda n: (n, 0, 0)),
                       pl.BlockSpec((1, 2, Cout), lambda n: (n, 0, 0))],
            scratch_shapes=[pltpu.VMEM((H + 2, W + 2, Cin), jnp.bfloat16),
                            pltpu.VMEM((H, W, 9 * Cin), jnp.bfloat16)]),
        compiler_params=pltpu.CompilerParams(dimension_semantics=("parallel",)),
    )(x_nhwc_f32, w_fatk)


def bn_relu_conv3x3_with_stats(y1, scale1, bias1, w_fatk, H, W):
    N, HW, C = y1.shape
    Cout = w_fatk.shape[1]
    return pl.pallas_call(
        _bn_relu_conv3x3_stats_kernel,
        out_shape=(jax.ShapeDtypeStruct((N, HW, Cout), jnp.float32),
                   jax.ShapeDtypeStruct((N, 2, Cout), jnp.float32)),
        grid_spec=pltpu.PrefetchScalarGridSpec(
            num_scalar_prefetch=0,
            grid=(N,),
            in_specs=[pl.BlockSpec((1, HW, C), lambda n: (n, 0, 0)),
                      pl.BlockSpec((1, 1, C), lambda n: (0, 0, 0)),
                      pl.BlockSpec((1, 1, C), lambda n: (0, 0, 0)),
                      pl.BlockSpec((9 * C, Cout), lambda n: (0, 0))],
            out_specs=[pl.BlockSpec((1, HW, Cout), lambda n: (n, 0, 0)),
                       pl.BlockSpec((1, 2, Cout), lambda n: (n, 0, 0))],
            scratch_shapes=[pltpu.VMEM((H + 2, W + 2, C), jnp.bfloat16),
                            pltpu.VMEM((H, W, 9 * C), jnp.bfloat16)]),
        compiler_params=pltpu.CompilerParams(dimension_semantics=("parallel",)),
    )(y1, scale1, bias1, w_fatk)


def _pick_row_tile(rows):
    for t in (1024, 512, 256, 128, 64, 32, 16, 8):
        if rows % t == 0:
            return t
    return rows


def bn_add_relu(y2_flat, scale, bias, sc_flat):
    """BN2 + shortcut + ReLU on flattened (N*H*W, C) tensors, lane-dense when possible."""
    M, C = y2_flat.shape
    if C % 128 != 0 and 128 % C == 0 and (M * C) % 128 == 0:
        # Re-view as (R, 128): fully lane-dense, unmasked 128-lane stores.
        L = 128
        R = (M * C) // L
        reps = L // C
        y2v, scv = y2_flat.reshape(R, L), sc_flat.reshape(R, L)
        scale_v = jnp.tile(scale, reps).reshape(1, L)
        bias_v = jnp.tile(bias, reps).reshape(1, L)
    else:
        L, R = C, M
        y2v, scv = y2_flat, sc_flat
        scale_v, bias_v = scale.reshape(1, C), bias.reshape(1, C)

    TR = _pick_row_tile(R)
    out = pl.pallas_call(
        _bn_add_relu_kernel,
        out_shape=jax.ShapeDtypeStruct((R, L), jnp.float32),
        grid_spec=pltpu.PrefetchScalarGridSpec(
            num_scalar_prefetch=0,
            grid=(R // TR,),
            in_specs=[pl.BlockSpec((TR, L), lambda i: (i, 0)),
                      pl.BlockSpec((1, L), lambda i: (0, 0)),
                      pl.BlockSpec((1, L), lambda i: (0, 0)),
                      pl.BlockSpec((TR, L), lambda i: (i, 0))],
            out_specs=pl.BlockSpec((TR, L), lambda i: (i, 0))),
        compiler_params=pltpu.CompilerParams(dimension_semantics=("parallel",)),
    )(y2v, scale_v, bias_v, scv)
    return out.reshape(M, C)


# ---------------------------------------------------------------------------
# Parameter prep / BN finish (tiny, plain JAX)
# ---------------------------------------------------------------------------
def conv_weight_to_fatk(w_oihw):
    """(Cout, Cin, 3, 3) -> (9*Cin, Cout) bf16; row order (kh, kw, cin) matches the slab."""
    Cout, Cin = w_oihw.shape[0], w_oihw.shape[1]
    w = jnp.transpose(w_oihw, (2, 3, 1, 0)).reshape(9 * Cin, Cout)
    return w.astype(jnp.bfloat16)


def _finish_bn(stats, gamma, beta, count):
    """Reduce (N, 2, C) per-image partial stats -> fused BN scale/bias of shape (C,)."""
    total = jnp.sum(stats[:, 0, :], axis=0)       # (C,)
    total_sq = jnp.sum(stats[:, 1, :], axis=0)    # (C,)
    mean = total / count
    # Biased variance (torch BN training-mode normalization); clamp against cancellation.
    var = jnp.maximum(total_sq / count - mean * mean, 0.0)
    scale = gamma / jnp.sqrt(var + EPS)
    bias = beta - mean * scale
    return scale, bias


# ---------------------------------------------------------------------------
# Forward pass
# ---------------------------------------------------------------------------
@partial(jax.jit, static_argnames=("stride",))
def residual_block_forward(x_nchw, params, stride=1):
    w1, w2 = params["w1"], params["w2"]           # (9*Cin, Cout), (9*C, C) bf16
    Cin, Cout = int(w1.shape[0]) // 9, int(w1.shape[1])
    if stride != 1 or Cin != Cout:
        # TODO(synk): projection shortcut (1x1 conv + BN) / stride != 1 not implemented;
        # the reference module defaults to shortcut=None (identity), which requires these.
        raise NotImplementedError("identity shortcut only: stride=1 and Cin==Cout")

    x = jnp.transpose(x_nchw, (0, 2, 3, 1)).astype(jnp.float32)   # NCHW -> NHWC (f32)
    N, H, W, C = x.shape
    M = N * H * W

    # conv1 (3x3, pad 1, no bias) + fused per-channel stats (bf16 cast inside kernel).
    y1, st1 = conv3x3_with_stats(x, w1)
    scale1, bias1 = _finish_bn(st1, params["gamma1"], params["beta1"], M)

    # BN1 + ReLU prologue + conv2 (3x3, stride 1, pad 1) + fused per-channel stats.
    y2, st2 = bn_relu_conv3x3_with_stats(
        y1, scale1.reshape(1, 1, C), bias1.reshape(1, 1, C), w2, H, W)
    scale2, bias2 = _finish_bn(st2, params["gamma2"], params["beta2"], M)

    # BN2 + identity shortcut + ReLU (f32 shortcut, as in the reference).
    out_flat = bn_add_relu(y2.reshape(M, C), scale2, bias2, x.reshape(M, C))

    out = out_flat.reshape(N, H, W, C)
    return jnp.transpose(out, (0, 3, 1, 2))                       # NHWC -> NCHW


# ---------------------------------------------------------------------------
# Pure-JAX reference (same bf16 matmul inputs, f32 accumulation) — verification only
# ---------------------------------------------------------------------------
def _reference_forward(x_nchw, params, stride=1):
    x = jnp.transpose(x_nchw, (0, 2, 3, 1)).astype(jnp.float32)
    dn = ("NHWC", "HWIO", "NHWC")

    def conv(a, w_oihw, s):
        w_hwio = jnp.transpose(w_oihw, (2, 3, 1, 0)).astype(jnp.bfloat16)
        return jax.lax.conv_general_dilated(
            a.astype(jnp.bfloat16), w_hwio, (s, s), ((1, 1), (1, 1)),
            dimension_numbers=dn, preferred_element_type=jnp.float32)

    def bn(a, gamma, beta):
        mean = jnp.mean(a, axis=(0, 1, 2))
        var = jnp.var(a, axis=(0, 1, 2))
        return (a - mean) / jnp.sqrt(var + EPS) * gamma + beta

    y = jax.nn.relu(bn(conv(x, params["w1_oihw"], stride),
                       params["gamma1"], params["beta1"]))
    y = bn(conv(y, params["w2_oihw"], 1), params["gamma2"], params["beta2"])
    y = jax.nn.relu(y + x)
    return jnp.transpose(y, (0, 3, 1, 2))


# ---------------------------------------------------------------------------
if __name__ == "__main__":
    N, C, H, W = 2, 4, 16, 16          # in_channel == out_channel, stride=1, shortcut=None
    key = jax.random.PRNGKey(0)
    kx, kw1, kw2 = jax.random.split(key, 3)

    x = jax.random.normal(kx, (N, C, H, W), dtype=jnp.float32)
    w1_oihw = 0.1 * jax.random.normal(kw1, (C, C, 3, 3), dtype=jnp.float32)
    w2_oihw = 0.1 * jax.random.normal(kw2, (C, C, 3, 3), dtype=jnp.float32)

    params = {
        "w1_oihw": w1_oihw,
        "w2_oihw": w2_oihw,
        "w1": conv_weight_to_fatk(w1_oihw),
        "w2": conv_weight_to_fatk(w2_oihw),
        "gamma1": jnp.ones((C,), jnp.float32),   # BatchNorm2d weight init
        "beta1": jnp.zeros((C,), jnp.float32),   # BatchNorm2d bias init
        "gamma2": jnp.ones((C,), jnp.float32),
        "beta2": jnp.zeros((C,), jnp.float32),
    }

    out = jax.block_until_ready(residual_block_forward(x, params, stride=1))
    ref = jax.block_until_ready(_reference_forward(x, params, stride=1))

    assert out.shape == (N, C, H, W)
    assert jnp.allclose(out, ref, atol=5e-3, rtol=5e-3), "mismatch vs reference"

    print("KERNEL_OK")
</pallas_src>

<mosaic_0001>
module attributes {stable_mosaic.version = 11 : i64} {
  func.func @_conv3x3_stats_kernel(%arg0: i32, %arg1: memref<1x16x16x4xf32, #tpu.memory_space<vmem>>, %arg2: memref<36x4xbf16, #tpu.memory_space<vmem>>, %arg3: memref<1x256x4xf32, #tpu.memory_space<vmem>>, %arg4: memref<1x2x4xf32, #tpu.memory_space<vmem>>, %arg5: memref<18x18x4xbf16, #tpu.memory_space<vmem>>, %arg6: memref<16x16x36xbf16, #tpu.memory_space<vmem>>) attributes {dimension_semantics = [#tpu.dimension_semantics<parallel>], iteration_bounds = array<i64: 2>, scalar_prefetch = 0 : i64, scratch_operands = 2 : i64, tpu.core_type = #tpu.core_type<tc>, window_params = [{transform_indices = @transform_0, window_bounds = array<i64: 1, 16, 16, 4>}, {pipeline_mode = #tpu.pipeline_mode<synchronous>, transform_indices = @transform_1, window_bounds = array<i64: 36, 4>}, {transform_indices = @transform_2, window_bounds = array<i64: 1, 256, 4>}, {transform_indices = @transform_3, window_bounds = array<i64: 1, 2, 4>}]} {
    %cst = arith.constant 0.000000e+00 : bf16
    %0 = vector.broadcast %cst : bf16 to vector<1x18x4xbf16>
    %cst_0 = arith.constant 0.000000e+00 : bf16
    %1 = vector.broadcast %cst_0 : bf16 to vector<18x1x4xbf16>
    %c0 = arith.constant 0 : index
    %c0_1 = arith.constant 0 : index
    %c0_2 = arith.constant 0 : index
    %2 = vector.load %arg5[%c0, %c0_1, %c0_2] : memref<18x18x4xbf16, #tpu.memory_space<vmem>>, vector<1x18x4xbf16>
    tpu.vector_store %arg5[%c0, %c0_1, %c0_2], %0 {strides = array<i32>} : memref<18x18x4xbf16, #tpu.memory_space<vmem>>, vector<1x18x4xbf16>,
    %c17 = arith.constant 17 : index
    %c0_3 = arith.constant 0 : index
    %c0_4 = arith.constant 0 : index
    %3 = vector.load %arg5[%c17, %c0_3, %c0_4] : memref<18x18x4xbf16, #tpu.memory_space<vmem>>, vector<1x18x4xbf16>
    tpu.vector_store %arg5[%c17, %c0_3, %c0_4], %0 {strides = array<i32>} : memref<18x18x4xbf16, #tpu.memory_space<vmem>>, vector<1x18x4xbf16>,
    %c0_5 = arith.constant 0 : index
    %c0_6 = arith.constant 0 : index
    %c0_7 = arith.constant 0 : index
    %4 = vector.load %arg5[%c0_5, %c0_6, %c0_7] : memref<18x18x4xbf16, #tpu.memory_space<vmem>>, vector<18x1x4xbf16>
    tpu.vector_store %arg5[%c0_5, %c0_6, %c0_7], %1 {strides = array<i32>} : memref<18x18x4xbf16, #tpu.memory_space<vmem>>, vector<18x1x4xbf16>,
    %c0_8 = arith.constant 0 : index
    %c17_9 = arith.constant 17 : index
    %c0_10 = arith.constant 0 : index
    %5 = vector.load %arg5[%c0_8, %c17_9, %c0_10] : memref<18x18x4xbf16, #tpu.memory_space<vmem>>, vector<18x1x4xbf16>
    tpu.vector_store %arg5[%c0_8, %c17_9, %c0_10], %1 {strides = array<i32>} : memref<18x18x4xbf16, #tpu.memory_space<vmem>>, vector<18x1x4xbf16>,
    %c0_11 = arith.constant 0 : index
    %c0_12 = arith.constant 0 : index
    %c0_13 = arith.constant 0 : index
    %c0_14 = arith.constant 0 : index
    %6 = vector.load %arg1[%c0_11, %c0_12, %c0_13, %c0_14] : memref<1x16x16x4xf32, #tpu.memory_space<vmem>>, vector<1x16x16x4xf32>
    %7 = vector.shape_cast %6 : vector<1x16x16x4xf32> to vector<16x16x4xf32>
    %8 = arith.truncf %7 : vector<16x16x4xf32> to vector<16x16x4xbf16>
    %c1 = arith.constant 1 : index
    %c1_15 = arith.constant 1 : index
    %c0_16 = arith.constant 0 : index
    %9 = vector.load %arg5[%c1, %c1_15, %c0_16] : memref<18x18x4xbf16, #tpu.memory_space<vmem>>, vector<16x16x4xbf16>
    tpu.vector_store %arg5[%c1, %c1_15, %c0_16], %8 {strides = array<i32>} : memref<18x18x4xbf16, #tpu.memory_space<vmem>>, vector<16x16x4xbf16>,
    %c0_17 = arith.constant 0 : index
    %c0_18 = arith.constant 0 : index
    %c0_19 = arith.constant 0 : index
    %10 = vector.load %arg5[%c0_17, %c0_18, %c0_19] : memref<18x18x4xbf16, #tpu.memory_space<vmem>>, vector<16x16x4xbf16>
    %c0_20 = arith.constant 0 : index
    %c0_21 = arith.constant 0 : index
    %c0_22 = arith.constant 0 : index
    %11 = vector.load %arg6[%c0_20, %c0_21, %c0_22] : memref<16x16x36xbf16, #tpu.memory_space<vmem>>, vector<16x16x4xbf16>
    tpu.vector_store %arg6[%c0_20, %c0_21, %c0_22], %10 {strides = array<i32>} : memref<16x16x36xbf16, #tpu.memory_space<vmem>>, vector<16x16x4xbf16>,
    %c0_23 = arith.constant 0 : index
    %c1_24 = arith.constant 1 : index
    %c0_25 = arith.constant 0 : index
    %12 = vector.load %arg5[%c0_23, %c1_24, %c0_25] : memref<18x18x4xbf16, #tpu.memory_space<vmem>>, vector<16x16x4xbf16>
    %c0_26 = arith.constant 0 : index
    %c0_27 = arith.constant 0 : index
    %c4 = arith.constant 4 : index
    %13 = vector.load %arg6[%c0_26, %c0_27, %c4] : memref<16x16x36xbf16, #tpu.memory_space<vmem>>, vector<16x16x4xbf16>
    tpu.vector_store %arg6[%c0_26, %c0_27, %c4], %12 {strides = array<i32>} : memref<16x16x36xbf16, #tpu.memory_space<vmem>>, vector<16x16x4xbf16>,
    %c0_28 = arith.constant 0 : index
    %c2 = arith.constant 2 : index
    %c0_29 = arith.constant 0 : index
    %14 = vector.load %arg5[%c0_28, %c2, %c0_29] : memref<18x18x4xbf16, #tpu.memory_space<vmem>>, vector<16x16x4xbf16>
    %c0_30 = arith.constant 0 : index
    %c0_31 = arith.constant 0 : index
    %c8 = arith.constant 8 : index
    %15 = vector.load %arg6[%c0_30, %c0_31, %c8] : memref<16x16x36xbf16, #tpu.memory_space<vmem>>, vector<16x16x4xbf16>
    tpu.vector_store %arg6[%c0_30, %c0_31, %c8], %14 {strides = array<i32>} : memref<16x16x36xbf16, #tpu.memory_space<vmem>>, vector<16x16x4xbf16>,
    %c1_32 = arith.constant 1 : index
    %c0_33 = arith.constant 0 : index
    %c0_34 = arith.constant 0 : index
    %16 = vector.load %arg5[%c1_32, %c0_33, %c0_34] : memref<18x18x4xbf16, #tpu.memory_space<vmem>>, vector<16x16x4xbf16>
    %c0_35 = arith.constant 0 : index
    %c0_36 = arith.constant 0 : index
    %c12 = arith.constant 12 : index
    %17 = vector.load %arg6[%c0_35, %c0_36, %c12] : memref<16x16x36xbf16, #tpu.memory_space<vmem>>, vector<16x16x4xbf16>
    tpu.vector_store %arg6[%c0_35, %c0_36, %c12], %16 {strides = array<i32>} : memref<16x16x36xbf16, #tpu.memory_space<vmem>>, vector<16x16x4xbf16>,
    %c1_37 = arith.constant 1 : index
    %c1_38 = arith.constant 1 : index
    %c0_39 = arith.constant 0 : index
    %18 = vector.load %arg5[%c1_37, %c1_38, %c0_39] : memref<18x18x4xbf16, #tpu.memory_space<vmem>>, vector<16x16x4xbf16>
    %c0_40 = arith.constant 0 : index
    %c0_41 = arith.constant 0 : index
    %c16 = arith.constant 16 : index
    %19 = vector.load %arg6[%c0_40, %c0_41, %c16] : memref<16x16x36xbf16, #tpu.memory_space<vmem>>, vector<16x16x4xbf16>
    tpu.vector_store %arg6[%c0_40, %c0_41, %c16], %18 {strides = array<i32>} : memref<16x16x36xbf16, #tpu.memory_space<vmem>>, vector<16x16x4xbf16>,
    %c1_42 = arith.constant 1 : index
    %c2_43 = arith.constant 2 : index
    %c0_44 = arith.constant 0 : index
    %20 = vector.load %arg5[%c1_42, %c2_43, %c0_44] : memref<18x18x4xbf16, #tpu.memory_space<vmem>>, vector<16x16x4xbf16>
    %c0_45 = arith.constant 0 : index
    %c0_46 = arith.constant 0 : index
    %c20 = arith.constant 20 : index
    %21 = vector.load %arg6[%c0_45, %c0_46, %c20] : memref<16x16x36xbf16, #tpu.memory_space<vmem>>, vector<16x16x4xbf16>
    tpu.vector_store %arg6[%c0_45, %c0_46, %c20], %20 {strides = array<i32>} : memref<16x16x36xbf16, #tpu.memory_space<vmem>>, vector<16x16x4xbf16>,
    %c2_47 = arith.constant 2 : index
    %c0_48 = arith.constant 0 : index
    %c0_49 = arith.constant 0 : index
    %22 = vector.load %arg5[%c2_47, %c0_48, %c0_49] : memref<18x18x4xbf16, #tpu.memory_space<vmem>>, vector<16x16x4xbf16>
    %c0_50 = arith.constant 0 : index
    %c0_51 = arith.constant 0 : index
    %c24 = arith.constant 24 : index
    %23 = vector.load %arg6[%c0_50, %c0_51, %c24] : memref<16x16x36xbf16, #tpu.memory_space<vmem>>, vector<16x16x4xbf16>
    tpu.vector_store %arg6[%c0_50, %c0_51, %c24], %22 {strides = array<i32>} : memref<16x16x36xbf16, #tpu.memory_space<vmem>>, vector<16x16x4xbf16>,
    %c2_52 = arith.constant 2 : index
    %c1_53 = arith.constant 1 : index
    %c0_54 = arith.constant 0 : index
    %24 = vector.load %arg5[%c2_52, %c1_53, %c0_54] : memref<18x18x4xbf16, #tpu.memory_space<vmem>>, vector<16x16x4xbf16>
    %c0_55 = arith.constant 0 : index
    %c0_56 = arith.constant 0 : index
    %c28 = arith.constant 28 : index
    %25 = vector.load %arg6[%c0_55, %c0_56, %c28] : memref<16x16x36xbf16, #tpu.memory_space<vmem>>, vector<16x16x4xbf16>
    tpu.vector_store %arg6[%c0_55, %c0_56, %c28], %24 {strides = array<i32>} : memref<16x16x36xbf16, #tpu.memory_space<vmem>>, vector<16x16x4xbf16>,
    %c2_57 = arith.constant 2 : index
    %c2_58 = arith.constant 2 : index
    %c0_59 = arith.constant 0 : index
    %26 = vector.load %arg5[%c2_57, %c2_58, %c0_59] : memref<18x18x4xbf16, #tpu.memory_space<vmem>>, vector<16x16x4xbf16>
    %c0_60 = arith.constant 0 : index
    %c0_61 = arith.constant 0 : index
    %c32 = arith.constant 32 : index
    %27 = vector.load %arg6[%c0_60, %c0_61, %c32] : memref<16x16x36xbf16, #tpu.memory_space<vmem>>, vector<16x16x4xbf16>
    tpu.vector_store %arg6[%c0_60, %c0_61, %c32], %26 {strides = array<i32>} : memref<16x16x36xbf16, #tpu.memory_space<vmem>>, vector<16x16x4xbf16>,
    %c0_62 = arith.constant 0 : index
    %c0_63 = arith.constant 0 : index
    %c0_64 = arith.constant 0 : index
    %28 = vector.load %arg6[%c0_62, %c0_63, %c0_64] : memref<16x16x36xbf16, #tpu.memory_space<vmem>>, vector<16x16x36xbf16>
    %29 = vector.shape_cast %28 : vector<16x16x36xbf16> to vector<256x36xbf16>
    %c0_65 = arith.constant 0 : index
    %c0_66 = arith.constant 0 : index
    %30 = vector.load %arg2[%c0_65, %c0_66] : memref<36x4xbf16, #tpu.memory_space<vmem>>, vector<36x4xbf16>
    %cst_67 = arith.constant dense<0.000000e+00> : vector<256x4xf32>
    %31 = tpu.matmul %29, %30, %cst_67 {dimension_numbers = #tpu.dot_dimension_numbers<[1], [0], [0], [1], [0, 0, 1, 1], [], []>} : vector<256x36xbf16>, vector<36x4xbf16>, vector<256x4xf32> -> vector<256x4xf32>
    %c0_68 = arith.constant 0 : index
    %c0_69 = arith.constant 0 : index
    %c0_70 = arith.constant 0 : index
    %32 = vector.load %arg3[%c0_68, %c0_69, %c0_70] : memref<1x256x4xf32, #tpu.memory_space<vmem>>, vector<1x256x4xf32>
    %33 = vector.shape_cast %32 : vector<1x256x4xf32> to vector<256x4xf32>
    %34 = vector.shape_cast %31 : vector<256x4xf32> to vector<1x256x4xf32>
    tpu.vector_store %arg3[%c0_68, %c0_69, %c0_70], %34 {strides = array<i32>} : memref<1x256x4xf32, #tpu.memory_space<vmem>>, vector<1x256x4xf32>,
    %cst_71 = arith.constant dense<0.000000e+00> : vector<4xf32>
    %35 = vector.multi_reduction <add>, %31, %cst_71 [0] : vector<256x4xf32> to vector<4xf32>
    %36 = vector.shape_cast %35 : vector<4xf32> to vector<1x4xf32>
    %37 = arith.mulf %31, %31 : vector<256x4xf32>
    %cst_72 = arith.constant dense<0.000000e+00> : vector<4xf32>
    %38 = vector.multi_reduction <add>, %37, %cst_72 [0] : vector<256x4xf32> to vector<4xf32>
    %39 = vector.shape_cast %38 : vector<4xf32> to vector<1x4xf32>
    %40 = tpu.concatenate %36, %39 in 0 : vector<1x4xf32>, vector<1x4xf32> -> vector<2x4xf32>
    %c0_73 = arith.constant 0 : index
    %c0_74 = arith.constant 0 : index
    %c0_75 = arith.constant 0 : index
    %41 = vector.load %arg4[%c0_73, %c0_74, %c0_75] : memref<1x2x4xf32, #tpu.memory_space<vmem>>, vector<1x2x4xf32>
    %42 = vector.shape_cast %41 : vector<1x2x4xf32> to vector<2x4xf32>
    %43 = vector.shape_cast %40 : vector<2x4xf32> to vector<1x2x4xf32>
    tpu.vector_store %arg4[%c0_73, %c0_74, %c0_75], %43 {strides = array<i32>} : memref<1x2x4xf32, #tpu.memory_space<vmem>>, vector<1x2x4xf32>,
    return
  }
  func.func @transform_0(%arg0: i32) -> (i32, i32, i32, i32) {
    %c0_i32 = arith.constant 0 : i32
    %c0_i32_0 = arith.constant 0 : i32
    %c0_i32_1 = arith.constant 0 : i32
    %c0_i32_2 = arith.constant 0 : i32
    return %arg0, %c0_i32, %c0_i32_0, %c0_i32_1 : i32, i32, i32, i32
  }
  func.func @transform_1(%arg0: i32) -> (i32, i32) {
    %c0_i32 = arith.constant 0 : i32
    %c0_i32_0 = arith.constant 0 : i32
    %c0_i32_1 = arith.constant 0 : i32
    return %c0_i32, %c0_i32_0 : i32, i32
  }
  func.func @transform_2(%arg0: i32) -> (i32, i32, i32) {
    %c0_i32 = arith.constant 0 : i32
    %c0_i32_0 = arith.constant 0 : i32
    %c0_i32_1 = arith.constant 0 : i32
    return %arg0, %c0_i32, %c0_i32_0 : i32, i32, i32
  }
  func.func @transform_3(%arg0: i32) -> (i32, i32, i32) {
    %c0_i32 = arith.constant 0 : i32
    %c0_i32_0 = arith.constant 0 : i32
    %c0_i32_1 = arith.constant 0 : i32
    return %arg0, %c0_i32, %c0_i32_0 : i32, i32, i32
  }
}

module attributes {stable_mosaic.version = 11 : i64} {
  func.func @_bn_relu_conv3x3_stats_kernel(%arg0: i32, %arg1: memref<1x256x4xf32, #tpu.memory_space<vmem>>, %arg2: memref<1x1x4xf32, #tpu.memory_space<vmem>>, %arg3: memref<1x1x4xf32, #tpu.memory_space<vmem>>, %arg4: memref<36x4xbf16, #tpu.memory_space<vmem>>, %arg5: memref<1x256x4xf32, #tpu.memory_space<vmem>>, %arg6: memref<1x2x4xf32, #tpu.memory_space<vmem>>, %arg7: memref<18x18x4xbf16, #tpu.memory_space<vmem>>, %arg8: memref<16x16x36xbf16, #tpu.memory_space<vmem>>) attributes {dimension_semantics = [#tpu.dimension_semantics<parallel>], iteration_bounds = array<i64: 2>, scalar_prefetch = 0 : i64, scratch_operands = 2 : i64, tpu.core_type = #tpu.core_type<tc>, window_params = [{transform_indices = @transform_0, window_bounds = array<i64: 1, 256, 4>}, {pipeline_mode = #tpu.pipeline_mode<synchronous>, transform_indices = @transform_1, window_bounds = array<i64: 1, 1, 4>}, {pipeline_mode = #tpu.pipeline_mode<synchronous>, transform_indices = @transform_2, window_bounds = array<i64: 1, 1, 4>}, {pipeline_mode = #tpu.pipeline_mode<synchronous>, transform_indices = @transform_3, window_bounds = array<i64: 36, 4>}, {transform_indices = @transform_4, window_bounds = array<i64: 1, 256, 4>}, {transform_indices = @transform_5, window_bounds = array<i64: 1, 2, 4>}]} {
    %cst = arith.constant 0.000000e+00 : bf16
    %0 = vector.broadcast %cst : bf16 to vector<1x18x4xbf16>
    %cst_0 = arith.constant 0.000000e+00 : bf16
    %1 = vector.broadcast %cst_0 : bf16 to vector<18x1x4xbf16>
    %c0 = arith.constant 0 : index
    %c0_1 = arith.constant 0 : index
    %c0_2 = arith.constant 0 : index
    %2 = vector.load %arg7[%c0, %c0_1, %c0_2] : memref<18x18x4xbf16, #tpu.memory_space<vmem>>, vector<1x18x4xbf16>
    tpu.vector_store %arg7[%c0, %c0_1, %c0_2], %0 {strides = array<i32>} : memref<18x18x4xbf16, #tpu.memory_space<vmem>>, vector<1x18x4xbf16>,
    %c17 = arith.constant 17 : index
    %c0_3 = arith.constant 0 : index
    %c0_4 = arith.constant 0 : index
    %3 = vector.load %arg7[%c17, %c0_3, %c0_4] : memref<18x18x4xbf16, #tpu.memory_space<vmem>>, vector<1x18x4xbf16>
    tpu.vector_store %arg7[%c17, %c0_3, %c0_4], %0 {strides = array<i32>} : memref<18x18x4xbf16, #tpu.memory_space<vmem>>, vector<1x18x4xbf16>,
    %c0_5 = arith.constant 0 : index
    %c0_6 = arith.constant 0 : index
    %c0_7 = arith.constant 0 : index
    %4 = vector.load %arg7[%c0_5, %c0_6, %c0_7] : memref<18x18x4xbf16, #tpu.memory_space<vmem>>, vector<18x1x4xbf16>
    tpu.vector_store %arg7[%c0_5, %c0_6, %c0_7], %1 {strides = array<i32>} : memref<18x18x4xbf16, #tpu.memory_space<vmem>>, vector<18x1x4xbf16>,
    %c0_8 = arith.constant 0 : index
    %c17_9 = arith.constant 17 : index
    %c0_10 = arith.constant 0 : index
    %5 = vector.load %arg7[%c0_8, %c17_9, %c0_10] : memref<18x18x4xbf16, #tpu.memory_space<vmem>>, vector<18x1x4xbf16>
    tpu.vector_store %arg7[%c0_8, %c17_9, %c0_10], %1 {strides = array<i32>} : memref<18x18x4xbf16, #tpu.memory_space<vmem>>, vector<18x1x4xbf16>,
    %c0_11 = arith.constant 0 : index
    %c0_12 = arith.constant 0 : index
    %c0_13 = arith.constant 0 : index
    %6 = vector.load %arg1[%c0_11, %c0_12, %c0_13] : memref<1x256x4xf32, #tpu.memory_space<vmem>>, vector<1x256x4xf32>
    %7 = vector.shape_cast %6 : vector<1x256x4xf32> to vector<256x4xf32>
    %c0_14 = arith.constant 0 : index
    %c0_15 = arith.constant 0 : index
    %c0_16 = arith.constant 0 : index
    %8 = vector.load %arg2[%c0_14, %c0_15, %c0_16] : memref<1x1x4xf32, #tpu.memory_space<vmem>>, vector<1x1x4xf32>
    %9 = vector.shape_cast %8 : vector<1x1x4xf32> to vector<1x4xf32>
    %10 = vector.broadcast %9 : vector<1x4xf32> to vector<256x4xf32>
    %11 = arith.mulf %7, %10 : vector<256x4xf32>
    %c0_17 = arith.constant 0 : index
    %c0_18 = arith.constant 0 : index
    %c0_19 = arith.constant 0 : index
    %12 = vector.load %arg3[%c0_17, %c0_18, %c0_19] : memref<1x1x4xf32, #tpu.memory_space<vmem>>, vector<1x1x4xf32>
    %13 = vector.shape_cast %12 : vector<1x1x4xf32> to vector<1x4xf32>
    %14 = vector.broadcast %13 : vector<1x4xf32> to vector<256x4xf32>
    %15 = arith.addf %11, %14 : vector<256x4xf32>
    %cst_20 = arith.constant 0.000000e+00 : f32
    %16 = vector.broadcast %cst_20 : f32 to vector<256x4xf32>
    %17 = arith.maximumf %15, %16 : vector<256x4xf32>
    %18 = arith.truncf %17 : vector<256x4xf32> to vector<256x4xbf16>
    %19 = vector.shape_cast %18 : vector<256x4xbf16> to vector<16x16x4xbf16>
    %c1 = arith.constant 1 : index
    %c1_21 = arith.constant 1 : index
    %c0_22 = arith.constant 0 : index
    %20 = vector.load %arg7[%c1, %c1_21, %c0_22] : memref<18x18x4xbf16, #tpu.memory_space<vmem>>, vector<16x16x4xbf16>
    tpu.vector_store %arg7[%c1, %c1_21, %c0_22], %19 {strides = array<i32>} : memref<18x18x4xbf16, #tpu.memory_space<vmem>>, vector<16x16x4xbf16>,
    %c0_23 = arith.constant 0 : index
    %c0_24 = arith.constant 0 : index
    %c0_25 = arith.constant 0 : index
    %21 = vector.load %arg7[%c0_23, %c0_24, %c0_25] : memref<18x18x4xbf16, #tpu.memory_space<vmem>>, vector<16x16x4xbf16>
    %c0_26 = arith.constant 0 : index
    %c0_27 = arith.constant 0 : index
    %c0_28 = arith.constant 0 : index
    %22 = vector.load %arg8[%c0_26, %c0_27, %c0_28] : memref<16x16x36xbf16, #tpu.memory_space<vmem>>, vector<16x16x4xbf16>
    tpu.vector_store %arg8[%c0_26, %c0_27, %c0_28], %21 {strides = array<i32>} : memref<16x16x36xbf16, #tpu.memory_space<vmem>>, vector<16x16x4xbf16>,
    %c0_29 = arith.constant 0 : index
    %c1_30 = arith.constant 1 : index
    %c0_31 = arith.constant 0 : index
    %23 = vector.load %arg7[%c0_29, %c1_30, %c0_31] : memref<18x18x4xbf16, #tpu.memory_space<vmem>>, vector<16x16x4xbf16>
    %c0_32 = arith.constant 0 : index
    %c0_33 = arith.constant 0 : index
    %c4 = arith.constant 4 : index
    %24 = vector.load %arg8[%c0_32, %c0_33, %c4] : memref<16x16x36xbf16, #tpu.memory_space<vmem>>, vector<16x16x4xbf16>
    tpu.vector_store %arg8[%c0_32, %c0_33, %c4], %23 {strides = array<i32>} : memref<16x16x36xbf16, #tpu.memory_space<vmem>>, vector<16x16x4xbf16>,
    %c0_34 = arith.constant 0 : index
    %c2 = arith.constant 2 : index
    %c0_35 = arith.constant 0 : index
    %25 = vector.load %arg7[%c0_34, %c2, %c0_35] : memref<18x18x4xbf16, #tpu.memory_space<vmem>>, vector<16x16x4xbf16>
    %c0_36 = arith.constant 0 : index
    %c0_37 = arith.constant 0 : index
    %c8 = arith.constant 8 : index
    %26 = vector.load %arg8[%c0_36, %c0_37, %c8] : memref<16x16x36xbf16, #tpu.memory_space<vmem>>, vector<16x16x4xbf16>
    tpu.vector_store %arg8[%c0_36, %c0_37, %c8], %25 {strides = array<i32>} : memref<16x16x36xbf16, #tpu.memory_space<vmem>>, vector<16x16x4xbf16>,
    %c1_38 = arith.constant 1 : index
    %c0_39 = arith.constant 0 : index
    %c0_40 = arith.constant 0 : index
    %27 = vector.load %arg7[%c1_38, %c0_39, %c0_40] : memref<18x18x4xbf16, #tpu.memory_space<vmem>>, vector<16x16x4xbf16>
    %c0_41 = arith.constant 0 : index
    %c0_42 = arith.constant 0 : index
    %c12 = arith.constant 12 : index
    %28 = vector.load %arg8[%c0_41, %c0_42, %c12] : memref<16x16x36xbf16, #tpu.memory_space<vmem>>, vector<16x16x4xbf16>
    tpu.vector_store %arg8[%c0_41, %c0_42, %c12], %27 {strides = array<i32>} : memref<16x16x36xbf16, #tpu.memory_space<vmem>>, vector<16x16x4xbf16>,
    %c1_43 = arith.constant 1 : index
    %c1_44 = arith.constant 1 : index
    %c0_45 = arith.constant 0 : index
    %29 = vector.load %arg7[%c1_43, %c1_44, %c0_45] : memref<18x18x4xbf16, #tpu.memory_space<vmem>>, vector<16x16x4xbf16>
    %c0_46 = arith.constant 0 : index
    %c0_47 = arith.constant 0 : index
    %c16 = arith.constant 16 : index
    %30 = vector.load %arg8[%c0_46, %c0_47, %c16] : memref<16x16x36xbf16, #tpu.memory_space<vmem>>, vector<16x16x4xbf16>
    tpu.vector_store %arg8[%c0_46, %c0_47, %c16], %29 {strides = array<i32>} : memref<16x16x36xbf16, #tpu.memory_space<vmem>>, vector<16x16x4xbf16>,
    %c1_48 = arith.constant 1 : index
    %c2_49 = arith.constant 2 : index
    %c0_50 = arith.constant 0 : index
    %31 = vector.load %arg7[%c1_48, %c2_49, %c0_50] : memref<18x18x4xbf16, #tpu.memory_space<vmem>>, vector<16x16x4xbf16>
    %c0_51 = arith.constant 0 : index
    %c0_52 = arith.constant 0 : index
    %c20 = arith.constant 20 : index
    %32 = vector.load %arg8[%c0_51, %c0_52, %c20] : memref<16x16x36xbf16, #tpu.memory_space<vmem>>, vector<16x16x4xbf16>
    tpu.vector_store %arg8[%c0_51, %c0_52, %c20], %31 {strides = array<i32>} : memref<16x16x36xbf16, #tpu.memory_space<vmem>>, vector<16x16x4xbf16>,
    %c2_53 = arith.constant 2 : index
    %c0_54 = arith.constant 0 : index
    %c0_55 = arith.constant 0 : index
    %33 = vector.load %arg7[%c2_53, %c0_54, %c0_55] : memref<18x18x4xbf16, #tpu.memory_space<vmem>>, vector<16x16x4xbf16>
    %c0_56 = arith.constant 0 : index
    %c0_57 = arith.constant 0 : index
    %c24 = arith.constant 24 : index
    %34 = vector.load %arg8[%c0_56, %c0_57, %c24] : memref<16x16x36xbf16, #tpu.memory_space<vmem>>, vector<16x16x4xbf16>
    tpu.vector_store %arg8[%c0_56, %c0_57, %c24], %33 {strides = array<i32>} : memref<16x16x36xbf16, #tpu.memory_space<vmem>>, vector<16x16x4xbf16>,
    %c2_58 = arith.constant 2 : index
    %c1_59 = arith.constant 1 : index
    %c0_60 = arith.constant 0 : index
    %35 = vector.load %arg7[%c2_58, %c1_59, %c0_60] : memref<18x18x4xbf16, #tpu.memory_space<vmem>>, vector<16x16x4xbf16>
    %c0_61 = arith.constant 0 : index
    %c0_62 = arith.constant 0 : index
    %c28 = arith.constant 28 : index
    %36 = vector.load %arg8[%c0_61, %c0_62, %c28] : memref<16x16x36xbf16, #tpu.memory_space<vmem>>, vector<16x16x4xbf16>
    tpu.vector_store %arg8[%c0_61, %c0_62, %c28], %35 {strides = array<i32>} : memref<16x16x36xbf16, #tpu.memory_space<vmem>>, vector<16x16x4xbf16>,
    %c2_63 = arith.constant 2 : index
    %c2_64 = arith.constant 2 : index
    %c0_65 = arith.constant 0 : index
    %37 = vector.load %arg7[%c2_63, %c2_64, %c0_65] : memref<18x18x4xbf16, #tpu.memory_space<vmem>>, vector<16x16x4xbf16>
    %c0_66 = arith.constant 0 : index
    %c0_67 = arith.constant 0 : index
    %c32 = arith.constant 32 : index
    %38 = vector.load %arg8[%c0_66, %c0_67, %c32] : memref<16x16x36xbf16, #tpu.memory_space<vmem>>, vector<16x16x4xbf16>
    tpu.vector_store %arg8[%c0_66, %c0_67, %c32], %37 {strides = array<i32>} : memref<16x16x36xbf16, #tpu.memory_space<vmem>>, vector<16x16x4xbf16>,
    %c0_68 = arith.constant 0 : index
    %c0_69 = arith.constant 0 : index
    %c0_70 = arith.constant 0 : index
    %39 = vector.load %arg8[%c0_68, %c0_69, %c0_70] : memref<16x16x36xbf16, #tpu.memory_space<vmem>>, vector<16x16x36xbf16>
    %40 = vector.shape_cast %39 : vector<16x16x36xbf16> to vector<256x36xbf16>
    %c0_71 = arith.constant 0 : index
    %c0_72 = arith.constant 0 : index
    %41 = vector.load %arg4[%c0_71, %c0_72] : memref<36x4xbf16, #tpu.memory_space<vmem>>, vector<36x4xbf16>
    %cst_73 = arith.constant dense<0.000000e+00> : vector<256x4xf32>
    %42 = tpu.matmul %40, %41, %cst_73 {dimension_numbers = #tpu.dot_dimension_numbers<[1], [0], [0], [1], [0, 0, 1, 1], [], []>} : vector<256x36xbf16>, vector<36x4xbf16>, vector<256x4xf32> -> vector<256x4xf32>
    %c0_74 = arith.constant 0 : index
    %c0_75 = arith.constant 0 : index
    %c0_76 = arith.constant 0 : index
    %43 = vector.load %arg5[%c0_74, %c0_75, %c0_76] : memref<1x256x4xf32, #tpu.memory_space<vmem>>, vector<1x256x4xf32>
    %44 = vector.shape_cast %43 : vector<1x256x4xf32> to vector<256x4xf32>
    %45 = vector.shape_cast %42 : vector<256x4xf32> to vector<1x256x4xf32>
    tpu.vector_store %arg5[%c0_74, %c0_75, %c0_76], %45 {strides = array<i32>} : memref<1x256x4xf32, #tpu.memory_space<vmem>>, vector<1x256x4xf32>,
    %cst_77 = arith.constant dense<0.000000e+00> : vector<4xf32>
    %46 = vector.multi_reduction <add>, %42, %cst_77 [0] : vector<256x4xf32> to vector<4xf32>
    %47 = vector.shape_cast %46 : vector<4xf32> to vector<1x4xf32>
    %48 = arith.mulf %42, %42 : vector<256x4xf32>
    %cst_78 = arith.constant dense<0.000000e+00> : vector<4xf32>
    %49 = vector.multi_reduction <add>, %48, %cst_78 [0] : vector<256x4xf32> to vector<4xf32>
    %50 = vector.shape_cast %49 : vector<4xf32> to vector<1x4xf32>
    %51 = tpu.concatenate %47, %50 in 0 : vector<1x4xf32>, vector<1x4xf32> -> vector<2x4xf32>
    %c0_79 = arith.constant 0 : index
    %c0_80 = arith.constant 0 : index
    %c0_81 = arith.constant 0 : index
    %52 = vector.load %arg6[%c0_79, %c0_80, %c0_81] : memref<1x2x4xf32, #tpu.memory_space<vmem>>, vector<1x2x4xf32>
    %53 = vector.shape_cast %52 : vector<1x2x4xf32> to vector<2x4xf32>
    %54 = vector.shape_cast %51 : vector<2x4xf32> to vector<1x2x4xf32>
    tpu.vector_store %arg6[%c0_79, %c0_80, %c0_81], %54 {strides = array<i32>} : memref<1x2x4xf32, #tpu.memory_space<vmem>>, vector<1x2x4xf32>,
    return
  }
  func.func @transform_0(%arg0: i32) -> (i32, i32, i32) {
    %c0_i32 = arith.constant 0 : i32
    %c0_i32_0 = arith.constant 0 : i32
    %c0_i32_1 = arith.constant 0 : i32
    return %arg0, %c0_i32, %c0_i32_0 : i32, i32, i32
  }
  func.func @transform_1(%arg0: i32) -> (i32, i32, i32) {
    %c0_i32 = arith.constant 0 : i32
    %c0_i32_0 = arith.constant 0 : i32
    %c0_i32_1 = arith.constant 0 : i32
    %c0_i32_2 = arith.constant 0 : i32
    return %c0_i32, %c0_i32_0, %c0_i32_1 : i32, i32, i32
  }
  func.func @transform_2(%arg0: i32) -> (i32, i32, i32) {
    %c0_i32 = arith.constant 0 : i32
    %c0_i32_0 = arith.constant 0 : i32
    %c0_i32_1 = arith.constant 0 : i32
    %c0_i32_2 = arith.constant 0 : i32
    return %c0_i32, %c0_i32_0, %c0_i32_1 : i32, i32, i32
  }
  func.func @transform_3(%arg0: i32) -> (i32, i32) {
    %c0_i32 = arith.constant 0 : i32
    %c0_i32_0 = arith.constant 0 : i32
    %c0_i32_1 = arith.constant 0 : i32
    return %c0_i32, %c0_i32_0 : i32, i32
  }
  func.func @transform_4(%arg0: i32) -> (i32, i32, i32) {
    %c0_i32 = arith.constant 0 : i32
    %c0_i32_0 = arith.constant 0 : i32
    %c0_i32_1 = arith.constant 0 : i32
    return %arg0, %c0_i32, %c0_i32_0 : i32, i32, i32
  }
  func.func @transform_5(%arg0: i32) -> (i32, i32, i32) {
    %c0_i32 = arith.constant 0 : i32
    %c0_i32_0 = arith.constant 0 : i32
    %c0_i32_1 = arith.constant 0 : i32
    return %arg0, %c0_i32, %c0_i32_0 : i32, i32, i32
  }
}

module attributes {stable_mosaic.version = 11 : i64} {
  func.func @_bn_add_relu_kernel(%arg0: i32, %arg1: memref<16x128xf32, #tpu.memory_space<vmem>>, %arg2: memref<1x128xf32, #tpu.memory_space<vmem>>, %arg3: memref<1x128xf32, #tpu.memory_space<vmem>>, %arg4: memref<16x128xf32, #tpu.memory_space<vmem>>, %arg5: memref<16x128xf32, #tpu.memory_space<vmem>>) attributes {dimension_semantics = [#tpu.dimension_semantics<parallel>], iteration_bounds = array<i64: 1>, scalar_prefetch = 0 : i64, scratch_operands = 0 : i64, tpu.core_type = #tpu.core_type<tc>, window_params = [{transform_indices = @transform_0, window_bounds = array<i64: 16, 128>}, {pipeline_mode = #tpu.pipeline_mode<synchronous>, transform_indices = @transform_1, window_bounds = array<i64: 1, 128>}, {pipeline_mode = #tpu.pipeline_mode<synchronous>, transform_indices = @transform_2, window_bounds = array<i64: 1, 128>}, {transform_indices = @transform_3, window_bounds = array<i64: 16, 128>}, {transform_indices = @transform_4, window_bounds = array<i64: 16, 128>}]} {
    %c0 = arith.constant 0 : index
    %c0_0 = arith.constant 0 : index
    %0 = vector.load %arg1[%c0, %c0_0] : memref<16x128xf32, #tpu.memory_space<vmem>>, vector<16x128xf32>
    %c0_1 = arith.constant 0 : index
    %c0_2 = arith.constant 0 : index
    %1 = vector.load %arg2[%c0_1, %c0_2] : memref<1x128xf32, #tpu.memory_space<vmem>>, vector<1x128xf32>
    %2 = vector.broadcast %1 : vector<1x128xf32> to vector<16x128xf32>
    %3 = arith.mulf %0, %2 : vector<16x128xf32>
    %c0_3 = arith.constant 0 : index
    %c0_4 = arith.constant 0 : index
    %4 = vector.load %arg3[%c0_3, %c0_4] : memref<1x128xf32, #tpu.memory_space<vmem>>, vector<1x128xf32>
    %5 = vector.broadcast %4 : vector<1x128xf32> to vector<16x128xf32>
    %6 = arith.addf %3, %5 : vector<16x128xf32>
    %c0_5 = arith.constant 0 : index
    %c0_6 = arith.constant 0 : index
    %7 = vector.load %arg4[%c0_5, %c0_6] : memref<16x128xf32, #tpu.memory_space<vmem>>, vector<16x128xf32>
    %8 = arith.addf %6, %7 : vector<16x128xf32>
    %cst = arith.constant 0.000000e+00 : f32
    %9 = vector.broadcast %cst : f32 to vector<16x128xf32>
    %10 = arith.maximumf %8, %9 : vector<16x128xf32>
    %c0_7 = arith.constant 0 : index
    %c0_8 = arith.constant 0 : index
    %11 = vector.load %arg5[%c0_7, %c0_8] : memref<16x128xf32, #tpu.memory_space<vmem>>, vector<16x128xf32>
    tpu.vector_store %arg5[%c0_7, %c0_8], %10 {strides = array<i32>} : memref<16x128xf32, #tpu.memory_space<vmem>>, vector<16x128xf32>,
    return
  }
  func.func @transform_0(%arg0: i32) -> (i32, i32) {
    %c0_i32 = arith.constant 0 : i32
    %c0_i32_0 = arith.constant 0 : i32
    return %arg0, %c0_i32 : i32, i32
  }
  func.func @transform_1(%arg0: i32) -> (i32, i32) {
    %c0_i32 = arith.constant 0 : i32
    %c0_i32_0 = arith.constant 0 : i32
    %c0_i32_1 = arith.constant 0 : i32
    return %c0_i32, %c0_i32_0 : i32, i32
  }
  func.func @transform_2(%arg0: i32) -> (i32, i32) {
    %c0_i32 = arith.constant 0 : i32
    %c0_i32_0 = arith.constant 0 : i32
    %c0_i32_1 = arith.constant 0 : i32
    return %c0_i32, %c0_i32_0 : i32, i32
  }
  func.func @transform_3(%arg0: i32) -> (i32, i32) {
    %c0_i32 = arith.constant 0 : i32
    %c0_i32_0 = arith.constant 0 : i32
    return %arg0, %c0_i32 : i32, i32
  }
  func.func @transform_4(%arg0: i32) -> (i32, i32) {
    %c0_i32 = arith.constant 0 : i32
    %c0_i32_0 = arith.constant 0 : i32
    return %arg0, %c0_i32 : i32, i32
  }
}

</mosaic_0001>

<bundles_post_ra>
// kernel: tile.18
= control target key start
LH: loop header
LB: loop body
LE: loop exit
PB: predicated region body
PF: predicated region fallthrough
CT: control target
= control target key end

     0   :  { %s40_s0 = inlined_call_operand.vmem [shape: f32[4], index: 0, kind: input, shape index: {}]   ;;  %s41_s1 = inlined_call_operand.vmem [shape: f32[32,4], index: 1, kind: output, shape index: {}]  }
   0x1   :  { %v4_v0 = vld [vmem:[%s40_s0] ss:$0 sm:$0xff] }
   0x2   :  { %5 = vst [vmem:[%s41_s1] sm:$0xff] %v4_v0  ;;  %12 = vst [vmem:[%s41_s1 + $0x8] sm:$0xff] %v4_v0 }
   0x3   :  { %13 = vst [vmem:[%s41_s1 + $0x10] sm:$0xff] %v4_v0  ;;  %14 = vst [vmem:[%s41_s1 + $0x18] sm:$0xff] %v4_v0 }

// kernel: tile.19
= control target key start
LH: loop header
LB: loop body
LE: loop exit
PB: predicated region body
PF: predicated region fallthrough
CT: control target
= control target key end

     0   :  { %s259_s10 = smov 124   ;;  %s260_s11 = smov 116   ;;  %vm3_vm0 = vcmask 31744   ;;  %vm9_vm1 = vcmask 1048544   ;;  %vm15_vm2 = vcmask 1015744   ;;  %vm21_vm3 = vcmask 982944   ;;  %s399_s0 = inlined_call_operand.vmem [shape: f32[32,4], index: 0, kind: input, shape index: {}]   ;;  %s400_s1 = inlined_call_operand.vmem [shape: f32[1,128], index: 1, kind: output, shape index: {}]  }
   0x1   :  { %v197_v0 = vld [vmem:[%s399_s0 + $0x1f] sm:$0x1]   ;;  %v199_v1 = vld [vmem:[%s399_s0 + $0x1d] sm:$0x1]   ;;  %v198_v2 = vld [vmem:[%s399_s0 + $0x1e] sm:$0x1]  }
   0x2   :  { %7 = vrot.lane.b32.xlu0 %v197_v0, %s259_s10  ;;  %19 = vrot.lane.b32.xlu1 %v199_v1, %s260_s11  ;;  %v200_v3 = vld [vmem:[%s399_s0 + $0x1c] sm:$0x1]   ;;  %s261_s16 = smov 120   ;;  %s262_s17 = smov 112   ;;  %v201_v4 = vld [vmem:[%s399_s0 + $0x1b] sm:$0x1]  }
   0x3   :  { %v202_v5 = vld [vmem:[%s399_s0 + $0x1a] sm:$0x1]   ;;  %s263_s22 = smov 108   ;;  %s264_s23 = smov 104   ;;  %v203_v6 = vld [vmem:[%s399_s0 + $0x19] sm:$0x1]  }
   0x4   :  { %v204_v7 = vld [vmem:[%s399_s0 + $0x18] sm:$0x1]   ;;  %s265_s28 = smov 100   ;;  %s266_s29 = smov 96   ;;  %v205_v8 = vld [vmem:[%s399_s0 + $0x17] sm:$0x1]  }
   0x5   :  { %v206_v9 = vld [vmem:[%s399_s0 + $0x16] sm:$0x1]   ;;  %v2_v10 = vld [vmem:[%s399_s0] sm:$0x1]   ;;  %s267_s7 = smov 92   ;;  %s268_s8 = smov 88  }
   0x6   :  { %13 = vrot.lane.b32.xlu0 %v198_v2, %s261_s16  ;;  %25 = vrot.lane.b32.xlu1 %v200_v3, %s262_s17  ;;  %4 = vst.msk [vmem:[#allocation0] sm:$0x1] %vm3_vm0, %v2_v10   ;;  %v207_v11 = vld [vmem:[%s399_s0 + $0x15] sm:$0x1]   ;;  %v208_v12 = vld [vmem:[%s399_s0 + $0x14] sm:$0x1]  }
   0x7   :  { %s269_s13 = smov 84   ;;  %s270_s14 = smov 80   ;;  %v209_v13 = vld [vmem:[%s399_s0 + $0x13] sm:$0x1]   ;;  %v210_v14 = vld [vmem:[%s399_s0 + $0x12] sm:$0x1]  }
   0x8   :  { %s271_s19 = smov 76   ;;  %s272_s20 = smov 72   ;;  %v211_v15 = vld [vmem:[%s399_s0 + $0x11] sm:$0x1]   ;;  %v212_v16 = vld [vmem:[%s399_s0 + $0x10] sm:$0x1]  }
   0x9   :  { %s273_s25 = smov 68   ;;  %s274_s26 = smov 64   ;;  %v213_v17 = vld [vmem:[%s399_s0 + $0xf] sm:$0x1]   ;;  %v214_v18 = vld [vmem:[%s399_s0 + $0xe] sm:$0x1]  }
   0xa   :  { %31 = vrot.lane.b32.xlu0 %v201_v4, %s263_s22  ;;  %37 = vrot.lane.b32.xlu1 %v202_v5, %s264_s23  ;;  %s275_s2 = smov 60   ;;  %s276_s3 = smov 56   ;;  %v215_v19 = vld [vmem:[%s399_s0 + $0xd] sm:$0x1]   ;;  %v216_v20 = vld [vmem:[%s399_s0 + $0xc] sm:$0x1]  }
   0xb   :  { %s278_s9 = smov 48   ;;  %v217_v21 = vld [vmem:[%s399_s0 + $0xb] sm:$0x1]   ;;  %v218_v22 = vld [vmem:[%s399_s0 + $0xa] sm:$0x1]   ;;  %s280_s15 = smov 40  }
   0xc   :  { %v219_v23 = vld [vmem:[%s399_s0 + $0x9] sm:$0x1]   ;;  %v220_v24 = vld [vmem:[%s399_s0 + $0x8] sm:$0x1]   ;;  %s282_s21 = smov 32   ;;  %s284_s27 = smov 24  }
   0xd   :  { %v221_v25 = vld [vmem:[%s399_s0 + $0x7] sm:$0x1]   ;;  %v222_v26 = vld [vmem:[%s399_s0 + $0x6] sm:$0x1]   ;;  %v223_v27 = vld [vmem:[%s399_s0 + $0x5] sm:$0x1]  }
   0xe   :  { %43 = vrot.lane.b32.xlu0 %v203_v6, %s265_s28  ;;  %49 = vrot.lane.b32.xlu1 %v204_v7, %s266_s29  ;;  %v224_v28 = vld [vmem:[%s399_s0 + $0x4] sm:$0x1]   ;;  %s286_s4 = smov 16   ;;  %v225_v29 = vld [vmem:[%s399_s0 + $0x3] sm:$0x1]   ;;  %s288_s10 = smov 8  }
   0xf   :  { %v226_v30 = vld [vmem:[%s399_s0 + $0x2] sm:$0x1]   ;;  %v227_v31 = vld [vmem:[%s399_s0 + $0x1] sm:$0x1]   ;;  %s289_s0 = smov 4   ;;  %vm27_vm4 = vcmask 950144  }
  0x10   :  { %vm33_vm5 = vcmask 917344   ;;  %vm39_vm6 = vcmask 884544   ;;  %vm45_vm7 = vcmask 851744   ;;  %vm51_vm8 = vcmask 818944  }
  0x11   :  { %vm57_vm9 = vcmask 786144   ;;  %vm63_vm10 = vcmask 753344   ;;  %vm69_vm11 = vcmask 720544   ;;  %vm75_vm12 = vcmask 687744  }
  0x12   :  { %55 = vrot.lane.b32.xlu0 %v205_v8, %s267_s7  ;;  %61 = vrot.lane.b32.xlu1 %v206_v9, %s268_s8  ;;  %s277_s8 = smov 52   ;;  %vm81_vm13 = vcmask 654944   ;;  %vm87_vm14 = vcmask 622144   ;;  %vm93_vm15 = vcmask 589344   ;;  %vm99_vm0 = vcmask 556544  }
  0x16   :  { %67 = vrot.lane.b32.xlu0 %v207_v11, %s269_s13  ;;  %73 = vrot.lane.b32.xlu1 %v208_v12, %s270_s14  ;;  %s279_s14 = smov 44  }
  0x1a   :  { %79 = vrot.lane.b32.xlu0 %v209_v13, %s271_s19  ;;  %85 = vrot.lane.b32.xlu1 %v210_v14, %s272_s20  ;;  %s281_s20 = smov 36  }
  0x1e   :  { %91 = vrot.lane.b32.xlu0 %v211_v15, %s273_s25  ;;  %97 = vrot.lane.b32.xlu1 %v212_v16, %s274_s26  ;;  %s283_s26 = smov 28  }
  0x22   :  { %103 = vrot.lane.b32.xlu0 %v213_v17, %s275_s2  ;;  %109 = vrot.lane.b32.xlu1 %v214_v18, %s276_s3  ;;  %s285_s3 = smov 20  }
  0x26   :  { %115 = vrot.lane.b32.xlu0 %v215_v19, %s277_s8  ;;  %121 = vrot.lane.b32.xlu1 %v216_v20, %s278_s9  ;;  %s287_s9 = smov 12  }
  0x2a   :  { %127 = vrot.lane.b32.xlu0 %v217_v21, %s279_s14  ;;  %133 = vrot.lane.b32.xlu1 %v218_v22, %s280_s15 }
  0x2e   :  { %139 = vrot.lane.b32.xlu0 %v219_v23, %s281_s20  ;;  %145 = vrot.lane.b32.xlu1 %v220_v24, %s282_s21 }
  0x32   :  { %151 = vrot.lane.b32.xlu0 %v221_v25, %s283_s26  ;;  %157 = vrot.lane.b32.xlu1 %v222_v26, %s284_s27 }
  0x36   :  { %163 = vrot.lane.b32.xlu0 %v223_v27, %s285_s3  ;;  %169 = vrot.lane.b32.xlu1 %v224_v28, %s286_s4 }
  0x3a   :  { %175 = vrot.lane.b32.xlu0 %v225_v29, %s287_s9  ;;  %181 = vrot.lane.b32.xlu1 %v226_v30, %s288_s10 }
  0x3e   :  { %187 = vrot.lane.b32.xlu0 %v227_v31, %s289_s0 }
  0x74   :  { %v8_v32 = vpop.permute.xlu0 %7   ;;  %v20_v33 = vpop.permute.xlu1 %19  }
  0x75   :  { %10 = vst.msk [vmem:[#allocation0] sm:$0x1] %vm9_vm1, %v8_v32   ;;  %vm105_vm1 = vcmask 523744  }
  0x78   :  { %v14_v34 = vpop.permute.xlu0 %13   ;;  %v26_v35 = vpop.permute.xlu1 %25  }
  0x79   :  { %16 = vst.msk [vmem:[#allocation0] sm:$0x1] %vm15_vm2, %v14_v34   ;;  %vm111_vm2 = vcmask 490944  }
  0x7a   :  { %22 = vst.msk [vmem:[#allocation0] sm:$0x1] %vm21_vm3, %v20_v33   ;;  %vm117_vm3 = vcmask 458144  }
  0x7b   :  { %28 = vst.msk [vmem:[#allocation0] sm:$0x1] %vm27_vm4, %v26_v35   ;;  %vm123_vm4 = vcmask 425344  }
  0x7c   :  { %v32_v36 = vpop.permute.xlu0 %31   ;;  %v38_v37 = vpop.permute.xlu1 %37  }
  0x7d   :  { %34 = vst.msk [vmem:[#allocation0] sm:$0x1] %vm33_vm5, %v32_v36   ;;  %vm129_vm5 = vcmask 392544  }
  0x7e   :  { %40 = vst.msk [vmem:[#allocation0] sm:$0x1] %vm39_vm6, %v38_v37   ;;  %vm135_vm6 = vcmask 359744  }
  0x80   :  { %v44_v38 = vpop.permute.xlu0 %43   ;;  %v50_v39 = vpop.permute.xlu1 %49  }
  0x81   :  { %46 = vst.msk [vmem:[#allocation0] sm:$0x1] %vm45_vm7, %v44_v38   ;;  %vm141_vm7 = vcmask 326944  }
  0x82   :  { %52 = vst.msk [vmem:[#allocation0] sm:$0x1] %vm51_vm8, %v50_v39   ;;  %vm147_vm8 = vcmask 294144  }
  0x84   :  { %v56_v40 = vpop.permute.xlu0 %55   ;;  %v62_v41 = vpop.permute.xlu1 %61  }
  0x85   :  { %58 = vst.msk [vmem:[#allocation0] sm:$0x1] %vm57_vm9, %v56_v40   ;;  %vm153_vm9 = vcmask 261344  }
  0x86   :  { %64 = vst.msk [vmem:[#allocation0] sm:$0x1] %vm63_vm10, %v62_v41   ;;  %vm159_vm10 = vcmask 228544  }
  0x88   :  { %v68_v42 = vpop.permute.xlu0 %67   ;;  %v74_v43 = vpop.permute.xlu1 %73  }
  0x89   :  { %70 = vst.msk [vmem:[#allocation0] sm:$0x1] %vm69_vm11, %v68_v42   ;;  %vm165_vm11 = vcmask 195744  }
  0x8a   :  { %76 = vst.msk [vmem:[#allocation0] sm:$0x1] %vm75_vm12, %v74_v43   ;;  %vm171_vm12 = vcmask 162944  }
  0x8c   :  { %v80_v44 = vpop.permute.xlu0 %79   ;;  %v86_v45 = vpop.permute.xlu1 %85  }
  0x8d   :  { %82 = vst.msk [vmem:[#allocation0] sm:$0x1] %vm81_vm13, %v80_v44   ;;  %vm177_vm13 = vcmask 130144  }
  0x8e   :  { %88 = vst.msk [vmem:[#allocation0] sm:$0x1] %vm87_vm14, %v86_v45   ;;  %vm183_vm14 = vcmask 97344  }
  0x90   :  { %v92_v46 = vpop.permute.xlu0 %91   ;;  %v98_v47 = vpop.permute.xlu1 %97  }
  0x91   :  { %94 = vst.msk [vmem:[#allocation0] sm:$0x1] %vm93_vm15, %v92_v46   ;;  %vm189_vm15 = vcmask 64544  }
  0x92   :  { %100 = vst.msk [vmem:[#allocation0] sm:$0x1] %vm99_vm0, %v98_v47  }
  0x94   :  { %v104_v48 = vpop.permute.xlu0 %103   ;;  %v110_v49 = vpop.permute.xlu1 %109  }
  0x95   :  { %106 = vst.msk [vmem:[#allocation0] sm:$0x1] %vm105_vm1, %v104_v48  }
  0x96   :  { %112 = vst.msk [vmem:[#allocation0] sm:$0x1] %vm111_vm2, %v110_v49  }
  0x98   :  { %v116_v50 = vpop.permute.xlu0 %115   ;;  %v122_v51 = vpop.permute.xlu1 %121  }
  0x99   :  { %118 = vst.msk [vmem:[#allocation0] sm:$0x1] %vm117_vm3, %v116_v50  }
  0x9a   :  { %124 = vst.msk [vmem:[#allocation0] sm:$0x1] %vm123_vm4, %v122_v51  }
  0x9c   :  { %v128_v52 = vpop.permute.xlu0 %127   ;;  %v134_v53 = vpop.permute.xlu1 %133  }
  0x9d   :  { %130 = vst.msk [vmem:[#allocation0] sm:$0x1] %vm129_vm5, %v128_v52  }
  0x9e   :  { %136 = vst.msk [vmem:[#allocation0] sm:$0x1] %vm135_vm6, %v134_v53  }
  0xa0   :  { %v140_v54 = vpop.permute.xlu0 %139   ;;  %v146_v55 = vpop.permute.xlu1 %145  }
  0xa1   :  { %142 = vst.msk [vmem:[#allocation0] sm:$0x1] %vm141_vm7, %v140_v54  }
  0xa2   :  { %148 = vst.msk [vmem:[#allocation0] sm:$0x1] %vm147_vm8, %v146_v55  }
  0xa4   :  { %v152_v56 = vpop.permute.xlu0 %151   ;;  %v158_v57 = vpop.permute.xlu1 %157  }
  0xa5   :  { %154 = vst.msk [vmem:[#allocation0] sm:$0x1] %vm153_vm9, %v152_v56  }
  0xa6   :  { %160 = vst.msk [vmem:[#allocation0] sm:$0x1] %vm159_vm10, %v158_v57  }
  0xa8   :  { %v164_v58 = vpop.permute.xlu0 %163   ;;  %v170_v59 = vpop.permute.xlu1 %169  }
  0xa9   :  { %166 = vst.msk [vmem:[#allocation0] sm:$0x1] %vm165_vm11, %v164_v58  }
  0xaa   :  { %172 = vst.msk [vmem:[#allocation0] sm:$0x1] %vm171_vm12, %v170_v59  }
  0xac   :  { %v176_v60 = vpop.permute.xlu0 %175   ;;  %v182_v61 = vpop.permute.xlu1 %181  }
  0xad   :  { %178 = vst.msk [vmem:[#allocation0] sm:$0x1] %vm177_vm13, %v176_v60  }
  0xae   :  { %184 = vst.msk [vmem:[#allocation0] sm:$0x1] %vm183_vm14, %v182_v61  }
  0xb0   :  { %v188_v62 = vpop.permute.xlu0 %187  }
  0xb1   :  { %190 = vst.msk [vmem:[#allocation0] sm:$0x1] %vm189_vm15, %v188_v62  }
  0xb8   :  { %v194_v63 = vld [vmem:[#allocation0] sm:$0x1] }
  0xb9   :  { %196 = vst [vmem:[%s400_s1] sm:$0x1] %v194_v63 }

// kernel: residual_block_forward.5
= control target key start
LH: loop header
LB: loop body
LE: loop exit
PB: predicated region body
PF: predicated region fallthrough
CT: control target
= control target key end

     0   :  { %s100_s0 = inlined_call_operand.vmem [shape: f32[16,128], index: 0, kind: input, shape index: {}]   ;;  %s101_s1 = inlined_call_operand.vmem [shape: f32[1,128], index: 1, kind: input, shape index: {}]   ;;  %s102_s2 = inlined_call_operand.vmem [shape: f32[1,128], index: 2, kind: input, shape index: {}]   ;;  %s103_s3 = inlined_call_operand.vmem [shape: f32[16,128], index: 3, kind: input, shape index: {}]   ;;  %s104_s4 = inlined_call_operand.vmem [shape: f32[16,128], index: 4, kind: output, shape index: {}]  }
   0x1   :  { %v17_v0 = vld [vmem:[%s100_s0] sm:$0xff]  ;;  %v18_v4 = vld [vmem:[%s100_s0 + $0x8] sm:$0xff] }
   0x2   :  { %v49_v1 = vld [vmem:[%s101_s1] ss:$0 sm:$0xff]  ;;  %v38_v8 = vld [vmem:[%s103_s3 + $0x8] sm:$0xff] }
   0x3   :  { %v50_v2 = vld [vmem:[%s102_s2] ss:$0 sm:$0xff]  ;;  %v26_v3 = vmul.f32 %v49_v1, %v17_v0  ;;  %v27_v6 = vmul.f32 %v49_v1, %v18_v4 }
   0x4   :  { %v37_v5 = vld [vmem:[%s103_s3] sm:$0xff] }
   0x5   :  { %v35_v7 = vadd.f32 %v50_v2, %v26_v3  ;;  %v36_v9 = vadd.f32 %v50_v2, %v27_v6 }
   0x7   :  { %v39_v10 = vadd.f32 %v37_v5, %v35_v7  ;;  %v40_v11 = vadd.f32 %v38_v8, %v36_v9 }
   0x9   :  { %v41_v12 = vmax.f32 %v39_v10, 0.0  ;;  %v42_v13 = vmax.f32 %v40_v11, 0.0 }
   0xb   :  { %43 = vst [vmem:[%s104_s4] sm:$0xff] %v41_v12  ;;  %44 = vst [vmem:[%s104_s4 + $0x8] sm:$0xff] %v42_v13 }

// kernel: residual_block_forward.4
= control target key start
LH: loop header
LB: loop body
LE: loop exit
PB: predicated region body
PF: predicated region fallthrough
CT: control target
= control target key end

     0   :  { %s4959_s18 = smov 0   ;;  %s5988_s0 = inlined_call_operand.vmem [shape: f32[2,256,4], index: 0, kind: input, shape index: {}]   ;;  %s5989_s1 = inlined_call_operand.vmem [shape: f32[1,1,4], index: 1, kind: input, shape index: {}]   ;;  %s5990_s2 = inlined_call_operand.vmem [shape: f32[1,1,4], index: 2, kind: input, shape index: {}]   ;;  %s5991_s3 = inlined_call_operand.vmem [shape: bf16[36,4], index: 3, kind: input, shape index: {}]   ;;  %s5992_s4 = inlined_call_operand.vmem [shape: f32[2,256,4], index: 4, kind: output, shape index: {0}]   ;;  %s5993_s5 = inlined_call_operand.vmem [shape: f32[2,2,4], index: 5, kind: output, shape index: {1}]  }
   0x1 LB: > { %s4244_s19 = sadd.s32 4294967295, %s4918_s18   ;;  %p4248_p0 = scmp.ge.s32.totalorder %s4918_s18, 1  ;;  %s4918_s18 = sphi %s4959_s18, %s16_s18  }
   0x2   : > { %p190_p1 = scmp.lt.s32.totalorder %s4918_s18, 3 }
   0x4   : > { %p191_p2 = pnand %p4248_p0, %p190_p1 }
   0x5   : > { %vm237_vm0 = vcmask (!%p191_p2), 27648   ;;  %vm240_vm1 = vcmask (!%p191_p2), 24576   ;;  %vm247_vm2 = vsmask.f32 (!%p191_p2), 256  ;;  %v4920_v0 = vmov (!%p191_p2), 0   ;;  %p222_p3 = scmp.lt.s32.totalorder (!%p191_p2), %s4244_s19, 1 }
   0x6   : > { %194 = sbr.rel (%p191_p2) target bundleno = 691 (0x2b3), region = 36  ;;  %238 = vst.msk [vmem:[#allocation2] sm:$0xf] (!%p191_p2), %vm237_vm0, %v4920_v0  ;;  %239 = vst.msk [vmem:[#allocation2 + $0x4] sm:$0xf] (!%p191_p2), %vm237_vm0, %v4920_v0  ;;  %vm1789_vm6 = vcmask (!%p191_p2), 1046528  }
   0x7   : > { %241 = vst.msk [vmem:[#allocation2 + $0x8] sm:$0x1] (!%p191_p2), %vm240_vm1, %v4920_v0  ;;  %245 = vst.msk [vmem:[#allocation2 + $0xd4] sm:$0x1] (!%p191_p2), %vm240_vm1, %v4920_v0  ;;  %vm303_vm4 = vsmask.f32 (!%p191_p2), 7938 }
   0x8   : > { %243 = vst.msk [vmem:[#allocation2 + $0xcc] sm:$0xf] (!%p191_p2), %vm237_vm0, %v4920_v0  ;;  %244 = vst.msk [vmem:[#allocation2 + $0xd0] sm:$0xf] (!%p191_p2), %vm237_vm0, %v4920_v0  ;;  %v255_v2 = vld [vmem:[#allocation2 + $0x18] sm:$0x1] (!%p191_p2) }
   0x9   : > { %vm4975_vm3 = vmand (!%p191_p2), %vm240_vm1, %vm247_vm2  ;;  %v252_v4 = vld [vmem:[#allocation2 + $0xc] sm:$0x1] (!%p191_p2)  ;;  %v258_v5 = vld [vmem:[#allocation2 + $0x24] sm:$0x1] (!%p191_p2)  ;;  %vm1355_vm7 = vsmask.f32 (!%p191_p2), 7424 }
   0xa   : > { %v256_v3 = vsel (!%p191_p2), %vm4975_vm3, 0, %v255_v2  ;;  %vm4985_vm5 = vmand (!%p191_p2), %vm240_vm1, %vm303_vm4  ;;  %v253_v7 = vsel (!%p191_p2), %vm4975_vm3, 0, %v252_v4  ;;  %v259_v8 = vsel (!%p191_p2), %vm4975_vm3, 0, %v258_v5  ;;  %v308_v9 = vld [vmem:[#allocation2 + $0x14] sm:$0x1] (!%p191_p2)  ;;  %s4921_s28 = smov (!%p191_p2), 8  }
   0xb   : > { %257 = vst [vmem:[#allocation2 + $0x18] sm:$0x1] (!%p191_p2), %v256_v3  ;;  %254 = vst [vmem:[#allocation2 + $0xc] sm:$0x1] (!%p191_p2), %v253_v7  ;;  %v309_v10 = vsel (!%p191_p2), %vm4985_vm5, 0, %v308_v9  ;;  %s4922_s29 = smov (!%p191_p2), 4  }
   0xc   : > { %260 = vst [vmem:[#allocation2 + $0x24] sm:$0x1] (!%p191_p2), %v259_v8  ;;  %v311_v11 = vld [vmem:[#allocation2 + $0x20] sm:$0x1] (!%p191_p2)  ;;  %v314_v12 = vld [vmem:[#allocation2 + $0x2c] sm:$0x1] (!%p191_p2)  ;;  %vm5052_vm9 = vmand (!%p191_p2), %vm237_vm0, %vm303_vm4 }
   0xd   : > { %s6051_s19 = smov (!%p222_p3, %s4244_s19), 1  ;;  %v5006_v13 = vld [vmem:[%s5989_s1] ss:$0 sm:$0xff]  ;;  %310 = vst [vmem:[#allocation2 + $0x14] sm:$0x1] %v309_v10  ;;  %v312_v14 = vsel %vm4985_vm5, 0, %v311_v11 }
   0xe   : > { %s4549_s20 = sshll.u32 %s6051_s19, 8  ;;  %v315_v15 = vsel %vm4985_vm5, 0, %v314_v12  ;;  %v261_v16 = vld [vmem:[#allocation2 + $0x30] sm:$0x1]  ;;  %v305_v17 = vld [vmem:[#allocation2 + $0x8] sm:$0x1] }
   0xf   : > { %s5001_s23 = scalar_lea.vmem %s5988_s0, %s4549_s20  ;;  %313 = vst [vmem:[#allocation2 + $0x20] sm:$0x1] %v312_v14  ;;  %316 = vst [vmem:[#allocation2 + $0x2c] sm:$0x1] %v315_v15  ;;  %v306_v18 = vsel %vm4985_vm5, 0, %v305_v17  ;;  %v262_v30 = vsel %vm4975_vm3, 0, %v261_v16 }
  0x10   : > { %v249_v19 = vld [vmem:[#allocation2] sm:$0x1]  ;;  %v361_v20 = vld [vmem:[%s5001_s23 + $0x10] sm:$0xff]  ;;  %307 = vst [vmem:[#allocation2 + $0x8] sm:$0x1] %v306_v18  ;;  %v362_v23 = vld [vmem:[%s5001_s23 + $0x18] sm:$0xff] }
  0x11   : > { %v5018_v21 = vld [vmem:[%s5990_s2] ss:$0 sm:$0xff]  ;;  %v250_v22 = vsel %vm4975_vm3, 0, %v249_v19  ;;  %v400_v24 = vmul.f32 %v5006_v13, %v361_v20  ;;  %v401_v26 = vmul.f32 %v5006_v13, %v362_v23  ;;  %v360_v27 = vld [vmem:[%s5001_s23 + $0x8] sm:$0xff]  ;;  %v4665_v31 = vld [vmem:[#allocation2] sm:$0xfe]  }
  0x12   : > { %v359_v25 = vld [vmem:[%s5001_s23] sm:$0xff]  ;;  %251 = vst [vmem:[#allocation2] sm:$0x1] %v250_v22  ;;  %v399_v33 = vmul.f32 %v5006_v13, %v360_v27  ;;  %v364_v34 = vld [vmem:[%s5001_s23 + $0x28] sm:$0xff]  ;;  %263 = vst [vmem:[#allocation2 + $0x30] sm:$0x1] %v262_v30 }
  0x13   : > { %v398_v28 = vmul.f32 %v5006_v13, %v359_v25  ;;  %v363_v29 = vld [vmem:[%s5001_s23 + $0x20] sm:$0xff]  ;;  %v439_v32 = vadd.f32 %v5018_v21, %v400_v24  ;;  %v365_v36 = vld [vmem:[%s5001_s23 + $0x30] sm:$0xff]  ;;  %v440_v37 = vadd.f32 %v5018_v21, %v401_v26  ;;  %v403_v39 = vmul.f32 %v5006_v13, %v364_v34  ;;  %v366_v43 = vld [vmem:[%s5001_s23 + $0x38] sm:$0xff]  ;;  %s4923_s30 = smov 12   ;;  %s4924_s6 = smov 24  }
  0x14   : > { %v402_v35 = vmul.f32 %v5006_v13, %v363_v29  ;;  %v438_v41 = vadd.f32 %v5018_v21, %v399_v33  ;;  %v404_v44 = vmul.f32 %v5006_v13, %v365_v36  ;;  %vm597_vm8 = vsmask.f32 4368  ;;  %v929_v14 = vld [vmem:[#allocation2 + $0x18] sm:$0xf]  ;;  %v922_v30 = vld [vmem:[#allocation2 + $0xc] sm:$0xf] }
  0x15   : > { %v437_v38 = vadd.f32 %v5018_v21, %v398_v28  ;;  %v471_v40 = vmax.f32 %v439_v32, 0.0  ;;  %v472_v45 = vmax.f32 %v440_v37, 0.0  ;;  %v442_v47 = vadd.f32 %v5018_v21, %v403_v39  ;;  %vm5060_vm10 = vmor %vm247_vm2, %vm597_vm8  ;;  %v926_v36 = vld [vmem:[#allocation2 + $0x14] sm:$0x1]  ;;  %v317_v37 = vld [vmem:[#allocation2 + $0x38] sm:$0x1] }
  0x16   : > { %v441_v42 = vadd.f32 %v5018_v21, %v402_v35  ;;  %v1790_v48 = vrot.slane %v4665_v31, 1  ;;  %v470_v50 = vmax.f32 %v438_v41, 0.0  ;;  %v5045_v56 = vmul.f32 %v5006_v13, %v366_v43  ;;  %v933_v31 = vld [vmem:[#allocation2 + $0x20] sm:$0x1]  ;;  %s4925_s7 = smov 20   ;;  %s4926_s8 = smov 32  }
  0x17   : > { %v469_v46 = vmax.f32 %v437_v38, 0.0  ;;  %v4553_v49 = vpack.c.bf16 %v471_v40, %v471_v40  ;;  %v4666_v52 = vld [vmem:[#allocation2 + $0x8] ss:$0 sps:$4 sm:$0x11]   ;;  %v4554_v53 = vpack.c.bf16 %v472_v45, %v472_v45  ;;  %v474_v55 = vmax.f32 %v442_v47, 0.0  ;;  %s4927_s9 = smov 16  }
  0x18   : > { %v473_v51 = vmax.f32 %v441_v42, 0.0  ;;  %v4552_v59 = vpack.c.bf16 %v470_v50, %v470_v50  ;;  %v5048_v61 = vadd.f32 %v5018_v21, %v404_v44  ;;  %v1791_v62 = vrot.slane %v4666_v52, 1  ;;  %v4668_v63 = vld [vmem:[#allocation2 + $0x8] ss:$0 sps:$4 sm:$0x11]   ;;  %s4928_s10 = smov 28  }
  0x19   : > { %v4551_v54 = vpack.c.bf16 %v469_v46, %v469_v46  ;;  %v4667_v57 = vld [vmem:[#allocation2] sm:$0xff]   ;;  %v617_v58 = vshrl.u32 %v4553_v49, 16  ;;  %v620_v0 = vshll.u32 %v4553_v49, 16  ;;  %v625_v2 = vshrl.u32 %v4554_v53, 16  ;;  %v264_v47 = vld [vmem:[#allocation2 + $0x3c] sm:$0x1] }
  0x1a   : > { %v4555_v60 = vpack.c.bf16 %v473_v51, %v473_v51  ;;  %v4556_v3 = vpack.c.bf16 %v474_v55, %v474_v55  ;;  %v1357_v4 = vshrl.u32 %v4667_v57, 16  ;;  %v1359_v5 = vshll.u32 %v4667_v57, 16  ;;  %v936_v42 = vld [vmem:[#allocation2 + $0x24] sm:$0xf] }
  0x1b   : > { %v619_v7 = vrot.slane %v617_v58, 7  ;;  %v628_v8 = vshll.u32 %v4554_v53, 16  ;;  %v1792_v10 = vsel %vm1789_vm6, %v1790_v48, %v1791_v62  ;;  %v1364_v11 = vshll.u32 %v4668_v63, 16 }
  0x1c   : > { %v627_v12 = vrot.slane %v625_v2, 7  ;;  %v600_v15 = vshrl.u32 %v4551_v54, 16  ;;  %1838 = vrot.lane.b32.xlu1 %v1792_v10, %s4921_s28  ;;  %v1361_v16 = vrot.slane %v1359_v5, 1  ;;  %v603_v20 = vshll.u32 %v4551_v54, 16  ;;  %v940_v54 = vld [vmem:[#allocation2 + $0x2c] sm:$0x1] }
  0x1d   : > { %v622_v18 = vor.u32 %v620_v0, %v619_v7  ;;  %v623_v19 = vrot.slane %v619_v7, 4  ;;  %v1366_v22 = vrot.slane %v1364_v11, 1  ;;  %v608_v28 = vshrl.u32 %v4552_v59, 16 }
  0x1e   : > { %v630_v23 = vor.u32 %v628_v8, %v627_v12  ;;  %v632_v24 = vrot.slane %v627_v12, 4  ;;  %v602_v25 = vrot.slane %v600_v15, 7  ;;  %v1362_v26 = vor.u32 %v1361_v16, %v1357_v4 }
  0x1f   : > { %v930_v27 = vsel %vm5052_vm9, %v622_v18, %v929_v14  ;;  %v611_v29 = vshll.u32 %v4552_v59, 16  ;;  %v634_v35 = vshrl.u32 %v4555_v60, 16  ;;  %v610_v39 = vrot.slane %v608_v28, 7 }
  0x20   : > { %v631_v32 = vsel %vm5060_vm10, %v623_v19, %v630_v23  ;;  %931 = vst [vmem:[#allocation2 + $0x18] sm:$0xf] %v930_v27  ;;  %v605_v33 = vor.u32 %v603_v20, %v602_v25  ;;  %v606_v34 = vrot.slane %v602_v25, 4  ;;  %v1367_v38 = vsel %vm1355_vm7, %v1362_v26, %v1366_v22 }
  0x21   : > { %932 = vst.msk [vmem:[#allocation2 + $0x1c] sm:$0xf] %vm237_vm0, %v631_v32  ;;  %v637_v40 = vshll.u32 %v4555_v60, 16  ;;  %v642_v41 = vshrl.u32 %v4556_v3, 16  ;;  %1548 = vrot.lane.b32.xlu0 %v1367_v38, %s4922_s29  ;;  %v636_v44 = vrot.slane %v634_v35, 7  ;;  %v645_v45 = vshll.u32 %v4556_v3, 16 }
  0x22   : > { %v923_v43 = vsel %vm5052_vm9, %v605_v33, %v922_v30  ;;  %v934_v46 = vsel %vm4975_vm3, %v632_v24, %v933_v31  ;;  %v613_v48 = vor.u32 %v611_v29, %v610_v39  ;;  %v615_v49 = vrot.slane %v610_v39, 4 }
  0x23   : > { %924 = vst [vmem:[#allocation2 + $0xc] sm:$0xf] %v923_v43  ;;  %v644_v50 = vrot.slane %v642_v41, 7  ;;  %935 = vst [vmem:[#allocation2 + $0x20] sm:$0x1] %v934_v46  ;;  %v475_v51 = vmax.f32 %v5048_v61, 0.0  ;;  %v639_v52 = vor.u32 %v637_v40, %v636_v44  ;;  %v5078_v55 = vadd.f32 %v5018_v21, %v5045_v56 }
  0x24   : > { %v640_v53 = vrot.slane %v636_v44, 4  ;;  %v318_v57 = vsel %vm4985_vm5, 0, %v317_v37  ;;  %v614_v58 = vsel %vm5060_vm10, %v606_v34, %v613_v48  ;;  %v927_v62 = vsel %vm4975_vm3, %v615_v49, %v926_v36 }
  0x25   : > { %v647_v59 = vor.u32 %v645_v45, %v644_v50  ;;  %v649_v60 = vrot.slane %v644_v50, 4  ;;  %319 = vst [vmem:[#allocation2 + $0x38] sm:$0x1] %v318_v57  ;;  %925 = vst.msk [vmem:[#allocation2 + $0x10] sm:$0xf] %vm237_vm0, %v614_v58  ;;  %v937_v61 = vsel %vm5052_vm9, %v639_v52, %v936_v42  ;;  %v5089_v56 = vpack.c.bf16 %v475_v51, %v475_v51 }
  0x26   : > { %928 = vst [vmem:[#allocation2 + $0x14] sm:$0x1] %v927_v62  ;;  %v265_v63 = vsel %vm4975_vm3, 0, %v264_v47  ;;  %938 = vst [vmem:[#allocation2 + $0x24] sm:$0xf] %v937_v61  ;;  %v476_v5 = vmax.f32 %v5078_v55, 0.0 }
  0x27   : > { %v648_v0 = vsel %vm5060_vm10, %v640_v53, %v647_v59  ;;  %v941_v2 = vsel %vm4975_vm3, %v649_v60, %v940_v54  ;;  %266 = vst [vmem:[#allocation2 + $0x3c] sm:$0x1] %v265_v63  ;;  %v651_v7 = vshrl.u32 %v5089_v56, 16  ;;  %v654_v10 = vshll.u32 %v5089_v56, 16  ;;  %v367_v63 = vld [vmem:[%s5001_s23 + $0x40] sm:$0xff] }
  0x28   : > { %v4669_v3 = vld [vmem:[#allocation2 + $0x18] sm:$0xff]   ;;  %939 = vst.msk [vmem:[#allocation2 + $0x28] sm:$0xf] %vm237_vm0, %v648_v0  ;;  %942 = vst [vmem:[#allocation2 + $0x2c] sm:$0x1] %v941_v2  ;;  %vm1162_vm11 = vcmask 31744  }
  0x29   : > { %v4677_v4 = vld [vmem:[#allocation2 + $0x18] sm:$0xfe]   ;;  %2017 = vrot.lane.b32.xlu1 %v4669_v3, %s4923_s30  ;;  %vm5995_vm12 = vcmask 64544   ;;  %vm5994_vm13 = vcmask 97344   ;;  %vm2063_vm14 = vcmask 130144   ;;  %vm2496_vm15 = vcmask 162944  }
  0x2a   : > { %v4678_v8 = vld [vmem:[#allocation2 + $0x20] ss:$0 sps:$4 sm:$0x11]   ;;  %v4672_v12 = vld [vmem:[#allocation2 + $0x18] sm:$0xff]   ;;  %v3589_v14 = vrot.slane %v4677_v4, 1  ;;  %vm2785_vm1 = vcmask 195744  }
  0x2b   : > { %v3590_v20 = vrot.slane %v4678_v8, 1  ;;  %v4679_v25 = vld [vmem:[#allocation2 + $0x18] sm:$0xfe]   ;;  %v4680_v26 = vld [vmem:[#allocation2 + $0x20] ss:$0 sps:$4 sm:$0x11]  }
  0x2c   : > { %v4670_v11 = vld [vmem:[#allocation2 + $0xc] sm:$0xff]   ;;  %v4687_v27 = vld [vmem:[#allocation2 + $0x18] sm:$0xff]   ;;  %v2692_v31 = vrot.slane %v4679_v25, 1  ;;  %v2693_v32 = vrot.slane %v4680_v26, 1  ;;  %vm2963_vm2 = vcmask 228544   ;;  %vm5997_vm4 = vcmask 261344  }
  0x2d   : > { %v4673_v15 = vld [vmem:[#allocation2 + $0xc] sm:$0xfe]   ;;  %2015 = vrot.lane.b32.xlu0 %v4670_v11, %s4923_s30  ;;  %v4674_v18 = vld [vmem:[#allocation2 + $0x14] ss:$0 sps:$4 sm:$0x11]   ;;  %v2269_v36 = vshrl.u32 %v4687_v27, 16  ;;  %v3591_v43 = vsel %vm1789_vm6, %v3589_v14, %v3590_v20 }
  0x2e   : > { %v2689_v19 = vrot.slane %v4673_v15, 1  ;;  %v2690_v22 = vrot.slane %v4674_v18, 1  ;;  %v4675_v23 = vld [vmem:[#allocation2 + $0xc] sm:$0xfe]   ;;  %v2271_v38 = vshll.u32 %v4687_v27, 16  ;;  %v2694_v39 = vsel %vm1789_vm6, %v2692_v31, %v2693_v32 }
  0x2f   : > { %v4671_v16 = vld [vmem:[#allocation2 + $0x24] sm:$0xff]   ;;  %v4676_v24 = vld [vmem:[#allocation2 + $0x14] ss:$0 sps:$4 sm:$0x11]   ;;  %v1793_v28 = vrot.slane %v4675_v23, 1  ;;  %v4691_v61 = vld [vmem:[#allocation2 + $0xc] sm:$0xff]   ;;  %v406_v27 = vmul.f32 %v5006_v13, %v367_v63 }
  0x30   : > { %2917 = vrot.lane.b32.xlu1 %v4671_v16, %s4924_s6  ;;  %v1794_v29 = vrot.slane %v4676_v24, 1  ;;  %v2691_v30 = vsel %vm1789_vm6, %v2689_v19, %v2690_v22  ;;  %v4681_v33 = vld [vmem:[#allocation2 + $0x24] sm:$0xfe]   ;;  %v4682_v35 = vld [vmem:[#allocation2 + $0x2c] ss:$0 sps:$4 sm:$0x11]  }
  0x31   : > { %2915 = vrot.lane.b32.xlu0 %v4672_v12, %s4924_s6  ;;  %v3592_v37 = vrot.slane %v4681_v33, 1  ;;  %v3593_v40 = vrot.slane %v4682_v35, 1  ;;  %v4683_v41 = vld [vmem:[#allocation2 + $0x24] sm:$0xfe]   ;;  %v4685_v47 = vld [vmem:[#allocation2 + $0x18] sm:$0xfe]  }
  0x32   : > { %v1795_v34 = vsel %vm1789_vm6, %v1793_v28, %v1794_v29  ;;  %v4684_v42 = vld [vmem:[#allocation2 + $0x2c] ss:$0 sps:$4 sm:$0x11]   ;;  %v4689_v44 = vld [vmem:[#allocation2 + $0x24] sm:$0xff]   ;;  %v1799_v45 = vrot.slane %v4683_v41, 1  ;;  %v2273_v49 = vrot.slane %v2271_v38, 1 }
  0x33   : > { %v1800_v46 = vrot.slane %v4684_v42, 1  ;;  %v4686_v48 = vld [vmem:[#allocation2 + $0x20] ss:$0 sps:$4 sm:$0x11]   ;;  %v1796_v51 = vrot.slane %v4685_v47, 1  ;;  %v3594_v53 = vsel %vm1789_vm6, %v3592_v37, %v3593_v40  ;;  %v3169_v57 = vshrl.u32 %v4689_v44, 16 }
  0x34   : > { %1840 = vrot.lane.b32.xlu1 %v1795_v34, %s4921_s28  ;;  %v4688_v52 = vld [vmem:[#allocation2 + $0x20] ss:$0 sps:$4 sm:$0x11]   ;;  %v1797_v54 = vrot.slane %v4686_v48, 1  ;;  %v2274_v58 = vor.u32 %v2273_v49, %v2269_v36  ;;  %v3171_v62 = vshll.u32 %v4689_v44, 16  ;;  %v1369_v11 = vshrl.u32 %v4691_v61, 16 }
  0x35   : > { %2737 = vrot.lane.b32.xlu0 %v2691_v30, %s4925_s7  ;;  %v1801_v50 = vsel %vm1789_vm6, %v1799_v45, %v1800_v46  ;;  %v2276_v59 = vshll.u32 %v4688_v52, 16  ;;  %v4690_v60 = vld [vmem:[#allocation2 + $0x2c] ss:$0 sps:$4 sm:$0x11]   ;;  %v1371_v12 = vshll.u32 %v4691_v61, 16  ;;  %v4693_v16 = vld [vmem:[#allocation2 + $0x18] sm:$0xff]   ;;  %v4558_v45 = vpack.c.bf16 %v476_v5, %v476_v5 }
  0x36   : > { %v3176_v2 = vshll.u32 %v4690_v60, 16  ;;  %v1798_v3 = vsel %vm1789_vm6, %v1796_v51, %v1797_v54  ;;  %v3173_v4 = vrot.slane %v3171_v62, 1  ;;  %v4692_v8 = vld [vmem:[#allocation2 + $0x14] ss:$0 sps:$4 sm:$0x11]   ;;  %v368_v18 = vld [vmem:[%s5001_s23 + $0x48] sm:$0xff]  ;;  %v445_v48 = vadd.f32 %v5018_v21, %v406_v27 }
  0x37   : > { %v2278_v0 = vrot.slane %v2276_v59, 1  ;;  %v1373_v20 = vrot.slane %v1371_v12, 1  ;;  %v1376_v22 = vshll.u32 %v4692_v8, 16  ;;  %v4694_v23 = vld [vmem:[#allocation2 + $0x20] ss:$0 sps:$4 sm:$0x11]  }
  0x38   : > { %2739 = vrot.lane.b32.xlu1 %v2694_v39, %s4925_s7  ;;  %v3178_v15 = vrot.slane %v3176_v2, 1  ;;  %v3174_v19 = vor.u32 %v3173_v4, %v3169_v57  ;;  %v4695_v24 = vld [vmem:[#allocation2 + $0xc] sm:$0xff]   ;;  %v1381_v25 = vshrl.u32 %v4693_v16, 16  ;;  %v1383_v26 = vshll.u32 %v4693_v16, 16  ;;  %v4697_v38 = vld [vmem:[#allocation2 + $0x24] sm:$0xff]   ;;  %v4699_v44 = vld [vmem:[#allocation2 + $0x18] sm:$0xff]  }
  0x39   : > { %3637 = vrot.lane.b32.xlu0 %v3591_v43, %s4926_s8  ;;  %v2279_v14 = vsel %vm1355_vm7, %v2274_v58, %v2278_v0  ;;  %v1374_v29 = vor.u32 %v1373_v20, %v1369_v11  ;;  %v1378_v30 = vrot.slane %v1376_v22, 1  ;;  %v1388_v31 = vshll.u32 %v4694_v23, 16  ;;  %v4696_v33 = vld [vmem:[#allocation2 + $0x14] ss:$0 sps:$4 sm:$0x11]   ;;  %v4703_v8 = vld [vmem:[#allocation2 + $0x24] sm:$0xff]  }
  0x3a   : > { %v3179_v28 = vsel %vm1355_vm7, %v3174_v19, %v3178_v15  ;;  %v1385_v32 = vrot.slane %v1383_v26, 1  ;;  %v2257_v34 = vshrl.u32 %v4695_v24, 16  ;;  %v2259_v35 = vshll.u32 %v4695_v24, 16  ;;  %v4698_v43 = vld [vmem:[#allocation2 + $0x2c] ss:$0 sps:$4 sm:$0x11]  }
  0x3b   : > { %v1379_v36 = vsel %vm1355_vm7, %v1374_v29, %v1378_v30  ;;  %v1390_v37 = vrot.slane %v1388_v31, 1  ;;  %v407_v39 = vmul.f32 %v5006_v13, %v368_v18  ;;  %v2264_v42 = vshll.u32 %v4696_v33, 16  ;;  %v369_v49 = vld [vmem:[%s5001_s23 + $0x50] sm:$0xff]  ;;  %v4700_v57 = vld [vmem:[#allocation2 + $0x20] ss:$0 sps:$4 sm:$0x11]  }
  0x3c   : > { %1844 = vrot.lane.b32.xlu1 %v1801_v50, %s4921_s28  ;;  %v1386_v40 = vor.u32 %v1385_v32, %v1381_v25  ;;  %v2261_v41 = vrot.slane %v2259_v35, 1  ;;  %v1393_v46 = vshrl.u32 %v4697_v38, 16  ;;  %v1395_v47 = vshll.u32 %v4697_v38, 16  ;;  %v943_v60 = vld [vmem:[#allocation2 + $0x30] sm:$0xf]  ;;  %v4701_v24 = vld [vmem:[#allocation2 + $0x24] sm:$0xff]  }
  0x3d   : > { %3639 = vrot.lane.b32.xlu0 %v3594_v53, %s4926_s8  ;;  %v2266_v52 = vrot.slane %v2264_v42, 1  ;;  %v1400_v53 = vshll.u32 %v4698_v43, 16  ;;  %v3157_v58 = vshrl.u32 %v4699_v44, 16  ;;  %v3159_v59 = vshll.u32 %v4699_v44, 16  ;;  %v320_v15 = vld [vmem:[#allocation2 + $0x44] sm:$0x1] }
  0x3e   : > { %v1391_v50 = vsel %vm1355_vm7, %v1386_v40, %v1390_v37  ;;  %v2262_v51 = vor.u32 %v2261_v41, %v2257_v34  ;;  %v1397_v54 = vrot.slane %v1395_v47, 1  ;;  %v446_v55 = vadd.f32 %v5018_v21, %v407_v39  ;;  %v4704_v20 = vld [vmem:[#allocation2 + $0x2c] ss:$0 sps:$4 sm:$0x11]   ;;  %v267_v23 = vld [vmem:[#allocation2 + $0x48] sm:$0x1] }
  0x3f   : > { %v1402_v62 = vrot.slane %v1400_v53, 1  ;;  %v653_v61 = vrot.slane %v651_v7, 7  ;;  %v659_v63 = vshrl.u32 %v4558_v45, 16  ;;  %v3161_v2 = vrot.slane %v3159_v59, 1  ;;  %v947_v27 = vld [vmem:[#allocation2 + $0x38] sm:$0x1] }
  0x40   : > { %2450 = vrot.lane.b32.xlu1 %v2279_v14, %s4927_s9  ;;  %v2267_v5 = vsel %vm1355_vm7, %v2262_v51, %v2266_v52  ;;  %v1398_v0 = vor.u32 %v1397_v54, %v1393_v46  ;;  %v662_v4 = vshll.u32 %v4558_v45, 16  ;;  %v408_v16 = vmul.f32 %v5006_v13, %v369_v49  ;;  %v4707_v34 = vld [vmem:[#allocation2 + $0x24] sm:$0xfe]   ;;  %v4708_v35 = vld [vmem:[#allocation2 + $0x2c] ss:$0 sps:$4 sm:$0x11]  }
  0x41   : > { %1842 = vrot.lane.b32.xlu0 %v1798_v3, %s4921_s28  ;;  %v3164_v3 = vshll.u32 %v4700_v57, 16  ;;  %v656_v11 = vor.u32 %v654_v10, %v653_v61  ;;  %v657_v12 = vrot.slane %v653_v61, 4  ;;  %v661_v14 = vrot.slane %v659_v63, 7  ;;  %v323_v41 = vld [vmem:[#allocation2 + $0x50] sm:$0x1] }
  0x42   : > { %v1403_v18 = vsel %vm1355_vm7, %v1398_v0, %v1402_v62  ;;  %v3162_v19 = vor.u32 %v3161_v2, %v3157_v58  ;;  %v2281_v22 = vshrl.u32 %v4703_v8, 16  ;;  %v2283_v10 = vshll.u32 %v4703_v8, 16  ;;  %v950_v49 = vld [vmem:[#allocation2 + $0x3c] sm:$0xf] }
  0x43   : > { %v3166_v7 = vrot.slane %v3164_v3, 1  ;;  %v664_v25 = vor.u32 %v662_v4, %v661_v14  ;;  %v666_v26 = vrot.slane %v661_v14, 4  ;;  %v944_v56 = vsel %vm5052_vm9, %v656_v11, %v943_v60  ;;  %v370_v58 = vld [vmem:[%s5001_s23 + $0x58] sm:$0xff] }
  0x44   : > { %3350 = vrot.lane.b32.xlu1 %v3179_v28, %s4928_s10  ;;  %945 = vst [vmem:[#allocation2 + $0x30] sm:$0xf] %v944_v56  ;;  %v2288_v29 = vshll.u32 %v4704_v20, 16  ;;  %v477_v30 = vmax.f32 %v445_v48, 0.0  ;;  %v2285_v32 = vrot.slane %v2283_v10, 1  ;;  %v478_v38 = vmax.f32 %v446_v55, 0.0 }
  0x45   : > { %1550 = vrot.lane.b32.xlu0 %v1379_v36, %s4922_s29  ;;  %v3167_v28 = vsel %vm1355_vm7, %v3162_v19, %v3166_v7  ;;  %v665_v31 = vsel %vm5060_vm10, %v657_v12, %v664_v25  ;;  %v948_v33 = vsel %vm4975_vm3, %v666_v26, %v947_v27  ;;  %v447_v36 = vadd.f32 %v5018_v21, %v408_v16 }
  0x46   : > { %946 = vst.msk [vmem:[#allocation2 + $0x34] sm:$0xf] %vm237_vm0, %v665_v31  ;;  %v2290_v37 = vrot.slane %v2288_v29, 1  ;;  %949 = vst [vmem:[#allocation2 + $0x38] sm:$0x1] %v948_v33  ;;  %v4559_v39 = vpack.c.bf16 %v477_v30, %v477_v30  ;;  %v321_v40 = vsel %vm4985_vm5, 0, %v320_v15  ;;  %v2286_v42 = vor.u32 %v2285_v32, %v2281_v22 }
  0x47   : > { %v2695_v43 = vrot.slane %v4707_v34, 1  ;;  %322 = vst [vmem:[#allocation2 + $0x44] sm:$0x1] %v321_v40  ;;  %v268_v44 = vsel %vm4975_vm3, 0, %v267_v23  ;;  %v2696_v45 = vrot.slane %v4708_v35, 1  ;;  %v4560_v46 = vpack.c.bf16 %v478_v38, %v478_v38 }
  0x48   : > { %1552 = vrot.lane.b32.xlu1 %v1391_v50, %s4922_s29  ;;  %v668_v47 = vshrl.u32 %v4559_v39, 16  ;;  %v671_v48 = vshll.u32 %v4559_v39, 16  ;;  %269 = vst [vmem:[#allocation2 + $0x48] sm:$0x1] %v268_v44  ;;  %v479_v50 = vmax.f32 %v447_v36, 0.0  ;;  %v324_v51 = vsel %vm4985_vm5, 0, %v323_v41 }
  0x49   : > { %2448 = vrot.lane.b32.xlu0 %v2267_v5, %s4927_s9  ;;  %v2291_v52 = vsel %vm1355_vm7, %v2286_v42, %v2290_v37  ;;  %v676_v54 = vshrl.u32 %v4560_v46, 16  ;;  %v679_v57 = vshll.u32 %v4560_v46, 16  ;;  %325 = vst [vmem:[#allocation2 + $0x50] sm:$0x1] %v324_v51  ;;  %v2697_v0 = vsel %vm1789_vm6, %v2695_v43, %v2696_v45 }
  0x4a   : > { %v670_v53 = vrot.slane %v668_v47, 7  ;;  %v5166_v62 = vpack.c.bf16 %v479_v50, %v479_v50  ;;  %v409_v4 = vmul.f32 %v5006_v13, %v370_v58  ;;  %vm5996_vm8 = vcmask 294144  }
  0x4b   : > { %v678_v55 = vrot.slane %v676_v54, 7  ;;  %v371_v54 = vld [vmem:[%s5001_s23 + $0x60] sm:$0xff] }
  0x4c   : > { %1554 = vrot.lane.b32.xlu1 %v1403_v18, %s4922_s29  ;;  %v673_v59 = vor.u32 %v671_v48, %v670_v53  ;;  %v674_v60 = vrot.slane %v670_v53, 4  ;;  %v685_v13 = vshrl.u32 %v5166_v62, 16  ;;  %v5179_v25 = vadd.f32 %v5018_v21, %v409_v4 }
  0x4d   : > { %3348 = vrot.lane.b32.xlu0 %v3167_v28, %s4928_s10  ;;  %v4702_v5 = vld [vmem:[#allocation2 + $0x30] sm:$0xff]   ;;  %v4706_v63 = vld [vmem:[#allocation2 + $0x38] ss:$0 sps:$4 sm:$0x11]   ;;  %v681_v2 = vor.u32 %v679_v57, %v678_v55  ;;  %v683_v19 = vrot.slane %v678_v55, 4 }
  0x4e   : > { %v4705_v61 = vld [vmem:[#allocation2 + $0x30] sm:$0xff]   ;;  %v951_v3 = vsel %vm5052_vm9, %v673_v59, %v950_v49  ;;  %v2300_v14 = vshll.u32 %v4706_v63, 16  ;;  %v4710_v15 = vld [vmem:[#allocation2 + $0x38] ss:$0 sps:$4 sm:$0x11]   ;;  %v480_v21 = vmax.f32 %v5179_v25, 0.0 }
  0x4f   : > { %v4709_v8 = vld [vmem:[#allocation2 + $0x30] sm:$0xfe]   ;;  %952 = vst [vmem:[#allocation2 + $0x3c] sm:$0xf] %v951_v3  ;;  %v2293_v11 = vshrl.u32 %v4705_v61, 16  ;;  %v2295_v12 = vshll.u32 %v4705_v61, 16  ;;  %v682_v16 = vsel %vm5060_vm10, %v674_v60, %v681_v2 }
  0x50   : > { %2021 = vrot.lane.b32.xlu1 %v4702_v5, %s4923_s30  ;;  %v4711_v18 = vld [vmem:[#allocation2 + $0x30] sm:$0xff]   ;;  %953 = vst.msk [vmem:[#allocation2 + $0x40] sm:$0xf] %vm237_vm0, %v682_v16  ;;  %v2302_v22 = vrot.slane %v2300_v14, 1  ;;  %v2698_v23 = vrot.slane %v4709_v8, 1  ;;  %v2699_v26 = vrot.slane %v4710_v15, 1 }
  0x51   : > { %2019 = vrot.lane.b32.xlu0 %v4701_v24, %s4923_s30  ;;  %v4713_v7 = vld [vmem:[#allocation2 + $0x30] sm:$0xff]   ;;  %v2297_v20 = vrot.slane %v2295_v12, 1  ;;  %v4714_v56 = vld [vmem:[#allocation2 + $0x38] ss:$0 sps:$4 sm:$0x11]   ;;  %v5188_v41 = vrot.slane %v685_v13, 7 }
  0x52   : > { %v4719_v24 = vld [vmem:[#allocation2 + $0x30] sm:$0xff]   ;;  %v3181_v27 = vshrl.u32 %v4713_v7, 16  ;;  %v3183_v28 = vshll.u32 %v4713_v7, 16  ;;  %v954_v29 = vld [vmem:[#allocation2 + $0x44] sm:$0x1]  ;;  %v3188_v30 = vshll.u32 %v4714_v56, 16  ;;  %v2700_v38 = vsel %vm1789_vm6, %v2698_v23, %v2699_v26 }
  0x53   : > { %v2298_v10 = vor.u32 %v2297_v20, %v2293_v11  ;;  %v955_v31 = vsel %vm4975_vm3, %v683_v19, %v954_v29  ;;  %v1407_v32 = vshll.u32 %v4719_v24, 16  ;;  %v4717_v36 = vld [vmem:[#allocation2 + $0x30] sm:$0xfe]   ;;  %v4718_v37 = vld [vmem:[#allocation2 + $0x38] ss:$0 sps:$4 sm:$0x11]   ;;  %v4562_v20 = vpack.c.bf16 %v480_v21, %v480_v21 }
  0x54   : > { %v3185_v34 = vrot.slane %v3183_v28, 1  ;;  %956 = vst [vmem:[#allocation2 + $0x44] sm:$0x1] %v955_v31  ;;  %v3190_v35 = vrot.slane %v3188_v30, 1  ;;  %v1405_v40 = vshrl.u32 %v4719_v24, 16  ;;  %v3595_v44 = vrot.slane %v4717_v36, 1 }
  0x55   : > { %2452 = vrot.lane.b32.xlu0 %v2291_v52, %s4927_s9  ;;  %v2303_v33 = vsel %vm1355_vm7, %v2298_v10, %v2302_v22  ;;  %v3596_v45 = vrot.slane %v4718_v37, 1  ;;  %v1409_v46 = vrot.slane %v1407_v32, 1  ;;  %v4720_v50 = vld [vmem:[#allocation2 + $0x38] ss:$0 sps:$4 sm:$0x11]   ;;  %v372_v63 = vld [vmem:[%s5001_s23 + $0x68] sm:$0xff] }
  0x56   : > { %2454 = vrot.lane.b32.xlu1 %v2303_v33, %s4927_s9  ;;  %v3186_v39 = vor.u32 %v3185_v34, %v3181_v27  ;;  %v1412_v59 = vshll.u32 %v4720_v50, 16  ;;  %v5201_v14 = vld [vmem:[%s5989_s1] ss:$0 sm:$0xff]  ;;  %v373_v16 = vld [vmem:[%s5001_s23 + $0x70] sm:$0xff]  ;;  %v688_v24 = vshll.u32 %v5166_v62, 16  ;;  %v691_v34 = vrot.slane %v5188_v41, 4 }
  0x57   : > { %v4712_v42 = vld [vmem:[#allocation2 + $0x3c] sm:$0xff]   ;;  %v3597_v52 = vsel %vm1789_vm6, %v3595_v44, %v3596_v45  ;;  %v1410_v11 = vor.u32 %v1409_v46, %v1405_v40  ;;  %v410_v15 = vmul.f32 %v5201_v14, %v371_v54  ;;  %v4725_v13 = vld [vmem:[#allocation2 + $0x30] sm:$0xfe]   ;;  %v4726_v23 = vld [vmem:[#allocation2 + $0x38] ss:$0 sps:$4 sm:$0x11]   ;;  %v411_v10 = vmul.f32 %v5201_v14, %v372_v63 }
  0x58   : > { %v4715_v43 = vld [vmem:[#allocation2 + $0x3c] sm:$0xff]   ;;  %v3191_v47 = vsel %vm1355_vm7, %v3186_v39, %v3190_v35  ;;  %v1414_v12 = vrot.slane %v1412_v59, 1  ;;  %v270_v25 = vld [vmem:[#allocation2 + $0x54] sm:$0x1]  ;;  %v1802_v56 = vrot.slane %v4725_v13, 1  ;;  %v1803_v29 = vrot.slane %v4726_v23, 1 }
  0x59   : > { %2741 = vrot.lane.b32.xlu0 %v2697_v0, %s4925_s7  ;;  %v3193_v48 = vshrl.u32 %v4715_v43, 16  ;;  %v3195_v49 = vshll.u32 %v4715_v43, 16  ;;  %v4723_v51 = vld [vmem:[#allocation2 + $0x3c] sm:$0xff]   ;;  %v690_v32 = vor.u32 %v688_v24, %v5188_v41  ;;  %v693_v62 = vshrl.u32 %v4562_v20, 16  ;;  %v957_v43 = vld [vmem:[#allocation2 + $0x48] sm:$0xf] }
  0x5a   : > { %2743 = vrot.lane.b32.xlu1 %v2700_v38, %s4925_s7  ;;  %v4721_v53 = vld [vmem:[#allocation2 + $0x3c] sm:$0xfe]   ;;  %v1417_v3 = vshrl.u32 %v4723_v51, 16  ;;  %v1419_v4 = vshll.u32 %v4723_v51, 16  ;;  %v1415_v27 = vsel %vm1355_vm7, %v1410_v11, %v1414_v12  ;;  %v412_v37 = vmul.f32 %v5201_v14, %v373_v16 }
  0x5b   : > { %v4716_v57 = vld [vmem:[#allocation2 + $0x44] ss:$0 sps:$4 sm:$0x11]   ;;  %v3197_v58 = vrot.slane %v3195_v49, 1  ;;  %v3598_v61 = vrot.slane %v4721_v53, 1  ;;  %v4729_v33 = vld [vmem:[#allocation2 + $0x3c] sm:$0xff]   ;;  %v1804_v38 = vsel %vm1789_vm6, %v1802_v56, %v1803_v29  ;;  %v958_v45 = vsel %vm5052_vm9, %v690_v32, %v957_v43 }
  0x5c   : > { %v4722_v60 = vld [vmem:[#allocation2 + $0x44] ss:$0 sps:$4 sm:$0x11]   ;;  %v3200_v5 = vshll.u32 %v4716_v57, 16  ;;  %v1421_v19 = vrot.slane %v1419_v4, 1  ;;  %v374_v36 = vld [vmem:[%s5001_s23 + $0x78] sm:$0xff] }
  0x5d   : > { %2919 = vrot.lane.b32.xlu0 %v4711_v18, %s4924_s6  ;;  %v3198_v55 = vor.u32 %v3197_v58, %v3193_v48  ;;  %v3599_v0 = vrot.slane %v4722_v60, 1  ;;  %v4724_v2 = vld [vmem:[#allocation2 + $0x44] ss:$0 sps:$4 sm:$0x11]   ;;  %v4727_v30 = vld [vmem:[#allocation2 + $0x3c] sm:$0xfe]  }
  0x5e   : > { %2921 = vrot.lane.b32.xlu1 %v4712_v42, %s4924_s6  ;;  %v3202_v8 = vrot.slane %v3200_v5, 1  ;;  %v1424_v7 = vshll.u32 %v4724_v2, 16  ;;  %v1422_v28 = vor.u32 %v1421_v19, %v1417_v3  ;;  %v4728_v31 = vld [vmem:[#allocation2 + $0x44] ss:$0 sps:$4 sm:$0x11]   ;;  %v1805_v39 = vrot.slane %v4727_v30, 1 }
  0x5f   : > { %v3600_v18 = vsel %vm1789_vm6, %v3598_v61, %v3599_v0  ;;  %v5217_v21 = vld [vmem:[%s5990_s2] ss:$0 sm:$0xff]  ;;  %v1806_v40 = vrot.slane %v4728_v31, 1  ;;  %v696_v42 = vshll.u32 %v4562_v20, 16  ;;  %v695_v41 = vrot.slane %v693_v62, 7 }
  0x60   : > { %v3203_v22 = vsel %vm1355_vm7, %v3198_v55, %v3202_v8  ;;  %v1426_v26 = vrot.slane %v1424_v7, 1  ;;  %v449_v35 = vadd.f32 %v5217_v21, %v410_v15  ;;  %v4731_v44 = vld [vmem:[#allocation2 + $0x3c] sm:$0xff]   ;;  %v271_v46 = vsel %vm4975_vm3, 0, %v270_v25  ;;  %959 = vst [vmem:[#allocation2 + $0x48] sm:$0xf] %v958_v45  ;;  %v4804_v25 = vld [vmem:[%s5991_s3 + $0x8] sm:$0xff]  }
  0x61   : > { %3352 = vrot.lane.b32.xlu0 %v3191_v47, %s4928_s10  ;;  %v326_v47 = vld [vmem:[#allocation2 + $0x5c] sm:$0x1]  ;;  %v4732_v49 = vld [vmem:[#allocation2 + $0x44] ss:$0 sps:$4 sm:$0x11]   ;;  %v2305_v50 = vshrl.u32 %v4731_v44, 16  ;;  %v450_v51 = vadd.f32 %v5217_v21, %v411_v10  ;;  %v698_v53 = vor.u32 %v696_v42, %v695_v41  ;;  %v413_v55 = vmul.f32 %v5201_v14, %v374_v36 }
  0x62   : > { %3354 = vrot.lane.b32.xlu1 %v3203_v22, %s4928_s10  ;;  %v1427_v48 = vsel %vm1355_vm7, %v1422_v28, %v1426_v26  ;;  %272 = vst [vmem:[#allocation2 + $0x54] sm:$0x1] %v271_v46  ;;  %v700_v54 = vrot.slane %v695_v41, 4  ;;  %v2307_v57 = vshll.u32 %v4731_v44, 16  ;;  %v961_v58 = vld [vmem:[#allocation2 + $0x50] sm:$0x1]  ;;  %v451_v5 = vadd.f32 %v5217_v21, %v412_v37 }
  0x63   : > { %v2312_v59 = vshll.u32 %v4732_v49, 16  ;;  %v481_v60 = vmax.f32 %v449_v35, 0.0  ;;  %v1807_v61 = vsel %vm1789_vm6, %v1805_v39, %v1806_v40  ;;  %v699_v63 = vsel %vm5060_vm10, %v691_v34, %v698_v53  ;;  %v4735_v3 = vld [vmem:[#allocation2 + $0x3c] sm:$0xfe]  }
  0x64   : > { %v2309_v0 = vrot.slane %v2307_v57, 1  ;;  %v962_v2 = vsel %vm4975_vm3, %v700_v54, %v961_v58  ;;  %v4736_v4 = vld [vmem:[#allocation2 + $0x44] ss:$0 sps:$4 sm:$0x11]   ;;  %960 = vst.msk [vmem:[#allocation2 + $0x4c] sm:$0xf] %vm237_vm0, %v699_v63  ;;  %v5254_v56 = vadd.f32 %v5217_v21, %v413_v55 }
  0x65   : > { %3641 = vrot.lane.b32.xlu0 %v3597_v52, %s4926_s8  ;;  %v273_v52 = vld [vmem:[#allocation2 + $0x60] sm:$0x1]  ;;  %v2314_v8 = vrot.slane %v2312_v59, 1  ;;  %963 = vst [vmem:[#allocation2 + $0x50] sm:$0x1] %v962_v2  ;;  %v482_v11 = vmax.f32 %v450_v51, 0.0  ;;  %v4563_v12 = vpack.c.bf16 %v481_v60, %v481_v60 }
  0x66   : > { %1556 = vrot.lane.b32.xlu1 %v1415_v27, %s4922_s29  ;;  %v327_v15 = vsel %vm4985_vm5, 0, %v326_v47  ;;  %v2310_v16 = vor.u32 %v2309_v0, %v2305_v50  ;;  %v2702_v19 = vrot.slane %v4736_v4, 1  ;;  %v274_v7 = vsel %vm4975_vm3, 0, %v273_v52  ;;  %v4799_v13 = vld [vmem:[%s5991_s3] sm:$0xff]  }
  0x67   : > { %328 = vst [vmem:[#allocation2 + $0x5c] sm:$0x1] %v327_v15  ;;  %v4564_v20 = vpack.c.bf16 %v482_v11, %v482_v11  ;;  %v702_v22 = vshrl.u32 %v4563_v12, 16  ;;  %v705_v23 = vshll.u32 %v4563_v12, 16  ;;  %275 = vst [vmem:[#allocation2 + $0x60] sm:$0x1] %v274_v7  ;;  %4602 = vmatprep.subr.bf16.mxu0 %v4799_v13  ;;  %4640 = vmatprep.subr.bf16.mxu1 %v4799_v13 }
  0x68   : > { %v483_v24 = vmax.f32 %v451_v5, 0.0  ;;  %v2315_v26 = vsel %vm1355_vm7, %v2310_v16, %v2314_v8  ;;  %4603 = vmatpush3.bf16.msra.mxu0 %v4799_v13  ;;  %4643 = vmatpush3.bf16.msra.mxu1 %v4799_v13  ;;  %v484_v62 = vmax.f32 %v5254_v56, 0.0  ;;  %v4792_v56 = vld [vmem:[#allocation2 + $0xc] sm:$0xff]  }
  0x69   : > { %3643 = vrot.lane.b32.xlu0 %v3600_v18, %s4926_s8  ;;  %v2701_v18 = vrot.slane %v4735_v3, 1  ;;  %v704_v10 = vrot.slane %v702_v22, 7  ;;  %v710_v27 = vshrl.u32 %v4564_v20, 16  ;;  %v713_v28 = vshll.u32 %v4564_v20, 16  ;;  %v964_v30 = vld [vmem:[#allocation2 + $0x54] sm:$0xf]  ;;  %4604 = vmatprep.subr.bf16.mxu0 %v4804_v25 }
  0x6a   : > { %1558 = vrot.lane.b32.xlu1 %v1427_v48, %s4922_s29  ;;  %v5259_v35 = vpack.c.bf16 %v483_v24, %v483_v24  ;;  %4641 = vmatprep.subr.bf16.mxu1 %v4804_v25  ;;  %1164 = vst.msk [vmem:[#allocation3 + $0x8] sm:$0xff] %vm1162_vm11, %v4792_v56 }
  0x6b   : > { %v2703_v29 = vsel %vm1789_vm6, %v2701_v18, %v2702_v19  ;;  %v707_v31 = vor.u32 %v705_v23, %v704_v10  ;;  %v708_v32 = vrot.slane %v704_v10, 4  ;;  %v4730_v34 = vld [vmem:[#allocation2 + $0x48] sm:$0xff]  }
  0x6c   : > { %v4733_v36 = vld [vmem:[#allocation2 + $0x48] sm:$0xff]   ;;  %v4734_v37 = vld [vmem:[#allocation2 + $0x50] ss:$0 sps:$4 sm:$0x11]   ;;  %4605 = vmatpush3.bf16.msra.mxu0 %v4804_v25  ;;  %4644 = vmatpush3.bf16.msra.mxu1 %v4804_v25  ;;  %v719_v49 = vshrl.u32 %v5259_v35, 16  ;;  %v722_v7 = vshll.u32 %v5259_v35, 16 }
  0x6d   : > { %1846 = vrot.lane.b32.xlu0 %v1804_v38, %s4921_s28  ;;  %v965_v39 = vsel %vm5052_vm9, %v707_v31, %v964_v30  ;;  %v4737_v40 = vld [vmem:[#allocation2 + $0x48] sm:$0xfe]   ;;  %v2317_v42 = vshrl.u32 %v4733_v36, 16  ;;  %v2319_v43 = vshll.u32 %v4733_v36, 16  ;;  %v2324_v44 = vshll.u32 %v4734_v37, 16 }
  0x6e   : > { %1848 = vrot.lane.b32.xlu1 %v1807_v61, %s4921_s28  ;;  %966 = vst [vmem:[#allocation2 + $0x54] sm:$0xf] %v965_v39  ;;  %v4738_v41 = vld [vmem:[#allocation2 + $0x50] ss:$0 sps:$4 sm:$0x11]   ;;  %v4739_v46 = vld [vmem:[#allocation2 + $0x48] sm:$0xff]  }
  0x6f   : > { %v4741_v48 = vld [vmem:[#allocation2 + $0x48] sm:$0xff]   ;;  %v2321_v50 = vrot.slane %v2319_v43, 1  ;;  %v2326_v51 = vrot.slane %v2324_v44, 1  ;;  %v2704_v52 = vrot.slane %v4737_v40, 1  ;;  %v2705_v54 = vrot.slane %v4738_v41, 1 }
  0x70   : > { %v4747_v53 = vld [vmem:[#allocation2 + $0x48] sm:$0xff]   ;;  %v4742_v57 = vld [vmem:[#allocation2 + $0x50] ss:$0 sps:$4 sm:$0x11]   ;;  %v3205_v59 = vshrl.u32 %v4741_v48, 16  ;;  %v3207_v60 = vshll.u32 %v4741_v48, 16 }
  0x71   : > { %2023 = vrot.lane.b32.xlu0 %v4729_v33, %s4923_s30  ;;  %v712_v33 = vrot.slane %v710_v27, 7  ;;  %v2322_v58 = vor.u32 %v2321_v50, %v2317_v42  ;;  %v968_v55 = vld [vmem:[#allocation2 + $0x5c] sm:$0x1]  ;;  %v3212_v5 = vshll.u32 %v4742_v57, 16  ;;  %v4745_v63 = vld [vmem:[#allocation2 + $0x48] sm:$0xfe]   ;;  %v2706_v16 = vsel %vm1789_vm6, %v2704_v52, %v2705_v54 }
  0x72   : > { %2025 = vrot.lane.b32.xlu1 %v4730_v34, %s4923_s30  ;;  %v1431_v0 = vshll.u32 %v4747_v53, 16  ;;  %v3209_v3 = vrot.slane %v3207_v60, 1  ;;  %v1429_v4 = vshrl.u32 %v4747_v53, 16  ;;  %v4746_v11 = vld [vmem:[#allocation2 + $0x50] ss:$0 sps:$4 sm:$0x11]  }
  0x73   : > { %v715_v38 = vor.u32 %v713_v28, %v712_v33  ;;  %v717_v47 = vrot.slane %v712_v33, 4  ;;  %v2327_v2 = vsel %vm1355_vm7, %v2322_v58, %v2326_v51  ;;  %v3214_v8 = vrot.slane %v3212_v5, 1  ;;  %v4748_v24 = vld [vmem:[#allocation2 + $0x50] ss:$0 sps:$4 sm:$0x11]   ;;  %v375_v33 = vld [vmem:[%s5001_s23 + $0x80] sm:$0xff] }
  0x74   : > { %v3601_v12 = vrot.slane %v4745_v63, 1  ;;  %v5274_v15 = vrot.slane %v719_v49, 7  ;;  %v3210_v18 = vor.u32 %v3209_v3, %v3205_v59  ;;  %v1433_v19 = vrot.slane %v1431_v0, 1  ;;  %v376_v40 = vld [vmem:[%s5001_s23 + $0x88] sm:$0xff]  ;;  %v4767_v59 = vld [vmem:[#allocation2] sm:$0xff]   ;;  %v4797_v60 = vld [vmem:[#allocation2 + $0x18] sm:$0xff]  }
  0x75   : > { %2456 = vrot.lane.b32.xlu0 %v2315_v26, %s4927_s9  ;;  %v716_v45 = vsel %vm5060_vm10, %v708_v32, %v715_v38  ;;  %v969_v61 = vsel %vm4975_vm3, %v717_v47, %v968_v55  ;;  %v3602_v22 = vrot.slane %v4746_v11, 1  ;;  %v4566_v47 = vpack.c.bf16 %v484_v62, %v484_v62  ;;  %v4754_v50 = vld [vmem:[#allocation2 + $0x50] ss:$0 sps:$4 sm:$0x11]   ;;  %v329_v58 = vld [vmem:[#allocation2 + $0x68] sm:$0x1] }
  0x76   : > { %967 = vst.msk [vmem:[#allocation2 + $0x58] sm:$0xf] %vm237_vm0, %v716_v45  ;;  %970 = vst [vmem:[#allocation2 + $0x5c] sm:$0x1] %v969_v61  ;;  %2458 = vrot.lane.b32.xlu1 %v2327_v2, %s4927_s9  ;;  %v3215_v23 = vsel %vm1355_vm7, %v3210_v18, %v3214_v8  ;;  %v1434_v41 = vor.u32 %v1433_v19, %v1429_v4  ;;  %v414_v51 = vmul.f32 %v5201_v14, %v375_v33  ;;  %v4801_v62 = vld [vmem:[#allocation2 + $0x24] sm:$0xff]  }
  0x77   : > { %v3603_v28 = vsel %vm1789_vm6, %v3601_v12, %v3602_v22  ;;  %v724_v54 = vor.u32 %v722_v7, %v5274_v15  ;;  %v725_v57 = vrot.slane %v5274_v15, 4  ;;  %v1809_v5 = vrot.slane %v4754_v50, 1  ;;  %v276_v12 = vld [vmem:[#allocation2 + $0x6c] sm:$0x1]  ;;  %v971_v19 = vld [vmem:[#allocation2 + $0x60] sm:$0xf] }
  0x78   : > { %v415_v0 = vmul.f32 %v5201_v14, %v376_v40  ;;  %v727_v11 = vshrl.u32 %v4566_v47, 16  ;;  %v730_v18 = vshll.u32 %v4566_v47, 16  ;;  %v377_v7 = vld [vmem:[%s5001_s23 + $0x90] sm:$0xff]  ;;  %1163 = vst.msk [vmem:[#allocation3] sm:$0xff] %vm1162_vm11, %v4767_v59  ;;  %1165 = vst.msk [vmem:[#allocation3 + $0x10] sm:$0xff] %vm1162_vm11, %v4797_v60 }
  0x79   : > { %2745 = vrot.lane.b32.xlu0 %v2703_v29, %s4925_s7  ;;  %v1436_v29 = vshll.u32 %v4748_v24, 16  ;;  %v972_v22 = vsel %vm5052_vm9, %v724_v54, %v971_v19  ;;  %v453_v24 = vadd.f32 %v5217_v21, %v414_v51  ;;  %1166 = vst.msk [vmem:[#allocation3 + $0x18] sm:$0xff] %vm1162_vm11, %v4801_v62 }
  0x7a   : > { %2747 = vrot.lane.b32.xlu1 %v2706_v16, %s4925_s7  ;;  %973 = vst [vmem:[#allocation2 + $0x60] sm:$0xf] %v972_v22 }
  0x7b   : > { %v1438_v34 = vrot.slane %v1436_v29, 1 }
  0x7d   : > { %2923 = vrot.lane.b32.xlu0 %v4739_v46, %s4924_s6  ;;  %v4740_v13 = vld [vmem:[#allocation2 + $0x54] sm:$0xff]   ;;  %v4744_v31 = vld [vmem:[#allocation2 + $0x5c] ss:$0 sps:$4 sm:$0x11]   ;;  %v4753_v46 = vld [vmem:[#allocation2 + $0x48] sm:$0xfe]   ;;  %v1439_v2 = vsel %vm1355_vm7, %v1434_v41, %v1438_v34 }
  0x7e   : > { %v4743_v20 = vld [vmem:[#allocation2 + $0x54] sm:$0xff]   ;;  %v4750_v35 = vld [vmem:[#allocation2 + $0x5c] ss:$0 sps:$4 sm:$0x11]   ;;  %2925 = vrot.lane.b32.xlu1 %v4740_v13, %s4924_s6  ;;  %v3224_v37 = vshll.u32 %v4744_v31, 16  ;;  %v1808_v53 = vrot.slane %v4753_v46, 1 }
  0x7f   : > { %v4751_v25 = vld [vmem:[#allocation2 + $0x54] sm:$0xff]   ;;  %v3217_v26 = vshrl.u32 %v4743_v20, 16  ;;  %v3219_v10 = vshll.u32 %v4743_v20, 16  ;;  %v3605_v42 = vrot.slane %v4750_v35, 1  ;;  %v5301_v20 = vrot.slane %v727_v11, 7 }
  0x80   : > { %v4749_v27 = vld [vmem:[#allocation2 + $0x54] sm:$0xfe]   ;;  %v1441_v30 = vshrl.u32 %v4751_v25, 16  ;;  %v1443_v39 = vshll.u32 %v4751_v25, 16  ;;  %v3226_v44 = vrot.slane %v3224_v37, 1  ;;  %v1810_v15 = vsel %vm1789_vm6, %v1808_v53, %v1809_v5 }
  0x81   : > { %3356 = vrot.lane.b32.xlu0 %v3215_v23, %s4928_s10  ;;  %v3221_v32 = vrot.slane %v3219_v10, 1  ;;  %v3604_v38 = vrot.slane %v4749_v27, 1  ;;  %v4752_v43 = vld [vmem:[#allocation2 + $0x5c] ss:$0 sps:$4 sm:$0x11]   ;;  %v4757_v8 = vld [vmem:[#allocation2 + $0x54] sm:$0xff]   ;;  %v454_v27 = vadd.f32 %v5217_v21, %v415_v0  ;;  %v732_v29 = vor.u32 %v730_v18, %v5301_v20 }
  0x82   : > { %v1445_v45 = vrot.slane %v1443_v39, 1  ;;  %v1448_v49 = vshll.u32 %v4752_v43, 16  ;;  %v4755_v61 = vld [vmem:[#allocation2 + $0x54] sm:$0xfe]   ;;  %v330_v10 = vsel %vm4985_vm5, 0, %v329_v58  ;;  %v485_v43 = vmax.f32 %v453_v24, 0.0 }
  0x83   : > { %v3222_v36 = vor.u32 %v3221_v32, %v3217_v26  ;;  %v3606_v48 = vsel %vm1789_vm6, %v3604_v38, %v3605_v42  ;;  %v4756_v4 = vld [vmem:[#allocation2 + $0x5c] ss:$0 sps:$4 sm:$0x11]   ;;  %v1811_v16 = vrot.slane %v4755_v61, 1  ;;  %v4759_v25 = vld [vmem:[#allocation2 + $0x54] sm:$0xff]   ;;  %v733_v39 = vsel %vm5060_vm10, %v725_v57, %v732_v29 }
  0x84   : > { %v1450_v55 = vrot.slane %v1448_v49, 1  ;;  %v1446_v3 = vor.u32 %v1445_v45, %v1441_v30  ;;  %v1812_v13 = vrot.slane %v4756_v4, 1  ;;  %v4760_v26 = vld [vmem:[#allocation2 + $0x5c] ss:$0 sps:$4 sm:$0x11]   ;;  %v734_v30 = vrot.slane %v5301_v20, 4 }
  0x85   : > { %3645 = vrot.lane.b32.xlu0 %v3603_v28, %s4926_s8  ;;  %v3227_v52 = vsel %vm1355_vm7, %v3222_v36, %v3226_v44  ;;  %331 = vst [vmem:[#allocation2 + $0x68] sm:$0x1] %v330_v10  ;;  %v332_v31 = vld [vmem:[#allocation2 + $0x74] sm:$0x1]  ;;  %v279_v32 = vld [vmem:[#allocation2 + $0x78] sm:$0x1]  ;;  %v416_v44 = vmul.f32 %v5201_v14, %v377_v7  ;;  %v4567_v49 = vpack.c.bf16 %v485_v43, %v485_v43 }
  0x86   : > { %3358 = vrot.lane.b32.xlu1 %v3227_v52, %s4928_s10  ;;  %v1451_v28 = vsel %vm1355_vm7, %v1446_v3, %v1450_v55  ;;  %v2329_v33 = vshrl.u32 %v4759_v25, 16  ;;  %v2331_v34 = vshll.u32 %v4759_v25, 16  ;;  %v2336_v35 = vshll.u32 %v4760_v26, 16  ;;  %v4763_v40 = vld [vmem:[#allocation2 + $0x54] sm:$0xfe]  }
  0x87   : > { %v277_v36 = vsel %vm4975_vm3, 0, %v276_v12  ;;  %v1813_v38 = vsel %vm1789_vm6, %v1811_v16, %v1812_v13  ;;  %v4764_v42 = vld [vmem:[#allocation2 + $0x5c] ss:$0 sps:$4 sm:$0x11]   ;;  %974 = vst.msk [vmem:[#allocation2 + $0x64] sm:$0xf] %vm237_vm0, %v733_v39  ;;  %v5347_v4 = vadd.f32 %v5217_v21, %v416_v44 }
  0x88   : > { %278 = vst [vmem:[#allocation2 + $0x6c] sm:$0x1] %v277_v36  ;;  %v2333_v41 = vrot.slane %v2331_v34, 1  ;;  %v2338_v45 = vrot.slane %v2336_v35, 1  ;;  %v486_v46 = vmax.f32 %v454_v27, 0.0  ;;  %v2707_v47 = vrot.slane %v4763_v40, 1 }
  0x89   : > { %3647 = vrot.lane.b32.xlu0 %v3606_v48, %s4926_s8  ;;  %v2708_v48 = vrot.slane %v4764_v42, 1  ;;  %v333_v53 = vsel %vm4985_vm5, 0, %v332_v31  ;;  %v280_v54 = vsel %vm4975_vm3, 0, %v279_v32  ;;  %v736_v59 = vshrl.u32 %v4567_v49, 16  ;;  %v378_v3 = vld [vmem:[%s5001_s23 + $0x98] sm:$0xff] }
  0x8a   : > { %1560 = vrot.lane.b32.xlu1 %v1439_v2, %s4922_s29  ;;  %v2334_v50 = vor.u32 %v2333_v41, %v2329_v33  ;;  %v4568_v51 = vpack.c.bf16 %v486_v46, %v486_v46  ;;  %334 = vst [vmem:[#allocation2 + $0x74] sm:$0x1] %v333_v53  ;;  %281 = vst [vmem:[#allocation2 + $0x78] sm:$0x1] %v280_v54  ;;  %v739_v56 = vshll.u32 %v4567_v49, 16  ;;  %v487_v27 = vmax.f32 %v5347_v4, 0.0 }
  0x8b   : > { %v2709_v61 = vsel %vm1789_vm6, %v2707_v47, %v2708_v48  ;;  %v417_v31 = vmul.f32 %v5201_v14, %v378_v3 }
  0x8c   : > { %v2339_v57 = vsel %vm1355_vm7, %v2334_v50, %v2338_v45  ;;  %v975_v58 = vld [vmem:[#allocation2 + $0x68] sm:$0x1]  ;;  %v744_v55 = vshrl.u32 %v4568_v51, 16  ;;  %v747_v5 = vshll.u32 %v4568_v51, 16 }
  0x8d   : > { %1850 = vrot.lane.b32.xlu0 %v1810_v15, %s4921_s28  ;;  %v976_v62 = vsel %vm4975_vm3, %v734_v30, %v975_v58  ;;  %v456_v48 = vadd.f32 %v5217_v21, %v417_v31 }
  0x8e   : > { %v1839_v63 = vpop.permute.xlu1 %1838  ;;  %1562 = vrot.lane.b32.xlu1 %v1451_v28, %s4922_s29  ;;  %977 = vst [vmem:[#allocation2 + $0x68] sm:$0x1] %v976_v62  ;;  %v746_v11 = vrot.slane %v744_v55, 7  ;;  %v4761_v12 = vld [vmem:[#allocation2 + $0x60] sm:$0xff]  }
  0x8f   : > { %v978_v0 = vld [vmem:[#allocation2 + $0x6c] sm:$0xf]  ;;  %v4765_v15 = vld [vmem:[#allocation2 + $0x60] sm:$0xfe]   ;;  %v2341_v22 = vshrl.u32 %v4761_v12, 16  ;;  %v488_v3 = vmax.f32 %v456_v48, 0.0 }
  0x90   : > { %v4768_v19 = vld [vmem:[#allocation2 + $0x60] sm:$0xff]   ;;  %v749_v7 = vor.u32 %v747_v5, %v746_v11  ;;  %v751_v13 = vrot.slane %v746_v11, 4  ;;  %v2710_v33 = vrot.slane %v4765_v15, 1 }
  0x91   : > { %2027 = vrot.lane.b32.xlu0 %v4757_v8, %s4923_s30  ;;  %v4758_v8 = vld [vmem:[#allocation2 + $0x60] sm:$0xff]   ;;  %v982_v26 = vld [vmem:[#allocation2 + $0x74] sm:$0x1] }
  0x92   : > { %1852 = vrot.lane.b32.xlu1 %v1813_v38, %s4921_s28  ;;  %v4770_v25 = vld [vmem:[#allocation2 + $0x60] sm:$0xff]   ;;  %v983_v29 = vsel %vm4975_vm3, %v751_v13, %v982_v26 }
  0x93   : > { %v1549_v23 = vpop.permute.xlu0 %1548  ;;  %v4774_v30 = vld [vmem:[#allocation2 + $0x60] sm:$0xfe]   ;;  %v3229_v34 = vshrl.u32 %v4770_v25, 16  ;;  %v3231_v35 = vshll.u32 %v4770_v25, 16  ;;  %984 = vst [vmem:[#allocation2 + $0x74] sm:$0x1] %v983_v29 }
  0x94   : > { %1597 = vst.msk [vmem:[#allocation3] sm:$0xff] %vm5995_vm12, %v1549_v23  ;;  %v2343_v23 = vshll.u32 %v4761_v12, 16  ;;  %v5365_v38 = vld [vmem:[#allocation2 + $0x60] sm:$0xff]   ;;  %v3607_v47 = vrot.slane %v4774_v30, 1  ;;  %v380_v25 = vld [vmem:[%s5001_s23 + $0xa8] sm:$0xff] }
  0x95   : > { %1887 = vst.msk [vmem:[#allocation3] sm:$0xff] %vm5994_vm13, %v1839_v63  ;;  %2460 = vrot.lane.b32.xlu0 %v2339_v57, %s4927_s9  ;;  %v738_v63 = vrot.slane %v736_v59, 7  ;;  %v4762_v36 = vld [vmem:[#allocation2 + $0x68] ss:$0 sps:$4 sm:$0x11]   ;;  %v3233_v42 = vrot.slane %v3231_v35, 1  ;;  %v419_v48 = vmul.f32 %v5201_v14, %v380_v25 }
  0x96   : > { %2029 = vrot.lane.b32.xlu1 %v4758_v8, %s4923_s30  ;;  %v2345_v32 = vrot.slane %v2343_v23, 1  ;;  %v4766_v40 = vld [vmem:[#allocation2 + $0x68] ss:$0 sps:$4 sm:$0x11]   ;;  %v2348_v41 = vshll.u32 %v4762_v36, 16  ;;  %v1453_v54 = vshrl.u32 %v5365_v38, 16 }
  0x97   : > { %v741_v16 = vor.u32 %v739_v56, %v738_v63  ;;  %v742_v18 = vrot.slane %v738_v63, 4  ;;  %v4771_v45 = vld [vmem:[#allocation2 + $0x68] ss:$0 sps:$4 sm:$0x11]   ;;  %v2711_v50 = vrot.slane %v4766_v40, 1  ;;  %v3234_v51 = vor.u32 %v3233_v42, %v3229_v34 }
  0x98   : > { %v2346_v44 = vor.u32 %v2345_v32, %v2341_v22  ;;  %v4775_v46 = vld [vmem:[#allocation2 + $0x68] ss:$0 sps:$4 sm:$0x11]   ;;  %v2350_v49 = vrot.slane %v2348_v41, 1  ;;  %v1455_v57 = vshll.u32 %v5365_v38, 16 }
  0x99   : > { %2749 = vrot.lane.b32.xlu0 %v2709_v61, %s4925_s7  ;;  %v979_v24 = vsel %vm5052_vm9, %v741_v16, %v978_v0  ;;  %v750_v28 = vsel %vm5060_vm10, %v742_v18, %v749_v7  ;;  %v3608_v62 = vrot.slane %v4775_v46, 1  ;;  %v2712_v61 = vsel %vm1789_vm6, %v2710_v33, %v2711_v50  ;;  %v4777_v0 = vld [vmem:[#allocation2 + $0x68] ss:$0 sps:$4 sm:$0x11]  }
  0x9a   : > { %980 = vst [vmem:[#allocation2 + $0x6c] sm:$0xf] %v979_v24  ;;  %981 = vst.msk [vmem:[#allocation2 + $0x70] sm:$0xf] %vm237_vm0, %v750_v28  ;;  %v2351_v59 = vsel %vm1355_vm7, %v2346_v44, %v2350_v49  ;;  %v1457_v13 = vrot.slane %v1455_v57, 1  ;;  %v1460_v22 = vshll.u32 %v4777_v0, 16  ;;  %v4569_v24 = vpack.c.bf16 %v487_v27, %v487_v27 }
  0x9b   : > { %v5320_v37 = vpop.permute.xlu1 %2017  ;;  %2462 = vrot.lane.b32.xlu1 %v2351_v59, %s4927_s9  ;;  %v4773_v5 = vld [vmem:[#allocation2 + $0x74] ss:$0 sps:$4 sm:$0x11]   ;;  %v3609_v7 = vsel %vm1789_vm6, %v3607_v47, %v3608_v62  ;;  %v4783_v46 = vld [vmem:[#allocation2 + $0x68] ss:$0 sps:$4 sm:$0x11]   ;;  %v4570_v47 = vpack.c.bf16 %v488_v3, %v488_v3 }
  0x9c   : > { %v3248_v15 = vshll.u32 %v4773_v5, 16  ;;  %v4779_v29 = vld [vmem:[#allocation2 + $0x74] ss:$0 sps:$4 sm:$0x11]   ;;  %v1462_v31 = vrot.slane %v1460_v22, 1  ;;  %v753_v42 = vshrl.u32 %v4569_v24, 16  ;;  %v1458_v50 = vor.u32 %v1457_v13, %v1453_v54 }
  0x9d   : > { %2927 = vrot.lane.b32.xlu0 %v4768_v19, %s4924_s6  ;;  %v379_v19 = vld [vmem:[%s5001_s23 + $0xa0] sm:$0xff]  ;;  %v3611_v35 = vrot.slane %v4779_v29, 1  ;;  %v4781_v36 = vld [vmem:[#allocation2 + $0x74] ss:$0 sps:$4 sm:$0x11]   ;;  %v1815_v62 = vrot.slane %v4783_v46, 1 }
  0x9e   : > { %v3250_v28 = vrot.slane %v3248_v15, 1  ;;  %v418_v27 = vmul.f32 %v5201_v14, %v379_v19  ;;  %v1472_v41 = vshll.u32 %v4781_v36, 16  ;;  %v335_v5 = vld [vmem:[#allocation2 + $0x80] sm:$0x1]  ;;  %v985_v19 = vld [vmem:[#allocation2 + $0x78] sm:$0xf] }
  0x9f   : > { %v2016_v52 = vpop.permute.xlu0 %2015  ;;  %2751 = vrot.lane.b32.xlu1 %v2712_v61, %s4925_s7  ;;  %v5406_v61 = vld [vmem:[#allocation2 + $0x74] ss:$0 sps:$4 sm:$0x11]   ;;  %v336_v29 = vsel %vm4985_vm5, 0, %v335_v5 }
  0xa0   : > { %2064 = vst.msk [vmem:[#allocation3] sm:$0xff] %vm2063_vm14, %v2016_v52  ;;  %v3236_v52 = vshll.u32 %v4771_v45, 16  ;;  %v4782_v45 = vld [vmem:[#allocation2 + $0x60] sm:$0xfe]   ;;  %v1474_v59 = vrot.slane %v1472_v41, 1 }
  0xa1   : > { %v4772_v55 = vld [vmem:[#allocation2 + $0x6c] sm:$0xff]   ;;  %337 = vst [vmem:[#allocation2 + $0x80] sm:$0x1] %v336_v29 }
  0xa2   : > { %v5337_v60 = vpop.permute.xlu1 %2917  ;;  %v3238_v56 = vrot.slane %v3236_v52, 1  ;;  %v4769_v8 = vld [vmem:[#allocation2 + $0x6c] sm:$0xff]   ;;  %v3241_v11 = vshrl.u32 %v4772_v55, 16  ;;  %v3243_v12 = vshll.u32 %v4772_v55, 16  ;;  %v755_v52 = vrot.slane %v753_v42, 7 }
  0xa3   : > { %v5343_v2 = vpop.permute.xlu0 %2915  ;;  %v4780_v16 = vld [vmem:[#allocation2 + $0x6c] sm:$0xff]   ;;  %2929 = vrot.lane.b32.xlu1 %v4769_v8, %s4924_s6  ;;  %v756_v55 = vshll.u32 %v4569_v24, 16  ;;  %v761_v8 = vshrl.u32 %v4570_v47, 16  ;;  %v458_v24 = vadd.f32 %v5217_v21, %v419_v48 }
  0xa4   : > { %v3239_v63 = vsel %vm1355_vm7, %v3234_v51, %v3238_v56  ;;  %v4778_v23 = vld [vmem:[#allocation2 + $0x6c] sm:$0xfe]   ;;  %v3245_v26 = vrot.slane %v3243_v12, 1  ;;  %v1465_v30 = vshrl.u32 %v4780_v16, 16  ;;  %v1467_v40 = vshll.u32 %v4780_v16, 16 }
  0xa5   : > { %3360 = vrot.lane.b32.xlu0 %v3239_v63, %s4928_s10  ;;  %v3610_v32 = vrot.slane %v4778_v23, 1  ;;  %v1814_v56 = vrot.slane %v4782_v45, 1  ;;  %v5404_v14 = vld [vmem:[#allocation2 + $0x6c] sm:$0xfe]   ;;  %v759_v54 = vrot.slane %v755_v52, 4  ;;  %v758_v3 = vor.u32 %v756_v55, %v755_v52 }
  0xa6   : > { %v5351_v20 = vpop.permute.xlu1 %1840  ;;  %v3246_v34 = vor.u32 %v3245_v26, %v3241_v11  ;;  %v1469_v51 = vrot.slane %v1467_v40, 1  ;;  %v4786_v0 = vld [vmem:[#allocation2 + $0x6c] sm:$0xff]   ;;  %v764_v11 = vshll.u32 %v4570_v47, 16  ;;  %v1463_v12 = vsel %vm1355_vm7, %v1458_v50, %v1462_v31 }
  0xa7   : > { %v5355_v10 = vpop.permute.xlu0 %2737  ;;  %v3612_v44 = vsel %vm1789_vm6, %v3610_v32, %v3611_v35  ;;  %v1817_v15 = vrot.slane %v5404_v14, 1  ;;  %v1818_v16 = vrot.slane %v5406_v61, 1  ;;  %v986_v13 = vsel %vm5052_vm9, %v758_v3, %v985_v19  ;;  %v4788_v22 = vld [vmem:[#allocation2 + $0x6c] sm:$0xff]  }
  0xa8   : > { %v3251_v49 = vsel %vm1355_vm7, %v3246_v34, %v3250_v28  ;;  %v457_v23 = vadd.f32 %v5217_v21, %v418_v27  ;;  %987 = vst [vmem:[#allocation2 + $0x78] sm:$0xf] %v986_v13  ;;  %v4789_v28 = vld [vmem:[#allocation2 + $0x74] ss:$0 sps:$4 sm:$0x11]   ;;  %v2353_v21 = vshrl.u32 %v4788_v22, 16 }
  0xa9   : > { %3649 = vrot.lane.b32.xlu0 %v3609_v7, %s4926_s8  ;;  %3362 = vrot.lane.b32.xlu1 %v3251_v49, %s4928_s10  ;;  %v282_v7 = vld [vmem:[#allocation2 + $0x84] sm:$0x1]  ;;  %v2355_v34 = vshll.u32 %v4788_v22, 16  ;;  %v2360_v36 = vshll.u32 %v4789_v28, 16  ;;  %v490_v27 = vmax.f32 %v458_v24, 0.0  ;;  %v1819_v45 = vsel %vm1789_vm6, %v1817_v15, %v1818_v16 }
  0xaa   : > { %v5367_v39 = vpop.permute.xlu1 %2739  ;;  %v283_v40 = vsel %vm4975_vm3, 0, %v282_v7  ;;  %v489_v42 = vmax.f32 %v457_v23, 0.0  ;;  %v4809_v41 = vld [vmem:[%s5991_s3 + $0x10] ss:$0 sps:$4 sm:$0x33]  }
  0xab   : > { %v5369_v43 = vpop.permute.xlu0 %3637  ;;  %284 = vst [vmem:[#allocation2 + $0x84] sm:$0x1] %v283_v40  ;;  %v4572_v48 = vpack.c.bf16 %v490_v27, %v490_v27  ;;  %v381_v27 = vld [vmem:[%s5001_s23 + $0xb0] sm:$0xff] }
  0xac   : > { %v4571_v47 = vpack.c.bf16 %v489_v42, %v489_v42 }
  0xad   : > { %3651 = vrot.lane.b32.xlu0 %v3612_v44, %s4926_s8  ;;  %1564 = vrot.lane.b32.xlu1 %v1463_v12, %s4922_s29 }
  0xae   : > { %v5372_v53 = vpop.permute.xlu1 %1844  ;;  %v770_v49 = vshrl.u32 %v4571_v47, 16  ;;  %v773_v50 = vshll.u32 %v4571_v47, 16 }
  0xaf   : > { %v5376_v58 = vpop.permute.xlu0 %3639 }
  0xb2   : > { %v5382_v4 = vpop.permute.xlu1 %2450 }
  0xb3   : > { %v1843_v18 = vpop.permute.xlu0 %1842 }
  0xb6   : > { %v5389_v33 = vpop.permute.xlu1 %3350 }
  0xb7   : > { %v1551_v38 = vpop.permute.xlu0 %1550 }
  0xb8   : > { %1598 = vst.msk [vmem:[#allocation3 + $0x8] sm:$0xff] %vm5995_vm12, %v1551_v38  ;;  %v2357_v38 = vrot.slane %v2355_v34, 1 }
  0xb9   : > { %1888 = vst.msk [vmem:[#allocation3 + $0x8] sm:$0xff] %vm5994_vm13, %v5351_v20  ;;  %v1470_v20 = vor.u32 %v1469_v51, %v1465_v30  ;;  %v338_v30 = vld [vmem:[#allocation2 + $0x8c] sm:$0x1] }
  0xba   : > { %2065 = vst.msk [vmem:[#allocation3 + $0x8] sm:$0xff] %vm2063_vm14, %v5320_v37  ;;  %v1553_v57 = vpop.permute.xlu1 %1552  ;;  %v1816_v37 = vsel %vm1789_vm6, %v1814_v56, %v1815_v62  ;;  %v339_v44 = vsel %vm4985_vm5, 0, %v338_v30  ;;  %v772_v62 = vrot.slane %v770_v49, 7 }
  0xbb   : > { %1599 = vst.msk [vmem:[#allocation3 + $0x10] sm:$0xff] %vm5995_vm12, %v1553_v57  ;;  %v2449_v63 = vpop.permute.xlu0 %2448  ;;  %1854 = vrot.lane.b32.xlu0 %v1816_v37, %s4921_s28  ;;  %v1475_v26 = vsel %vm1355_vm7, %v1470_v20, %v1474_v59  ;;  %340 = vst [vmem:[#allocation2 + $0x8c] sm:$0x1] %v339_v44  ;;  %v778_v57 = vshrl.u32 %v4572_v48, 16  ;;  %v781_v59 = vshll.u32 %v4572_v48, 16  ;;  %v382_v44 = vld [vmem:[%s5001_s23 + $0xb8] sm:$0xff] }
  0xbc   : > { %1889 = vst.msk [vmem:[#allocation3 + $0x10] sm:$0xff] %vm5994_vm13, %v1843_v18  ;;  %v5415_v18 = vrot.slane %v761_v8, 7  ;;  %1566 = vrot.lane.b32.xlu1 %v1475_v26, %s4922_s29  ;;  %v776_v37 = vrot.slane %v772_v62, 4 }
  0xbd   : > { %2498 = vst.msk [vmem:[#allocation3 + $0x8] sm:$0xff] %vm2496_vm15, %v5382_v4  ;;  %2497 = vst.msk [vmem:[#allocation3] sm:$0xff] %vm2496_vm15, %v2449_v63  ;;  %v780_v20 = vrot.slane %v778_v57, 7  ;;  %v775_v63 = vor.u32 %v773_v50, %v772_v62 }
  0xbe   : > { %v1555_v25 = vpop.permute.xlu1 %1554  ;;  %v766_v31 = vor.u32 %v764_v11, %v5415_v18  ;;  %v768_v32 = vrot.slane %v5415_v18, 4  ;;  %2787 = vst.msk [vmem:[#allocation3 + $0x8] sm:$0xff] %vm2785_vm1, %v5367_v39  ;;  %2786 = vst.msk [vmem:[#allocation3] sm:$0xff] %vm2785_vm1, %v5355_v10  ;;  %v2362_v39 = vrot.slane %v2360_v36, 1  ;;  %v992_v11 = vld [vmem:[#allocation2 + $0x84] sm:$0xf] }
  0xbf   : > { %1600 = vst.msk [vmem:[#allocation3 + $0x18] sm:$0xff] %vm5995_vm12, %v1555_v25  ;;  %v3349_v35 = vpop.permute.xlu0 %3348  ;;  %2031 = vrot.lane.b32.xlu0 %v4786_v0, %s4923_s30  ;;  %v4794_v10 = vld [vmem:[#allocation2 + $0x74] ss:$0 sps:$4 sm:$0x11]   ;;  %vm3738_vm12 = vcmask 293888   ;;  %v783_v3 = vor.u32 %v781_v59, %v780_v20  ;;  %v785_v8 = vrot.slane %v780_v20, 4  ;;  %v993_v7 = vsel %vm5052_vm9, %v775_v63, %v992_v11 }
  0xc0   : > { %1890 = vst.msk [vmem:[#allocation3 + $0x18] sm:$0xff] %vm5994_vm13, %v5372_v53  ;;  %v767_v4 = vsel %vm5060_vm10, %v759_v54, %v766_v31  ;;  %v4793_v53 = vld [vmem:[#allocation2 + $0x6c] sm:$0xfe]   ;;  %vm3787_vm13 = vcmask 1041408   ;;  %v2714_v46 = vrot.slane %v4794_v10, 1  ;;  %1856 = vrot.lane.b32.xlu1 %v1819_v45, %s4921_s28 }
  0xc1   : > { %2965 = vst.msk [vmem:[#allocation3 + $0x8] sm:$0xff] %vm2963_vm2, %v5337_v60  ;;  %2964 = vst.msk [vmem:[#allocation3] sm:$0xff] %vm2963_vm2, %v5343_v2  ;;  %v2358_v60 = vor.u32 %v2357_v38, %v2353_v21  ;;  %v2713_v2 = vrot.slane %v4793_v53, 1  ;;  %4646 = vmatprep.subr.msk.bf16.mxu0 %vm3787_vm13, %v4809_v41  ;;  %4647 = vmatprep.subr.msk.bf16.mxu1 %vm3787_vm13, %v4809_v41  ;;  %v3789_v55 = vsel %vm3787_vm13, %v4809_v41, 0  ;;  %vm6006_vm13 = vcmask 64544  }
  0xc2   : > { %988 = vst.msk [vmem:[#allocation2 + $0x7c] sm:$0xf] %vm237_vm0, %v767_v4  ;;  %v2022_v14 = vpop.permute.xlu1 %2021  ;;  %4607 = vmatpush3.bf16.msra.mxu0 %v3789_v55  ;;  %4645 = vmatpush3.bf16.msra.mxu1 %v3789_v55  ;;  %v784_v13 = vsel %vm5060_vm10, %v776_v37, %v783_v3  ;;  %994 = vst [vmem:[#allocation2 + $0x84] sm:$0xf] %v993_v7  ;;  %v996_v22 = vld [vmem:[#allocation2 + $0x8c] sm:$0x1] }
  0xc3   : > { %3398 = vst.msk [vmem:[#allocation3 + $0x8] sm:$0xff] %vm5997_vm4, %v5389_v33  ;;  %3397 = vst.msk [vmem:[#allocation3] sm:$0xff] %vm5997_vm4, %v3349_v35  ;;  %v2020_v33 = vpop.permute.xlu0 %2019  ;;  %v2715_v52 = vsel %vm1789_vm6, %v2713_v2, %v2714_v46  ;;  %v997_v28 = vsel %vm4975_vm3, %v785_v8, %v996_v22  ;;  %v5503_v55 = vld [vmem:[%s5989_s1] ss:$0 sm:$0xff] }
  0xc4   : > { %3687 = vst.msk [vmem:[#allocation3 + $0x8] sm:$0xff] %vm5996_vm8, %v5376_v58  ;;  %3686 = vst.msk [vmem:[#allocation3] sm:$0xff] %vm5996_vm8, %v5369_v43  ;;  %v2363_v58 = vsel %vm1355_vm7, %v2358_v60, %v2362_v39  ;;  %v989_v43 = vld [vmem:[#allocation2 + $0x80] sm:$0x1]  ;;  %v421_v37 = vmul.f32 %v5503_v55, %v382_v44 }
  0xc5   : > { %2066 = vst.msk [vmem:[#allocation3 + $0x10] sm:$0xff] %vm2063_vm14, %v2020_v33  ;;  %2464 = vrot.lane.b32.xlu0 %v2363_v58, %s4927_s9  ;;  %v990_v51 = vsel %vm4975_vm3, %v768_v32, %v989_v43  ;;  %2067 = vst.msk [vmem:[#allocation3 + $0x18] sm:$0xff] %vm2063_vm14, %v2022_v14  ;;  %v5516_v22 = vld [vmem:[%s5990_s2] ss:$0 sm:$0xff] }
  0xc6   : > { %991 = vst [vmem:[#allocation2 + $0x80] sm:$0x1] %v990_v51  ;;  %995 = vst.msk [vmem:[#allocation2 + $0x88] sm:$0xf] %vm237_vm0, %v784_v13 }
  0xc7   : > { %v2453_v56 = vpop.permute.xlu0 %2452  ;;  %998 = vst [vmem:[#allocation2 + $0x8c] sm:$0x1] %v997_v28 }
  0xc8   : > { %2499 = vst.msk [vmem:[#allocation3 + $0x10] sm:$0xff] %vm2496_vm15, %v2453_v56  ;;  %v2455_v4 = vpop.permute.xlu1 %2454 }
  0xc9   : > { %v4787_v5 = vld [vmem:[#allocation2 + $0x78] sm:$0xff]   ;;  %2753 = vrot.lane.b32.xlu0 %v2715_v52, %s4925_s7  ;;  %2500 = vst.msk [vmem:[#allocation3 + $0x18] sm:$0xff] %vm2496_vm15, %v2455_v4 }
  0xca   : > { %v4790_v61 = vld [vmem:[#allocation2 + $0x78] sm:$0xff]   ;;  %2033 = vrot.lane.b32.xlu1 %v4787_v5, %s4923_s30  ;;  %v420_v5 = vmul.f32 %v5503_v55, %v381_v27 }
  0xcb   : > { %v4795_v54 = vld [vmem:[#allocation2 + $0x78] sm:$0xfe]   ;;  %v2742_v12 = vpop.permute.xlu0 %2741  ;;  %v2365_v15 = vshrl.u32 %v4790_v61, 16  ;;  %v2367_v16 = vshll.u32 %v4790_v61, 16 }
  0xcc   : > { %v4798_v0 = vld [vmem:[#allocation2 + $0x78] sm:$0xff]   ;;  %v2716_v19 = vrot.slane %v4795_v54, 1  ;;  %2788 = vst.msk [vmem:[#allocation3 + $0x10] sm:$0xff] %vm2785_vm1, %v2742_v12  ;;  %v2744_v46 = vpop.permute.xlu1 %2743  ;;  %v3703_v54 = vld [vmem:[#allocation3 + $0x8] sm:$0xff] }
  0xcd   : > { %v4802_v18 = vld [vmem:[#allocation2 + $0x78] sm:$0xff]   ;;  %v2369_v24 = vrot.slane %v2367_v16, 1  ;;  %2931 = vrot.lane.b32.xlu0 %v4798_v0, %s4924_s6  ;;  %v4791_v29 = vld [vmem:[#allocation2 + $0x80] ss:$0 sps:$4 sm:$0x11]   ;;  %v4805_v48 = vld [vmem:[#allocation2 + $0x84] sm:$0xff]  }
  0xce   : > { %v4807_v23 = vld [vmem:[#allocation2 + $0x78] sm:$0xfe]   ;;  %v3253_v25 = vshrl.u32 %v4802_v18, 16  ;;  %v3255_v26 = vshll.u32 %v4802_v18, 16  ;;  %v2372_v35 = vshll.u32 %v4791_v29, 16  ;;  %2789 = vst.msk [vmem:[#allocation3 + $0x18] sm:$0xff] %vm2785_vm1, %v2744_v46 }
  0xcf   : > { %v5484_v30 = vld [vmem:[#allocation2 + $0x78] sm:$0xff]   ;;  %v2920_v31 = vpop.permute.xlu0 %2919  ;;  %v4796_v32 = vld [vmem:[#allocation2 + $0x80] ss:$0 sps:$4 sm:$0x11]   ;;  %v2370_v34 = vor.u32 %v2369_v24, %v2365_v15  ;;  %v3613_v53 = vrot.slane %v4807_v23, 1  ;;  %v4800_v52 = vld [vmem:[#allocation2 + $0x84] sm:$0xff]   ;;  %v459_v23 = vadd.f32 %v5516_v22, %v420_v5 }
  0xd0   : > { %v3257_v21 = vrot.slane %v3255_v26, 1  ;;  %2966 = vst.msk [vmem:[#allocation3 + $0x10] sm:$0xff] %vm2963_vm2, %v2920_v31  ;;  %v4803_v36 = vld [vmem:[#allocation2 + $0x80] ss:$0 sps:$4 sm:$0x11]   ;;  %v2374_v40 = vrot.slane %v2372_v35, 1  ;;  %v2922_v63 = vpop.permute.xlu1 %2921  ;;  %v460_v26 = vadd.f32 %v5516_v22, %v421_v37 }
  0xd1   : > { %v4808_v38 = vld [vmem:[#allocation2 + $0x80] ss:$0 sps:$4 sm:$0x11]   ;;  %v2717_v39 = vrot.slane %v4796_v32, 1  ;;  %v3260_v42 = vshll.u32 %v4803_v36, 16  ;;  %v1479_v60 = vshll.u32 %v5484_v30, 16 }
  0xd2   : > { %v3258_v10 = vor.u32 %v3257_v21, %v3253_v25  ;;  %v3702_v2 = vld [vmem:[#allocation3] sm:$0xff]  ;;  %v2375_v33 = vsel %vm1355_vm7, %v2370_v34, %v2374_v40  ;;  %v3614_v45 = vrot.slane %v4808_v38, 1  ;;  %v4806_v58 = vld [vmem:[#allocation2 + $0x8c] ss:$0 sps:$4 sm:$0x11]   ;;  %v1477_v51 = vshrl.u32 %v5484_v30, 16 }
  0xd3   : > { %v3262_v41 = vrot.slane %v3260_v42, 1  ;;  %4608 = vmatprep.mubr.msk.bf16.mxu0 %vm3738_vm12, %v3702_v2  ;;  %v3353_v47 = vpop.permute.xlu0 %3352  ;;  %2466 = vrot.lane.b32.xlu1 %v2375_v33, %s4927_s9  ;;  %v2718_v43 = vsel %vm1789_vm6, %v2716_v19, %v2717_v39  ;;  %v4811_v50 = vld [vmem:[#allocation2 + $0x80] ss:$0 sps:$4 sm:$0x11]   ;;  %v3265_v57 = vshrl.u32 %v4805_v48, 16  ;;  %v3267_v59 = vshll.u32 %v4805_v48, 16 }
  0xd4   : > { %3399 = vst.msk [vmem:[#allocation3 + $0x10] sm:$0xff] %vm5997_vm4, %v3353_v47  ;;  %v3272_v56 = vshll.u32 %v4806_v58, 16  ;;  %v4814_v62 = vld [vmem:[#allocation2 + $0x84] sm:$0xff]   ;;  %v3615_v20 = vsel %vm1789_vm6, %v3613_v53, %v3614_v45  ;;  %v1484_v14 = vshll.u32 %v4811_v50, 16  ;;  %v1481_v11 = vrot.slane %v1479_v60, 1  ;;  %4609 = vmatmul.mubr.msk.bf16.vlgmr.msra.gmra.mrb[0].mxu0 %vm3738_vm12, %v3703_v54  ;;  %v3355_v34 = vpop.permute.xlu1 %3354 }
  0xd5   : > { %v3263_v49 = vsel %vm1355_vm7, %v3258_v10, %v3262_v41  ;;  %v4812_v61 = vld [vmem:[#allocation2 + $0x84] sm:$0xfe]   ;;  %v3269_v3 = vrot.slane %v3267_v59, 1  ;;  %v4813_v12 = vld [vmem:[#allocation2 + $0x8c] ss:$0 sps:$4 sm:$0x11]  }
  0xd6   : > { %3364 = vrot.lane.b32.xlu0 %v3263_v49, %s4928_s10  ;;  %v3274_v8 = vrot.slane %v3272_v56, 1  ;;  %2967 = vst.msk [vmem:[#allocation3 + $0x18] sm:$0xff] %vm2963_vm2, %v2922_v63  ;;  %v285_v15 = vld [vmem:[#allocation2 + $0x90] sm:$0x1]  ;;  %v3616_v16 = vrot.slane %v4812_v61, 1  ;;  %v1489_v19 = vshrl.u32 %v4814_v62, 16  ;;  %v1482_v29 = vor.u32 %v1481_v11, %v1477_v51 }
  0xd7   : > { %v3642_v0 = vpop.permute.xlu0 %3641  ;;  %2755 = vrot.lane.b32.xlu1 %v2718_v43, %s4925_s7  ;;  %v3270_v7 = vor.u32 %v3269_v3, %v3265_v57  ;;  %v3617_v18 = vrot.slane %v4813_v12, 1  ;;  %v4815_v13 = vld [vmem:[#allocation2 + $0x8c] ss:$0 sps:$4 sm:$0x11]   ;;  %v1486_v24 = vrot.slane %v1484_v14, 1  ;;  %v1491_v25 = vshll.u32 %v4814_v62, 16 }
  0xd8   : > { %3688 = vst.msk [vmem:[#allocation3 + $0x10] sm:$0xff] %vm5996_vm8, %v3642_v0  ;;  %v1496_v31 = vshll.u32 %v4815_v13, 16  ;;  %v4816_v32 = vld [vmem:[#allocation2 + $0x78] sm:$0xfe]   ;;  %v286_v4 = vsel %vm4975_vm3, 0, %v285_v15  ;;  %v491_v39 = vmax.f32 %v459_v23, 0.0  ;;  %v1557_v45 = vpop.permute.xlu1 %1556 }
  0xd9   : > { %v3618_v30 = vsel %vm1789_vm6, %v3616_v16, %v3617_v18  ;;  %v4817_v21 = vld [vmem:[#allocation2 + $0x80] ss:$0 sps:$4 sm:$0x11]   ;;  %v3275_v35 = vsel %vm1355_vm7, %v3270_v7, %v3274_v8  ;;  %v1493_v36 = vrot.slane %v1491_v25, 1  ;;  %3400 = vst.msk [vmem:[#allocation3 + $0x18] sm:$0xff] %vm5997_vm4, %v3355_v34  ;;  %v1820_v53 = vrot.slane %v4816_v32, 1  ;;  %vm6008_vm4 = vmmov %vm6006_vm13 }
  0xda   : > { %3653 = vrot.lane.b32.xlu0 %v3615_v20, %s4926_s8  ;;  %v1498_v38 = vrot.slane %v1496_v31, 1  ;;  %v1821_v40 = vrot.slane %v4817_v21, 1  ;;  %287 = vst [vmem:[#allocation2 + $0x90] sm:$0x1] %v286_v4  ;;  %v341_v10 = vld [vmem:[#allocation2 + $0x98] sm:$0x1]  ;;  %v1487_v2 = vsel %vm1355_vm7, %v1482_v29, %v1486_v24  ;;  %v4573_v41 = vpack.c.bf16 %v491_v39, %v491_v39 }
  0xdb   : > { %v3644_v28 = vpop.permute.xlu0 %3643  ;;  %2933 = vrot.lane.b32.xlu1 %v4800_v52, %s4924_s6  ;;  %v4818_v42 = vld [vmem:[#allocation2 + $0x84] sm:$0xfe]   ;;  %v4819_v27 = vld [vmem:[#allocation2 + $0x8c] ss:$0 sps:$4 sm:$0x11]   ;;  %v492_v60 = vmax.f32 %v460_v26, 0.0  ;;  %v1494_v47 = vor.u32 %v1493_v36, %v1489_v19 }
  0xdc   : > { %3689 = vst.msk [vmem:[#allocation3 + $0x18] sm:$0xff] %vm5996_vm8, %v3644_v28  ;;  %v1822_v44 = vsel %vm1789_vm6, %v1820_v53, %v1821_v40  ;;  %v4820_v33 = vld [vmem:[#allocation2 + $0x84] sm:$0xff]   ;;  %v1823_v48 = vrot.slane %v4818_v42, 1  ;;  %v1824_v58 = vrot.slane %v4819_v27, 1  ;;  %v787_v49 = vshrl.u32 %v4573_v41, 16  ;;  %v4826_v62 = vld [vmem:[#allocation2 + $0x30] sm:$0xff]   ;;  %v1559_v54 = vpop.permute.xlu1 %1558 }
  0xdd   : > { %v4574_v43 = vpack.c.bf16 %v492_v60, %v492_v60  ;;  %v790_v50 = vshll.u32 %v4573_v41, 16  ;;  %v4822_v51 = vld [vmem:[#allocation2 + $0x84] sm:$0xff]   ;;  %v4823_v52 = vld [vmem:[#allocation2 + $0x8c] ss:$0 sps:$4 sm:$0x11]   ;;  %v342_v56 = vsel %vm4985_vm5, 0, %v341_v10  ;;  %v1499_v37 = vsel %vm1355_vm7, %v1494_v47, %v1498_v38 }
  0xde   : > { %3655 = vrot.lane.b32.xlu0 %v3618_v30, %s4926_s8  ;;  %v789_v5 = vrot.slane %v787_v49, 7  ;;  %v2377_v20 = vshrl.u32 %v4822_v51, 16  ;;  %v2379_v14 = vshll.u32 %v4822_v51, 16  ;;  %v2384_v61 = vshll.u32 %v4823_v52, 16  ;;  %343 = vst [vmem:[#allocation2 + $0x98] sm:$0x1] %v342_v56 }
  0xdf   : > { %3366 = vrot.lane.b32.xlu1 %v3275_v35, %s4928_s10  ;;  %v1847_v46 = vpop.permute.xlu0 %1846  ;;  %v795_v57 = vshrl.u32 %v4574_v43, 16  ;;  %v798_v59 = vshll.u32 %v4574_v43, 16  ;;  %1167 = vst.msk [vmem:[#allocation3 + $0x20] sm:$0xff] %vm1162_vm11, %v4826_v62  ;;  %v4831_v8 = vld [vmem:[#allocation2 + $0x3c] sm:$0xff]   ;;  %v4827_v13 = vld [vmem:[#allocation2 + $0x84] sm:$0xfe]   ;;  %v1825_v32 = vsel %vm1789_vm6, %v1823_v48, %v1824_v58 }
  0xe0   : > { %v792_v11 = vor.u32 %v790_v50, %v789_v5  ;;  %v793_v12 = vrot.slane %v789_v5, 4  ;;  %v2381_v15 = vrot.slane %v2379_v14, 1  ;;  %v2386_v16 = vrot.slane %v2384_v61, 1  ;;  %1601 = vst.msk [vmem:[#allocation3 + $0x20] sm:$0xff] %vm6006_vm13, %v1557_v45  ;;  %v383_v19 = vld [vmem:[%s5001_s23 + $0xc0] sm:$0xff]  ;;  %v384_v23 = vld [vmem:[%s5001_s23 + $0xc8] sm:$0xff]  ;;  %v1849_v30 = vpop.permute.xlu1 %1848 }
  0xe1   : > { %v797_v0 = vrot.slane %v795_v57, 7  ;;  %v999_v3 = vld [vmem:[#allocation2 + $0x90] sm:$0xf]  ;;  %1168 = vst.msk [vmem:[#allocation3 + $0x28] sm:$0xff] %vm1162_vm11, %v4831_v8  ;;  %v422_v24 = vmul.f32 %v5503_v55, %v383_v19  ;;  %vm6007_vm8 = vcmask 97344   ;;  %v423_v29 = vmul.f32 %v5503_v55, %v384_v23  ;;  %v3704_v31 = vld [vmem:[#allocation3 + $0x10] sm:$0xff] }
  0xe2   : > { %1858 = vrot.lane.b32.xlu0 %v1822_v44, %s4921_s28  ;;  %1891 = vst.msk [vmem:[#allocation3 + $0x20] sm:$0xff] %vm6007_vm8, %v1847_v46  ;;  %v1000_v25 = vsel %vm5052_vm9, %v792_v11, %v999_v3  ;;  %v2382_v26 = vor.u32 %v2381_v15, %v2377_v20  ;;  %v4828_v28 = vld [vmem:[#allocation2 + $0x8c] ss:$0 sps:$4 sm:$0x11]   ;;  %v2719_v34 = vrot.slane %v4827_v13, 1  ;;  %4612 = vmatprep.mubr.msk.bf16.mxu0 %vm3738_vm12, %v3704_v31  ;;  %v4861_v52 = vld [vmem:[#allocation2 + $0x54] sm:$0xff]  }
  0xe3   : > { %1568 = vrot.lane.b32.xlu1 %v1487_v2, %s4922_s29  ;;  %v2024_v63 = vpop.permute.xlu0 %2023  ;;  %v800_v7 = vor.u32 %v798_v59, %v797_v0  ;;  %v802_v18 = vrot.slane %v797_v0, 4  ;;  %1602 = vst.msk [vmem:[#allocation3 + $0x28] sm:$0xff] %vm6008_vm4, %v1559_v54  ;;  %1001 = vst [vmem:[#allocation2 + $0x90] sm:$0xf] %v1000_v25  ;;  %v288_v35 = vld [vmem:[#allocation2 + $0x9c] sm:$0x1]  ;;  %v461_v36 = vadd.f32 %v5516_v22, %v422_v24 }
  0xe4   : > { %2068 = vst.msk [vmem:[#allocation3 + $0x20] sm:$0xff] %vm2063_vm14, %v2024_v63  ;;  %v3705_v4 = vld [vmem:[#allocation3 + $0x18] sm:$0xff]  ;;  %v2387_v53 = vsel %vm1355_vm7, %v2382_v26, %v2386_v16  ;;  %v2720_v40 = vrot.slane %v4828_v28, 1  ;;  %v289_v39 = vsel %vm4975_vm3, 0, %v288_v35  ;;  %v462_v10 = vadd.f32 %v5516_v22, %v423_v29  ;;  %v344_v42 = vld [vmem:[#allocation2 + $0xa4] sm:$0x1]  ;;  %v2026_v51 = vpop.permute.xlu1 %2025 }
  0xe5   : > { %v801_v21 = vsel %vm5060_vm10, %v793_v12, %v800_v7  ;;  %1892 = vst.msk [vmem:[#allocation3 + $0x28] sm:$0xff] %vm6007_vm8, %v1849_v30  ;;  %4613 = vmatmul.mubr.msk.bf16.gmra.mrb[4].mxu0 %vm3738_vm12, %v3705_v4  ;;  %v291_v27 = vld [vmem:[#allocation2 + $0xa8] sm:$0x1]  ;;  %v1003_v60 = vld [vmem:[#allocation2 + $0x98] sm:$0x1]  ;;  %v493_v2 = vmax.f32 %v461_v36, 0.0 }
  0xe6   : > { %2035 = vrot.lane.b32.xlu0 %v4820_v33, %s4923_s30  ;;  %1002 = vst.msk [vmem:[#allocation2 + $0x94] sm:$0xf] %vm237_vm0, %v801_v21  ;;  %290 = vst [vmem:[#allocation2 + $0x9c] sm:$0x1] %v289_v39  ;;  %v345_v44 = vsel %vm4985_vm5, 0, %v344_v42  ;;  %v292_v33 = vsel %vm4975_vm3, 0, %v291_v27  ;;  %v1004_v41 = vsel %vm4975_vm3, %v802_v18, %v1003_v60  ;;  %v2721_v45 = vsel %vm1789_vm6, %v2719_v34, %v2720_v40 }
  0xe7   : > { %1570 = vrot.lane.b32.xlu1 %v1499_v37, %s4922_s29  ;;  %v2457_v38 = vpop.permute.xlu0 %2456  ;;  %v494_v46 = vmax.f32 %v462_v10, 0.0  ;;  %346 = vst [vmem:[#allocation2 + $0xa4] sm:$0x1] %v345_v44  ;;  %293 = vst [vmem:[#allocation2 + $0xa8] sm:$0x1] %v292_v33  ;;  %v4575_v48 = vpack.c.bf16 %v493_v2, %v493_v2  ;;  %v4856_v49 = vld [vmem:[#allocation2 + $0x48] sm:$0xff]  }
  0xe8   : > { %2501 = vst.msk [vmem:[#allocation3 + $0x20] sm:$0xff] %vm2496_vm15, %v2457_v38  ;;  %v347_v47 = vld [vmem:[#allocation2 + $0xb0] sm:$0x1]  ;;  %1005 = vst [vmem:[#allocation2 + $0x98] sm:$0x1] %v1004_v41  ;;  %v386_v12 = vld [vmem:[%s5001_s23 + $0xd8] sm:$0xff]  ;;  %v2459_v25 = vpop.permute.xlu1 %2458 }
  0xe9   : > { %v348_v43 = vsel %vm4985_vm5, 0, %v347_v47  ;;  %v4576_v50 = vpack.c.bf16 %v494_v46, %v494_v46  ;;  %v294_v57 = vld [vmem:[#allocation2 + $0xb4] sm:$0x1]  ;;  %v804_v59 = vshrl.u32 %v4575_v48, 16  ;;  %v807_v56 = vshll.u32 %v4575_v48, 16  ;;  %2069 = vst.msk [vmem:[#allocation3 + $0x28] sm:$0xff] %vm2063_vm14, %v2026_v51 }
  0xea   : > { %2468 = vrot.lane.b32.xlu0 %v2387_v53, %s4927_s9  ;;  %349 = vst [vmem:[#allocation2 + $0xb0] sm:$0x1] %v348_v43  ;;  %1169 = vst.msk [vmem:[#allocation3 + $0x30] sm:$0xff] %vm1162_vm11, %v4856_v49  ;;  %v295_v62 = vsel %vm4975_vm3, 0, %v294_v57  ;;  %v385_v5 = vld [vmem:[%s5001_s23 + $0xd0] sm:$0xff]  ;;  %v425_v53 = vmul.f32 %v5503_v55, %v386_v12  ;;  %vm6009_vm4 = vcmask 261344  }
  0xeb   : > { %1860 = vrot.lane.b32.xlu1 %v1825_v32, %s4921_s28  ;;  %v2746_v58 = vpop.permute.xlu0 %2745  ;;  %1170 = vst.msk [vmem:[#allocation3 + $0x38] sm:$0xff] %vm1162_vm11, %v4861_v52  ;;  %296 = vst [vmem:[#allocation2 + $0xb4] sm:$0x1] %v295_v62  ;;  %v806_v14 = vrot.slane %v804_v59, 7  ;;  %v812_v63 = vshrl.u32 %v4576_v50, 16  ;;  %v424_v19 = vmul.f32 %v5503_v55, %v385_v5  ;;  %v815_v23 = vshll.u32 %v4576_v50, 16 }
  0xec   : > { %2790 = vst.msk [vmem:[#allocation3 + $0x20] sm:$0xff] %vm2785_vm1, %v2746_v58  ;;  %v2748_v60 = vpop.permute.xlu1 %2747  ;;  %v464_v58 = vadd.f32 %v5516_v22, %v425_v53  ;;  %vm6010_vm13 = vcmask 294144   ;;  %vm6011_vm8 = vmmov %vm6009_vm4  ;;  %v4903_v6 = vld [vmem:[#allocation2 + $0x84] sm:$0xff]  }
  0xed   : > { %v4821_v20 = vld [vmem:[#allocation2 + $0x90] sm:$0xff]   ;;  %v809_v3 = vor.u32 %v807_v56, %v806_v14  ;;  %v810_v18 = vrot.slane %v806_v14, 4  ;;  %v814_v13 = vrot.slane %v812_v63, 7  ;;  %v1006_v24 = vld [vmem:[#allocation2 + $0x9c] sm:$0xf]  ;;  %2502 = vst.msk [vmem:[#allocation3 + $0x28] sm:$0xff] %vm2496_vm15, %v2459_v25  ;;  %v5594_v40 = vadd.f32 %v5516_v22, %v424_v19 }
  0xee   : > { %2757 = vrot.lane.b32.xlu0 %v2721_v45, %s4925_s7  ;;  %v4824_v61 = vld [vmem:[#allocation2 + $0x90] sm:$0xff]   ;;  %v1010_v4 = vld [vmem:[#allocation2 + $0xa4] sm:$0x1]  ;;  %2791 = vst.msk [vmem:[#allocation3 + $0x28] sm:$0xff] %vm2785_vm1, %v2748_v60  ;;  %v388_v25 = vld [vmem:[%s5001_s23 + $0xe8] sm:$0xff] }
  0xef   : > { %v4829_v54 = vld [vmem:[#allocation2 + $0x90] sm:$0xfe]   ;;  %v2924_v37 = vpop.permute.xlu0 %2923  ;;  %2037 = vrot.lane.b32.xlu1 %v4821_v20, %s4923_s30  ;;  %v4825_v8 = vld [vmem:[#allocation2 + $0x98] ss:$0 sps:$4 sm:$0x11]   ;;  %v2389_v11 = vshrl.u32 %v4824_v61, 16  ;;  %v1007_v29 = vsel %vm5052_vm9, %v809_v3, %v1006_v24  ;;  %v817_v32 = vor.u32 %v815_v23, %v814_v13 }
  0xf0   : > { %v4832_v0 = vld [vmem:[#allocation2 + $0x90] sm:$0xff]   ;;  %2968 = vst.msk [vmem:[#allocation3 + $0x20] sm:$0xff] %vm2963_vm2, %v2924_v37  ;;  %v2391_v15 = vshll.u32 %v4824_v61, 16  ;;  %v4830_v16 = vld [vmem:[#allocation2 + $0x98] ss:$0 sps:$4 sm:$0x11]   ;;  %v2926_v59 = vpop.permute.xlu1 %2925 }
  0xf1   : > { %v2396_v7 = vshll.u32 %v4825_v8, 16  ;;  %v2722_v28 = vrot.slane %v4829_v54, 1  ;;  %v2723_v31 = vrot.slane %v4830_v16, 1  ;;  %v819_v21 = vrot.slane %v814_v13, 4  ;;  %1008 = vst [vmem:[#allocation2 + $0x9c] sm:$0xf] %v1007_v29 }
  0xf2   : > { %2935 = vrot.lane.b32.xlu0 %v4832_v0, %s4924_s6  ;;  %v2393_v26 = vrot.slane %v2391_v15, 1  ;;  %v4834_v34 = vld [vmem:[#allocation2 + $0x90] sm:$0xff]   ;;  %v4835_v36 = vld [vmem:[#allocation2 + $0x98] ss:$0 sps:$4 sm:$0x11]   ;;  %v818_v39 = vsel %vm5060_vm10, %v810_v18, %v817_v32  ;;  %v495_v43 = vmax.f32 %v5594_v40, 0.0 }
  0xf3   : > { %v2398_v30 = vrot.slane %v2396_v7, 1  ;;  %v5590_v38 = vld [vmem:[#allocation2 + $0x90] sm:$0xff]   ;;  %v3277_v10 = vshrl.u32 %v4834_v34, 16  ;;  %v3279_v42 = vshll.u32 %v4834_v34, 16  ;;  %v1011_v27 = vsel %vm4975_vm3, %v819_v21, %v1010_v4  ;;  %v3357_v2 = vpop.permute.xlu0 %3356  ;;  %1009 = vst.msk [vmem:[#allocation2 + $0xa0] sm:$0xf] %vm237_vm0, %v818_v39 }
  0xf4   : > { %v2394_v35 = vor.u32 %v2393_v26, %v2389_v11  ;;  %v3284_v33 = vshll.u32 %v4835_v36, 16  ;;  %1012 = vst [vmem:[#allocation2 + $0xa4] sm:$0x1] %v1011_v27  ;;  %v4838_v41 = vld [vmem:[#allocation2 + $0x90] sm:$0xfe]   ;;  %3401 = vst.msk [vmem:[#allocation3 + $0x20] sm:$0xff] %vm6009_vm4, %v3357_v2  ;;  %v2724_v47 = vsel %vm1789_vm6, %v2722_v28, %v2723_v31 }
  0xf5   : > { %v3281_v45 = vrot.slane %v3279_v42, 1  ;;  %v4839_v46 = vld [vmem:[#allocation2 + $0x98] ss:$0 sps:$4 sm:$0x11]   ;;  %v3619_v50 = vrot.slane %v4838_v41, 1  ;;  %v1503_v57 = vshll.u32 %v5590_v38, 16  ;;  %vm6012_vm4 = vmmov %vm6010_vm13 }
  0xf6   : > { %v2399_v44 = vsel %vm1355_vm7, %v2394_v35, %v2398_v30  ;;  %v3286_v48 = vrot.slane %v3284_v33, 1  ;;  %v3620_v51 = vrot.slane %v4839_v46, 1  ;;  %v4841_v52 = vld [vmem:[#allocation2 + $0x98] ss:$0 sps:$4 sm:$0x11]   ;;  %2969 = vst.msk [vmem:[#allocation3 + $0x28] sm:$0xff] %vm2963_vm2, %v2926_v59 }
  0xf7   : > { %2470 = vrot.lane.b32.xlu1 %v2399_v44, %s4927_s9  ;;  %v3282_v49 = vor.u32 %v3281_v45, %v3277_v10  ;;  %v3646_v56 = vpop.permute.xlu0 %3645  ;;  %v1501_v5 = vshrl.u32 %v5590_v38, 16  ;;  %v1508_v20 = vshll.u32 %v4841_v52, 16  ;;  %v1505_v14 = vrot.slane %v1503_v57, 1  ;;  %v4846_v0 = vld [vmem:[#allocation2 + $0x90] sm:$0xfe]   ;;  %v387_v13 = vld [vmem:[%s5001_s23 + $0xe0] sm:$0xff] }
  0xf8   : > { %3690 = vst.msk [vmem:[#allocation3 + $0x20] sm:$0xff] %vm6010_vm13, %v3646_v56  ;;  %v496_v61 = vmax.f32 %v464_v58, 0.0  ;;  %v3621_v63 = vsel %vm1789_vm6, %v3619_v50, %v3620_v51  ;;  %v3359_v12 = vpop.permute.xlu1 %3358  ;;  %v4847_v36 = vld [vmem:[#allocation2 + $0x98] ss:$0 sps:$4 sm:$0x11]   ;;  %v1826_v4 = vrot.slane %v4846_v0, 1  ;;  %v4577_v38 = vpack.c.bf16 %v495_v43, %v495_v43 }
  0xf9   : > { %v3287_v62 = vsel %vm1355_vm7, %v3282_v49, %v3286_v48  ;;  %v1510_v37 = vrot.slane %v1508_v20, 1  ;;  %3402 = vst.msk [vmem:[#allocation3 + $0x28] sm:$0xff] %vm6011_vm8, %v3359_v12  ;;  %v1506_v30 = vor.u32 %v1505_v14, %v1501_v5  ;;  %vm6013_vm13 = vcmask 64544   ;;  %v389_v42 = vld [vmem:[%s5001_s23 + $0xf0] sm:$0xff]  ;;  %v1013_v5 = vld [vmem:[#allocation2 + $0xa8] sm:$0xf] }
  0xfa   : > { %3368 = vrot.lane.b32.xlu0 %v3287_v62, %s4928_s10  ;;  %v4833_v54 = vld [vmem:[#allocation2 + $0x9c] sm:$0xff]   ;;  %v4578_v10 = vpack.c.bf16 %v496_v61, %v496_v61  ;;  %vm6014_vm8 = vcmask 97344   ;;  %v1827_v60 = vrot.slane %v4847_v36, 1  ;;  %v426_v44 = vmul.f32 %v5503_v55, %v387_v13  ;;  %1174 = vst.msk [vmem:[#allocation3 + $0x58] sm:$0xff] %vm1162_vm11, %v4903_v6 }
  0xfb   : > { %2759 = vrot.lane.b32.xlu1 %v2724_v47, %s4925_s7  ;;  %v3648_v3 = vpop.permute.xlu0 %3647  ;;  %v4836_v8 = vld [vmem:[#allocation2 + $0x9c] sm:$0xff]   ;;  %v4837_v11 = vld [vmem:[#allocation2 + $0xa4] ss:$0 sps:$4 sm:$0x11]   ;;  %v1511_v45 = vsel %vm1355_vm7, %v1506_v30, %v1510_v37  ;;  %v427_v58 = vmul.f32 %v5503_v55, %v388_v25  ;;  %v821_v52 = vshrl.u32 %v4577_v38, 16  ;;  %v824_v59 = vshll.u32 %v4577_v38, 16 }
  0xfc   : > { %v4842_v15 = vld [vmem:[#allocation2 + $0x9c] sm:$0xfe]   ;;  %v3289_v16 = vshrl.u32 %v4836_v8, 16  ;;  %v3291_v19 = vshll.u32 %v4836_v8, 16  ;;  %v3296_v7 = vshll.u32 %v4837_v11, 16  ;;  %3691 = vst.msk [vmem:[#allocation3 + $0x28] sm:$0xff] %vm6012_vm4, %v3648_v3  ;;  %v1561_v21 = vpop.permute.xlu1 %1560  ;;  %v1828_v49 = vsel %vm1789_vm6, %v1826_v4, %v1827_v60  ;;  %vm6015_vm4 = vmmov %vm6013_vm13 }
  0xfd   : > { %v4843_v18 = vld [vmem:[#allocation2 + $0xa4] ss:$0 sps:$4 sm:$0x11]   ;;  %v3622_v23 = vrot.slane %v4842_v15, 1  ;;  %v4844_v24 = vld [vmem:[#allocation2 + $0x9c] sm:$0xff]   ;;  %1603 = vst.msk [vmem:[#allocation3 + $0x30] sm:$0xff] %vm6013_vm13, %v1561_v21  ;;  %v428_v61 = vmul.f32 %v5503_v55, %v389_v42  ;;  %v465_v0 = vadd.f32 %v5516_v22, %v426_v44  ;;  %v466_v3 = vadd.f32 %v5516_v22, %v427_v58  ;;  %vm6016_vm13 = vmmov %vm6014_vm8 }
  0xfe   : > { %3657 = vrot.lane.b32.xlu0 %v3621_v63, %s4926_s8  ;;  %v3293_v28 = vrot.slane %v3291_v19, 1  ;;  %v3298_v29 = vrot.slane %v3296_v7, 1  ;;  %v3623_v31 = vrot.slane %v4843_v18, 1  ;;  %v4845_v32 = vld [vmem:[#allocation2 + $0xa4] ss:$0 sps:$4 sm:$0x11]  }
  0xff   : > { %2937 = vrot.lane.b32.xlu1 %v4833_v54, %s4924_s6  ;;  %v1851_v26 = vpop.permute.xlu0 %1850  ;;  %v1513_v34 = vshrl.u32 %v4844_v24, 16  ;;  %v1515_v35 = vshll.u32 %v4844_v24, 16  ;;  %v1520_v39 = vshll.u32 %v4845_v32, 16  ;;  %v5627_v2 = vld [vmem:[#allocation2 + $0x9c] sm:$0xfe]   ;;  %v829_v56 = vshrl.u32 %v4578_v10, 16 }
 0x100   : > { %v3294_v53 = vor.u32 %v3293_v28, %v3289_v16  ;;  %v3624_v40 = vsel %vm1789_vm6, %v3622_v23, %v3623_v31  ;;  %1893 = vst.msk [vmem:[#allocation3 + $0x30] sm:$0xff] %vm6014_vm8, %v1851_v26  ;;  %v5632_v47 = vld [vmem:[#allocation2 + $0xa4] ss:$0 sps:$4 sm:$0x11]   ;;  %v1563_v48 = vpop.permute.xlu1 %1562  ;;  %v1829_v50 = vrot.slane %v5627_v2, 1  ;;  %v4850_v51 = vld [vmem:[#allocation2 + $0x9c] sm:$0xff]   ;;  %v5654_v30 = vadd.f32 %v5516_v22, %v428_v61 }
 0x101   : > { %v1517_v27 = vrot.slane %v1515_v35, 1  ;;  %v1522_v46 = vrot.slane %v1520_v39, 1  ;;  %1604 = vst.msk [vmem:[#allocation3 + $0x38] sm:$0xff] %vm6015_vm4, %v1563_v48  ;;  %v1830_v57 = vrot.slane %v5632_v47, 1  ;;  %v832_v62 = vshll.u32 %v4578_v10, 16  ;;  %v4852_v14 = vld [vmem:[#allocation2 + $0x9c] sm:$0xff]  }
 0x102   : > { %3659 = vrot.lane.b32.xlu0 %v3624_v40, %s4926_s8  ;;  %v3299_v41 = vsel %vm1355_vm7, %v3294_v53, %v3298_v29  ;;  %v823_v20 = vrot.slane %v821_v52, 7  ;;  %v831_v54 = vrot.slane %v829_v56, 7  ;;  %v4853_v63 = vld [vmem:[#allocation2 + $0xa4] ss:$0 sps:$4 sm:$0x11]   ;;  %v2401_v15 = vshrl.u32 %v4852_v14, 16 }
 0x103   : > { %v2028_v33 = vpop.permute.xlu0 %2027  ;;  %3370 = vrot.lane.b32.xlu1 %v3299_v41, %s4928_s10  ;;  %v1518_v43 = vor.u32 %v1517_v27, %v1513_v34  ;;  %v1017_v37 = vld [vmem:[#allocation2 + $0xb0] sm:$0x1]  ;;  %v2403_v16 = vshll.u32 %v4852_v14, 16  ;;  %v3706_v19 = vld [vmem:[#allocation3 + $0x20] sm:$0xff]  ;;  %v2408_v23 = vshll.u32 %v4853_v63, 16  ;;  %v497_v34 = vmax.f32 %v465_v0, 0.0 }
 0x104   : > { %2070 = vst.msk [vmem:[#allocation3 + $0x30] sm:$0xff] %vm2063_vm14, %v2028_v33  ;;  %v1853_v8 = vpop.permute.xlu1 %1852  ;;  %v826_v11 = vor.u32 %v824_v59, %v823_v20  ;;  %v827_v12 = vrot.slane %v823_v20, 4  ;;  %v834_v13 = vor.u32 %v832_v62, %v831_v54  ;;  %v836_v24 = vrot.slane %v831_v54, 4  ;;  %4616 = vmatprep.mubr.msk.bf16.mxu0 %vm3738_vm12, %v3706_v19  ;;  %v4857_v28 = vld [vmem:[#allocation2 + $0x9c] sm:$0xfe]  }
 0x105   : > { %1894 = vst.msk [vmem:[#allocation3 + $0x38] sm:$0xff] %vm6016_vm13, %v1853_v8  ;;  %v1523_v18 = vsel %vm1355_vm7, %v1518_v43, %v1522_v46  ;;  %v2405_v26 = vrot.slane %v2403_v16, 1  ;;  %v4858_v29 = vld [vmem:[#allocation2 + $0xa4] ss:$0 sps:$4 sm:$0x11]   ;;  %v2410_v32 = vrot.slane %v2408_v23, 1  ;;  %v1831_v27 = vsel %vm1789_vm6, %v1829_v50, %v1830_v57 }
 0x106   : > { %1862 = vrot.lane.b32.xlu0 %v1828_v49, %s4921_s28  ;;  %v1014_v25 = vsel %vm5052_vm9, %v826_v11, %v1013_v5  ;;  %v835_v31 = vsel %vm5060_vm10, %v827_v12, %v834_v13  ;;  %v1018_v21 = vsel %vm4975_vm3, %v836_v24, %v1017_v37  ;;  %v350_v35 = vld [vmem:[#allocation2 + $0xbc] sm:$0x1]  ;;  %v2725_v4 = vrot.slane %v4857_v28, 1  ;;  %v3707_v39 = vld [vmem:[#allocation3 + $0x28] sm:$0xff]  ;;  %v353_v41 = vld [vmem:[#allocation2 + $0xc8] sm:$0x1] }
 0x107   : > { %1572 = vrot.lane.b32.xlu1 %v1511_v45, %s4922_s29  ;;  %v2461_v7 = vpop.permute.xlu0 %2460  ;;  %1015 = vst [vmem:[#allocation2 + $0xa8] sm:$0xf] %v1014_v25  ;;  %1016 = vst.msk [vmem:[#allocation2 + $0xac] sm:$0xf] %vm237_vm0, %v835_v31  ;;  %v2406_v36 = vor.u32 %v2405_v26, %v2401_v15  ;;  %v2726_v38 = vrot.slane %v4858_v29, 1  ;;  %v498_v53 = vmax.f32 %v466_v3, 0.0  ;;  %v4579_v60 = vpack.c.bf16 %v497_v34, %v497_v34 }
 0x108   : > { %2503 = vst.msk [vmem:[#allocation3 + $0x30] sm:$0xff] %vm2496_vm15, %v2461_v7  ;;  %1019 = vst [vmem:[#allocation2 + $0xb0] sm:$0x1] %v1018_v21  ;;  %v2030_v40 = vpop.permute.xlu1 %2029  ;;  %v297_v42 = vld [vmem:[#allocation2 + $0xc0] sm:$0x1]  ;;  %v351_v2 = vsel %vm4985_vm5, 0, %v350_v35  ;;  %4617 = vmatmul.mubr.msk.bf16.gmra.mrb[8].mxu0 %vm3738_vm12, %v3707_v39 }
 0x109   : > { %2071 = vst.msk [vmem:[#allocation3 + $0x38] sm:$0xff] %vm2063_vm14, %v2030_v40  ;;  %v298_v44 = vsel %vm4975_vm3, 0, %v297_v42  ;;  %v390_v33 = vld [vmem:[%s5001_s23 + $0xf8] sm:$0xff]  ;;  %v2411_v45 = vsel %vm1355_vm7, %v2406_v36, %v2410_v32  ;;  %v4580_v46 = vpack.c.bf16 %v498_v53, %v498_v53  ;;  %352 = vst [vmem:[#allocation2 + $0xbc] sm:$0x1] %v351_v2  ;;  %v4886_v47 = vld [vmem:[#allocation2 + $0x60] sm:$0xff]   ;;  %v2727_v50 = vsel %vm1789_vm6, %v2725_v4, %v2726_v38 }
 0x10a   : > { %2039 = vrot.lane.b32.xlu0 %v4850_v51, %s4923_s30  ;;  %299 = vst [vmem:[#allocation2 + $0xc0] sm:$0x1] %v298_v44  ;;  %v838_v48 = vshrl.u32 %v4579_v60, 16  ;;  %v841_v58 = vshll.u32 %v4579_v60, 16  ;;  %v354_v43 = vsel %vm4985_vm5, 0, %v353_v41  ;;  %v4891_v49 = vld [vmem:[#allocation2 + $0x6c] sm:$0xff]   ;;  %v429_v57 = vmul.f32 %v5503_v55, %v390_v33 }
 0x10b   : > { %1574 = vrot.lane.b32.xlu1 %v1523_v18, %s4922_s29  ;;  %v2750_v10 = vpop.permute.xlu0 %2749  ;;  %v1020_v51 = vld [vmem:[#allocation2 + $0xb4] sm:$0xf]  ;;  %v499_v59 = vmax.f32 %v5654_v30, 0.0  ;;  %355 = vst [vmem:[#allocation2 + $0xc8] sm:$0x1] %v354_v43  ;;  %1171 = vst.msk [vmem:[#allocation3 + $0x40] sm:$0xff] %vm1162_vm11, %v4886_v47 }
 0x10c   : > { %2792 = vst.msk [vmem:[#allocation3 + $0x30] sm:$0xff] %vm2785_vm1, %v2750_v10  ;;  %v300_v56 = vld [vmem:[#allocation2 + $0xcc] sm:$0x1]  ;;  %v840_v62 = vrot.slane %v838_v48, 7  ;;  %v846_v5 = vshrl.u32 %v4580_v46, 16  ;;  %v849_v20 = vshll.u32 %v4580_v46, 16  ;;  %v468_v8 = vadd.f32 %v5516_v22, %v429_v57 }
 0x10d   : > { %1172 = vst.msk [vmem:[#allocation3 + $0x48] sm:$0xff] %vm1162_vm11, %v4891_v49  ;;  %v301_v14 = vsel %vm4975_vm3, 0, %v300_v56  ;;  %v2463_v18 = vpop.permute.xlu1 %2462  ;;  %v4581_v34 = vpack.c.bf16 %v499_v59, %v499_v59  ;;  %vm6017_vm8 = vcmask 261344   ;;  %vm6018_vm4 = vcmask 294144  }
 0x10e   : > { %2472 = vrot.lane.b32.xlu0 %v2411_v45, %s4927_s9  ;;  %302 = vst [vmem:[#allocation2 + $0xcc] sm:$0x1] %v301_v14  ;;  %v4851_v61 = vld [vmem:[#allocation2 + $0xa8] sm:$0xff]   ;;  %v843_v55 = vor.u32 %v841_v58, %v840_v62  ;;  %v844_v54 = vrot.slane %v840_v62, 4  ;;  %v848_v25 = vrot.slane %v846_v5, 7  ;;  %2504 = vst.msk [vmem:[#allocation3 + $0x38] sm:$0xff] %vm2496_vm15, %v2463_v18 }
 0x10f   : > { %1864 = vrot.lane.b32.xlu1 %v1831_v27, %s4921_s28  ;;  %v2928_v52 = vpop.permute.xlu0 %2927  ;;  %v4854_v63 = vld [vmem:[#allocation2 + $0xa8] sm:$0xff]   ;;  %v4855_v37 = vld [vmem:[#allocation2 + $0xb0] ss:$0 sps:$4 sm:$0x11]   ;;  %v500_v28 = vmax.f32 %v468_v8, 0.0  ;;  %v855_v45 = vshrl.u32 %v4581_v34, 16  ;;  %vm6019_vm13 = vmmov %vm6017_vm8 }
 0x110   : > { %2970 = vst.msk [vmem:[#allocation3 + $0x30] sm:$0xff] %vm2963_vm2, %v2928_v52  ;;  %v4859_v0 = vld [vmem:[#allocation2 + $0xa8] sm:$0xfe]   ;;  %v1021_v3 = vsel %vm5052_vm9, %v843_v55, %v1020_v51  ;;  %v2413_v11 = vshrl.u32 %v4854_v63, 16  ;;  %v2415_v12 = vshll.u32 %v4854_v63, 16  ;;  %v2420_v15 = vshll.u32 %v4855_v37, 16 }
 0x111   : > { %v4860_v16 = vld [vmem:[#allocation2 + $0xb0] ss:$0 sps:$4 sm:$0x11]   ;;  %1022 = vst [vmem:[#allocation2 + $0xb4] sm:$0xf] %v1021_v3  ;;  %v2728_v19 = vrot.slane %v4859_v0, 1  ;;  %v851_v30 = vor.u32 %v849_v20, %v848_v25  ;;  %v2752_v4 = vpop.permute.xlu1 %2751  ;;  %v5703_v49 = vpack.c.bf16 %v500_v28, %v500_v28 }
 0x112   : > { %2761 = vrot.lane.b32.xlu0 %v2727_v50, %s4925_s7  ;;  %v4862_v7 = vld [vmem:[#allocation2 + $0xa8] sm:$0xff]   ;;  %v2417_v13 = vrot.slane %v2415_v12, 1  ;;  %v2422_v23 = vrot.slane %v2420_v15, 1  ;;  %v2729_v24 = vrot.slane %v4860_v16, 1  ;;  %v853_v32 = vrot.slane %v848_v25, 4  ;;  %2793 = vst.msk [vmem:[#allocation3 + $0x38] sm:$0xff] %vm2785_vm1, %v2752_v4 }
 0x113   : > { %2041 = vrot.lane.b32.xlu1 %v4851_v61, %s4923_s30  ;;  %v4864_v26 = vld [vmem:[#allocation2 + $0xa8] sm:$0xff]   ;;  %v4865_v31 = vld [vmem:[#allocation2 + $0xb0] ss:$0 sps:$4 sm:$0x11]   ;;  %v1024_v21 = vld [vmem:[#allocation2 + $0xbc] sm:$0x1]  ;;  %v852_v53 = vsel %vm5060_vm10, %v844_v54, %v851_v30 }
 0x114   : > { %v2418_v22 = vor.u32 %v2417_v13, %v2413_v11  ;;  %v3301_v35 = vshrl.u32 %v4864_v26, 16  ;;  %v3303_v36 = vshll.u32 %v4864_v26, 16  ;;  %v3308_v40 = vshll.u32 %v4865_v31, 16  ;;  %v4868_v10 = vld [vmem:[#allocation2 + $0xa8] sm:$0xfe]  }
 0x115   : > { %v1025_v39 = vsel %vm4975_vm3, %v853_v32, %v1024_v21  ;;  %v4870_v42 = vld [vmem:[#allocation2 + $0xa8] sm:$0xff]   ;;  %1023 = vst.msk [vmem:[#allocation2 + $0xb8] sm:$0xf] %vm237_vm0, %v852_v53  ;;  %v2730_v2 = vsel %vm1789_vm6, %v2728_v19, %v2729_v24  ;;  %v4869_v33 = vld [vmem:[#allocation2 + $0xb0] ss:$0 sps:$4 sm:$0x11]   ;;  %v2930_v47 = vpop.permute.xlu1 %2929 }
 0x116   : > { %2939 = vrot.lane.b32.xlu0 %v4862_v7, %s4924_s6  ;;  %v2423_v38 = vsel %vm1355_vm7, %v2418_v22, %v2422_v23  ;;  %v3305_v27 = vrot.slane %v3303_v36, 1  ;;  %1026 = vst [vmem:[#allocation2 + $0xbc] sm:$0x1] %v1025_v39  ;;  %v3310_v44 = vrot.slane %v3308_v40, 1  ;;  %v3625_v41 = vrot.slane %v4868_v10, 1  ;;  %2971 = vst.msk [vmem:[#allocation3 + $0x38] sm:$0xff] %vm2963_vm2, %v2930_v47 }
 0x117   : > { %v3361_v29 = vpop.permute.xlu0 %3360  ;;  %2474 = vrot.lane.b32.xlu1 %v2423_v38, %s4927_s9  ;;  %v3626_v48 = vrot.slane %v4869_v33, 1  ;;  %v4871_v58 = vld [vmem:[#allocation2 + $0xb0] ss:$0 sps:$4 sm:$0x11]   ;;  %v1527_v43 = vshll.u32 %v4870_v42, 16  ;;  %v5708_v52 = vrot.slane %v855_v45, 7 }
 0x118   : > { %3403 = vst.msk [vmem:[#allocation3 + $0x30] sm:$0xff] %vm6017_vm8, %v3361_v29  ;;  %v3306_v46 = vor.u32 %v3305_v27, %v3301_v35  ;;  %v858_v57 = vshll.u32 %v4581_v34, 16  ;;  %v1525_v56 = vshrl.u32 %v4870_v42, 16  ;;  %v1532_v5 = vshll.u32 %v4871_v58, 16  ;;  %v4876_v61 = vld [vmem:[#allocation2 + $0xa8] sm:$0xfe]   ;;  %vm6020_vm8 = vmmov %vm6018_vm4 }
 0x119   : > { %v3627_v59 = vsel %vm1789_vm6, %v3625_v41, %v3626_v48  ;;  %v1529_v62 = vrot.slane %v1527_v43, 1  ;;  %v4877_v55 = vld [vmem:[#allocation2 + $0xb0] ss:$0 sps:$4 sm:$0x11]   ;;  %v863_v54 = vshrl.u32 %v5703_v49, 16  ;;  %v1832_v30 = vrot.slane %v4876_v61, 1 }
 0x11a   : > { %v3311_v50 = vsel %vm1355_vm7, %v3306_v46, %v3310_v44  ;;  %v860_v18 = vor.u32 %v858_v57, %v5708_v52  ;;  %v1534_v29 = vrot.slane %v1532_v5, 1  ;;  %v1833_v31 = vrot.slane %v4877_v55, 1  ;;  %v1027_v33 = vld [vmem:[#allocation2 + $0xc0] sm:$0xf] }
 0x11b   : > { %v3650_v60 = vpop.permute.xlu0 %3649  ;;  %2763 = vrot.lane.b32.xlu1 %v2730_v2, %s4925_s7  ;;  %3372 = vrot.lane.b32.xlu0 %v3311_v50, %s4928_s10  ;;  %v3363_v20 = vpop.permute.xlu1 %3362  ;;  %v1530_v24 = vor.u32 %v1529_v62, %v1525_v56  ;;  %v861_v10 = vrot.slane %v5708_v52, 4  ;;  %v865_v42 = vrot.slane %v863_v54, 7  ;;  %v866_v44 = vshll.u32 %v5703_v49, 16  ;;  %v1031_v52 = vld [vmem:[#allocation2 + $0xc8] sm:$0x1] }
 0x11c   : > { %3692 = vst.msk [vmem:[#allocation3 + $0x30] sm:$0xff] %vm6018_vm4, %v3650_v60  ;;  %v4863_v14 = vld [vmem:[#allocation2 + $0xb4] sm:$0xff]   ;;  %vm6021_vm4 = vcmask 64544   ;;  %v1834_v39 = vsel %vm1789_vm6, %v1832_v30, %v1833_v31  ;;  %v1028_v48 = vsel %vm5052_vm9, %v860_v18, %v1027_v33  ;;  %v4905_v33 = vld [vmem:[#allocation2 + $0x9c] sm:$0xff]  }
 0x11d   : > { %3404 = vst.msk [vmem:[#allocation3 + $0x38] sm:$0xff] %vm6019_vm13, %v3363_v20  ;;  %v4866_v63 = vld [vmem:[#allocation2 + $0xb4] sm:$0xff]   ;;  %v4867_v37 = vld [vmem:[#allocation2 + $0xbc] ss:$0 sps:$4 sm:$0x11]   ;;  %vm6022_vm13 = vcmask 97344   ;;  %v1535_v46 = vsel %vm1355_vm7, %v1530_v24, %v1534_v29  ;;  %v868_v43 = vor.u32 %v866_v44, %v865_v42 }
 0x11e   : > { %v4872_v3 = vld [vmem:[#allocation2 + $0xb4] sm:$0xfe]   ;;  %v3313_v8 = vshrl.u32 %v4866_v63, 16  ;;  %v3315_v11 = vshll.u32 %v4866_v63, 16  ;;  %v3320_v12 = vshll.u32 %v4867_v37, 16  ;;  %v870_v57 = vrot.slane %v865_v42, 4 }
 0x11f   : > { %v3652_v51 = vpop.permute.xlu0 %3651  ;;  %2941 = vrot.lane.b32.xlu1 %v4863_v14, %s4924_s6  ;;  %3661 = vrot.lane.b32.xlu0 %v3627_v59, %s4926_s8  ;;  %v4873_v15 = vld [vmem:[#allocation2 + $0xbc] ss:$0 sps:$4 sm:$0x11]   ;;  %v1565_v16 = vpop.permute.xlu1 %1564  ;;  %v3628_v19 = vrot.slane %v4872_v3, 1  ;;  %v4874_v7 = vld [vmem:[#allocation2 + $0xb4] sm:$0xff]   ;;  %v869_v9 = vsel %vm5060_vm10, %v861_v10, %v868_v43  ;;  %1176 = vst.msk [vmem:[#allocation3 + $0x68] sm:$0xff] %vm1162_vm11, %v4905_v33 }
 0x120   : > { %3693 = vst.msk [vmem:[#allocation3 + $0x38] sm:$0xff] %vm6020_vm8, %v3652_v51  ;;  %v3317_v13 = vrot.slane %v3315_v11, 1  ;;  %v3322_v23 = vrot.slane %v3320_v12, 1  ;;  %v3629_v25 = vrot.slane %v4873_v15, 1  ;;  %v1539_v22 = vshll.u32 %v4874_v7, 16  ;;  %vm6023_vm8 = vmmov %vm6021_vm4  ;;  %v4880_v2 = vld [vmem:[#allocation2 + $0xb4] sm:$0xff]  }
 0x121   : > { %1605 = vst.msk [vmem:[#allocation3 + $0x40] sm:$0xff] %vm6021_vm4, %v1565_v16  ;;  %v4875_v26 = vld [vmem:[#allocation2 + $0xbc] ss:$0 sps:$4 sm:$0x11]   ;;  %v1537_v34 = vshrl.u32 %v4874_v7, 16  ;;  %v4882_v41 = vld [vmem:[#allocation2 + $0xb4] sm:$0xff]   ;;  %vm6024_vm4 = vmmov %vm6022_vm13  ;;  %v1032_v61 = vsel %vm4975_vm3, %v870_v57, %v1031_v52 }
 0x122   : > { %v3318_v32 = vor.u32 %v3317_v13, %v3313_v8  ;;  %v3630_v21 = vsel %vm1789_vm6, %v3628_v19, %v3629_v25  ;;  %v1544_v35 = vshll.u32 %v4875_v26, 16  ;;  %v1541_v4 = vrot.slane %v1539_v22, 1  ;;  %v4878_v38 = vld [vmem:[#allocation2 + $0xb4] sm:$0xfe]   ;;  %1029 = vst [vmem:[#allocation2 + $0xc0] sm:$0xf] %v1028_v48  ;;  %vm6029_vm10 = vmmov %vm6023_vm8 }
 0x123   : > { %3663 = vrot.lane.b32.xlu0 %v3630_v21, %s4926_s8  ;;  %v4879_v53 = vld [vmem:[#allocation2 + $0xbc] ss:$0 sps:$4 sm:$0x11]   ;;  %v1835_v60 = vrot.slane %v4878_v38, 1  ;;  %v2425_v51 = vshrl.u32 %v4882_v41, 16  ;;  %v2427_v49 = vshll.u32 %v4882_v41, 16 }
 0x124   : > { %v3323_v40 = vsel %vm1355_vm7, %v3318_v32, %v3322_v23  ;;  %v1546_v27 = vrot.slane %v1544_v35, 1  ;;  %v1542_v47 = vor.u32 %v1541_v4, %v1537_v34  ;;  %v4883_v50 = vld [vmem:[#allocation2 + $0xbc] ss:$0 sps:$4 sm:$0x11]   ;;  %v1836_v59 = vrot.slane %v4879_v53, 1  ;;  %v3708_v37 = vld [vmem:[#allocation3 + $0x30] sm:$0xff] }
 0x125   : > { %3374 = vrot.lane.b32.xlu1 %v3323_v40, %s4928_s10  ;;  %v2432_v56 = vshll.u32 %v4883_v50, 16  ;;  %v4887_v62 = vld [vmem:[#allocation2 + $0xb4] sm:$0xfe]   ;;  %1030 = vst.msk [vmem:[#allocation2 + $0xc4] sm:$0xf] %vm237_vm0, %v869_v9  ;;  %v2429_v14 = vrot.slane %v2427_v49, 1  ;;  %4620 = vmatprep.mubr.msk.bf16.mxu0 %vm3738_vm12, %v3708_v37 }
 0x126   : > { %v1547_v20 = vsel %vm1355_vm7, %v1542_v47, %v1546_v27  ;;  %v4888_v55 = vld [vmem:[#allocation2 + $0xbc] ss:$0 sps:$4 sm:$0x11]   ;;  %1033 = vst [vmem:[#allocation2 + $0xc8] sm:$0x1] %v1032_v61  ;;  %v2731_v17 = vrot.slane %v4887_v62, 1  ;;  %v1837_v19 = vsel %vm1789_vm6, %v1835_v60, %v1836_v59 }
 0x127   : > { %1866 = vrot.lane.b32.xlu0 %v1834_v39, %s4921_s28  ;;  %v2434_v63 = vrot.slane %v2432_v56, 1  ;;  %v2430_v3 = vor.u32 %v2429_v14, %v2425_v51  ;;  %v2732_v8 = vrot.slane %v4888_v55, 1  ;;  %v5748_v11 = vld [vmem:[#allocation2 + $0xcc] sm:$0xff]   ;;  %v4902_v16 = vld [vmem:[#allocation2 + $0x78] sm:$0xff]   ;;  %vm6025_vm0 = vcmask 261344  }
 0x128   : > { %v3709_v12 = vld [vmem:[#allocation3 + $0x38] sm:$0xff]  ;;  %1173 = vst.msk [vmem:[#allocation3 + $0x50] sm:$0xff] %vm1162_vm11, %v4902_v16  ;;  %v3337_v23 = vshrl.u32 %v5748_v11, 16  ;;  %v3339_v32 = vshll.u32 %v5748_v11, 16  ;;  %vm6026_vm3 = vcmask 294144   ;;  %v4906_v57 = vld [vmem:[#allocation2 + $0xa8] sm:$0xff]  }
 0x129   : > { %1576 = vrot.lane.b32.xlu1 %v1535_v46, %s4922_s29  ;;  %v2435_v7 = vsel %vm1355_vm7, %v2430_v3, %v2434_v63  ;;  %4621 = vmatmul.mubr.msk.bf16.gmra.mrb[12].mxu0 %vm3738_vm12, %v3709_v12  ;;  %v2733_v18 = vsel %vm1789_vm6, %v2731_v17, %v2732_v8  ;;  %v4904_v60 = vld [vmem:[#allocation2 + $0x90] sm:$0xff]   ;;  %1177 = vst.msk [vmem:[#allocation3 + $0x70] sm:$0xff] %vm1162_vm11, %v4906_v57  ;;  %vm6028_vm9 = vmmov %vm6026_vm3 }
 0x12a   : > { %1175 = vst.msk [vmem:[#allocation3 + $0x60] sm:$0xff] %vm1162_vm11, %v4904_v60  ;;  %v3341_v52 = vrot.slane %v3339_v32, 1  ;;  %v4907_v56 = vld [vmem:[#allocation2 + $0xb4] sm:$0xff]   ;;  %v4893_v62 = vld [vmem:[#allocation2 + $0xcc] sm:$0xff]  }
 0x12b   : > { %2043 = vrot.lane.b32.xlu0 %v4880_v2, %s4923_s30  ;;  %v4900_v14 = vld [vmem:[#allocation2 + $0xcc] sm:$0xfe]   ;;  %1178 = vst.msk [vmem:[#allocation3 + $0x78] sm:$0xff] %vm1162_vm11, %v4907_v56 }
 0x12c   : > { %v4881_v13 = vld [vmem:[#allocation2 + $0xc0] sm:$0xff]   ;;  %v3634_v8 = vrot.slane %v4900_v14, 1 }
 0x12d   : > { %v1855_v0 = vpop.permute.xlu0 %1854  ;;  %1578 = vrot.lane.b32.xlu1 %v1547_v20, %s4922_s29  ;;  %v4884_v24 = vld [vmem:[#allocation2 + $0xc0] sm:$0xff]   ;;  %v4885_v25 = vld [vmem:[#allocation2 + $0xc8] ss:$0 sps:$4 sm:$0x11]   ;;  %s5831_s29 = scalar_lea.vmem %s5992_s4, %s4549_s20  ;;  %s4253_s20 = sshll.u32 %s6051_s19, 1 }
 0x12e   : > { %1895 = vst.msk [vmem:[#allocation3 + $0x40] sm:$0xff] %vm6022_vm13, %v1855_v0  ;;  %v1567_v36 = vpop.permute.xlu1 %1566  ;;  %v356_v0 = vld [vmem:[#allocation2 + $0xd4] sm:$0x1]  ;;  %v4889_v26 = vld [vmem:[#allocation2 + $0xc0] sm:$0xfe]   ;;  %v2439_v29 = vshll.u32 %v4884_v24, 16  ;;  %vm6030_vm13 = vmmov %vm6024_vm4 }
 0x12f   : > { %1606 = vst.msk [vmem:[#allocation3 + $0x48] sm:$0xff] %vm6023_vm8, %v1567_v36  ;;  %v357_v1 = vsel %vm4985_vm5, 0, %v356_v0  ;;  %2476 = vrot.lane.b32.xlu0 %v2435_v7, %s4927_s9  ;;  %v2444_v22 = vshll.u32 %v4885_v25, 16  ;;  %v4890_v30 = vld [vmem:[#allocation2 + $0xc8] ss:$0 sps:$4 sm:$0x11]   ;;  %vm6027_vm5 = vmmov %vm6025_vm0 }
 0x130   : > { %358 = vst [vmem:[#allocation2 + $0xd4] sm:$0x1] %v357_v1  ;;  %v4892_v31 = vld [vmem:[#allocation2 + $0xc0] sm:$0xff]   ;;  %v2441_v34 = vrot.slane %v2439_v29, 1  ;;  %v2734_v36 = vrot.slane %v4889_v26, 1  ;;  %v2735_v38 = vrot.slane %v4890_v30, 1 }
 0x131   : > { %v2032_v28 = vpop.permute.xlu0 %2031  ;;  %1868 = vrot.lane.b32.xlu1 %v1837_v19, %s4921_s28  ;;  %v2446_v35 = vrot.slane %v2444_v22, 1  ;;  %v4894_v4 = vld [vmem:[#allocation2 + $0xc0] sm:$0xff]   ;;  %v4895_v53 = vld [vmem:[#allocation2 + $0xc8] ss:$0 sps:$4 sm:$0x11]  }
 0x132   : > { %2072 = vst.msk [vmem:[#allocation3 + $0x40] sm:$0xff] %vm2063_vm14, %v2032_v28  ;;  %v1857_v58 = vpop.permute.xlu1 %1856  ;;  %v2437_v28 = vshrl.u32 %v4884_v24, 16  ;;  %v3325_v10 = vshrl.u32 %v4894_v4, 16  ;;  %v3327_v42 = vshll.u32 %v4894_v4, 16  ;;  %v3332_v2 = vshll.u32 %v4895_v53, 16 }
 0x133   : > { %1896 = vst.msk [vmem:[#allocation3 + $0x48] sm:$0xff] %vm6024_vm4, %v1857_v58  ;;  %2765 = vrot.lane.b32.xlu0 %v2733_v18, %s4925_s7  ;;  %v4898_v47 = vld [vmem:[#allocation2 + $0xc0] sm:$0xfe]   ;;  %v4899_v58 = vld [vmem:[#allocation2 + $0xc8] ss:$0 sps:$4 sm:$0x11]   ;;  %v2736_v50 = vsel %vm1789_vm6, %v2734_v36, %v2735_v38 }
 0x134   : > { %v2442_v39 = vor.u32 %v2441_v34, %v2437_v28  ;;  %v3334_v48 = vrot.slane %v3332_v2, 1  ;;  %v3631_v49 = vrot.slane %v4898_v47, 1  ;;  %v3632_v59 = vrot.slane %v4899_v58, 1 }
 0x135   : > { %2045 = vrot.lane.b32.xlu1 %v4881_v13, %s4923_s30 }
 0x136   : > { %v2447_v41 = vsel %vm1355_vm7, %v2442_v39, %v2446_v35  ;;  %v3633_v63 = vsel %vm1789_vm6, %v3631_v49, %v3632_v59 }
 0x137   : > { %v2465_v45 = vpop.permute.xlu0 %2464  ;;  %2943 = vrot.lane.b32.xlu0 %v4892_v31, %s4924_s6  ;;  %v4897_v27 = vld [vmem:[#allocation2 + $0xd4] ss:$0 sps:$4 sm:$0x11]  }
 0x138   : > { %2505 = vst.msk [vmem:[#allocation3 + $0x40] sm:$0xff] %vm2496_vm15, %v2465_v45  ;;  %v3329_v45 = vrot.slane %v3327_v42, 1  ;;  %v3344_v46 = vshll.u32 %v4897_v27, 16  ;;  %v4901_v61 = vld [vmem:[#allocation2 + $0xd4] ss:$0 sps:$4 sm:$0x11]  }
 0x139   : > { %2478 = vrot.lane.b32.xlu1 %v2447_v41, %s4927_s9  ;;  %v3635_v1 = vrot.slane %v4901_v61, 1 }
 0x13a   : > { %v3330_v51 = vor.u32 %v3329_v45, %v3325_v10  ;;  %v3346_v20 = vrot.slane %v3344_v46, 1 }
 0x13b   : > { %v2754_v5 = vpop.permute.xlu0 %2753 }
 0x13c   : > { %v2034_v54 = vpop.permute.xlu1 %2033  ;;  %2794 = vst.msk [vmem:[#allocation3 + $0x40] sm:$0xff] %vm2785_vm1, %v2754_v5  ;;  %v3335_v5 = vsel %vm1355_vm7, %v3330_v51, %v3334_v48 }
 0x13d   : > { %2073 = vst.msk [vmem:[#allocation3 + $0x48] sm:$0xff] %vm2063_vm14, %v2034_v54  ;;  %2767 = vrot.lane.b32.xlu1 %v2736_v50, %s4925_s7  ;;  %3376 = vrot.lane.b32.xlu0 %v3335_v5, %s4928_s10  ;;  %v3342_v54 = vor.u32 %v3341_v52, %v3337_v23  ;;  %s235_s7 = scalar_lea.vmem %s5993_s5, %s4253_s20 }
 0x13f   : > { %v2932_v15 = vpop.permute.xlu0 %2931  ;;  %v3347_v3 = vsel %vm1355_vm7, %v3342_v54, %v3346_v20  ;;  %vm6031_vm7 = vmmov %vm6024_vm4 }
 0x140   : > { %2972 = vst.msk [vmem:[#allocation3 + $0x40] sm:$0xff] %vm2963_vm2, %v2932_v15  ;;  %v3636_v15 = vsel %vm1789_vm6, %v3634_v8, %v3635_v1  ;;  %vm6032_vm6 = vmmov %vm6025_vm0 }
 0x141   : > { %2945 = vrot.lane.b32.xlu1 %v4893_v62, %s4924_s6  ;;  %3665 = vrot.lane.b32.xlu0 %v3633_v63, %s4926_s8  ;;  %vm6033_vm4 = vmmov %vm6026_vm3 }
 0x145   : > { %v2467_v21 = vpop.permute.xlu1 %2466  ;;  %3378 = vrot.lane.b32.xlu1 %v3347_v3, %s4928_s10 }
 0x146   : > { %2506 = vst.msk [vmem:[#allocation3 + $0x48] sm:$0xff] %vm2496_vm15, %v2467_v21 }
 0x148   : > { %v3365_v40 = vpop.permute.xlu0 %3364 }
 0x149   : > { %3405 = vst.msk [vmem:[#allocation3 + $0x40] sm:$0xff] %vm6025_vm0, %v3365_v40  ;;  %v2756_v44 = vpop.permute.xlu1 %2755  ;;  %3667 = vrot.lane.b32.xlu1 %v3636_v15, %s4926_s8 }
 0x14a   : > { %2795 = vst.msk [vmem:[#allocation3 + $0x48] sm:$0xff] %vm2785_vm1, %v2756_v44 }
 0x14c   : > { %v3654_v43 = vpop.permute.xlu0 %3653 }
 0x14d   : > { %3694 = vst.msk [vmem:[#allocation3 + $0x40] sm:$0xff] %vm6026_vm3, %v3654_v43  ;;  %v2934_v9 = vpop.permute.xlu1 %2933 }
 0x14e   : > { %2973 = vst.msk [vmem:[#allocation3 + $0x48] sm:$0xff] %vm2963_vm2, %v2934_v9 }
 0x150   : > { %v3656_v55 = vpop.permute.xlu0 %3655 }
 0x151   : > { %v3367_v17 = vpop.permute.xlu1 %3366 }
 0x152   : > { %3406 = vst.msk [vmem:[#allocation3 + $0x48] sm:$0xff] %vm6027_vm5, %v3367_v17  ;;  %vm6034_vm5 = vmmov %vm6023_vm8 }
 0x153   : > { %3695 = vst.msk [vmem:[#allocation3 + $0x48] sm:$0xff] %vm6028_vm9, %v3656_v55  ;;  %vm6035_vm9 = vmmov %vm6031_vm7 }
 0x154   : > { %v1859_v37 = vpop.permute.xlu0 %1858  ;;  %v3710_v0 = vld [vmem:[#allocation3 + $0x40] sm:$0xff] }
 0x155   : > { %4624 = vmatprep.mubr.msk.bf16.mxu1 %vm3738_vm12, %v3710_v0  ;;  %v1569_v11 = vpop.permute.xlu1 %1568 }
 0x156   : > { %1607 = vst.msk [vmem:[#allocation3 + $0x50] sm:$0xff] %vm6029_vm10, %v1569_v11  ;;  %vm6036_vm10 = vmmov %vm6034_vm5 }
 0x157   : > { %1897 = vst.msk [vmem:[#allocation3 + $0x50] sm:$0xff] %vm6030_vm13, %v1859_v37  ;;  %vm6037_vm13 = vmmov %vm6031_vm7 }
 0x158   : > { %v2036_v12 = vpop.permute.xlu0 %2035 }
 0x159   : > { %2074 = vst.msk [vmem:[#allocation3 + $0x50] sm:$0xff] %vm2063_vm14, %v2036_v12  ;;  %v1571_v16 = vpop.permute.xlu1 %1570 }
 0x15a   : > { %1608 = vst.msk [vmem:[#allocation3 + $0x58] sm:$0xff] %vm6023_vm8, %v1571_v16  ;;  %v3711_v19 = vld [vmem:[#allocation3 + $0x48] sm:$0xff]  ;;  %vm6038_vm8 = vmmov %vm6025_vm0 }
 0x15b   : > { %4625 = vmatmul.mubr.msk.bf16.vlgmr.msra.gmra.mrb[0].mxu1 %vm3738_vm12, %v3711_v19 }
 0x15c   : > { %v2469_v7 = vpop.permute.xlu0 %2468 }
 0x15d   : > { %v1861_v6 = vpop.permute.xlu1 %1860  ;;  %2507 = vst.msk [vmem:[#allocation3 + $0x50] sm:$0xff] %vm2496_vm15, %v2469_v7 }
 0x15e   : > { %1898 = vst.msk [vmem:[#allocation3 + $0x58] sm:$0xff] %vm6031_vm7, %v1861_v6  ;;  %vm6039_vm7 = vmmov %vm6026_vm3 }
 0x160   : > { %v2758_v18 = vpop.permute.xlu0 %2757 }
 0x161   : > { %2796 = vst.msk [vmem:[#allocation3 + $0x50] sm:$0xff] %vm2785_vm1, %v2758_v18  ;;  %v2038_v13 = vpop.permute.xlu1 %2037 }
 0x162   : > { %2075 = vst.msk [vmem:[#allocation3 + $0x58] sm:$0xff] %vm2063_vm14, %v2038_v13 }
 0x164   : > { %v2936_v23 = vpop.permute.xlu0 %2935 }
 0x165   : > { %2974 = vst.msk [vmem:[#allocation3 + $0x50] sm:$0xff] %vm2963_vm2, %v2936_v23 }
 0x169   : > { %v2471_v24 = vpop.permute.xlu1 %2470 }
 0x16a   : > { %2508 = vst.msk [vmem:[#allocation3 + $0x58] sm:$0xff] %vm2496_vm15, %v2471_v24 }
 0x16c   : > { %v3369_v26 = vpop.permute.xlu0 %3368 }
 0x16d   : > { %v2760_v25 = vpop.permute.xlu1 %2759  ;;  %3407 = vst.msk [vmem:[#allocation3 + $0x50] sm:$0xff] %vm6032_vm6, %v3369_v26  ;;  %vm6040_vm6 = vmmov %vm6025_vm0 }
 0x16e   : > { %2797 = vst.msk [vmem:[#allocation3 + $0x58] sm:$0xff] %vm2785_vm1, %v2760_v25 }
 0x170   : > { %v3658_v29 = vpop.permute.xlu0 %3657 }
 0x171   : > { %v2938_v28 = vpop.permute.xlu1 %2937  ;;  %3696 = vst.msk [vmem:[#allocation3 + $0x50] sm:$0xff] %vm6033_vm4, %v3658_v29  ;;  %vm6041_vm4 = vmmov %vm6026_vm3 }
 0x172   : > { %2975 = vst.msk [vmem:[#allocation3 + $0x58] sm:$0xff] %vm2963_vm2, %v2938_v28 }
 0x174   : > { %v3660_v22 = vpop.permute.xlu0 %3659 }
 0x175   : > { %v3371_v30 = vpop.permute.xlu1 %3370 }
 0x176   : > { %3408 = vst.msk [vmem:[#allocation3 + $0x58] sm:$0xff] %vm6025_vm0, %v3371_v30  ;;  %vm6042_vm0 = vmmov %vm6034_vm5 }
 0x177   : > { %3697 = vst.msk [vmem:[#allocation3 + $0x58] sm:$0xff] %vm6026_vm3, %v3660_v22  ;;  %vm6043_vm3 = vmmov %vm6035_vm9 }
 0x178   : > { %v3712_v31 = vld [vmem:[#allocation3 + $0x50] sm:$0xff]  ;;  %v1863_v32 = vpop.permute.xlu0 %1862 }
 0x179   : > { %4628 = vmatprep.mubr.msk.bf16.mxu1 %vm3738_vm12, %v3712_v31  ;;  %v1573_v21 = vpop.permute.xlu1 %1572 }
 0x17a   : > { %1609 = vst.msk [vmem:[#allocation3 + $0x60] sm:$0xff] %vm6034_vm5, %v1573_v21  ;;  %vm6044_vm5 = vmmov %vm6042_vm0 }
 0x17b   : > { %1899 = vst.msk [vmem:[#allocation3 + $0x60] sm:$0xff] %vm6035_vm9, %v1863_v32  ;;  %vm6045_vm9 = vmmov %vm6043_vm3 }
 0x17c   : > { %v2040_v34 = vpop.permute.xlu0 %2039 }
 0x17d   : > { %2076 = vst.msk [vmem:[#allocation3 + $0x60] sm:$0xff] %vm2063_vm14, %v2040_v34  ;;  %v1575_v35 = vpop.permute.xlu1 %1574 }
 0x17e   : > { %1610 = vst.msk [vmem:[#allocation3 + $0x68] sm:$0xff] %vm6036_vm10, %v1575_v35  ;;  %v3713_v36 = vld [vmem:[#allocation3 + $0x58] sm:$0xff]  ;;  %vm6049_vm10 = vmmov %vm6041_vm4 }
 0x17f   : > { %4629 = vmatmul.mubr.msk.bf16.gmra.mrb[4].mxu1 %vm3738_vm12, %v3713_v36 }
 0x180   : > { %v2473_v4 = vpop.permute.xlu0 %2472 }
 0x181   : > { %v1865_v38 = vpop.permute.xlu1 %1864  ;;  %2509 = vst.msk [vmem:[#allocation3 + $0x60] sm:$0xff] %vm2496_vm15, %v2473_v4 }
 0x182   : > { %1900 = vst.msk [vmem:[#allocation3 + $0x68] sm:$0xff] %vm6037_vm13, %v1865_v38 }
 0x184   : > { %v2762_v53 = vpop.permute.xlu0 %2761 }
 0x185   : > { %2798 = vst.msk [vmem:[#allocation3 + $0x60] sm:$0xff] %vm2785_vm1, %v2762_v53  ;;  %v2042_v40 = vpop.permute.xlu1 %2041 }
 0x186   : > { %2077 = vst.msk [vmem:[#allocation3 + $0x68] sm:$0xff] %vm2063_vm14, %v2042_v40 }
 0x188   : > { %v2940_v39 = vpop.permute.xlu0 %2939 }
 0x189   : > { %2976 = vst.msk [vmem:[#allocation3 + $0x60] sm:$0xff] %vm2963_vm2, %v2940_v39  ;;  %v2475_v10 = vpop.permute.xlu1 %2474 }
 0x18a   : > { %2510 = vst.msk [vmem:[#allocation3 + $0x68] sm:$0xff] %vm2496_vm15, %v2475_v10 }
 0x18d   : > { %v2764_v42 = vpop.permute.xlu1 %2763  ;;  %v3373_v27 = vpop.permute.xlu0 %3372 }
 0x18e   : > { %2799 = vst.msk [vmem:[#allocation3 + $0x68] sm:$0xff] %vm2785_vm1, %v2764_v42 }
 0x18f   : > { %3409 = vst.msk [vmem:[#allocation3 + $0x60] sm:$0xff] %vm6038_vm8, %v3373_v27 }
 0x191   : > { %v2942_v60 = vpop.permute.xlu1 %2941  ;;  %v3662_v2 = vpop.permute.xlu0 %3661 }
 0x192   : > { %2977 = vst.msk [vmem:[#allocation3 + $0x68] sm:$0xff] %vm2963_vm2, %v2942_v60 }
 0x193   : > { %3698 = vst.msk [vmem:[#allocation3 + $0x60] sm:$0xff] %vm6039_vm7, %v3662_v2 }
 0x195   : > { %v3664_v44 = vpop.permute.xlu0 %3663 }
 0x197   : > { %v3375_v33 = vpop.permute.xlu1 %3374 }
 0x198   : > { %3410 = vst.msk [vmem:[#allocation3 + $0x68] sm:$0xff] %vm6040_vm6, %v3375_v33 }
 0x199   : > { %3699 = vst.msk [vmem:[#allocation3 + $0x68] sm:$0xff] %vm6041_vm4, %v3664_v44  ;;  %v1867_v45 = vpop.permute.xlu0 %1866 }
 0x19a   : > { %v3714_v41 = vld [vmem:[#allocation3 + $0x60] sm:$0xff] }
 0x19b   : > { %4632 = vmatprep.mubr.msk.bf16.mxu1 %vm3738_vm12, %v3714_v41  ;;  %v1577_v47 = vpop.permute.xlu1 %1576 }
 0x19c   : > { %1611 = vst.msk [vmem:[#allocation3 + $0x70] sm:$0xff] %vm6042_vm0, %v1577_v47 }
 0x19d   : > { %1901 = vst.msk [vmem:[#allocation3 + $0x70] sm:$0xff] %vm6043_vm3, %v1867_v45  ;;  %v2044_v50 = vpop.permute.xlu0 %2043 }
 0x19e   : > { %2078 = vst.msk [vmem:[#allocation3 + $0x70] sm:$0xff] %vm2063_vm14, %v2044_v50 }
 0x19f   : > { %v1579_v9 = vpop.permute.xlu1 %1578 }
 0x1a0   : > { %1612 = vst.msk [vmem:[#allocation3 + $0x78] sm:$0xff] %vm6044_vm5, %v1579_v9  ;;  %v3715_v62 = vld [vmem:[#allocation3 + $0x68] sm:$0xff] }
 0x1a1   : > { %4633 = vmatmul.mubr.msk.bf16.gmra.mrb[8].mxu1 %vm3738_vm12, %v3715_v62  ;;  %v2477_v55 = vpop.permute.xlu0 %2476 }
 0x1a2   : > { %2511 = vst.msk [vmem:[#allocation3 + $0x70] sm:$0xff] %vm2496_vm15, %v2477_v55 }
 0x1a3   : > { %v1869_v0 = vpop.permute.xlu1 %1868 }
 0x1a4   : > { %1902 = vst.msk [vmem:[#allocation3 + $0x78] sm:$0xff] %vm6045_vm9, %v1869_v0 }
 0x1a5   : > { %v2766_v11 = vpop.permute.xlu0 %2765 }
 0x1a6   : > { %2800 = vst.msk [vmem:[#allocation3 + $0x70] sm:$0xff] %vm2785_vm1, %v2766_v11 }
 0x1a7   : > { %v4610_v46 = vpop.f32.mrb[0].mxu0  ;;  %v2046_v15 = vpop.permute.xlu1 %2045 }
 0x1a8   : > { %3954 = vst.msk [vmem:[%s5831_s29 + $0x10] sm:$0xff] %vm1162_vm11, %v4610_v46  ;;  %v3825_v48 = vpop.f32.mrb[1].mxu0  ;;  %v4055_v52 = vmul.f32 %v4610_v46, %v4610_v46  ;;  %v3987_v5 = vsel %vm1162_vm11, %v4610_v46, 0.0 }
 0x1a9   : > { %3952 = vst.msk [vmem:[%s5831_s29] sm:$0xff] %vm1162_vm11, %v3825_v48  ;;  %v4053_v58 = vmul.f32 %v3825_v48, %v3825_v48  ;;  %v4611_v43 = vpop.f32.mrb[2].mxu0  ;;  %v3984_v49 = vsel %vm1162_vm11, %v3825_v48, 0.0  ;;  %v2944_v16 = vpop.permute.xlu0 %2943 }
 0x1aa   : > { %3955 = vst.msk [vmem:[%s5831_s29 + $0x18] sm:$0xff] %vm1162_vm11, %v4611_v43  ;;  %v3828_v51 = vpop.f32.mrb[3].mxu0  ;;  %v4056_v14 = vmul.f32 %v4611_v43, %v4611_v43  ;;  %v4088_v17 = vsel %vm1162_vm11, %v4055_v52, 0.0  ;;  %v3989_v37 = vsel %vm1162_vm11, %v4611_v43, 0.0 }
 0x1ab   : > { %3953 = vst.msk [vmem:[%s5831_s29 + $0x8] sm:$0xff] %vm1162_vm11, %v3828_v51  ;;  %v3985_v57 = vsel %vm1162_vm11, %v3828_v51, 0.0  ;;  %v4054_v59 = vmul.f32 %v3828_v51, %v3828_v51  ;;  %v4085_v20 = vsel %vm1162_vm11, %v4053_v58, 0.0  ;;  %v2479_v7 = vpop.permute.xlu1 %2478 }
 0x1ac   : > { %v3986_v56 = vadd.f32 %v3985_v57, %v3984_v49  ;;  %v4090_v1 = vsel %vm1162_vm11, %v4056_v14, 0.0  ;;  %2079 = vst.msk [vmem:[#allocation3 + $0x78] sm:$0xff] %vm2063_vm14, %v2046_v15  ;;  %vm6046_vm14 = vmmov %vm6040_vm6 }
 0x1ad   : > { %v4086_v61 = vsel %vm1162_vm11, %v4054_v59, 0.0  ;;  %2978 = vst.msk [vmem:[#allocation3 + $0x70] sm:$0xff] %vm2963_vm2, %v2944_v16 }
 0x1ae   : > { %v3988_v54 = vadd.f32 %v3987_v5, %v3986_v56  ;;  %v4087_v63 = vadd.f32 %v4086_v61, %v4085_v20  ;;  %2512 = vst.msk [vmem:[#allocation3 + $0x78] sm:$0xff] %vm2496_vm15, %v2479_v7  ;;  %vm6047_vm15 = vmmov %vm6041_vm4 }
 0x1af   : > { %v2768_v30 = vpop.permute.xlu1 %2767  ;;  %v3377_v31 = vpop.permute.xlu0 %3376 }
 0x1b0   : > { %v4089_v3 = vadd.f32 %v4088_v17, %v4087_v63  ;;  %v3990_v8 = vadd.f32 %v3989_v37, %v3988_v54  ;;  %2801 = vst.msk [vmem:[#allocation3 + $0x78] sm:$0xff] %vm2785_vm1, %v2768_v30  ;;  %vm6048_vm1 = vmmov %vm6040_vm6 }
 0x1b1   : > { %3411 = vst.msk [vmem:[#allocation3 + $0x70] sm:$0xff] %vm6046_vm14, %v3377_v31 }
 0x1b2   : > { %v4091_v12 = vadd.f32 %v4090_v1, %v4089_v3 }
 0x1b3   : > { %v2946_v39 = vpop.permute.xlu1 %2945  ;;  %v3666_v10 = vpop.permute.xlu0 %3665 }
 0x1b4   : > { %2979 = vst.msk [vmem:[#allocation3 + $0x78] sm:$0xff] %vm2963_vm2, %v2946_v39 }
 0x1b5   : > { %3700 = vst.msk [vmem:[#allocation3 + $0x70] sm:$0xff] %vm6047_vm15, %v3666_v10 }
 0x1b7   : > { %v3379_v44 = vpop.permute.xlu1 %3378 }
 0x1b8   : > { %v4614_v19 = vpop.f32.mrb[4].mxu0  ;;  %3412 = vst.msk [vmem:[#allocation3 + $0x78] sm:$0xff] %vm6048_vm1, %v3379_v44 }
 0x1b9   : > { %3958 = vst.msk [vmem:[%s5831_s29 + $0x30] sm:$0xff] %vm1162_vm11, %v4614_v19  ;;  %v3841_v6 = vpop.f32.mrb[5].mxu0  ;;  %v4059_v26 = vmul.f32 %v4614_v19, %v4614_v19  ;;  %v3995_v34 = vsel %vm1162_vm11, %v4614_v19, 0.0 }
 0x1ba   : > { %3956 = vst.msk [vmem:[%s5831_s29 + $0x20] sm:$0xff] %vm1162_vm11, %v3841_v6  ;;  %v3991_v18 = vsel %vm1162_vm11, %v3841_v6, 0.0  ;;  %v4057_v13 = vmul.f32 %v3841_v6, %v3841_v6  ;;  %v4615_v23 = vpop.f32.mrb[6].mxu0 }
 0x1bb   : > { %v3992_v24 = vadd.f32 %v3991_v18, %v3990_v8  ;;  %3959 = vst.msk [vmem:[%s5831_s29 + $0x38] sm:$0xff] %vm1162_vm11, %v4615_v23  ;;  %v3844_v25 = vpop.f32.mrb[7].mxu0  ;;  %v4060_v35 = vmul.f32 %v4615_v23, %v4615_v23  ;;  %v4096_v53 = vsel %vm1162_vm11, %v4059_v26, 0.0  ;;  %v3997_v40 = vsel %vm1162_vm11, %v4615_v23, 0.0  ;;  %v3668_v33 = vpop.permute.xlu1 %3667 }
 0x1bc   : > { %v4092_v28 = vsel %vm1162_vm11, %v4057_v13, 0.0  ;;  %3957 = vst.msk [vmem:[%s5831_s29 + $0x28] sm:$0xff] %vm1162_vm11, %v3844_v25  ;;  %v3993_v29 = vsel %vm1162_vm11, %v3844_v25, 0.0  ;;  %v4058_v22 = vmul.f32 %v3844_v25, %v3844_v25  ;;  %v3716_v41 = vld [vmem:[#allocation3 + $0x70] sm:$0xff] }
 0x1bd   : > { %v4093_v32 = vadd.f32 %v4092_v28, %v4091_v12  ;;  %v3994_v21 = vadd.f32 %v3993_v29, %v3992_v24  ;;  %v4098_v60 = vsel %vm1162_vm11, %v4060_v35, 0.0  ;;  %3701 = vst.msk [vmem:[#allocation3 + $0x78] sm:$0xff] %vm6049_vm10, %v3668_v33  ;;  %4636 = vmatprep.mubr.msk.bf16.mxu1 %vm3738_vm12, %v3716_v41 }
 0x1be   : > { %v4094_v36 = vsel %vm1162_vm11, %v4058_v22, 0.0 }
 0x1bf   : > { %v3996_v4 = vadd.f32 %v3995_v34, %v3994_v21  ;;  %v4095_v38 = vadd.f32 %v4094_v36, %v4093_v32 }
 0x1c1   : > { %v4097_v42 = vadd.f32 %v4096_v53, %v4095_v38  ;;  %v3998_v27 = vadd.f32 %v3997_v40, %v3996_v4 }
 0x1c3   : > { %v4099_v2 = vadd.f32 %v4098_v60, %v4097_v42 }
 0x1c4   : > { %v3717_v45 = vld [vmem:[#allocation3 + $0x78] sm:$0xff] }
 0x1c5   : > { %4637 = vmatmul.mubr.msk.bf16.gmra.mrb[12].mxu1 %vm3738_vm12, %v3717_v45  ;;  %vm4154_vm12 = vcmask 1040384  }
 0x1db   : > { %v4618_v46 = vpop.f32.mrb[8].mxu0 }
 0x1dc   : > { %3962 = vst.msk [vmem:[%s5831_s29 + $0x50] sm:$0xff] %vm1162_vm11, %v4618_v46  ;;  %v3857_v47 = vpop.f32.mrb[9].mxu0  ;;  %v4063_v52 = vmul.f32 %v4618_v46, %v4618_v46  ;;  %v4003_v62 = vsel %vm1162_vm11, %v4618_v46, 0.0 }
 0x1dd   : > { %3960 = vst.msk [vmem:[%s5831_s29 + $0x40] sm:$0xff] %vm1162_vm11, %v3857_v47  ;;  %v3999_v48 = vsel %vm1162_vm11, %v3857_v47, 0.0  ;;  %v4061_v58 = vmul.f32 %v3857_v47, %v3857_v47  ;;  %v4619_v43 = vpop.f32.mrb[10].mxu0 }
 0x1de   : > { %v4000_v50 = vadd.f32 %v3999_v48, %v3998_v27  ;;  %3963 = vst.msk [vmem:[%s5831_s29 + $0x58] sm:$0xff] %vm1162_vm11, %v4619_v43  ;;  %v3860_v51 = vpop.f32.mrb[11].mxu0  ;;  %v4064_v5 = vmul.f32 %v4619_v43, %v4619_v43  ;;  %v4104_v55 = vsel %vm1162_vm11, %v4063_v52, 0.0  ;;  %v4005_v54 = vsel %vm1162_vm11, %v4619_v43, 0.0 }
 0x1df   : > { %v4100_v49 = vsel %vm1162_vm11, %v4061_v58, 0.0  ;;  %3961 = vst.msk [vmem:[%s5831_s29 + $0x48] sm:$0xff] %vm1162_vm11, %v3860_v51  ;;  %v4001_v57 = vsel %vm1162_vm11, %v3860_v51, 0.0  ;;  %v4062_v59 = vmul.f32 %v3860_v51, %v3860_v51 }
 0x1e0   : > { %v4101_v9 = vadd.f32 %v4100_v49, %v4099_v2  ;;  %v4002_v56 = vadd.f32 %v4001_v57, %v4000_v50  ;;  %v4106_v37 = vsel %vm1162_vm11, %v4064_v5, 0.0 }
 0x1e1   : > { %v4102_v20 = vsel %vm1162_vm11, %v4062_v59, 0.0 }
 0x1e2   : > { %v4004_v14 = vadd.f32 %v4003_v62, %v4002_v56  ;;  %v4103_v61 = vadd.f32 %v4102_v20, %v4101_v9 }
 0x1e4   : > { %v4105_v63 = vadd.f32 %v4104_v55, %v4103_v61  ;;  %v4006_v17 = vadd.f32 %v4005_v54, %v4004_v14 }
 0x1e6   : > { %v4107_v0 = vadd.f32 %v4106_v37, %v4105_v63 }
 0x1fc   : > { %v4622_v3 = vpop.f32.mrb[12].mxu0 }
 0x1fd   : > { %3966 = vst.msk [vmem:[%s5831_s29 + $0x70] sm:$0xff] %vm1162_vm11, %v4622_v3  ;;  %v3873_v8 = vpop.f32.mrb[13].mxu0  ;;  %v4067_v19 = vmul.f32 %v4622_v3, %v4622_v3  ;;  %v4011_v24 = vsel %vm1162_vm11, %v4622_v3, 0.0 }
 0x1fe   : > { %3964 = vst.msk [vmem:[%s5831_s29 + $0x60] sm:$0xff] %vm1162_vm11, %v3873_v8  ;;  %v4007_v1 = vsel %vm1162_vm11, %v3873_v8, 0.0  ;;  %v4065_v11 = vmul.f32 %v3873_v8, %v3873_v8  ;;  %v4623_v12 = vpop.f32.mrb[14].mxu0 }
 0x1ff   : > { %v4008_v15 = vadd.f32 %v4007_v1, %v4006_v17  ;;  %3967 = vst.msk [vmem:[%s5831_s29 + $0x78] sm:$0xff] %vm1162_vm11, %v4623_v12  ;;  %v3876_v16 = vpop.f32.mrb[15].mxu0  ;;  %v4068_v25 = vmul.f32 %v4623_v12, %v4623_v12  ;;  %v4112_v22 = vsel %vm1162_vm11, %v4067_v19, 0.0  ;;  %v4013_v30 = vsel %vm1162_vm11, %v4623_v12, 0.0 }
 0x200   : > { %v4108_v7 = vsel %vm1162_vm11, %v4065_v11, 0.0  ;;  %3965 = vst.msk [vmem:[%s5831_s29 + $0x68] sm:$0xff] %vm1162_vm11, %v3876_v16  ;;  %v4009_v6 = vsel %vm1162_vm11, %v3876_v16, 0.0  ;;  %v4066_v18 = vmul.f32 %v3876_v16, %v3876_v16 }
 0x201   : > { %v4109_v13 = vadd.f32 %v4108_v7, %v4107_v0  ;;  %v4010_v23 = vadd.f32 %v4009_v6, %v4008_v15  ;;  %v4114_v21 = vsel %vm1162_vm11, %v4068_v25, 0.0 }
 0x202   : > { %v4110_v26 = vsel %vm1162_vm11, %v4066_v18, 0.0 }
 0x203   : > { %v4012_v28 = vadd.f32 %v4011_v24, %v4010_v23  ;;  %v4111_v29 = vadd.f32 %v4110_v26, %v4109_v13 }
 0x205   : > { %v4113_v31 = vadd.f32 %v4112_v22, %v4111_v29  ;;  %v4014_v32 = vadd.f32 %v4013_v30, %v4012_v28 }
 0x207   : > { %v4115_v34 = vadd.f32 %v4114_v21, %v4113_v31 }
 0x22e   : > { %v4626_v35 = vpop.f32.mrb[0].mxu1 }
 0x22f   : > { %3970 = vst.msk [vmem:[%s5831_s29 + $0x90] sm:$0xff] %vm1162_vm11, %v4626_v35  ;;  %v3889_v36 = vpop.f32.mrb[1].mxu1  ;;  %v4071_v10 = vmul.f32 %v4626_v35, %v4626_v35  ;;  %v4019_v33 = vsel %vm1162_vm11, %v4626_v35, 0.0 }
 0x230   : > { %3968 = vst.msk [vmem:[%s5831_s29 + $0x80] sm:$0xff] %vm1162_vm11, %v3889_v36  ;;  %v4015_v4 = vsel %vm1162_vm11, %v3889_v36, 0.0  ;;  %v4069_v38 = vmul.f32 %v3889_v36, %v3889_v36  ;;  %v4627_v53 = vpop.f32.mrb[2].mxu1 }
 0x231   : > { %v4016_v40 = vadd.f32 %v4015_v4, %v4014_v32  ;;  %3971 = vst.msk [vmem:[%s5831_s29 + $0x98] sm:$0xff] %vm1162_vm11, %v4627_v53  ;;  %v3892_v39 = vpop.f32.mrb[3].mxu1  ;;  %v4072_v41 = vmul.f32 %v4627_v53, %v4627_v53  ;;  %v4120_v48 = vsel %vm1162_vm11, %v4071_v10, 0.0  ;;  %v4021_v58 = vsel %vm1162_vm11, %v4627_v53, 0.0 }
 0x232   : > { %v4116_v42 = vsel %vm1162_vm11, %v4069_v38, 0.0  ;;  %3969 = vst.msk [vmem:[%s5831_s29 + $0x88] sm:$0xff] %vm1162_vm11, %v3892_v39  ;;  %v4017_v27 = vsel %vm1162_vm11, %v3892_v39, 0.0  ;;  %v4070_v60 = vmul.f32 %v3892_v39, %v3892_v39 }
 0x233   : > { %v4117_v2 = vadd.f32 %v4116_v42, %v4115_v34  ;;  %v4018_v44 = vadd.f32 %v4017_v27, %v4016_v40  ;;  %v4122_v51 = vsel %vm1162_vm11, %v4072_v41, 0.0 }
 0x234   : > { %v4118_v45 = vsel %vm1162_vm11, %v4070_v60, 0.0 }
 0x235   : > { %v4020_v46 = vadd.f32 %v4019_v33, %v4018_v44  ;;  %v4119_v47 = vadd.f32 %v4118_v45, %v4117_v2 }
 0x237   : > { %v4121_v43 = vadd.f32 %v4120_v48, %v4119_v47  ;;  %v4022_v50 = vadd.f32 %v4021_v58, %v4020_v46 }
 0x239   : > { %v4123_v52 = vadd.f32 %v4122_v51, %v4121_v43 }
 0x252   : > { %v4630_v49 = vpop.f32.mrb[4].mxu1 }
 0x253   : > { %3974 = vst.msk [vmem:[%s5831_s29 + $0xb0] sm:$0xff] %vm1162_vm11, %v4630_v49  ;;  %v3905_v57 = vpop.f32.mrb[5].mxu1  ;;  %v4075_v20 = vmul.f32 %v4630_v49, %v4630_v49  ;;  %v4027_v17 = vsel %vm1162_vm11, %v4630_v49, 0.0 }
 0x254   : > { %3972 = vst.msk [vmem:[%s5831_s29 + $0xa0] sm:$0xff] %vm1162_vm11, %v3905_v57  ;;  %v4023_v59 = vsel %vm1162_vm11, %v3905_v57, 0.0  ;;  %v4073_v9 = vmul.f32 %v3905_v57, %v3905_v57  ;;  %v4631_v56 = vpop.f32.mrb[6].mxu1 }
 0x255   : > { %v4024_v62 = vadd.f32 %v4023_v59, %v4022_v50  ;;  %3975 = vst.msk [vmem:[%s5831_s29 + $0xb8] sm:$0xff] %vm1162_vm11, %v4631_v56  ;;  %v3908_v5 = vpop.f32.mrb[7].mxu1  ;;  %v4076_v37 = vmul.f32 %v4631_v56, %v4631_v56  ;;  %v4128_v1 = vsel %vm1162_vm11, %v4075_v20, 0.0  ;;  %v4029_v11 = vsel %vm1162_vm11, %v4631_v56, 0.0 }
 0x256   : > { %v4124_v14 = vsel %vm1162_vm11, %v4073_v9, 0.0  ;;  %3973 = vst.msk [vmem:[%s5831_s29 + $0xa8] sm:$0xff] %vm1162_vm11, %v3908_v5  ;;  %v4025_v61 = vsel %vm1162_vm11, %v3908_v5, 0.0  ;;  %v4074_v55 = vmul.f32 %v3908_v5, %v3908_v5 }
 0x257   : > { %v4125_v54 = vadd.f32 %v4124_v14, %v4123_v52  ;;  %v4026_v63 = vadd.f32 %v4025_v61, %v4024_v62  ;;  %v4130_v16 = vsel %vm1162_vm11, %v4076_v37, 0.0 }
 0x258   : > { %v4126_v0 = vsel %vm1162_vm11, %v4074_v55, 0.0 }
 0x259   : > { %v4028_v3 = vadd.f32 %v4027_v17, %v4026_v63  ;;  %v4127_v8 = vadd.f32 %v4126_v0, %v4125_v54 }
 0x25b   : > { %v4129_v12 = vadd.f32 %v4128_v1, %v4127_v8  ;;  %v4030_v15 = vadd.f32 %v4029_v11, %v4028_v3 }
 0x25d   : > { %v4131_v19 = vadd.f32 %v4130_v16, %v4129_v12 }
 0x274   : > { %v4634_v7 = vpop.f32.mrb[8].mxu1 }
 0x275   : > { %3978 = vst.msk [vmem:[%s5831_s29 + $0xd0] sm:$0xff] %vm1162_vm11, %v4634_v7  ;;  %v3921_v6 = vpop.f32.mrb[9].mxu1  ;;  %v4079_v26 = vmul.f32 %v4634_v7, %v4634_v7  ;;  %v4035_v32 = vsel %vm1162_vm11, %v4634_v7, 0.0 }
 0x276   : > { %3976 = vst.msk [vmem:[%s5831_s29 + $0xc0] sm:$0xff] %vm1162_vm11, %v3921_v6  ;;  %v4031_v18 = vsel %vm1162_vm11, %v3921_v6, 0.0  ;;  %v4077_v13 = vmul.f32 %v3921_v6, %v3921_v6  ;;  %v4635_v23 = vpop.f32.mrb[10].mxu1 }
 0x277   : > { %v4032_v24 = vadd.f32 %v4031_v18, %v4030_v15  ;;  %3979 = vst.msk [vmem:[%s5831_s29 + $0xd8] sm:$0xff] %vm1162_vm11, %v4635_v23  ;;  %v3924_v25 = vpop.f32.mrb[11].mxu1  ;;  %v4080_v21 = vmul.f32 %v4635_v23, %v4635_v23  ;;  %v4136_v4 = vsel %vm1162_vm11, %v4079_v26, 0.0  ;;  %v4037_v38 = vsel %vm1162_vm11, %v4635_v23, 0.0 }
 0x278   : > { %v4132_v28 = vsel %vm1162_vm11, %v4077_v13, 0.0  ;;  %3977 = vst.msk [vmem:[%s5831_s29 + $0xc8] sm:$0xff] %vm1162_vm11, %v3924_v25  ;;  %v4033_v29 = vsel %vm1162_vm11, %v3924_v25, 0.0  ;;  %v4078_v22 = vmul.f32 %v3924_v25, %v3924_v25 }
 0x279   : > { %v4133_v30 = vadd.f32 %v4132_v28, %v4131_v19  ;;  %v4034_v31 = vadd.f32 %v4033_v29, %v4032_v24  ;;  %v4138_v39 = vsel %vm1162_vm11, %v4080_v21, 0.0 }
 0x27a   : > { %v4134_v34 = vsel %vm1162_vm11, %v4078_v22, 0.0 }
 0x27b   : > { %v4036_v35 = vadd.f32 %v4035_v32, %v4034_v31  ;;  %v4135_v36 = vadd.f32 %v4134_v34, %v4133_v30 }
 0x27d   : > { %v4137_v53 = vadd.f32 %v4136_v4, %v4135_v36  ;;  %v4038_v40 = vadd.f32 %v4037_v38, %v4036_v35 }
 0x27f   : > { %v4139_v10 = vadd.f32 %v4138_v39, %v4137_v53 }
 0x298   : > { %v4638_v42 = vpop.f32.mrb[12].mxu1 }
 0x299   : > { %3982 = vst.msk [vmem:[%s5831_s29 + $0xf0] sm:$0xff] %vm1162_vm11, %v4638_v42  ;;  %v3937_v27 = vpop.f32.mrb[13].mxu1  ;;  %v4083_v45 = vmul.f32 %v4638_v42, %v4638_v42  ;;  %v4043_v50 = vsel %vm1162_vm11, %v4638_v42, 0.0 }
 0x29a   : > { %3980 = vst.msk [vmem:[%s5831_s29 + $0xe0] sm:$0xff] %vm1162_vm11, %v3937_v27  ;;  %v4039_v60 = vsel %vm1162_vm11, %v3937_v27, 0.0  ;;  %v4081_v2 = vmul.f32 %v3937_v27, %v3937_v27  ;;  %v4639_v44 = vpop.f32.mrb[14].mxu1 }
 0x29b   : > { %v4040_v33 = vadd.f32 %v4039_v60, %v4038_v40  ;;  %3983 = vst.msk [vmem:[%s5831_s29 + $0xf8] sm:$0xff] %vm1162_vm11, %v4639_v44  ;;  %v3940_v41 = vpop.f32.mrb[15].mxu1  ;;  %v4084_v51 = vmul.f32 %v4639_v44, %v4639_v44  ;;  %v4144_v59 = vsel %vm1162_vm11, %v4083_v45, 0.0  ;;  %v4045_v9 = vsel %vm1162_vm11, %v4639_v44, 0.0 }
 0x29c   : > { %v4140_v46 = vsel %vm1162_vm11, %v4081_v2, 0.0  ;;  %3981 = vst.msk [vmem:[%s5831_s29 + $0xe8] sm:$0xff] %vm1162_vm11, %v3940_v41  ;;  %v4041_v47 = vsel %vm1162_vm11, %v3940_v41, 0.0  ;;  %v4082_v48 = vmul.f32 %v3940_v41, %v3940_v41 }
 0x29d   : > { %v4141_v58 = vadd.f32 %v4140_v46, %v4139_v10  ;;  %v4042_v43 = vadd.f32 %v4041_v47, %v4040_v33  ;;  %v4146_v5 = vsel %vm1162_vm11, %v4084_v51, 0.0 }
 0x29e   : > { %v4142_v52 = vsel %vm1162_vm11, %v4082_v48, 0.0  ;;  %vm4156_vm11 = vcmask 25600  }
 0x29f   : > { %v4044_v49 = vadd.f32 %v4043_v50, %v4042_v43  ;;  %v4143_v57 = vadd.f32 %v4142_v52, %v4141_v58 }
 0x2a1   : > { %v4046_v56 = vadd.f32 %v4045_v9, %v4044_v49  ;;  %v4145_v62 = vadd.f32 %v4144_v59, %v4143_v57 }
 0x2a3   : > { %v4047_v20 = vrot.slane %v4046_v56, 4  ;;  %v4147_v14 = vadd.f32 %v4146_v5, %v4145_v62 }
 0x2a5   : > { %v4048_v61 = vadd.f32 %v4047_v20, %v4046_v56  ;;  %v4148_v55 = vrot.slane %v4147_v14, 4 }
 0x2a7   : > { %v4049_v54 = vrot.slane %v4048_v61, 2  ;;  %v4149_v63 = vadd.f32 %v4148_v55, %v4147_v14 }
 0x2a9   : > { %v4050_v17 = vadd.f32 %v4049_v54, %v4048_v61  ;;  %v4150_v37 = vrot.slane %v4149_v63, 2 }
 0x2ab   : > { %v4051_v0 = vrot.slane %v4050_v17, 1  ;;  %v4151_v3 = vadd.f32 %v4150_v37, %v4149_v63 }
 0x2ad   : > { %v4152_v8 = vrot.slane %v4151_v3, 1  ;;  %v4052_v1 = vadd.f32 %v4051_v0, %v4050_v17 }
 0x2af   : > { %v4153_v11 = vadd.f32 %v4152_v8, %v4151_v3 }
 0x2b1   : > { %v4155_v12 = vsel %vm4154_vm12, %v4052_v1, %v4153_v11 }
 0x2b2   : > { %4157 = vst.msk [vmem:[%s235_s7] sm:$0x3] %vm4156_vm11, %v4155_v12 }
 0x2b3 PF: > { %s16_s18 = sadd.s32 1, %s4918_s18  }
 0x2b4   : > { %p13_p4 = scmp.ge.s32.totalorder %s16_s18, 4  }
 0x2b6   :  { %15 = sbr.rel (!%p13_p4) target bundleno = 1 (0x1), region = 81 }

// kernel: residual_block_forward.3
= control target key start
LH: loop header
LB: loop body
LE: loop exit
PB: predicated region body
PF: predicated region fallthrough
CT: control target
= control target key end

     0   :  { %s4779_s12 = smov 0   ;;  %s5727_s0 = inlined_call_operand.vmem [shape: f32[2,16,16,4], index: 0, kind: input, shape index: {}]   ;;  %s5728_s1 = inlined_call_operand.vmem [shape: bf16[36,4], index: 1, kind: input, shape index: {}]   ;;  %s5729_s2 = inlined_call_operand.vmem [shape: f32[2,256,4], index: 2, kind: output, shape index: {0}]   ;;  %s5730_s3 = inlined_call_operand.vmem [shape: f32[2,2,4], index: 3, kind: output, shape index: {1}]  }
   0x1 LB: > { %s4080_s13 = sadd.s32 4294967295, %s4748_s12   ;;  %p4084_p0 = scmp.ge.s32.totalorder %s4748_s12, 1  ;;  %s4748_s12 = sphi %s4779_s12, %s14_s12  }
   0x2   : > { %p140_p1 = scmp.lt.s32.totalorder %s4748_s12, 3 }
   0x4   : > { %p141_p2 = pnand %p4084_p0, %p140_p1 }
   0x5   : > { %p168_p3 = scmp.lt.s32.totalorder (!%p141_p2), %s4080_s13, 1  ;;  %vm183_vm0 = vcmask (!%p141_p2), 27648   ;;  %vm186_vm1 = vcmask (!%p141_p2), 24576   ;;  %vm193_vm2 = vsmask.f32 (!%p141_p2), 256  ;;  %v4750_v4 = vmov (!%p141_p2), 0  }
   0x6   : > { %144 = sbr.rel (%p141_p2) target bundleno = 693 (0x2b5), region = 28  ;;  %vm4789_vm3 = vmand (!%p141_p2), %vm186_vm1, %vm193_vm2  ;;  %v198_v1 = vld [vmem:[#allocation2 + $0xc] sm:$0x1] (!%p141_p2)  ;;  %vm249_vm4 = vsmask.f32 (!%p141_p2), 7938  ;;  %vm1625_vm9 = vcmask (!%p141_p2), 1046528  }
   0x7   : > { %v199_v2 = vsel (!%p141_p2), %vm4789_vm3, 0, %v198_v1  ;;  %v201_v3 = vld [vmem:[#allocation2 + $0x18] sm:$0x1] (!%p141_p2)  ;;  %184 = vst.msk [vmem:[#allocation2] sm:$0xf] (!%p141_p2), %vm183_vm0, %v4750_v4  ;;  %vm4808_vm5 = vmand (!%p141_p2), %vm186_vm1, %vm249_vm4  ;;  %s4751_s18 = smov (!%p141_p2), 8  }
   0x8   : > { %200 = vst [vmem:[#allocation2 + $0xc] sm:$0x1] (!%p141_p2), %v199_v2  ;;  %185 = vst.msk [vmem:[#allocation2 + $0x4] sm:$0xf] (!%p141_p2), %vm183_vm0, %v4750_v4  ;;  %v202_v5 = vsel (!%p141_p2), %vm4789_vm3, 0, %v201_v3  ;;  %s4752_s19 = smov (!%p141_p2), 12  }
   0x9   : > { %187 = vst.msk [vmem:[#allocation2 + $0x8] sm:$0x1] (!%p141_p2), %vm186_vm1, %v4750_v4  ;;  %191 = vst.msk [vmem:[#allocation2 + $0xd4] sm:$0x1] (!%p141_p2), %vm186_vm1, %v4750_v4  ;;  %v204_v7 = vld [vmem:[#allocation2 + $0x24] sm:$0x1] (!%p141_p2) }
   0xa   : > { %189 = vst.msk [vmem:[#allocation2 + $0xcc] sm:$0xf] (!%p141_p2), %vm183_vm0, %v4750_v4  ;;  %190 = vst.msk [vmem:[#allocation2 + $0xd0] sm:$0xf] (!%p141_p2), %vm183_vm0, %v4750_v4  ;;  %v254_v8 = vld [vmem:[#allocation2 + $0x14] sm:$0x1] (!%p141_p2) }
   0xb   : > { %203 = vst [vmem:[#allocation2 + $0x18] sm:$0x1] (!%p141_p2), %v202_v5  ;;  %v205_v9 = vsel (!%p141_p2), %vm4789_vm3, 0, %v204_v7  ;;  %v255_v10 = vsel (!%p141_p2), %vm4808_vm5, 0, %v254_v8  ;;  %v257_v11 = vld [vmem:[#allocation2 + $0x20] sm:$0x1] (!%p141_p2)  ;;  %vm4842_vm8 = vmand (!%p141_p2), %vm183_vm0, %vm249_vm4 }
   0xc   : > { %206 = vst [vmem:[#allocation2 + $0x24] sm:$0x1] (!%p141_p2), %v205_v9  ;;  %256 = vst [vmem:[#allocation2 + $0x14] sm:$0x1] (!%p141_p2), %v255_v10  ;;  %v258_v15 = vsel (!%p141_p2), %vm4808_vm5, 0, %v257_v11  ;;  %s4753_s20 = smov (!%p141_p2), 24  }
   0xd   : > { %s5776_s13 = smov (!%p168_p3, %s4080_s13), 1  ;;  %259 = vst [vmem:[#allocation2 + $0x20] sm:$0x1] %v258_v15  ;;  %vm433_vm6 = vsmask.f32 4368  ;;  %s4754_s21 = smov 4  }
   0xe   : > { %s4383_s14 = sshll.u32 %s5776_s13, 8  ;;  %vm4834_vm7 = vmor %vm193_vm2, %vm433_vm6  ;;  %v195_v46 = vld [vmem:[#allocation2] sm:$0x1]  ;;  %v260_v5 = vld [vmem:[#allocation2 + $0x2c] sm:$0x1]  ;;  %s4755_s22 = smov 20  }
   0xf   : > { %s4817_s17 = scalar_lea.vmem %s5727_s0, %s4383_s14  ;;  %v758_v28 = vld [vmem:[#allocation2 + $0xc] sm:$0xf]  ;;  %v4846_v37 = vld [vmem:[#allocation2] sm:$0xfe]   ;;  %v196_v50 = vsel %vm4789_vm3, 0, %v195_v46  ;;  %s4756_s23 = smov 32  }
  0x10   : > { %v305_v12 = vld [vmem:[%s4817_s17] sm:$0xff]  ;;  %v306_v13 = vld [vmem:[%s4817_s17 + $0x8] sm:$0xff]  ;;  %v307_v14 = vld [vmem:[%s4817_s17 + $0x10] sm:$0xff]  ;;  %v1626_v47 = vrot.slane %v4846_v37, 1  ;;  %197 = vst [vmem:[#allocation2] sm:$0x1] %v196_v50  ;;  %s5568_s7 = scalar_lea.vmem %s5729_s2, %s4383_s14 }
  0x11   : > { %v4385_v16 = vpack.c.bf16 %v305_v12, %v305_v12  ;;  %v4386_v17 = vpack.c.bf16 %v306_v13, %v306_v13  ;;  %v308_v18 = vld [vmem:[%s4817_s17 + $0x18] sm:$0xff]  ;;  %v4387_v19 = vpack.c.bf16 %v307_v14, %v307_v14  ;;  %v309_v20 = vld [vmem:[%s4817_s17 + $0x20] sm:$0xff]  ;;  %v310_v21 = vld [vmem:[%s4817_s17 + $0x28] sm:$0xff]  ;;  %vm1191_vm10 = vsmask.f32 7424  ;;  %s4757_s24 = smov 16  }
  0x12   : > { %v4388_v22 = vpack.c.bf16 %v308_v18, %v308_v18  ;;  %v4389_v23 = vpack.c.bf16 %v309_v20, %v309_v20  ;;  %v251_v29 = vld [vmem:[#allocation2 + $0x8] sm:$0x1]  ;;  %v4831_v30 = vpack.c.bf16 %v310_v21, %v310_v21  ;;  %v311_v51 = vld [vmem:[%s4817_s17 + $0x30] sm:$0xff]  ;;  %v765_v54 = vld [vmem:[#allocation2 + $0x18] sm:$0xf]  ;;  %s4758_s25 = smov 28  }
  0x13   : > { %v436_v24 = vshrl.u32 %v4385_v16, 16  ;;  %v439_v25 = vshll.u32 %v4385_v16, 16  ;;  %v444_v26 = vshrl.u32 %v4386_v17, 16  ;;  %v447_v27 = vshll.u32 %v4386_v17, 16  ;;  %v762_v57 = vld [vmem:[#allocation2 + $0x14] sm:$0x1] }
  0x14   : > { %v252_v34 = vsel %vm4808_vm5, 0, %v251_v29  ;;  %v453_v35 = vshrl.u32 %v4387_v19, 16  ;;  %v456_v38 = vshll.u32 %v4387_v19, 16  ;;  %v461_v39 = vshrl.u32 %v4388_v22, 16  ;;  %v772_v62 = vld [vmem:[#allocation2 + $0x24] sm:$0xf] }
  0x15   : > { %v438_v32 = vrot.slane %v436_v24, 7  ;;  %v446_v33 = vrot.slane %v444_v26, 7  ;;  %253 = vst [vmem:[#allocation2 + $0x8] sm:$0x1] %v252_v34  ;;  %v464_v40 = vshll.u32 %v4388_v22, 16  ;;  %v470_v41 = vshrl.u32 %v4389_v23, 16 }
  0x16   : > { %v455_v48 = vrot.slane %v453_v35, 7  ;;  %v463_v49 = vrot.slane %v461_v39, 7  ;;  %v473_v56 = vshll.u32 %v4389_v23, 16  ;;  %v769_v63 = vld [vmem:[#allocation2 + $0x20] sm:$0x1]  ;;  %v478_v3 = vshrl.u32 %v4831_v30, 16 }
  0x17   : > { %v441_v42 = vor.u32 %v439_v25, %v438_v32  ;;  %v442_v43 = vrot.slane %v438_v32, 4  ;;  %v449_v44 = vor.u32 %v447_v27, %v446_v33  ;;  %v451_v45 = vrot.slane %v446_v33, 4  ;;  %v207_v11 = vld [vmem:[#allocation2 + $0x30] sm:$0x1]  ;;  %v4504_v21 = vld [vmem:[#allocation2] sm:$0xff]   ;;  %s4089_s8 = sshll.u32 %s5776_s13, 1 }
  0x18   : > { %v472_v55 = vrot.slane %v470_v41, 7  ;;  %v458_v58 = vor.u32 %v456_v38, %v455_v48  ;;  %v459_v59 = vrot.slane %v455_v48, 4  ;;  %v466_v60 = vor.u32 %v464_v40, %v463_v49  ;;  %s181_s11 = scalar_lea.vmem %s5730_s3, %s4089_s8 }
  0x19   : > { %v450_v52 = vsel %vm4834_vm7, %v442_v43, %v449_v44  ;;  %v759_v53 = vsel %vm4842_vm8, %v441_v42, %v758_v28  ;;  %v468_v61 = vrot.slane %v463_v49, 4  ;;  %v481_v4 = vshll.u32 %v4831_v30, 16 }
  0x1a   : > { %760 = vst [vmem:[#allocation2 + $0xc] sm:$0xf] %v759_v53  ;;  %761 = vst.msk [vmem:[#allocation2 + $0x10] sm:$0xf] %vm183_vm0, %v450_v52  ;;  %v475_v1 = vor.u32 %v473_v56, %v472_v55  ;;  %v476_v2 = vrot.slane %v472_v55, 4  ;;  %v467_v7 = vsel %vm4834_vm7, %v459_v59, %v466_v60  ;;  %v766_v8 = vsel %vm4842_vm8, %v458_v58, %v765_v54 }
  0x1b   : > { %v763_v9 = vsel %vm4789_vm3, %v451_v45, %v762_v57  ;;  %v770_v10 = vsel %vm4789_vm3, %v468_v61, %v769_v63  ;;  %767 = vst [vmem:[#allocation2 + $0x18] sm:$0xf] %v766_v8  ;;  %768 = vst.msk [vmem:[#allocation2 + $0x1c] sm:$0xf] %vm183_vm0, %v467_v7  ;;  %v4868_v13 = vrot.slane %v478_v3, 7  ;;  %v4872_v15 = vpack.c.bf16 %v311_v51, %v311_v51 }
  0x1c   : > { %v4501_v12 = vld [vmem:[#allocation2 + $0x8] ss:$0 sps:$4 sm:$0x11]   ;;  %v773_v14 = vsel %vm4842_vm8, %v475_v1, %v772_v62  ;;  %764 = vst [vmem:[#allocation2 + $0x14] sm:$0x1] %v763_v9  ;;  %v261_v17 = vsel %vm4808_vm5, 0, %v260_v5 }
  0x1d   : > { %771 = vst [vmem:[#allocation2 + $0x20] sm:$0x1] %v770_v10  ;;  %v4505_v16 = vld [vmem:[#allocation2 + $0x8] ss:$0 sps:$4 sm:$0x11]   ;;  %v1627_v18 = vrot.slane %v4501_v12, 1  ;;  %v483_v19 = vor.u32 %v481_v4, %v4868_v13 }
  0x1e   : > { %774 = vst [vmem:[#allocation2 + $0x24] sm:$0xf] %v773_v14  ;;  %262 = vst [vmem:[#allocation2 + $0x2c] sm:$0x1] %v261_v17  ;;  %v208_v20 = vsel %vm4789_vm3, 0, %v207_v11  ;;  %v1200_v22 = vshll.u32 %v4505_v16, 16 }
  0x1f   : > { %v485_v23 = vrot.slane %v4868_v13, 4  ;;  %209 = vst [vmem:[#allocation2 + $0x30] sm:$0x1] %v208_v20  ;;  %v1628_v25 = vsel %vm1625_vm9, %v1626_v47, %v1627_v18  ;;  %v484_v26 = vsel %vm4834_vm7, %v476_v2, %v483_v19  ;;  %v487_v27 = vshrl.u32 %v4872_v15, 16  ;;  %v312_v16 = vld [vmem:[%s4817_s17 + $0x38] sm:$0xff] }
  0x20   : > { %1674 = vrot.lane.b32.xlu1 %v1628_v25, %s4751_s18  ;;  %v1193_v28 = vshrl.u32 %v4504_v21, 16  ;;  %v1195_v29 = vshll.u32 %v4504_v21, 16  ;;  %v1202_v30 = vrot.slane %v1200_v22, 1  ;;  %775 = vst.msk [vmem:[#allocation2 + $0x28] sm:$0xf] %vm183_vm0, %v484_v26  ;;  %v490_v32 = vshll.u32 %v4872_v15, 16 }
  0x21   : > { %v4499_v24 = vld [vmem:[#allocation2 + $0xc] sm:$0xff]   ;;  %vm998_vm11 = vcmask 31744   ;;  %vm5732_vm12 = vcmask 64544   ;;  %vm5731_vm13 = vcmask 97344   ;;  %vm1899_vm14 = vcmask 130144  }
  0x22   : > { %1851 = vrot.lane.b32.xlu0 %v4499_v24, %s4752_s19  ;;  %v4507_v33 = vld [vmem:[#allocation2 + $0xc] sm:$0xfe]   ;;  %v4502_v34 = vld [vmem:[#allocation2 + $0x18] sm:$0xff]   ;;  %v1197_v35 = vrot.slane %v1195_v29, 1  ;;  %vm2332_vm15 = vcmask 162944   ;;  %vm2621_vm1 = vcmask 195744  }
  0x23   : > { %v4519_v37 = vld [vmem:[#allocation2 + $0xc] sm:$0xff]   ;;  %v4503_v38 = vld [vmem:[#allocation2 + $0x18] sm:$0xff]   ;;  %v2525_v39 = vrot.slane %v4507_v33, 1  ;;  %v4508_v41 = vld [vmem:[#allocation2 + $0x14] ss:$0 sps:$4 sm:$0x11]  }
  0x24   : > { %v1198_v40 = vor.u32 %v1197_v35, %v1193_v28  ;;  %1853 = vrot.lane.b32.xlu1 %v4503_v38, %s4752_s19  ;;  %v4517_v42 = vld [vmem:[#allocation2 + $0x18] sm:$0xff]   ;;  %v4509_v44 = vld [vmem:[#allocation2 + $0xc] sm:$0xfe]   ;;  %v4510_v45 = vld [vmem:[#allocation2 + $0x14] ss:$0 sps:$4 sm:$0x11]  }
  0x25   : > { %v1205_v46 = vshrl.u32 %v4519_v37, 16  ;;  %v2526_v48 = vrot.slane %v4508_v41, 1  ;;  %v1629_v49 = vrot.slane %v4509_v44, 1  ;;  %v1630_v50 = vrot.slane %v4510_v45, 1  ;;  %v4511_v51 = vld [vmem:[#allocation2 + $0x18] sm:$0xfe]  }
  0x26   : > { %2751 = vrot.lane.b32.xlu0 %v4502_v34, %s4753_s20  ;;  %v1203_v43 = vsel %vm1191_vm10, %v1198_v40, %v1202_v30  ;;  %v4512_v52 = vld [vmem:[#allocation2 + $0x20] ss:$0 sps:$4 sm:$0x11]   ;;  %v2105_v53 = vshrl.u32 %v4517_v42, 16  ;;  %v3425_v56 = vrot.slane %v4511_v51, 1  ;;  %v2107_v62 = vshll.u32 %v4517_v42, 16 }
  0x27   : > { %v4506_v47 = vld [vmem:[#allocation2 + $0x24] sm:$0xff]   ;;  %v2527_v54 = vsel %vm1625_vm9, %v2525_v39, %v2526_v48  ;;  %v1631_v55 = vsel %vm1625_vm9, %v1629_v49, %v1630_v50  ;;  %v3426_v57 = vrot.slane %v4512_v52, 1  ;;  %v4513_v58 = vld [vmem:[#allocation2 + $0x18] sm:$0xfe]   ;;  %v776_v59 = vld [vmem:[#allocation2 + $0x2c] sm:$0x1] }
  0x28   : > { %2753 = vrot.lane.b32.xlu1 %v4506_v47, %s4753_s20  ;;  %v4514_v60 = vld [vmem:[#allocation2 + $0x20] ss:$0 sps:$4 sm:$0x11]   ;;  %v777_v61 = vsel %vm4789_vm3, %v485_v23, %v776_v59  ;;  %v2528_v63 = vrot.slane %v4513_v58, 1  ;;  %v4515_v1 = vld [vmem:[#allocation2 + $0x24] sm:$0xfe]  }
  0x29   : > { %778 = vst [vmem:[#allocation2 + $0x2c] sm:$0x1] %v777_v61  ;;  %v1207_v2 = vshll.u32 %v4519_v37, 16  ;;  %v3427_v3 = vsel %vm1625_vm9, %v3425_v56, %v3426_v57  ;;  %v2529_v4 = vrot.slane %v4514_v60, 1  ;;  %v2109_v5 = vrot.slane %v2107_v62, 1  ;;  %v4521_v14 = vld [vmem:[#allocation2 + $0x24] sm:$0xff]  }
  0x2a   : > { %1384 = vrot.lane.b32.xlu0 %v1203_v43, %s4754_s21  ;;  %v3428_v7 = vrot.slane %v4515_v1, 1  ;;  %v4518_v8 = vld [vmem:[#allocation2 + $0x20] ss:$0 sps:$4 sm:$0x11]   ;;  %v3005_v19 = vshrl.u32 %v4521_v14, 16  ;;  %v4523_v20 = vld [vmem:[#allocation2 + $0xc] sm:$0xff]   ;;  %v4906_v37 = vpack.c.bf16 %v312_v16, %v312_v16 }
  0x2b   : > { %v2530_v9 = vsel %vm1625_vm9, %v2528_v63, %v2529_v4  ;;  %v2110_v10 = vor.u32 %v2109_v5, %v2105_v53  ;;  %v2112_v11 = vshll.u32 %v4518_v8, 16  ;;  %v4520_v12 = vld [vmem:[#allocation2 + $0x14] ss:$0 sps:$4 sm:$0x11]   ;;  %v1209_v13 = vrot.slane %v1207_v2, 1  ;;  %v4525_v41 = vld [vmem:[#allocation2 + $0x18] sm:$0xff]  }
  0x2c   : > { %1676 = vrot.lane.b32.xlu1 %v1631_v55, %s4751_s18  ;;  %v1212_v18 = vshll.u32 %v4520_v12, 16  ;;  %v3007_v22 = vshll.u32 %v4521_v14, 16  ;;  %v2093_v30 = vshrl.u32 %v4523_v20, 16  ;;  %v2095_v33 = vshll.u32 %v4523_v20, 16  ;;  %v4527_v45 = vld [vmem:[#allocation2 + $0x18] sm:$0xff]   ;;  %v4529_v53 = vld [vmem:[#allocation2 + $0x24] sm:$0xff]  }
  0x2d   : > { %v2114_v17 = vrot.slane %v2112_v11, 1  ;;  %v1210_v24 = vor.u32 %v1209_v13, %v1205_v46  ;;  %v4524_v35 = vld [vmem:[#allocation2 + $0x14] ss:$0 sps:$4 sm:$0x11]   ;;  %v1217_v48 = vshrl.u32 %v4525_v41, 16  ;;  %v1219_v49 = vshll.u32 %v4525_v41, 16 }
  0x2e   : > { %2573 = vrot.lane.b32.xlu0 %v2527_v54, %s4755_s22  ;;  %v1214_v25 = vrot.slane %v1212_v18, 1  ;;  %v3009_v29 = vrot.slane %v3007_v22, 1  ;;  %v2097_v40 = vrot.slane %v2095_v33, 1  ;;  %v2100_v43 = vshll.u32 %v4524_v35, 16  ;;  %v4531_v11 = vld [vmem:[#allocation2 + $0x18] sm:$0xfe]  }
  0x2f   : > { %v2115_v23 = vsel %vm1191_vm10, %v2110_v10, %v2114_v17  ;;  %v4526_v44 = vld [vmem:[#allocation2 + $0x20] ss:$0 sps:$4 sm:$0x11]   ;;  %v495_v54 = vshrl.u32 %v4906_v37, 16  ;;  %v1221_v55 = vrot.slane %v1219_v49, 1  ;;  %v2993_v57 = vshrl.u32 %v4527_v45, 16 }
  0x30   : > { %2575 = vrot.lane.b32.xlu1 %v2530_v9, %s4755_s22  ;;  %v4516_v21 = vld [vmem:[#allocation2 + $0x2c] ss:$0 sps:$4 sm:$0x11]   ;;  %v3010_v39 = vor.u32 %v3009_v29, %v3005_v19  ;;  %v1215_v46 = vsel %vm1191_vm10, %v1210_v24, %v1214_v25  ;;  %v2098_v47 = vor.u32 %v2097_v40, %v2093_v30  ;;  %v2102_v51 = vrot.slane %v2100_v43, 1  ;;  %v313_v13 = vld [vmem:[%s4817_s17 + $0x40] sm:$0xff] }
  0x31   : > { %v4522_v26 = vld [vmem:[#allocation2 + $0x2c] ss:$0 sps:$4 sm:$0x11]   ;;  %v3429_v28 = vrot.slane %v4516_v21, 1  ;;  %v1224_v52 = vshll.u32 %v4526_v44, 16  ;;  %v2995_v58 = vshll.u32 %v4527_v45, 16  ;;  %v1222_v62 = vor.u32 %v1221_v55, %v1217_v48 }
  0x32   : > { %3473 = vrot.lane.b32.xlu0 %v3427_v3, %s4756_s23  ;;  %v3012_v34 = vshll.u32 %v4522_v26, 16  ;;  %v4528_v56 = vld [vmem:[#allocation2 + $0x20] ss:$0 sps:$4 sm:$0x11]   ;;  %v2103_v59 = vsel %vm1191_vm10, %v2098_v47, %v2102_v51  ;;  %v1229_v61 = vshrl.u32 %v4529_v53, 16  ;;  %v1231_v2 = vshll.u32 %v4529_v53, 16 }
  0x33   : > { %v3430_v38 = vsel %vm1625_vm9, %v3428_v7, %v3429_v28  ;;  %v1226_v60 = vrot.slane %v1224_v52, 1  ;;  %v2997_v63 = vrot.slane %v2995_v58, 1  ;;  %v3000_v1 = vshll.u32 %v4528_v56, 16  ;;  %v4530_v3 = vld [vmem:[#allocation2 + $0x2c] ss:$0 sps:$4 sm:$0x11]  }
  0x34   : > { %2286 = vrot.lane.b32.xlu1 %v2115_v23, %s4757_s24  ;;  %v3014_v42 = vrot.slane %v3012_v34, 1  ;;  %v489_v4 = vrot.slane %v487_v27, 7  ;;  %v1233_v9 = vrot.slane %v1231_v2, 1  ;;  %v1236_v10 = vshll.u32 %v4530_v3, 16  ;;  %v4537_v27 = vld [vmem:[#allocation2 + $0x24] sm:$0xff]   ;;  %v316_v3 = vld [vmem:[%s4817_s17 + $0x58] sm:$0xff] }
  0x35   : > { %v1227_v5 = vsel %vm1191_vm10, %v1222_v62, %v1226_v60  ;;  %v2998_v7 = vor.u32 %v2997_v63, %v2993_v57  ;;  %v3002_v8 = vrot.slane %v3000_v1, 1  ;;  %v4532_v12 = vld [vmem:[#allocation2 + $0x20] ss:$0 sps:$4 sm:$0x11]   ;;  %v314_v18 = vld [vmem:[%s4817_s17 + $0x48] sm:$0xff]  ;;  %v1632_v20 = vrot.slane %v4531_v11, 1 }
  0x36   : > { %3475 = vrot.lane.b32.xlu0 %v3430_v38, %s4756_s23  ;;  %v3015_v50 = vsel %vm1191_vm10, %v3010_v39, %v3014_v42  ;;  %v1234_v16 = vor.u32 %v1233_v9, %v1229_v61  ;;  %v492_v17 = vor.u32 %v490_v32, %v489_v4  ;;  %v1238_v19 = vrot.slane %v1236_v10, 1  ;;  %v4533_v22 = vld [vmem:[#allocation2 + $0x24] sm:$0xfe]   ;;  %v263_v24 = vld [vmem:[#allocation2 + $0x38] sm:$0x1]  ;;  %v315_v39 = vld [vmem:[%s4817_s17 + $0x50] sm:$0xff] }
  0x37   : > { %v3003_v14 = vsel %vm1191_vm10, %v2998_v7, %v3002_v8  ;;  %v1633_v21 = vrot.slane %v4532_v12, 1  ;;  %v493_v23 = vrot.slane %v489_v4, 4  ;;  %v4534_v25 = vld [vmem:[#allocation2 + $0x2c] ss:$0 sps:$4 sm:$0x11]   ;;  %v4926_v26 = vrot.slane %v495_v54, 7 }
  0x38   : > { %3186 = vrot.lane.b32.xlu1 %v3015_v50, %s4758_s25  ;;  %v210_v28 = vld [vmem:[#allocation2 + $0x3c] sm:$0x1]  ;;  %v1239_v29 = vsel %vm1191_vm10, %v1234_v16, %v1238_v19  ;;  %v1635_v30 = vrot.slane %v4533_v22, 1  ;;  %v498_v15 = vshll.u32 %v4906_v37, 16  ;;  %v779_v32 = vld [vmem:[#allocation2 + $0x30] sm:$0xf]  ;;  %v4393_v38 = vpack.c.bf16 %v313_v13, %v313_v13 }
  0x39   : > { %v1634_v33 = vsel %vm1625_vm9, %v1632_v20, %v1633_v21  ;;  %v1636_v34 = vrot.slane %v4534_v25, 1  ;;  %v780_v35 = vsel %vm4842_vm8, %v492_v17, %v779_v32  ;;  %v4535_v40 = vld [vmem:[#allocation2 + $0x24] sm:$0xff]   ;;  %v4538_v42 = vld [vmem:[#allocation2 + $0x2c] ss:$0 sps:$4 sm:$0x11]   ;;  %v2117_v43 = vshrl.u32 %v4537_v27, 16 }
  0x3a   : > { %1386 = vrot.lane.b32.xlu0 %v1215_v46, %s4754_s21  ;;  %v500_v41 = vor.u32 %v498_v15, %v4926_v26  ;;  %781 = vst [vmem:[#allocation2 + $0x30] sm:$0xf] %v780_v35  ;;  %v4394_v44 = vpack.c.bf16 %v314_v18, %v314_v18  ;;  %v266_v45 = vld [vmem:[#allocation2 + $0x44] sm:$0x1]  ;;  %v2119_v46 = vshll.u32 %v4537_v27, 16  ;;  %v264_v47 = vsel %vm4808_vm5, 0, %v263_v24 }
  0x3b   : > { %v1637_v37 = vsel %vm1625_vm9, %v1635_v30, %v1636_v34  ;;  %v213_v48 = vld [vmem:[#allocation2 + $0x48] sm:$0x1]  ;;  %v2124_v50 = vshll.u32 %v4538_v42, 16  ;;  %265 = vst [vmem:[#allocation2 + $0x38] sm:$0x1] %v264_v47  ;;  %v211_v52 = vsel %vm4789_vm3, 0, %v210_v28  ;;  %v4945_v53 = vpack.c.bf16 %v315_v39, %v315_v39 }
  0x3c   : > { %1388 = vrot.lane.b32.xlu1 %v1227_v5, %s4754_s21  ;;  %v501_v49 = vsel %vm4834_vm7, %v493_v23, %v500_v41  ;;  %v4541_v51 = vld [vmem:[#allocation2 + $0x24] sm:$0xfe]   ;;  %v502_v54 = vrot.slane %v4926_v26, 4  ;;  %v2121_v55 = vrot.slane %v2119_v46, 1  ;;  %212 = vst [vmem:[#allocation2 + $0x3c] sm:$0x1] %v211_v52  ;;  %v4396_v12 = vpack.c.bf16 %v316_v3, %v316_v3 }
  0x3d   : > { %782 = vst.msk [vmem:[#allocation2 + $0x34] sm:$0xf] %vm183_vm0, %v501_v49  ;;  %v4542_v56 = vld [vmem:[#allocation2 + $0x2c] ss:$0 sps:$4 sm:$0x11]   ;;  %v504_v57 = vshrl.u32 %v4393_v38, 16 }
  0x3e   : > { %2284 = vrot.lane.b32.xlu0 %v2103_v59, %s4757_s24  ;;  %v2126_v58 = vrot.slane %v2124_v50, 1  ;;  %v507_v59 = vshll.u32 %v4393_v38, 16  ;;  %v512_v60 = vshrl.u32 %v4394_v44, 16  ;;  %v515_v61 = vshll.u32 %v4394_v44, 16 }
  0x3f   : > { %v2122_v62 = vor.u32 %v2121_v55, %v2117_v43  ;;  %v2531_v63 = vrot.slane %v4541_v51, 1  ;;  %v506_v1 = vrot.slane %v504_v57, 7  ;;  %v267_v2 = vsel %vm4808_vm5, 0, %v266_v45 }
  0x40   : > { %1390 = vrot.lane.b32.xlu1 %v1239_v29, %s4754_s21  ;;  %v2532_v4 = vrot.slane %v4542_v56, 1  ;;  %v514_v5 = vrot.slane %v512_v60, 7  ;;  %268 = vst [vmem:[#allocation2 + $0x44] sm:$0x1] %v267_v2  ;;  %v214_v7 = vsel %vm4789_vm3, 0, %v213_v48  ;;  %v521_v8 = vshrl.u32 %v4945_v53, 16 }
  0x41   : > { %v2127_v9 = vsel %vm1191_vm10, %v2122_v62, %v2126_v58  ;;  %215 = vst [vmem:[#allocation2 + $0x48] sm:$0x1] %v214_v7  ;;  %v510_v10 = vrot.slane %v506_v1, 4  ;;  %v529_v24 = vshrl.u32 %v4396_v12, 16  ;;  %v524_v30 = vshll.u32 %v4945_v53, 16 }
  0x42   : > { %3184 = vrot.lane.b32.xlu0 %v3003_v14, %s4758_s25  ;;  %v517_v11 = vor.u32 %v515_v61, %v514_v5  ;;  %v783_v13 = vld [vmem:[#allocation2 + $0x38] sm:$0x1]  ;;  %v509_v14 = vor.u32 %v507_v59, %v506_v1  ;;  %v519_v18 = vrot.slane %v514_v5, 4  ;;  %v2533_v20 = vsel %vm1625_vm9, %v2531_v63, %v2532_v4 }
  0x43   : > { %v784_v17 = vsel %vm4789_vm3, %v502_v54, %v783_v13  ;;  %v4965_v22 = vrot.slane %v521_v8, 7  ;;  %v786_v23 = vld [vmem:[#allocation2 + $0x3c] sm:$0xf]  ;;  %v4977_v41 = vrot.slane %v529_v24, 7  ;;  %v532_v46 = vshll.u32 %v4396_v12, 16 }
  0x44   : > { %1680 = vrot.lane.b32.xlu1 %v1637_v37, %s4751_s18  ;;  %v4536_v16 = vld [vmem:[#allocation2 + $0x30] sm:$0xff]   ;;  %v518_v27 = vsel %vm4834_vm7, %v510_v10, %v517_v11  ;;  %785 = vst [vmem:[#allocation2 + $0x38] sm:$0x1] %v784_v17  ;;  %v787_v28 = vsel %vm4842_vm8, %v509_v14, %v786_v23  ;;  %v317_v17 = vld [vmem:[%s4817_s17 + $0x60] sm:$0xff]  ;;  %vm2799_vm2 = vcmask 228544   ;;  %vm3232_vm4 = vcmask 261344  }
  0x45   : > { %v4539_v19 = vld [vmem:[#allocation2 + $0x30] sm:$0xff]   ;;  %789 = vst.msk [vmem:[#allocation2 + $0x40] sm:$0xf] %vm183_vm0, %v518_v27  ;;  %788 = vst [vmem:[#allocation2 + $0x3c] sm:$0xf] %v787_v28  ;;  %v527_v39 = vrot.slane %v4965_v22, 4  ;;  %v534_v54 = vor.u32 %v532_v46, %v4977_v41 }
  0x46   : > { %1678 = vrot.lane.b32.xlu0 %v1634_v33, %s4751_s18  ;;  %v4543_v21 = vld [vmem:[#allocation2 + $0x30] sm:$0xfe]   ;;  %v2131_v25 = vshll.u32 %v4539_v19, 16  ;;  %v2129_v33 = vshrl.u32 %v4539_v19, 16  ;;  %vm5733_vm6 = vcmask 294144  }
  0x47   : > { %v4545_v26 = vld [vmem:[#allocation2 + $0x30] sm:$0xff]   ;;  %v790_v15 = vld [vmem:[#allocation2 + $0x44] sm:$0x1]  ;;  %v2534_v42 = vrot.slane %v4543_v21, 1  ;;  %v535_v59 = vsel %vm4834_vm7, %v527_v39, %v534_v54 }
  0x48   : > { %1857 = vrot.lane.b32.xlu1 %v4536_v16, %s4752_s19  ;;  %v4547_v29 = vld [vmem:[#allocation2 + $0x30] sm:$0xff]   ;;  %v791_v35 = vsel %vm4789_vm3, %v519_v18, %v790_v15  ;;  %796 = vst.msk [vmem:[#allocation2 + $0x4c] sm:$0xf] %vm183_vm0, %v535_v59 }
  0x49   : > { %v4551_v32 = vld [vmem:[#allocation2 + $0x30] sm:$0xfe]   ;;  %v3019_v34 = vshll.u32 %v4547_v29, 16  ;;  %792 = vst [vmem:[#allocation2 + $0x44] sm:$0x1] %v791_v35  ;;  %v3017_v43 = vshrl.u32 %v4547_v29, 16 }
  0x4a   : > { %1855 = vrot.lane.b32.xlu0 %v4535_v40, %s4752_s19  ;;  %v4974_v38 = vld [vmem:[#allocation2 + $0x30] sm:$0xff]   ;;  %v2133_v40 = vrot.slane %v2131_v25, 1  ;;  %v3431_v44 = vrot.slane %v4551_v32, 1  ;;  %v318_v35 = vld [vmem:[%s4817_s17 + $0x68] sm:$0xff] }
  0x4b   : > { %v1243_v45 = vshll.u32 %v4974_v38, 16  ;;  %v4540_v37 = vld [vmem:[#allocation2 + $0x38] ss:$0 sps:$4 sm:$0x11]   ;;  %v3021_v48 = vrot.slane %v3019_v34, 1  ;;  %v1241_v52 = vshrl.u32 %v4974_v38, 16 }
  0x4c   : > { %v4544_v47 = vld [vmem:[#allocation2 + $0x38] ss:$0 sps:$4 sm:$0x11]   ;;  %v4981_v49 = vld [vmem:[#allocation2 + $0x30] sm:$0xfe]   ;;  %v2134_v50 = vor.u32 %v2133_v40, %v2129_v33  ;;  %v2136_v51 = vshll.u32 %v4540_v37, 16 }
  0x4d   : > { %v2535_v55 = vrot.slane %v4544_v47, 1  ;;  %v1245_v56 = vrot.slane %v1243_v45, 1  ;;  %v4548_v58 = vld [vmem:[#allocation2 + $0x38] ss:$0 sps:$4 sm:$0x11]   ;;  %v4549_v60 = vld [vmem:[#allocation2 + $0x3c] sm:$0xff]   ;;  %v3022_v63 = vor.u32 %v3021_v48, %v3017_v43 }
  0x4e   : > { %2288 = vrot.lane.b32.xlu0 %v2127_v9, %s4757_s24  ;;  %v2138_v57 = vrot.slane %v2136_v51, 1  ;;  %v3024_v1 = vshll.u32 %v4548_v58, 16  ;;  %v4552_v2 = vld [vmem:[#allocation2 + $0x38] ss:$0 sps:$4 sm:$0x11]   ;;  %v3031_v3 = vshll.u32 %v4549_v60, 16 }
  0x4f   : > { %v4557_v5 = vld [vmem:[#allocation2 + $0x3c] sm:$0xff]   ;;  %v1638_v7 = vrot.slane %v4981_v49, 1  ;;  %v2536_v8 = vsel %vm1625_vm9, %v2534_v42, %v2535_v55  ;;  %v3029_v10 = vshrl.u32 %v4549_v60, 16  ;;  %v3432_v11 = vrot.slane %v4552_v2, 1  ;;  %v269_v21 = vld [vmem:[#allocation2 + $0x50] sm:$0x1] }
  0x50   : > { %v4550_v61 = vld [vmem:[#allocation2 + $0x44] ss:$0 sps:$4 sm:$0x11]   ;;  %v2139_v62 = vsel %vm1191_vm10, %v2134_v50, %v2138_v57  ;;  %v3026_v9 = vrot.slane %v3024_v1, 1  ;;  %v4546_v13 = vld [vmem:[#allocation2 + $0x3c] sm:$0xff]   ;;  %v3033_v14 = vrot.slane %v3031_v3, 1  ;;  %v4397_v42 = vpack.c.bf16 %v317_v17, %v317_v17 }
  0x51   : > { %2290 = vrot.lane.b32.xlu1 %v2139_v62, %s4757_s24  ;;  %v3036_v4 = vshll.u32 %v4550_v61, 16  ;;  %v4554_v12 = vld [vmem:[#allocation2 + $0x38] ss:$0 sps:$4 sm:$0x11]   ;;  %v4555_v19 = vld [vmem:[#allocation2 + $0x3c] sm:$0xfe]   ;;  %v1246_v43 = vor.u32 %v1245_v56, %v1241_v52  ;;  %v4398_v56 = vpack.c.bf16 %v318_v35, %v318_v35 }
  0x52   : > { %2577 = vrot.lane.b32.xlu0 %v2533_v20, %s4755_s22  ;;  %v3027_v27 = vsel %vm1191_vm10, %v3022_v63, %v3026_v9  ;;  %v1248_v18 = vshll.u32 %v4554_v12, 16  ;;  %v1253_v20 = vshrl.u32 %v4557_v5, 16  ;;  %v4556_v23 = vld [vmem:[#allocation2 + $0x44] ss:$0 sps:$4 sm:$0x11]   ;;  %v1255_v24 = vshll.u32 %v4557_v5, 16 }
  0x53   : > { %v3038_v16 = vrot.slane %v3036_v4, 1  ;;  %v3034_v25 = vor.u32 %v3033_v14, %v3029_v10  ;;  %v3434_v29 = vrot.slane %v4555_v19, 1  ;;  %v3435_v15 = vrot.slane %v4556_v23, 1  ;;  %v4558_v32 = vld [vmem:[#allocation2 + $0x44] ss:$0 sps:$4 sm:$0x11]  }
  0x54   : > { %v1250_v28 = vrot.slane %v1248_v18, 1  ;;  %v1257_v33 = vrot.slane %v1255_v24, 1  ;;  %v536_v34 = vrot.slane %v4977_v41, 4  ;;  %v4560_v38 = vld [vmem:[#allocation2 + $0x38] ss:$0 sps:$4 sm:$0x11]  }
  0x55   : > { %2579 = vrot.lane.b32.xlu1 %v2536_v8, %s4755_s22  ;;  %v4565_v39 = vld [vmem:[#allocation2 + $0x3c] sm:$0xff]   ;;  %v216_v40 = vld [vmem:[#allocation2 + $0x54] sm:$0x1]  ;;  %v1260_v45 = vshll.u32 %v4558_v32, 16  ;;  %v270_v37 = vsel %vm4808_vm5, 0, %v269_v21  ;;  %v3039_v41 = vsel %vm1191_vm10, %v3034_v25, %v3038_v16  ;;  %v3436_v46 = vsel %vm1625_vm9, %v3434_v29, %v3435_v15 }
  0x56   : > { %2755 = vrot.lane.b32.xlu0 %v4545_v26, %s4753_s20  ;;  %v3433_v26 = vsel %vm1625_vm9, %v3431_v44, %v3432_v11  ;;  %v526_v44 = vor.u32 %v524_v30, %v4965_v22  ;;  %v1639_v47 = vrot.slane %v4560_v38, 1  ;;  %v4561_v48 = vld [vmem:[#allocation2 + $0x3c] sm:$0xfe]   ;;  %v2141_v49 = vshrl.u32 %v4565_v39, 16  ;;  %271 = vst [vmem:[#allocation2 + $0x50] sm:$0x1] %v270_v37 }
  0x57   : > { %v1262_v50 = vrot.slane %v1260_v45, 1  ;;  %v4562_v51 = vld [vmem:[#allocation2 + $0x44] ss:$0 sps:$4 sm:$0x11]   ;;  %v1641_v54 = vrot.slane %v4561_v48, 1  ;;  %v2143_v55 = vshll.u32 %v4565_v39, 16  ;;  %v1251_v53 = vsel %vm1191_vm10, %v1246_v43, %v1250_v28 }
  0x58   : > { %v793_v52 = vld [vmem:[#allocation2 + $0x48] sm:$0xf]  ;;  %v1642_v22 = vrot.slane %v4562_v51, 1  ;;  %v217_v57 = vsel %vm4789_vm3, 0, %v216_v40  ;;  %v1258_v58 = vor.u32 %v1257_v33, %v1253_v20  ;;  %v1640_v59 = vsel %vm1625_vm9, %v1638_v7, %v1639_v47  ;;  %v319_v62 = vld [vmem:[%s4817_s17 + $0x70] sm:$0xff]  ;;  %v4563_v63 = vld [vmem:[#allocation2 + $0x3c] sm:$0xff]  }
  0x59   : > { %2757 = vrot.lane.b32.xlu1 %v4546_v13, %s4753_s20  ;;  %v794_v30 = vsel %vm4842_vm8, %v526_v44, %v793_v52  ;;  %v2145_v60 = vrot.slane %v2143_v55, 1  ;;  %218 = vst [vmem:[#allocation2 + $0x54] sm:$0x1] %v217_v57  ;;  %v538_v61 = vshrl.u32 %v4397_v42, 16  ;;  %v541_v2 = vshll.u32 %v4397_v42, 16 }
  0x5a   : > { %3188 = vrot.lane.b32.xlu0 %v3027_v27, %s4758_s25  ;;  %795 = vst [vmem:[#allocation2 + $0x48] sm:$0xf] %v794_v30  ;;  %v4566_v1 = vld [vmem:[#allocation2 + $0x44] ss:$0 sps:$4 sm:$0x11]   ;;  %v1263_v10 = vsel %vm1191_vm10, %v1258_v58, %v1262_v50  ;;  %v546_v13 = vshrl.u32 %v4398_v56, 16  ;;  %v5022_v16 = vpack.c.bf16 %v319_v62, %v319_v62  ;;  %v1643_v20 = vsel %vm1625_vm9, %v1641_v54, %v1642_v22 }
  0x5b   : > { %v272_v3 = vld [vmem:[#allocation2 + $0x5c] sm:$0x1]  ;;  %v2148_v4 = vshll.u32 %v4566_v1, 16  ;;  %v4569_v8 = vld [vmem:[#allocation2 + $0x3c] sm:$0xfe]   ;;  %v540_v9 = vrot.slane %v538_v61, 7  ;;  %v2146_v7 = vor.u32 %v2145_v60, %v2141_v49 }
  0x5c   : > { %v4570_v12 = vld [vmem:[#allocation2 + $0x44] ss:$0 sps:$4 sm:$0x11]   ;;  %v548_v27 = vrot.slane %v546_v13, 7  ;;  %v549_v18 = vshll.u32 %v4398_v56, 16  ;;  %v273_v19 = vsel %vm4808_vm5, 0, %v272_v3 }
  0x5d   : > { %3190 = vrot.lane.b32.xlu1 %v3039_v41, %s4758_s25  ;;  %v797_v5 = vld [vmem:[#allocation2 + $0x50] sm:$0x1]  ;;  %v2150_v14 = vrot.slane %v2148_v4, 1  ;;  %v544_v17 = vrot.slane %v540_v9, 4  ;;  %v543_v21 = vor.u32 %v541_v2, %v540_v9  ;;  %274 = vst [vmem:[#allocation2 + $0x5c] sm:$0x1] %v273_v19 }
  0x5e   : > { %3477 = vrot.lane.b32.xlu0 %v3433_v26, %s4756_s23  ;;  %v798_v11 = vsel %vm4789_vm3, %v536_v34, %v797_v5  ;;  %v2537_v25 = vrot.slane %v4569_v8, 1  ;;  %v2538_v26 = vrot.slane %v4570_v12, 1  ;;  %v551_v28 = vor.u32 %v549_v18, %v548_v27 }
  0x5f   : > { %799 = vst [vmem:[#allocation2 + $0x50] sm:$0x1] %v798_v11  ;;  %v2151_v23 = vsel %vm1191_vm10, %v2146_v7, %v2150_v14  ;;  %v555_v38 = vshrl.u32 %v5022_v16, 16  ;;  %v553_v39 = vrot.slane %v548_v27, 4 }
  0x60   : > { %v800_v15 = vld [vmem:[#allocation2 + $0x54] sm:$0xf]  ;;  %v552_v35 = vsel %vm4834_vm7, %v544_v17, %v551_v28  ;;  %v2539_v44 = vsel %vm1625_vm9, %v2537_v25, %v2538_v26 }
  0x61   : > { %1392 = vrot.lane.b32.xlu1 %v1251_v53, %s4754_s21  ;;  %v4567_v24 = vld [vmem:[#allocation2 + $0x48] sm:$0xff]   ;;  %v801_v40 = vsel %vm4842_vm8, %v543_v21, %v800_v15  ;;  %803 = vst.msk [vmem:[#allocation2 + $0x58] sm:$0xf] %vm183_vm0, %v552_v35  ;;  %v5044_v61 = vrot.slane %v555_v38, 7 }
  0x62   : > { %3479 = vrot.lane.b32.xlu0 %v3436_v46, %s4756_s23  ;;  %v4571_v29 = vld [vmem:[#allocation2 + $0x48] sm:$0xfe]   ;;  %v2153_v33 = vshrl.u32 %v4567_v24, 16  ;;  %v2155_v34 = vshll.u32 %v4567_v24, 16  ;;  %802 = vst [vmem:[#allocation2 + $0x54] sm:$0xf] %v801_v40 }
  0x63   : > { %v4564_v32 = vld [vmem:[#allocation2 + $0x48] sm:$0xff]   ;;  %v2540_v41 = vrot.slane %v4571_v29, 1  ;;  %v320_v29 = vld [vmem:[%s4817_s17 + $0x78] sm:$0xff] }
  0x64   : > { %v4575_v42 = vld [vmem:[#allocation2 + $0x48] sm:$0xff]   ;;  %v2157_v45 = vrot.slane %v2155_v34, 1  ;;  %v804_v52 = vld [vmem:[#allocation2 + $0x5c] sm:$0x1] }
  0x65   : > { %1394 = vrot.lane.b32.xlu1 %v1263_v10, %s4754_s21  ;;  %v4573_v46 = vld [vmem:[#allocation2 + $0x48] sm:$0xff]   ;;  %v3041_v51 = vshrl.u32 %v4575_v42, 16  ;;  %v3043_v54 = vshll.u32 %v4575_v42, 16  ;;  %v805_v22 = vsel %vm4789_vm3, %v553_v39, %v804_v52  ;;  %v561_v52 = vrot.slane %v5044_v61, 4 }
  0x66   : > { %1682 = vrot.lane.b32.xlu0 %v1640_v59, %s4751_s18  ;;  %v4568_v43 = vld [vmem:[#allocation2 + $0x50] ss:$0 sps:$4 sm:$0x11]   ;;  %v4579_v47 = vld [vmem:[#allocation2 + $0x48] sm:$0xfe]   ;;  %v2158_v48 = vor.u32 %v2157_v45, %v2153_v33 }
  0x67   : > { %v4572_v37 = vld [vmem:[#allocation2 + $0x50] ss:$0 sps:$4 sm:$0x11]   ;;  %v2160_v49 = vshll.u32 %v4568_v43, 16  ;;  %v3045_v57 = vrot.slane %v3043_v54, 1  ;;  %v4581_v58 = vld [vmem:[#allocation2 + $0x48] sm:$0xff]  }
  0x68   : > { %v4576_v50 = vld [vmem:[#allocation2 + $0x50] ss:$0 sps:$4 sm:$0x11]   ;;  %v2541_v56 = vrot.slane %v4572_v37, 1  ;;  %806 = vst [vmem:[#allocation2 + $0x5c] sm:$0x1] %v805_v22 }
  0x69   : > { %1684 = vrot.lane.b32.xlu1 %v1643_v20, %s4751_s18  ;;  %v2162_v55 = vrot.slane %v2160_v49, 1  ;;  %v3048_v53 = vshll.u32 %v4576_v50, 16  ;;  %v4580_v30 = vld [vmem:[#allocation2 + $0x50] ss:$0 sps:$4 sm:$0x11]   ;;  %v3046_v62 = vor.u32 %v3045_v57, %v3041_v51  ;;  %v4577_v3 = vld [vmem:[#allocation2 + $0x54] sm:$0xff]  }
  0x6a   : > { %1859 = vrot.lane.b32.xlu0 %v4563_v63, %s4752_s19  ;;  %v3437_v63 = vrot.slane %v4579_v47, 1  ;;  %v3438_v1 = vrot.slane %v4580_v30, 1  ;;  %v2542_v2 = vsel %vm1625_vm9, %v2540_v41, %v2541_v56  ;;  %v4582_v4 = vld [vmem:[#allocation2 + $0x50] ss:$0 sps:$4 sm:$0x11]   ;;  %v4574_v5 = vld [vmem:[#allocation2 + $0x54] sm:$0xff]  }
  0x6b   : > { %v2163_v59 = vsel %vm1191_vm10, %v2158_v48, %v2162_v55  ;;  %v3050_v60 = vrot.slane %v3048_v53, 1  ;;  %v1267_v9 = vshll.u32 %v4581_v58, 16  ;;  %v4585_v10 = vld [vmem:[#allocation2 + $0x54] sm:$0xff]   ;;  %v3053_v7 = vshrl.u32 %v4577_v3, 16  ;;  %v4587_v40 = vld [vmem:[#allocation2 + $0x48] sm:$0xfe]  }
  0x6c   : > { %v3055_v11 = vshll.u32 %v4577_v3, 16  ;;  %v1265_v12 = vshrl.u32 %v4581_v58, 16  ;;  %v1272_v13 = vshll.u32 %v4582_v4, 16  ;;  %v4583_v14 = vld [vmem:[#allocation2 + $0x54] sm:$0xfe]   ;;  %v1277_v27 = vshrl.u32 %v4585_v10, 16 }
  0x6d   : > { %1861 = vrot.lane.b32.xlu1 %v4564_v32, %s4752_s19  ;;  %v3051_v8 = vsel %vm1191_vm10, %v3046_v62, %v3050_v60  ;;  %v1269_v17 = vrot.slane %v1267_v9, 1  ;;  %v3439_v20 = vsel %vm1625_vm9, %v3437_v63, %v3438_v1  ;;  %v3440_v26 = vrot.slane %v4583_v14, 1  ;;  %v4588_v42 = vld [vmem:[#allocation2 + $0x50] ss:$0 sps:$4 sm:$0x11]   ;;  %v4593_v43 = vld [vmem:[#allocation2 + $0x54] sm:$0xff]  }
  0x6e   : > { %2292 = vrot.lane.b32.xlu0 %v2151_v23, %s4757_s24  ;;  %v3057_v19 = vrot.slane %v3055_v11, 1  ;;  %v1274_v21 = vrot.slane %v1272_v13, 1  ;;  %v1279_v28 = vshll.u32 %v4585_v10, 16  ;;  %v321_v37 = vld [vmem:[%s4817_s17 + $0x80] sm:$0xff]  ;;  %v1645_v47 = vrot.slane %v4588_v42, 1  ;;  %v4591_v53 = vld [vmem:[#allocation2 + $0x54] sm:$0xff]  }
  0x6f   : > { %v4578_v18 = vld [vmem:[#allocation2 + $0x5c] ss:$0 sps:$4 sm:$0x11]   ;;  %v1270_v34 = vor.u32 %v1269_v17, %v1265_v12  ;;  %v4589_v48 = vld [vmem:[#allocation2 + $0x54] sm:$0xfe]   ;;  %v558_v49 = vshll.u32 %v5022_v16, 16  ;;  %v4401_v63 = vpack.c.bf16 %v321_v37, %v321_v37 }
  0x70   : > { %v4584_v23 = vld [vmem:[#allocation2 + $0x5c] ss:$0 sps:$4 sm:$0x11]   ;;  %v3058_v24 = vor.u32 %v3057_v19, %v3053_v7  ;;  %v3060_v25 = vshll.u32 %v4578_v18, 16  ;;  %v1281_v35 = vrot.slane %v1279_v28, 1  ;;  %v1647_v56 = vrot.slane %v4589_v48, 1 }
  0x71   : > { %2294 = vrot.lane.b32.xlu1 %v2163_v59, %s4757_s24  ;;  %v3441_v15 = vrot.slane %v4584_v23, 1  ;;  %v4586_v32 = vld [vmem:[#allocation2 + $0x5c] ss:$0 sps:$4 sm:$0x11]   ;;  %v1275_v50 = vsel %vm1191_vm10, %v1270_v34, %v1274_v21  ;;  %v219_v22 = vld [vmem:[#allocation2 + $0x60] sm:$0x1] }
  0x72   : > { %2581 = vrot.lane.b32.xlu0 %v2539_v44, %s4755_s22  ;;  %v3062_v33 = vrot.slane %v3060_v25, 1  ;;  %v1284_v39 = vshll.u32 %v4586_v32, 16  ;;  %v4400_v44 = vpack.c.bf16 %v320_v29, %v320_v29  ;;  %v1282_v51 = vor.u32 %v1281_v35, %v1277_v27  ;;  %v4590_v54 = vld [vmem:[#allocation2 + $0x5c] ss:$0 sps:$4 sm:$0x11]   ;;  %v322_v30 = vld [vmem:[%s4817_s17 + $0x88] sm:$0xff] }
  0x73   : > { %v3442_v38 = vsel %vm1625_vm9, %v3440_v26, %v3441_v15  ;;  %v1648_v57 = vrot.slane %v4590_v54, 1  ;;  %v220_v58 = vsel %vm4789_vm3, 0, %v219_v22  ;;  %v2165_v16 = vshrl.u32 %v4593_v43, 16  ;;  %v4594_v3 = vld [vmem:[#allocation2 + $0x5c] ss:$0 sps:$4 sm:$0x11]  }
  0x74   : > { %v3063_v45 = vsel %vm1191_vm10, %v3058_v24, %v3062_v33  ;;  %v1286_v41 = vrot.slane %v1284_v39, 1  ;;  %v563_v59 = vshrl.u32 %v4400_v44, 16  ;;  %v566_v60 = vshll.u32 %v4400_v44, 16  ;;  %221 = vst [vmem:[#allocation2 + $0x60] sm:$0x1] %v220_v58  ;;  %v4607_v29 = vld [vmem:[#allocation2] sm:$0xff]  }
  0x75   : > { %2583 = vrot.lane.b32.xlu1 %v2542_v2, %s4755_s22  ;;  %v2167_v62 = vshll.u32 %v4593_v43, 16  ;;  %v275_v4 = vld [vmem:[#allocation2 + $0x68] sm:$0x1]  ;;  %v4402_v10 = vpack.c.bf16 %v322_v30, %v322_v30  ;;  %v2172_v12 = vshll.u32 %v4594_v3, 16  ;;  %v4597_v13 = vld [vmem:[#allocation2 + $0x54] sm:$0xfe]   ;;  %v1649_v17 = vsel %vm1625_vm9, %v1647_v56, %v1648_v57 }
  0x76   : > { %2759 = vrot.lane.b32.xlu0 %v4573_v46, %s4753_s20  ;;  %v1644_v46 = vrot.slane %v4587_v40, 1  ;;  %v1287_v1 = vsel %vm1191_vm10, %v1282_v51, %v1286_v41  ;;  %v565_v2 = vrot.slane %v563_v59, 7  ;;  %v560_v27 = vor.u32 %v558_v49, %v5044_v61  ;;  %v4598_v19 = vld [vmem:[#allocation2 + $0x5c] ss:$0 sps:$4 sm:$0x11]   ;;  %v323_v37 = vld [vmem:[%s4817_s17 + $0x90] sm:$0xff] }
  0x77   : > { %v572_v21 = vshrl.u32 %v4401_v63, 16  ;;  %v2174_v24 = vrot.slane %v2172_v12, 1  ;;  %v2543_v25 = vrot.slane %v4597_v13, 1  ;;  %v278_v28 = vld [vmem:[#allocation2 + $0x74] sm:$0x1]  ;;  %v2544_v15 = vrot.slane %v4598_v19, 1 }
  0x78   : > { %v1646_v55 = vsel %vm1625_vm9, %v1644_v46, %v1645_v47  ;;  %v568_v7 = vor.u32 %v566_v60, %v565_v2  ;;  %v570_v11 = vrot.slane %v565_v2, 4  ;;  %v575_v32 = vshll.u32 %v4401_v63, 16  ;;  %v225_v44 = vld [vmem:[#allocation2 + $0x78] sm:$0x1]  ;;  %999 = vst.msk [vmem:[#allocation3] sm:$0xff] %vm998_vm11, %v4607_v29  ;;  %v4622_v22 = vld [vmem:[#allocation2 + $0xc] sm:$0xff]  }
  0x79   : > { %2761 = vrot.lane.b32.xlu1 %v4574_v5, %s4753_s20  ;;  %v2169_v5 = vrot.slane %v2167_v62, 1  ;;  %v574_v61 = vrot.slane %v572_v21, 7  ;;  %v580_v33 = vshrl.u32 %v4402_v10, 16  ;;  %v279_v42 = vsel %vm4808_vm5, 0, %v278_v28  ;;  %v324_v41 = vld [vmem:[%s4817_s17 + $0x98] sm:$0xff]  ;;  %1000 = vst.msk [vmem:[#allocation3 + $0x8] sm:$0xff] %vm998_vm11, %v4622_v22 }
  0x7a   : > { %3192 = vrot.lane.b32.xlu0 %v3051_v8, %s4758_s25  ;;  %v276_v8 = vsel %vm4808_vm5, 0, %v275_v4  ;;  %v569_v23 = vsel %vm4834_vm7, %v561_v52, %v568_v7  ;;  %280 = vst [vmem:[#allocation2 + $0x74] sm:$0x1] %v279_v42  ;;  %v226_v49 = vsel %vm4789_vm3, 0, %v225_v44  ;;  %v4404_v51 = vpack.c.bf16 %v324_v41, %v324_v41  ;;  %v4627_v30 = vld [vmem:[#allocation2 + $0x18] sm:$0xff]  }
  0x7b   : > { %277 = vst [vmem:[#allocation2 + $0x68] sm:$0x1] %v276_v8  ;;  %v2170_v18 = vor.u32 %v2169_v5, %v2165_v16  ;;  %810 = vst.msk [vmem:[#allocation2 + $0x64] sm:$0xf] %vm183_vm0, %v569_v23  ;;  %v807_v34 = vld [vmem:[#allocation2 + $0x60] sm:$0xf]  ;;  %v577_v52 = vor.u32 %v575_v32, %v574_v61 }
  0x7c   : > { %v808_v43 = vsel %vm4842_vm8, %v560_v27, %v807_v34  ;;  %v578_v46 = vrot.slane %v574_v61, 4  ;;  %v582_v47 = vrot.slane %v580_v33, 7  ;;  %227 = vst [vmem:[#allocation2 + $0x78] sm:$0x1] %v226_v49  ;;  %v597_v59 = vshrl.u32 %v4404_v51, 16  ;;  %1001 = vst.msk [vmem:[#allocation3 + $0x10] sm:$0xff] %vm998_vm11, %v4627_v30 }
  0x7d   : > { %3194 = vrot.lane.b32.xlu1 %v3063_v45, %s4758_s25  ;;  %v2175_v35 = vsel %vm1191_vm10, %v2170_v18, %v2174_v24  ;;  %v2545_v45 = vsel %vm1625_vm9, %v2543_v25, %v2544_v15  ;;  %809 = vst [vmem:[#allocation2 + $0x60] sm:$0xf] %v808_v43  ;;  %v600_v60 = vshll.u32 %v4404_v51, 16 }
  0x7e   : > { %3481 = vrot.lane.b32.xlu0 %v3439_v20, %s4756_s23  ;;  %v222_v20 = vld [vmem:[#allocation2 + $0x6c] sm:$0x1]  ;;  %v587_v57 = vrot.slane %v582_v47, 4  ;;  %v5131_v7 = vrot.slane %v597_v59, 7 }
  0x7f   : > { %v223_v26 = vsel %vm4789_vm3, 0, %v222_v20 }
  0x80   : > { %224 = vst [vmem:[#allocation2 + $0x6c] sm:$0x1] %v223_v26  ;;  %v602_v27 = vor.u32 %v600_v60, %v5131_v7 }
  0x81   : > { %1396 = vrot.lane.b32.xlu1 %v1275_v50, %s4754_s21  ;;  %v5103_v50 = vpack.c.bf16 %v323_v37, %v323_v37 }
  0x82   : > { %3483 = vrot.lane.b32.xlu0 %v3442_v38, %s4756_s23  ;;  %v583_v38 = vshll.u32 %v4402_v10, 16  ;;  %v811_v48 = vld [vmem:[#allocation2 + $0x68] sm:$0x1] }
  0x83   : > { %v812_v54 = vsel %vm4789_vm3, %v570_v11, %v811_v48  ;;  %v589_v58 = vshrl.u32 %v5103_v50, 16 }
  0x84   : > { %813 = vst [vmem:[#allocation2 + $0x68] sm:$0x1] %v812_v54  ;;  %v4592_v4 = vld [vmem:[#allocation2 + $0x60] sm:$0xff]  }
  0x85   : > { %1398 = vrot.lane.b32.xlu1 %v1287_v1, %s4754_s21  ;;  %v818_v1 = vld [vmem:[#allocation2 + $0x74] sm:$0x1]  ;;  %v5129_v8 = vrot.slane %v589_v58, 7  ;;  %v4599_v10 = vld [vmem:[#allocation2 + $0x60] sm:$0xfe]  }
  0x86   : > { %1686 = vrot.lane.b32.xlu0 %v1646_v55, %s4751_s18  ;;  %v585_v55 = vor.u32 %v583_v38, %v582_v47  ;;  %v819_v5 = vsel %vm4789_vm3, %v587_v57, %v818_v1  ;;  %v4601_v11 = vld [vmem:[#allocation2 + $0x60] sm:$0xff]   ;;  %v2546_v25 = vrot.slane %v4599_v10, 1 }
  0x87   : > { %v814_v62 = vld [vmem:[#allocation2 + $0x6c] sm:$0xf]  ;;  %820 = vst [vmem:[#allocation2 + $0x74] sm:$0x1] %v819_v5  ;;  %v595_v12 = vrot.slane %v5129_v8, 4  ;;  %v4603_v26 = vld [vmem:[#allocation2 + $0x60] sm:$0xff]  }
  0x88   : > { %v586_v16 = vsel %vm4834_vm7, %v578_v46, %v585_v55  ;;  %v815_v63 = vsel %vm4842_vm8, %v577_v52, %v814_v62  ;;  %v3065_v32 = vshrl.u32 %v4603_v26, 16  ;;  %v3067_v33 = vshll.u32 %v4603_v26, 16  ;;  %v4610_v43 = vld [vmem:[#allocation2 + $0x60] sm:$0xff]  }
  0x89   : > { %1688 = vrot.lane.b32.xlu1 %v1649_v17, %s4751_s18  ;;  %817 = vst.msk [vmem:[#allocation2 + $0x70] sm:$0xf] %vm183_vm0, %v586_v16  ;;  %816 = vst [vmem:[#allocation2 + $0x6c] sm:$0xf] %v815_v63  ;;  %v603_v23 = vsel %vm4834_vm7, %v595_v12, %v602_v27  ;;  %v4608_v48 = vld [vmem:[#allocation2 + $0x60] sm:$0xfe]  }
  0x8a   : > { %1863 = vrot.lane.b32.xlu0 %v4591_v53, %s4752_s19  ;;  %824 = vst.msk [vmem:[#allocation2 + $0x7c] sm:$0xf] %vm183_vm0, %v603_v23  ;;  %v3069_v44 = vrot.slane %v3067_v33, 1  ;;  %v592_v55 = vshll.u32 %v5103_v50, 16  ;;  %v3443_v30 = vrot.slane %v4608_v48, 1  ;;  %v1289_v57 = vshrl.u32 %v4610_v43, 16 }
  0x8b   : > { %v4596_v13 = vld [vmem:[#allocation2 + $0x68] ss:$0 sps:$4 sm:$0x11]   ;;  %v1291_v58 = vshll.u32 %v4610_v43, 16  ;;  %v281_v43 = vld [vmem:[#allocation2 + $0x80] sm:$0x1] }
  0x8c   : > { %v4600_v19 = vld [vmem:[#allocation2 + $0x68] ss:$0 sps:$4 sm:$0x11]   ;;  %v2184_v20 = vshll.u32 %v4596_v13, 16  ;;  %v3070_v54 = vor.u32 %v3069_v44, %v3065_v32 }
  0x8d   : > { %1865 = vrot.lane.b32.xlu1 %v4592_v4, %s4752_s19  ;;  %v4604_v28 = vld [vmem:[#allocation2 + $0x68] ss:$0 sps:$4 sm:$0x11]   ;;  %v2547_v15 = vrot.slane %v4600_v19, 1  ;;  %v1293_v5 = vrot.slane %v1291_v58, 1  ;;  %v282_v58 = vsel %vm4808_vm5, 0, %v281_v43 }
  0x8e   : > { %2296 = vrot.lane.b32.xlu0 %v2175_v35, %s4757_s24  ;;  %v2186_v29 = vrot.slane %v2184_v20, 1  ;;  %v3072_v35 = vshll.u32 %v4604_v28, 16  ;;  %v4606_v42 = vld [vmem:[#allocation2 + $0x74] ss:$0 sps:$4 sm:$0x11]  }
  0x8f   : > { %v3084_v47 = vshll.u32 %v4606_v42, 16  ;;  %v2548_v51 = vsel %vm1625_vm9, %v2546_v25, %v2547_v15  ;;  %v4609_v52 = vld [vmem:[#allocation2 + $0x68] ss:$0 sps:$4 sm:$0x11]   ;;  %v604_v15 = vrot.slane %v5131_v7, 4 }
  0x90   : > { %v4605_v38 = vld [vmem:[#allocation2 + $0x6c] sm:$0xff]   ;;  %v3074_v37 = vrot.slane %v3072_v35, 1  ;;  %v3444_v16 = vrot.slane %v4609_v52, 1  ;;  %v4611_v62 = vld [vmem:[#allocation2 + $0x68] ss:$0 sps:$4 sm:$0x11]   ;;  %v594_v35 = vor.u32 %v592_v55, %v5129_v8 }
  0x91   : > { %v3077_v41 = vshrl.u32 %v4605_v38, 16  ;;  %v3079_v46 = vshll.u32 %v4605_v38, 16  ;;  %v4614_v59 = vld [vmem:[#allocation2 + $0x6c] sm:$0xff]   ;;  %v3086_v4 = vrot.slane %v3084_v47, 1  ;;  %v1296_v10 = vshll.u32 %v4611_v62, 16 }
  0x92   : > { %v5073_v9 = vpop.permute.xlu1 %1674  ;;  %2585 = vrot.lane.b32.xlu0 %v2545_v45, %s4755_s22  ;;  %v3075_v60 = vsel %vm1191_vm10, %v3070_v54, %v3074_v37  ;;  %v4613_v12 = vld [vmem:[#allocation2 + $0x74] ss:$0 sps:$4 sm:$0x11]   ;;  %v1303_v23 = vshll.u32 %v4614_v59, 16  ;;  %v4618_v38 = vld [vmem:[#allocation2 + $0x6c] sm:$0xfe]  }
  0x93   : > { %v3081_v22 = vrot.slane %v3079_v46, 1  ;;  %v4615_v27 = vld [vmem:[#allocation2 + $0x74] ss:$0 sps:$4 sm:$0x11]   ;;  %v1298_v20 = vrot.slane %v1296_v10, 1  ;;  %v1653_v48 = vrot.slane %v4618_v38, 1 }
  0x94   : > { %v5075_v14 = vpop.permute.xlu0 %1851  ;;  %v1308_v28 = vshll.u32 %v4615_v27, 16  ;;  %v4619_v42 = vld [vmem:[#allocation2 + $0x74] ss:$0 sps:$4 sm:$0x11]   ;;  %v4620_v54 = vld [vmem:[#allocation2 + $0x6c] sm:$0xff]  }
  0x95   : > { %v3082_v1 = vor.u32 %v3081_v22, %v3077_v41  ;;  %v821_v41 = vld [vmem:[#allocation2 + $0x78] sm:$0xf]  ;;  %v4623_v52 = vld [vmem:[#allocation2 + $0x6c] sm:$0xff]   ;;  %v4624_v55 = vld [vmem:[#allocation2 + $0x74] ss:$0 sps:$4 sm:$0x11]  }
  0x96   : > { %v5089_v40 = vpop.permute.xlu1 %1853  ;;  %2763 = vrot.lane.b32.xlu0 %v4601_v11, %s4753_s20  ;;  %v4612_v11 = vld [vmem:[#allocation2 + $0x6c] sm:$0xfe]   ;;  %v1310_v32 = vrot.slane %v1308_v28, 1  ;;  %v822_v8 = vsel %vm4842_vm8, %v594_v35, %v821_v41  ;;  %283 = vst [vmem:[#allocation2 + $0x80] sm:$0x1] %v282_v58 }
  0x97   : > { %v3446_v13 = vrot.slane %v4612_v11, 1  ;;  %v3087_v19 = vsel %vm1191_vm10, %v3082_v1, %v3086_v4  ;;  %823 = vst [vmem:[#allocation2 + $0x78] sm:$0xf] %v822_v8  ;;  %v4628_v62 = vld [vmem:[#allocation2 + $0x6c] sm:$0xfe]  }
  0x98   : > { %v5087_v39 = vpop.permute.xlu0 %2751 }
  0x9a   : > { %v5107_v53 = vpop.permute.xlu1 %2753  ;;  %3196 = vrot.lane.b32.xlu0 %v3075_v60, %s4758_s25 }
  0x9c   : > { %v1385_v56 = vpop.permute.xlu0 %1384 }
  0x9d   : > { %1433 = vst.msk [vmem:[#allocation3] sm:$0xff] %vm5732_vm12, %v1385_v56  ;;  %v4602_v56 = vld [vmem:[#allocation2 + $0x6c] sm:$0xff]  }
  0x9e   : > { %1723 = vst.msk [vmem:[#allocation3] sm:$0xff] %vm5731_vm13, %v5073_v9  ;;  %v5125_v3 = vpop.permute.xlu1 %1676  ;;  %v4595_v9 = vld [vmem:[#allocation2 + $0x60] sm:$0xff]   ;;  %v4625_v10 = vld [vmem:[#allocation2 + $0x78] sm:$0xff]  }
  0x9f   : > { %1900 = vst.msk [vmem:[#allocation3] sm:$0xff] %vm1899_vm14, %v5075_v14  ;;  %v2177_v14 = vshrl.u32 %v4595_v9, 16  ;;  %v2179_v18 = vshll.u32 %v4595_v9, 16  ;;  %v3445_v9 = vsel %vm1625_vm9, %v3443_v30, %v3444_v16  ;;  %v2189_v30 = vshrl.u32 %v4623_v52, 16  ;;  %v5219_v27 = vld [vmem:[#allocation2 + $0x78] sm:$0xfe]  }
  0xa0   : > { %v5123_v2 = vpop.permute.xlu0 %2573  ;;  %3485 = vrot.lane.b32.xlu0 %v3445_v9, %s4756_s23  ;;  %v4621_v9 = vld [vmem:[#allocation2 + $0x78] sm:$0xff]  }
  0xa1   : > { %v2181_v24 = vrot.slane %v2179_v18, 1  ;;  %v1301_v18 = vshrl.u32 %v4614_v59, 16 }
  0xa2   : > { %v5135_v17 = vpop.permute.xlu1 %2575 }
  0xa3   : > { %v2182_v61 = vor.u32 %v2181_v24, %v2177_v14  ;;  %v3447_v14 = vrot.slane %v4613_v12, 1  ;;  %v825_v12 = vld [vmem:[#allocation2 + $0x80] sm:$0x1] }
  0xa4   : > { %v5139_v21 = vpop.permute.xlu0 %3473 }
  0xa5   : > { %v2187_v45 = vsel %vm1191_vm10, %v2182_v61, %v2186_v29  ;;  %v3448_v26 = vsel %vm1625_vm9, %v3446_v13, %v3447_v14  ;;  %v4616_v29 = vld [vmem:[#allocation2 + $0x60] sm:$0xfe]   ;;  %v4617_v61 = vld [vmem:[#allocation2 + $0x68] ss:$0 sps:$4 sm:$0x11]   ;;  %v826_v14 = vsel %vm4789_vm3, %v604_v15, %v825_v12 }
  0xa6   : > { %v2287_v34 = vpop.permute.xlu1 %2286  ;;  %2298 = vrot.lane.b32.xlu1 %v2187_v45, %s4757_s24  ;;  %v1650_v33 = vrot.slane %v4616_v29, 1  ;;  %3487 = vrot.lane.b32.xlu0 %v3448_v26, %s4756_s23  ;;  %827 = vst [vmem:[#allocation2 + $0x80] sm:$0x1] %v826_v14  ;;  %v4637_v26 = vld [vmem:[#allocation2 + $0x78] sm:$0xff]   ;;  %v284_v15 = vld [vmem:[#allocation2 + $0x8c] sm:$0x1] }
  0xa7   : > { %v3091_v38 = vshll.u32 %v4637_v26, 16 }
  0xa8   : > { %v5146_v49 = vpop.permute.xlu0 %3475 }
  0xaa   : > { %v5151_v63 = vpop.permute.xlu1 %3186  ;;  %2587 = vrot.lane.b32.xlu1 %v2548_v51, %s4755_s22  ;;  %v1654_v51 = vrot.slane %v4619_v42, 1  ;;  %v285_v42 = vsel %vm4808_vm5, 0, %v284_v15  ;;  %v4660_v15 = vld [vmem:[#allocation2 + $0x30] sm:$0xff]  }
  0xab   : > { %286 = vst [vmem:[#allocation2 + $0x8c] sm:$0x1] %v285_v42  ;;  %1003 = vst.msk [vmem:[#allocation3 + $0x20] sm:$0xff] %vm998_vm11, %v4660_v15  ;;  %v328_v42 = vld [vmem:[%s4817_s17 + $0xb8] sm:$0xff] }
  0xac   : > { %v1387_v50 = vpop.permute.xlu0 %1386  ;;  %v1655_v1 = vsel %vm1625_vm9, %v1653_v48, %v1654_v51  ;;  %v3093_v48 = vrot.slane %v3091_v38, 1 }
  0xad   : > { %1434 = vst.msk [vmem:[#allocation3 + $0x8] sm:$0xff] %vm5732_vm12, %v1387_v50 }
  0xae   : > { %1724 = vst.msk [vmem:[#allocation3 + $0x8] sm:$0xff] %vm5731_vm13, %v5125_v3  ;;  %2765 = vrot.lane.b32.xlu1 %v4602_v56, %s4753_s20  ;;  %v1389_v25 = vpop.permute.xlu1 %1388  ;;  %v1294_v3 = vor.u32 %v1293_v5, %v1289_v57  ;;  %v2191_v57 = vshll.u32 %v4623_v52, 16 }
  0xaf   : > { %1901 = vst.msk [vmem:[#allocation3 + $0x8] sm:$0xff] %vm1899_vm14, %v5089_v40  ;;  %v1305_v40 = vrot.slane %v1303_v23, 1  ;;  %v325_v23 = vld [vmem:[%s4817_s17 + $0xa0] sm:$0xff] }
  0xb0   : > { %2334 = vst.msk [vmem:[#allocation3 + $0x8] sm:$0xff] %vm2332_vm15, %v2287_v34  ;;  %v2285_v24 = vpop.permute.xlu0 %2284  ;;  %v1651_v34 = vrot.slane %v4617_v61, 1  ;;  %v1299_v44 = vsel %vm1191_vm10, %v1294_v3, %v1298_v20  ;;  %v2193_v59 = vrot.slane %v2191_v57, 1  ;;  %v228_v20 = vld [vmem:[#allocation2 + $0x84] sm:$0x1]  ;;  %v4405_v3 = vpack.c.bf16 %v325_v23, %v325_v23 }
  0xb1   : > { %2333 = vst.msk [vmem:[#allocation3] sm:$0xff] %vm2332_vm15, %v2285_v24  ;;  %v1306_v37 = vor.u32 %v1305_v40, %v1301_v18  ;;  %v4634_v18 = vld [vmem:[#allocation2 + $0x78] sm:$0xff]   ;;  %v2203_v24 = vshll.u32 %v4625_v10, 16  ;;  %v229_v7 = vsel %vm4789_vm3, 0, %v228_v20  ;;  %v2201_v40 = vshrl.u32 %v4625_v10, 16 }
  0xb2   : > { %1435 = vst.msk [vmem:[#allocation3 + $0x10] sm:$0xff] %vm5732_vm12, %v1389_v25  ;;  %3198 = vrot.lane.b32.xlu1 %v3087_v19, %s4758_s25  ;;  %v1391_v46 = vpop.permute.xlu1 %1390  ;;  %v1652_v47 = vsel %vm1625_vm9, %v1650_v33, %v1651_v34  ;;  %v2194_v4 = vor.u32 %v2193_v59, %v2189_v30  ;;  %v326_v25 = vld [vmem:[%s4817_s17 + $0xa8] sm:$0xff]  ;;  %230 = vst [vmem:[#allocation2 + $0x84] sm:$0x1] %v229_v7  ;;  %v606_v61 = vshrl.u32 %v4405_v3, 16  ;;  %v5241_v30 = vld [vmem:[#allocation2 + $0x78] sm:$0xff]  }
  0xb3   : > { %1690 = vrot.lane.b32.xlu0 %v1652_v47, %s4751_s18  ;;  %2623 = vst.msk [vmem:[#allocation3 + $0x8] sm:$0xff] %vm2621_vm1, %v5135_v17  ;;  %2622 = vst.msk [vmem:[#allocation3] sm:$0xff] %vm2621_vm1, %v5123_v2  ;;  %v1311_v22 = vsel %vm1191_vm10, %v1306_v37, %v1310_v32  ;;  %v4630_v17 = vld [vmem:[%s5728_s1] sm:$0xff]   ;;  %v2196_v2 = vshll.u32 %v4624_v55, 16  ;;  %v4406_v29 = vpack.c.bf16 %v326_v25, %v326_v25  ;;  %v609_v32 = vshll.u32 %v4405_v3, 16 }
  0xb4   : > { %v3185_v45 = vpop.permute.xlu0 %3184  ;;  %2801 = vst.msk [vmem:[#allocation3 + $0x8] sm:$0xff] %vm2799_vm2, %v5107_v53  ;;  %2800 = vst.msk [vmem:[#allocation3] sm:$0xff] %vm2799_vm2, %v5087_v39  ;;  %v4633_v53 = vld [vmem:[#allocation2 + $0x24] sm:$0xff]   ;;  %4436 = vmatprep.subr.bf16.mxu0 %v4630_v17  ;;  %4474 = vmatprep.subr.bf16.mxu1 %v4630_v17  ;;  %v4639_v33 = vld [vmem:[%s5728_s1 + $0x10] ss:$0 sps:$4 sm:$0x33]  }
  0xb5   : > { %3234 = vst.msk [vmem:[#allocation3 + $0x8] sm:$0xff] %vm3232_vm4, %v5151_v63  ;;  %3233 = vst.msk [vmem:[#allocation3] sm:$0xff] %vm3232_vm4, %v3185_v45  ;;  %v4635_v39 = vld [vmem:[%s5728_s1 + $0x8] sm:$0xff]   ;;  %v2198_v16 = vrot.slane %v2196_v2, 1  ;;  %4437 = vmatpush3.bf16.msra.mxu0 %v4630_v17  ;;  %4477 = vmatpush3.bf16.msra.mxu1 %v4630_v17  ;;  %v614_v35 = vshrl.u32 %v4406_v29, 16  ;;  %v617_v34 = vshll.u32 %v4406_v29, 16 }
  0xb6   : > { %1400 = vrot.lane.b32.xlu1 %v1299_v44, %s4754_s21  ;;  %3523 = vst.msk [vmem:[#allocation3 + $0x8] sm:$0xff] %vm5733_vm6, %v5146_v49  ;;  %3522 = vst.msk [vmem:[#allocation3] sm:$0xff] %vm5733_vm6, %v5139_v21  ;;  %v1681_v60 = vpop.permute.xlu1 %1680  ;;  %v4629_v63 = vld [vmem:[#allocation2 + $0x74] ss:$0 sps:$4 sm:$0x11]   ;;  %v2549_v21 = vrot.slane %v4628_v62, 1  ;;  %4438 = vmatprep.subr.bf16.mxu0 %v4635_v39 }
  0xb7   : > { %1867 = vrot.lane.b32.xlu0 %v4620_v54, %s4752_s19  ;;  %1002 = vst.msk [vmem:[#allocation3 + $0x18] sm:$0xff] %vm998_vm11, %v4633_v53  ;;  %v2550_v5 = vrot.slane %v4629_v63, 1  ;;  %4475 = vmatprep.subr.bf16.mxu1 %v4635_v39  ;;  %v2199_v50 = vsel %vm1191_vm10, %v2194_v4, %v2198_v16  ;;  %v2205_v43 = vrot.slane %v2203_v24, 1  ;;  %v2552_v45 = vrot.slane %v5219_v27, 1  ;;  %v4642_v55 = vld [vmem:[#allocation2 + $0x78] sm:$0xfe]  }
  0xb8   : > { %v1679_v56 = vpop.permute.xlu0 %1678  ;;  %1436 = vst.msk [vmem:[#allocation3 + $0x18] sm:$0xff] %vm5732_vm12, %v1391_v46  ;;  %vm3574_vm12 = vcmask 293888   ;;  %v608_v44 = vrot.slane %v606_v61, 7  ;;  %v616_v46 = vrot.slane %v614_v35, 7  ;;  %v3089_v47 = vshrl.u32 %v4637_v26, 16  ;;  %v327_v29 = vld [vmem:[%s4817_s17 + $0xb0] sm:$0xff] }
  0xb9   : > { %1725 = vst.msk [vmem:[#allocation3 + $0x10] sm:$0xff] %vm5731_vm13, %v1679_v56  ;;  %1726 = vst.msk [vmem:[#allocation3 + $0x18] sm:$0xff] %vm5731_vm13, %v1681_v60  ;;  %v2551_v13 = vsel %vm1625_vm9, %v2549_v21, %v2550_v5  ;;  %4439 = vmatpush3.bf16.msra.mxu0 %v4635_v39  ;;  %4478 = vmatpush3.bf16.msra.mxu1 %v4635_v39  ;;  %vm3623_vm13 = vcmask 1041408   ;;  %v4626_v54 = vld [vmem:[#allocation2 + $0x80] ss:$0 sps:$4 sm:$0x11]   ;;  %v2206_v57 = vor.u32 %v2205_v43, %v2201_v40 }
  0xba   : > { %1402 = vrot.lane.b32.xlu1 %v1311_v22, %s4754_s21  ;;  %v1858_v19 = vpop.permute.xlu1 %1857  ;;  %4480 = vmatprep.subr.msk.bf16.mxu0 %vm3623_vm13, %v4639_v33  ;;  %v3625_v37 = vsel %vm3623_vm13, %v4639_v33, 0  ;;  %v611_v8 = vor.u32 %v609_v32, %v608_v44  ;;  %v612_v52 = vrot.slane %v608_v44, 4  ;;  %v4632_v56 = vld [vmem:[#allocation2 + $0x80] ss:$0 sps:$4 sm:$0x11]   ;;  %v619_v22 = vor.u32 %v617_v34, %v616_v46 }
  0xbb   : > { %2300 = vrot.lane.b32.xlu0 %v2199_v50, %s4757_s24  ;;  %1903 = vst.msk [vmem:[#allocation3 + $0x18] sm:$0xff] %vm1899_vm14, %v1858_v19  ;;  %4481 = vmatprep.subr.msk.bf16.mxu1 %vm3623_vm13, %v4639_v33  ;;  %v2208_v58 = vshll.u32 %v4626_v54, 16  ;;  %v621_v17 = vrot.slane %v616_v46, 4  ;;  %v828_v2 = vld [vmem:[#allocation2 + $0x84] sm:$0xf]  ;;  %v2553_v53 = vrot.slane %v4632_v56, 1  ;;  %v3094_v63 = vor.u32 %v3093_v48, %v3089_v47 }
  0xbc   : > { %v1856_v49 = vpop.permute.xlu0 %1855  ;;  %v620_v59 = vsel %vm4834_vm7, %v612_v52, %v619_v22  ;;  %v829_v39 = vsel %vm4842_vm8, %v611_v8, %v828_v2  ;;  %v4638_v60 = vld [vmem:[#allocation2 + $0x80] ss:$0 sps:$4 sm:$0x11]   ;;  %v3449_v50 = vrot.slane %v4642_v55, 1  ;;  %v1315_v10 = vshll.u32 %v5241_v30, 16 }
  0xbd   : > { %1902 = vst.msk [vmem:[#allocation3 + $0x10] sm:$0xff] %vm1899_vm14, %v1856_v49  ;;  %4441 = vmatpush3.bf16.msra.mxu0 %v3625_v37  ;;  %v3538_v51 = vld [vmem:[#allocation3] sm:$0xff]  ;;  %4479 = vmatpush3.bf16.msra.mxu1 %v3625_v37  ;;  %v2210_v16 = vrot.slane %v2208_v58, 1  ;;  %830 = vst [vmem:[#allocation2 + $0x84] sm:$0xf] %v829_v39  ;;  %v3096_v49 = vshll.u32 %v4638_v60, 16  ;;  %v2554_v14 = vsel %vm1625_vm9, %v2552_v45, %v2553_v53 }
  0xbe   : > { %1692 = vrot.lane.b32.xlu1 %v1655_v1, %s4751_s18  ;;  %4442 = vmatprep.mubr.msk.bf16.mxu0 %vm3574_vm12, %v3538_v51  ;;  %831 = vst.msk [vmem:[#allocation2 + $0x88] sm:$0xf] %vm183_vm0, %v620_v59  ;;  %v4643_v62 = vld [vmem:[#allocation2 + $0x80] ss:$0 sps:$4 sm:$0x11]   ;;  %v1313_v25 = vshrl.u32 %v5241_v30, 16  ;;  %v4407_v43 = vpack.c.bf16 %v327_v29, %v327_v29  ;;  %v4408_v58 = vpack.c.bf16 %v328_v42, %v328_v42 }
  0xbf   : > { %2589 = vrot.lane.b32.xlu0 %v2551_v13, %s4755_s22  ;;  %v832_v1 = vld [vmem:[#allocation2 + $0x8c] sm:$0x1]  ;;  %v2211_v21 = vsel %vm1191_vm10, %v2206_v57, %v2210_v16  ;;  %v3098_v12 = vrot.slane %v3096_v49, 1  ;;  %v3450_v13 = vrot.slane %v4643_v62, 1  ;;  %v231_v24 = vld [vmem:[#allocation2 + $0x90] sm:$0x1] }
  0xc0   : > { %v2289_v11 = vpop.permute.xlu0 %2288  ;;  %v833_v5 = vsel %vm4789_vm3, %v621_v17, %v832_v1  ;;  %v4651_v23 = vld [vmem:[#allocation2 + $0x80] ss:$0 sps:$4 sm:$0x11]   ;;  %v1317_v3 = vrot.slane %v1315_v10, 1  ;;  %v623_v55 = vshrl.u32 %v4407_v43, 16  ;;  %vm5742_vm13 = vcmask 64544  }
  0xc1   : > { %2335 = vst.msk [vmem:[#allocation3 + $0x10] sm:$0xff] %vm2332_vm15, %v2289_v11  ;;  %v3539_v11 = vld [vmem:[#allocation3 + $0x8] sm:$0xff]  ;;  %834 = vst [vmem:[#allocation2 + $0x8c] sm:$0x1] %v833_v5  ;;  %v3099_v19 = vsel %vm1191_vm10, %v3094_v63, %v3098_v12  ;;  %v3451_v61 = vsel %vm1625_vm9, %v3449_v50, %v3450_v13  ;;  %v1657_v35 = vrot.slane %v4651_v23, 1  ;;  %v626_v13 = vshll.u32 %v4407_v43, 16 }
  0xc2   : > { %1869 = vrot.lane.b32.xlu1 %v4621_v9, %s4752_s19  ;;  %v4645_v9 = vld [vmem:[#allocation2 + $0x80] ss:$0 sps:$4 sm:$0x11]   ;;  %4443 = vmatmul.mubr.msk.bf16.vlgmr.msra.gmra.mrb[0].mxu0 %vm3574_vm12, %v3539_v11  ;;  %v1318_v48 = vor.u32 %v1317_v3, %v1313_v25  ;;  %v287_v39 = vld [vmem:[#allocation2 + $0x98] sm:$0x1] }
  0xc3   : > { %2767 = vrot.lane.b32.xlu0 %v4634_v18, %s4753_s20  ;;  %v2291_v4 = vpop.permute.xlu1 %2290  ;;  %v1320_v27 = vshll.u32 %v4645_v9, 16  ;;  %v5256_v18 = vld [vmem:[#allocation2 + $0x78] sm:$0xfe]   ;;  %v329_v42 = vld [vmem:[%s4817_s17 + $0xc0] sm:$0xff] }
  0xc4   : > { %v2578_v28 = vpop.permute.xlu0 %2577  ;;  %2336 = vst.msk [vmem:[#allocation3 + $0x18] sm:$0xff] %vm2332_vm15, %v2291_v4  ;;  %v1656_v32 = vrot.slane %v5256_v18, 1  ;;  %v4665_v25 = vld [vmem:[#allocation2 + $0x3c] sm:$0xff]  }
  0xc5   : > { %2624 = vst.msk [vmem:[#allocation3 + $0x10] sm:$0xff] %vm2621_vm1, %v2578_v28  ;;  %v1322_v26 = vrot.slane %v1320_v27, 1  ;;  %v232_v28 = vsel %vm4789_vm3, 0, %v231_v24  ;;  %v4636_v40 = vld [vmem:[#allocation2 + $0x84] sm:$0xff]  }
  0xc6   : > { %2302 = vrot.lane.b32.xlu1 %v2211_v21, %s4757_s24  ;;  %233 = vst [vmem:[#allocation2 + $0x90] sm:$0x1] %v232_v28  ;;  %v4640_v33 = vld [vmem:[#allocation2 + $0x84] sm:$0xff]   ;;  %v1658_v4 = vsel %vm1625_vm9, %v1656_v32, %v1657_v35  ;;  %v625_v21 = vrot.slane %v623_v55, 7  ;;  %1004 = vst.msk [vmem:[#allocation3 + $0x28] sm:$0xff] %vm998_vm11, %v4665_v25 }
  0xc7   : > { %v2580_v20 = vpop.permute.xlu1 %2579  ;;  %3200 = vrot.lane.b32.xlu0 %v3099_v19, %s4758_s25  ;;  %v4646_v34 = vld [vmem:[#allocation2 + $0x84] sm:$0xfe]   ;;  %v3101_v37 = vshrl.u32 %v4640_v33, 16  ;;  %v1323_v60 = vsel %vm1191_vm10, %v1318_v48, %v1322_v26  ;;  %v631_v19 = vshrl.u32 %v4408_v58, 16 }
  0xc8   : > { %v2756_v41 = vpop.permute.xlu0 %2755  ;;  %2625 = vst.msk [vmem:[#allocation3 + $0x18] sm:$0xff] %vm2621_vm1, %v2580_v20  ;;  %v4641_v44 = vld [vmem:[#allocation2 + $0x8c] ss:$0 sps:$4 sm:$0x11]   ;;  %v3452_v51 = vrot.slane %v4646_v34, 1  ;;  %v4648_v52 = vld [vmem:[#allocation2 + $0x84] sm:$0xff]   ;;  %v628_v24 = vor.u32 %v626_v13, %v625_v21 }
  0xc9   : > { %2802 = vst.msk [vmem:[#allocation3 + $0x10] sm:$0xff] %vm2799_vm2, %v2756_v41  ;;  %v3103_v41 = vshll.u32 %v4640_v33, 16  ;;  %v4647_v46 = vld [vmem:[#allocation2 + $0x8c] ss:$0 sps:$4 sm:$0x11]   ;;  %v3108_v47 = vshll.u32 %v4641_v44, 16 }
  0xca   : > { %2591 = vrot.lane.b32.xlu1 %v2554_v14, %s4755_s22  ;;  %v3453_v8 = vrot.slane %v4647_v46, 1  ;;  %v4649_v57 = vld [vmem:[#allocation2 + $0x8c] ss:$0 sps:$4 sm:$0x11]   ;;  %v1325_v53 = vshrl.u32 %v4648_v52, 16  ;;  %v1327_v59 = vshll.u32 %v4648_v52, 16 }
  0xcb   : > { %v2758_v38 = vpop.permute.xlu1 %2757  ;;  %3489 = vrot.lane.b32.xlu0 %v3451_v61, %s4756_s23  ;;  %v3105_v54 = vrot.slane %v3103_v41, 1  ;;  %v3110_v30 = vrot.slane %v3108_v47, 1  ;;  %v1332_v16 = vshll.u32 %v4649_v57, 16  ;;  %v4652_v62 = vld [vmem:[#allocation2 + $0x84] sm:$0xfe]   ;;  %v629_v18 = vrot.slane %v625_v21, 4 }
  0xcc   : > { %v3189_v7 = vpop.permute.xlu0 %3188  ;;  %2803 = vst.msk [vmem:[#allocation3 + $0x18] sm:$0xff] %vm2799_vm2, %v2758_v38  ;;  %v3454_v2 = vsel %vm1625_vm9, %v3452_v51, %v3453_v8  ;;  %v4653_v63 = vld [vmem:[#allocation2 + $0x8c] ss:$0 sps:$4 sm:$0x11]   ;;  %v1329_v1 = vrot.slane %v1327_v59, 1  ;;  %v1659_v10 = vrot.slane %v4652_v62, 1 }
  0xcd   : > { %3235 = vst.msk [vmem:[#allocation3 + $0x10] sm:$0xff] %vm3232_vm4, %v3189_v7  ;;  %v3106_v17 = vor.u32 %v3105_v54, %v3101_v37  ;;  %v1334_v9 = vrot.slane %v1332_v16, 1  ;;  %v1660_v11 = vrot.slane %v4653_v63, 1  ;;  %v4654_v12 = vld [vmem:[#allocation2 + $0x84] sm:$0xff]   ;;  %v835_v14 = vld [vmem:[#allocation2 + $0x90] sm:$0xf] }
  0xce   : > { %2769 = vrot.lane.b32.xlu1 %v4636_v40, %s4753_s20  ;;  %v1330_v27 = vor.u32 %v1329_v1, %v1325_v53  ;;  %v634_v20 = vshll.u32 %v4408_v58, 16  ;;  %v4656_v23 = vld [vmem:[#allocation2 + $0x84] sm:$0xff]   ;;  %v288_v7 = vsel %vm4808_vm5, 0, %v287_v39  ;;  %v633_v3 = vrot.slane %v631_v19, 7  ;;  %v234_v8 = vld [vmem:[#allocation2 + $0x9c] sm:$0x1] }
  0xcf   : > { %v3191_v56 = vpop.permute.xlu1 %3190  ;;  %3491 = vrot.lane.b32.xlu0 %v3454_v2, %s4756_s23  ;;  %v3111_v49 = vsel %vm1191_vm10, %v3106_v17, %v3110_v30  ;;  %v4657_v26 = vld [vmem:[#allocation2 + $0x8c] ss:$0 sps:$4 sm:$0x11]   ;;  %v2213_v28 = vshrl.u32 %v4656_v23, 16  ;;  %v2215_v29 = vshll.u32 %v4656_v23, 16  ;;  %v836_v32 = vsel %vm4842_vm8, %v628_v24, %v835_v14  ;;  %v331_v19 = vld [vmem:[%s4817_s17 + $0xd0] sm:$0xff] }
  0xd0   : > { %v3478_v45 = vpop.permute.xlu0 %3477  ;;  %3236 = vst.msk [vmem:[#allocation3 + $0x18] sm:$0xff] %vm3232_vm4, %v3191_v56  ;;  %289 = vst [vmem:[#allocation2 + $0x98] sm:$0x1] %v288_v7  ;;  %v1335_v61 = vsel %vm1191_vm10, %v1330_v27, %v1334_v9  ;;  %v636_v33 = vor.u32 %v634_v20, %v633_v3  ;;  %v638_v35 = vrot.slane %v633_v3, 4  ;;  %v2220_v38 = vshll.u32 %v4657_v26, 16  ;;  %v330_v52 = vld [vmem:[%s4817_s17 + $0xc8] sm:$0xff] }
  0xd1   : > { %3524 = vst.msk [vmem:[#allocation3 + $0x10] sm:$0xff] %vm5733_vm6, %v3478_v45  ;;  %837 = vst [vmem:[#allocation2 + $0x90] sm:$0xf] %v836_v32  ;;  %v2217_v34 = vrot.slane %v2215_v29, 1  ;;  %v4661_v43 = vld [vmem:[#allocation2 + $0x84] sm:$0xfe]   ;;  %v4409_v45 = vpack.c.bf16 %v329_v42, %v329_v42  ;;  %v1661_v51 = vsel %vm1625_vm9, %v1659_v10, %v1660_v11  ;;  %v4410_v57 = vpack.c.bf16 %v330_v52, %v330_v52 }
  0xd2   : > { %3202 = vrot.lane.b32.xlu1 %v3111_v49, %s4758_s25  ;;  %v637_v44 = vsel %vm4834_vm7, %v629_v18, %v636_v33  ;;  %v2222_v41 = vrot.slane %v2220_v38, 1  ;;  %v4662_v46 = vld [vmem:[#allocation2 + $0x8c] ss:$0 sps:$4 sm:$0x11]   ;;  %v2555_v54 = vrot.slane %v4661_v43, 1  ;;  %v235_v30 = vsel %vm4789_vm3, 0, %v234_v8 }
  0xd3   : > { %v1393_v5 = vpop.permute.xlu1 %1392  ;;  %1694 = vrot.lane.b32.xlu0 %v1658_v4, %s4751_s18  ;;  %v2218_v37 = vor.u32 %v2217_v34, %v2213_v28  ;;  %838 = vst.msk [vmem:[#allocation2 + $0x94] sm:$0xf] %vm183_vm0, %v637_v44  ;;  %v640_v55 = vshrl.u32 %v4409_v45, 16  ;;  %v290_v17 = vld [vmem:[#allocation2 + $0xa4] sm:$0x1]  ;;  %v643_v39 = vshll.u32 %v4409_v45, 16  ;;  %v5334_v38 = vpack.c.bf16 %v331_v19, %v331_v19 }
  0xd4   : > { %v3480_v22 = vpop.permute.xlu0 %3479  ;;  %1437 = vst.msk [vmem:[#allocation3 + $0x20] sm:$0xff] %vm5742_vm13, %v1393_v5  ;;  %236 = vst [vmem:[#allocation2 + $0x9c] sm:$0x1] %v235_v30  ;;  %v648_v63 = vshrl.u32 %v4410_v57, 16  ;;  %v651_v49 = vshll.u32 %v4410_v57, 16 }
  0xd5   : > { %3525 = vst.msk [vmem:[#allocation3 + $0x18] sm:$0xff] %vm5733_vm6, %v3480_v22  ;;  %vm5743_vm6 = vcmask 97344   ;;  %v2223_v56 = vsel %vm1191_vm10, %v2218_v37, %v2222_v41  ;;  %v2556_v22 = vrot.slane %v4662_v46, 1  ;;  %v642_v59 = vrot.slane %v640_v55, 7  ;;  %v237_v21 = vld [vmem:[#allocation2 + $0xa8] sm:$0x1] }
  0xd6   : > { %1404 = vrot.lane.b32.xlu1 %v1323_v60, %s4754_s21  ;;  %v291_v60 = vsel %vm4808_vm5, 0, %v290_v17  ;;  %v238_v18 = vsel %vm4789_vm3, 0, %v237_v21  ;;  %v4690_v46 = vld [vmem:[#allocation2 + $0x48] sm:$0xff]   ;;  %v657_v57 = vshrl.u32 %v5334_v38, 16 }
  0xd7   : > { %v1395_v15 = vpop.permute.xlu1 %1394  ;;  %1871 = vrot.lane.b32.xlu0 %v4654_v12, %s4752_s19  ;;  %v839_v53 = vld [vmem:[#allocation2 + $0x98] sm:$0x1]  ;;  %v2557_v62 = vsel %vm1625_vm9, %v2555_v54, %v2556_v22  ;;  %292 = vst [vmem:[#allocation2 + $0xa4] sm:$0x1] %v291_v60  ;;  %v646_v5 = vrot.slane %v642_v59, 4  ;;  %v645_v9 = vor.u32 %v643_v39, %v642_v59  ;;  %1005 = vst.msk [vmem:[#allocation3 + $0x30] sm:$0xff] %vm998_vm11, %v4690_v46 }
  0xd8   : > { %v1683_v50 = vpop.permute.xlu0 %1682  ;;  %v3540_v58 = vld [vmem:[#allocation3 + $0x10] sm:$0xff]  ;;  %v840_v16 = vsel %vm4789_vm3, %v638_v35, %v839_v53  ;;  %239 = vst [vmem:[#allocation2 + $0xa8] sm:$0x1] %v238_v18 }
  0xd9   : > { %1727 = vst.msk [vmem:[#allocation3 + $0x20] sm:$0xff] %vm5743_vm6, %v1683_v50  ;;  %vm5744_vm6 = vmmov %vm5742_vm13  ;;  %vm5745_vm13 = vcmask 97344   ;;  %4446 = vmatprep.mubr.msk.bf16.mxu0 %vm3574_vm12, %v3540_v58  ;;  %v650_v50 = vrot.slane %v648_v63, 7 }
  0xda   : > { %1438 = vst.msk [vmem:[#allocation3 + $0x28] sm:$0xff] %vm5744_vm6, %v1395_v15  ;;  %1406 = vrot.lane.b32.xlu1 %v1335_v61, %s4754_s21  ;;  %841 = vst [vmem:[#allocation2 + $0x98] sm:$0x1] %v840_v16  ;;  %v4655_v10 = vld [vmem:[#allocation2 + $0x90] sm:$0xff]   ;;  %vm5746_vm6 = vcmask 294144  }
  0xdb   : > { %v1685_v47 = vpop.permute.xlu1 %1684  ;;  %2304 = vrot.lane.b32.xlu0 %v2223_v56, %s4757_s24  ;;  %v653_v11 = vor.u32 %v651_v49, %v650_v50  ;;  %v4658_v14 = vld [vmem:[#allocation2 + $0x90] sm:$0xff]   ;;  %v842_v24 = vld [vmem:[#allocation2 + $0x9c] sm:$0xf]  ;;  %v655_v3 = vrot.slane %v650_v50, 4 }
  0xdc   : > { %v1860_v40 = vpop.permute.xlu0 %1859  ;;  %1728 = vst.msk [vmem:[#allocation3 + $0x28] sm:$0xff] %vm5745_vm13, %v1685_v47  ;;  %v3541_v2 = vld [vmem:[#allocation3 + $0x18] sm:$0xff]  ;;  %v2225_v7 = vshrl.u32 %v4658_v14, 16  ;;  %v2227_v25 = vshll.u32 %v4658_v14, 16  ;;  %v843_v26 = vsel %vm4842_vm8, %v645_v9, %v842_v24  ;;  %v332_v50 = vld [vmem:[%s4817_s17 + $0xd8] sm:$0xff]  ;;  %vm5747_vm13 = vmmov %vm5746_vm6 }
  0xdd   : > { %1904 = vst.msk [vmem:[#allocation3 + $0x20] sm:$0xff] %vm1899_vm14, %v1860_v40  ;;  %4447 = vmatmul.mubr.msk.bf16.gmra.mrb[4].mxu0 %vm3574_vm12, %v3541_v2  ;;  %v4663_v27 = vld [vmem:[#allocation2 + $0x90] sm:$0xfe]   ;;  %v654_v23 = vsel %vm4834_vm7, %v646_v5, %v653_v11  ;;  %844 = vst [vmem:[#allocation2 + $0x9c] sm:$0xf] %v843_v26 }
  0xde   : > { %1696 = vrot.lane.b32.xlu1 %v1661_v51, %s4751_s18  ;;  %v4666_v20 = vld [vmem:[#allocation2 + $0x90] sm:$0xff]   ;;  %845 = vst.msk [vmem:[#allocation2 + $0xa0] sm:$0xf] %vm183_vm0, %v654_v23  ;;  %v2558_v15 = vrot.slane %v4663_v27, 1  ;;  %v2229_v32 = vrot.slane %v2227_v25, 1 }
  0xdf   : > { %v1862_v1 = vpop.permute.xlu1 %1861  ;;  %2593 = vrot.lane.b32.xlu0 %v2557_v62, %s4755_s22  ;;  %v4668_v28 = vld [vmem:[#allocation2 + $0x90] sm:$0xff]   ;;  %v846_v37 = vld [vmem:[#allocation2 + $0xa4] sm:$0x1] }
  0xe0   : > { %v2293_v48 = vpop.permute.xlu0 %2292  ;;  %1905 = vst.msk [vmem:[#allocation3 + $0x28] sm:$0xff] %vm1899_vm14, %v1862_v1  ;;  %v2230_v42 = vor.u32 %v2229_v32, %v2225_v7  ;;  %v3113_v45 = vshrl.u32 %v4668_v28, 16  ;;  %v3115_v44 = vshll.u32 %v4668_v28, 16  ;;  %v4674_v41 = vld [vmem:[#allocation2 + $0x90] sm:$0xff]   ;;  %v847_v51 = vsel %vm4789_vm3, %v655_v3, %v846_v37 }
  0xe1   : > { %2337 = vst.msk [vmem:[#allocation3 + $0x20] sm:$0xff] %vm2332_vm15, %v2293_v48  ;;  %v4659_v29 = vld [vmem:[#allocation2 + $0x98] ss:$0 sps:$4 sm:$0x11]   ;;  %848 = vst [vmem:[#allocation2 + $0xa4] sm:$0x1] %v847_v51  ;;  %v4412_v28 = vpack.c.bf16 %v332_v50, %v332_v50 }
  0xe2   : > { %1873 = vrot.lane.b32.xlu1 %v4655_v10, %s4752_s19  ;;  %v4664_v33 = vld [vmem:[#allocation2 + $0x98] ss:$0 sps:$4 sm:$0x11]   ;;  %v2232_v35 = vshll.u32 %v4659_v29, 16  ;;  %v3117_v52 = vrot.slane %v3115_v44, 1  ;;  %v1337_v2 = vshrl.u32 %v4674_v41, 16 }
  0xe3   : > { %v2295_v12 = vpop.permute.xlu1 %2294  ;;  %2771 = vrot.lane.b32.xlu0 %v4666_v20, %s4753_s20  ;;  %v4669_v34 = vld [vmem:[#allocation2 + $0x98] ss:$0 sps:$4 sm:$0x11]   ;;  %v2559_v43 = vrot.slane %v4664_v33, 1  ;;  %v4672_v55 = vld [vmem:[#allocation2 + $0x90] sm:$0xfe]  }
  0xe4   : > { %v2582_v4 = vpop.permute.xlu0 %2581  ;;  %2338 = vst.msk [vmem:[#allocation3 + $0x28] sm:$0xff] %vm2332_vm15, %v2295_v12  ;;  %v2234_v47 = vrot.slane %v2232_v35, 1  ;;  %v3120_v48 = vshll.u32 %v4669_v34, 16  ;;  %v4673_v56 = vld [vmem:[#allocation2 + $0x98] ss:$0 sps:$4 sm:$0x11]   ;;  %v3118_v58 = vor.u32 %v3117_v52, %v3113_v45 }
  0xe5   : > { %2626 = vst.msk [vmem:[#allocation3 + $0x20] sm:$0xff] %vm2621_vm1, %v2582_v4  ;;  %v3455_v17 = vrot.slane %v4672_v55, 1  ;;  %v2560_v53 = vsel %vm1625_vm9, %v2558_v15, %v2559_v43  ;;  %v4670_v59 = vld [vmem:[#allocation2 + $0x9c] sm:$0xff]   ;;  %v3456_v39 = vrot.slane %v4673_v56, 1  ;;  %v1339_v1 = vshll.u32 %v4674_v41, 16 }
  0xe6   : > { %v2235_v22 = vsel %vm1191_vm10, %v2230_v42, %v2234_v47  ;;  %v3122_v30 = vrot.slane %v3120_v48, 1  ;;  %v4667_v62 = vld [vmem:[#allocation2 + $0x9c] sm:$0xff]   ;;  %v4675_v49 = vld [vmem:[#allocation2 + $0x98] ss:$0 sps:$4 sm:$0x11]   ;;  %v3125_v4 = vshrl.u32 %v4670_v59, 16 }
  0xe7   : > { %v2584_v40 = vpop.permute.xlu1 %2583  ;;  %2306 = vrot.lane.b32.xlu1 %v2235_v22, %s4757_s24  ;;  %v3127_v21 = vshll.u32 %v4670_v59, 16  ;;  %v4676_v5 = vld [vmem:[#allocation2 + $0x9c] sm:$0xfe]   ;;  %v3457_v9 = vsel %vm1625_vm9, %v3455_v17, %v3456_v39  ;;  %v1341_v10 = vrot.slane %v1339_v1, 1  ;;  %v1344_v11 = vshll.u32 %v4675_v49, 16 }
  0xe8   : > { %v2760_v13 = vpop.permute.xlu0 %2759  ;;  %2627 = vst.msk [vmem:[#allocation3 + $0x28] sm:$0xff] %vm2621_vm1, %v2584_v40  ;;  %v3123_v63 = vsel %vm1191_vm10, %v3118_v58, %v3122_v30  ;;  %v4671_v12 = vld [vmem:[#allocation2 + $0xa4] ss:$0 sps:$4 sm:$0x11]   ;;  %v3458_v24 = vrot.slane %v4676_v5, 1  ;;  %v4678_v7 = vld [vmem:[#allocation2 + $0x9c] sm:$0xff]  }
  0xe9   : > { %2804 = vst.msk [vmem:[#allocation3 + $0x20] sm:$0xff] %vm2799_vm2, %v2760_v13  ;;  %3204 = vrot.lane.b32.xlu0 %v3123_v63, %s4758_s25  ;;  %v3129_v13 = vrot.slane %v3127_v21, 1  ;;  %v4677_v18 = vld [vmem:[#allocation2 + $0xa4] ss:$0 sps:$4 sm:$0x11]   ;;  %v3132_v20 = vshll.u32 %v4671_v12, 16  ;;  %v1342_v25 = vor.u32 %v1341_v10, %v1337_v2 }
  0xea   : > { %v1346_v23 = vrot.slane %v1344_v11, 1  ;;  %v3459_v3 = vrot.slane %v4677_v18, 1  ;;  %v4679_v26 = vld [vmem:[#allocation2 + $0xa4] ss:$0 sps:$4 sm:$0x11]   ;;  %v1349_v15 = vshrl.u32 %v4678_v7, 16 }
  0xeb   : > { %v2762_v54 = vpop.permute.xlu1 %2761  ;;  %2595 = vrot.lane.b32.xlu1 %v2560_v53, %s4755_s22  ;;  %v3130_v19 = vor.u32 %v3129_v13, %v3125_v4  ;;  %v3134_v29 = vrot.slane %v3132_v20, 1  ;;  %v1351_v40 = vshll.u32 %v4678_v7, 16  ;;  %v1356_v35 = vshll.u32 %v4679_v26, 16  ;;  %v4680_v34 = vld [vmem:[#allocation2 + $0x90] sm:$0xfe]   ;;  %v4684_v55 = vld [vmem:[#allocation2 + $0x9c] sm:$0xff]  }
  0xec   : > { %v3193_v61 = vpop.permute.xlu0 %3192  ;;  %2805 = vst.msk [vmem:[#allocation3 + $0x28] sm:$0xff] %vm2799_vm2, %v2762_v54  ;;  %v3460_v33 = vsel %vm1625_vm9, %v3458_v24, %v3459_v3  ;;  %v4681_v42 = vld [vmem:[#allocation2 + $0x98] ss:$0 sps:$4 sm:$0x11]   ;;  %v660_v37 = vshll.u32 %v5334_v38, 16  ;;  %v1662_v46 = vrot.slane %v4680_v34, 1  ;;  %v1347_v51 = vsel %vm1191_vm10, %v1342_v25, %v1346_v23 }
  0xed   : > { %3237 = vst.msk [vmem:[#allocation3 + $0x20] sm:$0xff] %vm3232_vm4, %v3193_v61  ;;  %3493 = vrot.lane.b32.xlu0 %v3457_v9, %s4756_s23  ;;  %v659_v61 = vrot.slane %v657_v57, 7  ;;  %v3135_v45 = vsel %vm1191_vm10, %v3130_v19, %v3134_v29  ;;  %v1353_v44 = vrot.slane %v1351_v40, 1  ;;  %v1358_v41 = vrot.slane %v1356_v35, 1  ;;  %v293_v30 = vld [vmem:[#allocation2 + $0xb0] sm:$0x1] }
  0xee   : > { %v1663_v47 = vrot.slane %v4681_v42, 1  ;;  %v4683_v52 = vld [vmem:[#allocation2 + $0xa4] ss:$0 sps:$4 sm:$0x11]   ;;  %v665_v22 = vshrl.u32 %v4412_v28, 16  ;;  %v668_v17 = vshll.u32 %v4412_v28, 16 }
  0xef   : > { %v3195_v60 = vpop.permute.xlu1 %3194  ;;  %2773 = vrot.lane.b32.xlu1 %v4667_v62, %s4753_s20  ;;  %v663_v48 = vrot.slane %v659_v61, 4  ;;  %v1354_v54 = vor.u32 %v1353_v44, %v1349_v15  ;;  %v662_v56 = vor.u32 %v660_v37, %v659_v61  ;;  %v4686_v38 = vld [vmem:[#allocation2 + $0x9c] sm:$0xff]   ;;  %v1666_v53 = vrot.slane %v4683_v52, 1  ;;  %v849_v39 = vld [vmem:[#allocation2 + $0xa8] sm:$0xf]  ;;  %v335_v44 = vld [vmem:[%s4817_s17 + $0xf0] sm:$0xff] }
  0xf0   : > { %v3482_v8 = vpop.permute.xlu0 %3481  ;;  %3238 = vst.msk [vmem:[#allocation3 + $0x28] sm:$0xff] %vm3232_vm4, %v3195_v60  ;;  %v1664_v58 = vsel %vm1625_vm9, %v1662_v46, %v1663_v47  ;;  %v5366_v59 = vrot.slane %v665_v22, 7  ;;  %v4695_v60 = vld [vmem:[#allocation2 + $0x54] sm:$0xff]   ;;  %v4687_v1 = vld [vmem:[#allocation2 + $0xa4] ss:$0 sps:$4 sm:$0x11]   ;;  %v5401_v47 = vpack.c.bf16 %v335_v44, %v335_v44 }
  0xf1   : > { %3526 = vst.msk [vmem:[#allocation3 + $0x20] sm:$0xff] %vm5746_vm6, %v3482_v8  ;;  %vm5748_vm6 = vcmask 64544   ;;  %3495 = vrot.lane.b32.xlu0 %v3460_v33, %s4756_s23  ;;  %v4682_v8 = vld [vmem:[#allocation2 + $0x9c] sm:$0xfe]   ;;  %v1359_v63 = vsel %vm1191_vm10, %v1354_v54, %v1358_v41  ;;  %v2237_v4 = vshrl.u32 %v4686_v38, 16  ;;  %v2239_v21 = vshll.u32 %v4686_v38, 16 }
  0xf2   : > { %v1665_v2 = vrot.slane %v4682_v8, 1  ;;  %v670_v49 = vor.u32 %v668_v17, %v5366_v59  ;;  %1006 = vst.msk [vmem:[#allocation3 + $0x38] sm:$0xff] %vm998_vm11, %v4695_v60  ;;  %v333_v5 = vld [vmem:[%s4817_s17 + $0xe0] sm:$0xff]  ;;  %v294_v9 = vsel %vm4808_vm5, 0, %v293_v30  ;;  %v672_v10 = vrot.slane %v5366_v59, 4  ;;  %v334_v25 = vld [vmem:[%s4817_s17 + $0xe8] sm:$0xff] }
  0xf3   : > { %v1397_v14 = vpop.permute.xlu1 %1396  ;;  %3206 = vrot.lane.b32.xlu1 %v3135_v45, %s4758_s25  ;;  %v4413_v11 = vpack.c.bf16 %v333_v5, %v333_v5  ;;  %v2241_v13 = vrot.slane %v2239_v21, 1  ;;  %295 = vst [vmem:[#allocation2 + $0xb0] sm:$0x1] %v294_v9  ;;  %v4692_v23 = vld [vmem:[#allocation2 + $0xa4] ss:$0 sps:$4 sm:$0x11]   ;;  %v4414_v40 = vpack.c.bf16 %v334_v25, %v334_v25 }
  0xf4   : > { %v3484_v16 = vpop.permute.xlu0 %3483  ;;  %1439 = vst.msk [vmem:[#allocation3 + $0x30] sm:$0xff] %vm5748_vm6, %v1397_v14  ;;  %v671_v12 = vsel %vm4834_vm7, %v663_v48, %v670_v49  ;;  %v2244_v14 = vshll.u32 %v4687_v1, 16  ;;  %v1667_v18 = vsel %vm1625_vm9, %v1665_v2, %v1666_v53  ;;  %v240_v7 = vld [vmem:[#allocation2 + $0xb4] sm:$0x1]  ;;  %v2562_v29 = vrot.slane %v4692_v23, 1 }
  0xf5   : > { %3527 = vst.msk [vmem:[#allocation3 + $0x28] sm:$0xff] %vm5747_vm13, %v3484_v16  ;;  %vm5749_vm13 = vcmask 97344   ;;  %1698 = vrot.lane.b32.xlu0 %v1664_v58, %s4751_s18  ;;  %v850_v16 = vsel %vm4842_vm8, %v662_v56, %v849_v39  ;;  %v2242_v19 = vor.u32 %v2241_v13, %v2237_v4  ;;  %v674_v3 = vshrl.u32 %v4413_v11, 16 }
  0xf6   : > { %851 = vst [vmem:[#allocation2 + $0xa8] sm:$0xf] %v850_v16  ;;  %852 = vst.msk [vmem:[#allocation2 + $0xac] sm:$0xf] %vm183_vm0, %v671_v12  ;;  %v2246_v20 = vrot.slane %v2244_v14, 1  ;;  %v677_v26 = vshll.u32 %v4413_v11, 16 }
  0xf7   : > { %v1399_v43 = vpop.permute.xlu1 %1398  ;;  %1408 = vrot.lane.b32.xlu1 %v1347_v51, %s4754_s21  ;;  %v241_v15 = vsel %vm4789_vm3, 0, %v240_v7  ;;  %v676_v42 = vrot.slane %v674_v3, 7  ;;  %v685_v41 = vshll.u32 %v4414_v40, 16  ;;  %v691_v38 = vshrl.u32 %v5401_v47, 16 }
  0xf8   : > { %v1687_v27 = vpop.permute.xlu0 %1686  ;;  %1440 = vst.msk [vmem:[#allocation3 + $0x38] sm:$0xff] %vm5748_vm6, %v1399_v43  ;;  %v2247_v28 = vsel %vm1191_vm10, %v2242_v19, %v2246_v20  ;;  %v3542_v61 = vld [vmem:[#allocation3 + $0x20] sm:$0xff]  ;;  %242 = vst [vmem:[#allocation2 + $0xb4] sm:$0x1] %v241_v15  ;;  %v682_v43 = vshrl.u32 %v4414_v40, 16  ;;  %vm5750_vm6 = vcmask 294144  }
  0xf9   : > { %1729 = vst.msk [vmem:[#allocation3 + $0x30] sm:$0xff] %vm5749_vm13, %v1687_v27  ;;  %1875 = vrot.lane.b32.xlu0 %v4684_v55, %s4752_s19  ;;  %v4691_v27 = vld [vmem:[#allocation2 + $0x9c] sm:$0xfe]   ;;  %4450 = vmatprep.mubr.msk.bf16.mxu0 %vm3574_vm12, %v3542_v61  ;;  %v680_v54 = vrot.slane %v676_v42, 4  ;;  %v679_v55 = vor.u32 %v677_v26, %v676_v42 }
  0xfa   : > { %v2561_v24 = vrot.slane %v4691_v27, 1  ;;  %v853_v37 = vld [vmem:[#allocation2 + $0xb0] sm:$0x1]  ;;  %v684_v56 = vrot.slane %v682_v43, 7 }
  0xfb   : > { %v1689_v62 = vpop.permute.xlu1 %1688  ;;  %1410 = vrot.lane.b32.xlu1 %v1359_v63, %s4754_s21  ;;  %v854_v51 = vsel %vm4789_vm3, %v672_v10, %v853_v37  ;;  %v5419_v10 = vrot.slane %v691_v38, 7 }
  0xfc   : > { %v1864_v32 = vpop.permute.xlu0 %1863  ;;  %1730 = vst.msk [vmem:[#allocation3 + $0x38] sm:$0xff] %vm5749_vm13, %v1689_v62  ;;  %v3543_v35 = vld [vmem:[#allocation3 + $0x28] sm:$0xff]  ;;  %v2563_v34 = vsel %vm1625_vm9, %v2561_v24, %v2562_v29  ;;  %855 = vst [vmem:[#allocation2 + $0xb0] sm:$0x1] %v854_v51  ;;  %v687_v58 = vor.u32 %v685_v41, %v684_v56  ;;  %v689_v53 = vrot.slane %v684_v56, 4  ;;  %v336_v56 = vld [vmem:[%s4817_s17 + $0xf8] sm:$0xff] }
  0xfd   : > { %1906 = vst.msk [vmem:[#allocation3 + $0x30] sm:$0xff] %vm1899_vm14, %v1864_v32  ;;  %v296_v32 = vld [vmem:[#allocation2 + $0xbc] sm:$0x1]  ;;  %2308 = vrot.lane.b32.xlu0 %v2247_v28, %s4757_s24  ;;  %4451 = vmatmul.mubr.msk.bf16.gmra.mrb[8].mxu0 %vm3574_vm12, %v3543_v35  ;;  %v4685_v48 = vld [vmem:[#allocation2 + $0xa8] sm:$0xff]   ;;  %vm5751_vm13 = vmmov %vm5750_vm6 }
  0xfe   : > { %v297_v46 = vsel %vm4808_vm5, 0, %v296_v32  ;;  %v4688_v8 = vld [vmem:[#allocation2 + $0xa8] sm:$0xff]   ;;  %v688_v16 = vsel %vm4834_vm7, %v680_v54, %v687_v58 }
  0xff   : > { %v1866_v33 = vpop.permute.xlu1 %1865  ;;  %1700 = vrot.lane.b32.xlu1 %v1667_v18, %s4751_s18  ;;  %298 = vst [vmem:[#allocation2 + $0xbc] sm:$0x1] %v297_v46  ;;  %v4693_v52 = vld [vmem:[#allocation2 + $0xa8] sm:$0xfe]   ;;  %v2249_v30 = vshrl.u32 %v4688_v8, 16  ;;  %v694_v18 = vshll.u32 %v5401_v47, 16 }
 0x100   : > { %v2297_v57 = vpop.permute.xlu0 %2296  ;;  %1907 = vst.msk [vmem:[#allocation3 + $0x38] sm:$0xff] %vm1899_vm14, %v1866_v33  ;;  %v4696_v22 = vld [vmem:[#allocation2 + $0xa8] sm:$0xff]   ;;  %v856_v2 = vld [vmem:[#allocation2 + $0xb4] sm:$0xf]  ;;  %v2564_v60 = vrot.slane %v4693_v52, 1 }
 0x101   : > { %2339 = vst.msk [vmem:[#allocation3 + $0x30] sm:$0xff] %vm2332_vm15, %v2297_v57  ;;  %2597 = vrot.lane.b32.xlu0 %v2563_v34, %s4755_s22  ;;  %v2251_v57 = vshll.u32 %v4688_v8, 16  ;;  %v4698_v17 = vld [vmem:[#allocation2 + $0xa8] sm:$0xff]   ;;  %v857_v62 = vsel %vm4842_vm8, %v679_v55, %v856_v2 }
 0x102   : > { %v5408_v59 = vld [vmem:[#allocation2 + $0xa8] sm:$0xff]   ;;  %858 = vst [vmem:[#allocation2 + $0xb4] sm:$0xf] %v857_v62  ;;  %859 = vst.msk [vmem:[#allocation2 + $0xb8] sm:$0xf] %vm183_vm0, %v688_v16  ;;  %v3137_v1 = vshrl.u32 %v4698_v17, 16 }
 0x103   : > { %1877 = vrot.lane.b32.xlu1 %v4685_v48, %s4752_s19  ;;  %v2253_v39 = vrot.slane %v2251_v57, 1  ;;  %v4702_v63 = vld [vmem:[#allocation2 + $0xa8] sm:$0xfe]   ;;  %v3139_v4 = vshll.u32 %v4698_v17, 16  ;;  %v1361_v21 = vshrl.u32 %v5408_v59, 16  ;;  %v1363_v5 = vshll.u32 %v5408_v59, 16 }
 0x104   : > { %v2586_v50 = vpop.permute.xlu0 %2585  ;;  %v3461_v9 = vrot.slane %v4702_v63, 1  ;;  %v4689_v11 = vld [vmem:[#allocation2 + $0xb0] ss:$0 sps:$4 sm:$0x11]  }
 0x105   : > { %2628 = vst.msk [vmem:[#allocation3 + $0x30] sm:$0xff] %vm2621_vm1, %v2586_v50  ;;  %2775 = vrot.lane.b32.xlu0 %v4696_v22, %s4753_s20  ;;  %v3141_v12 = vrot.slane %v3139_v4, 1  ;;  %v4694_v14 = vld [vmem:[#allocation2 + $0xb0] ss:$0 sps:$4 sm:$0x11]   ;;  %v2254_v20 = vor.u32 %v2253_v39, %v2249_v30  ;;  %v2256_v23 = vshll.u32 %v4689_v11, 16 }
 0x106   : > { %v860_v50 = vld [vmem:[#allocation2 + $0xbc] sm:$0x1]  ;;  %v4699_v24 = vld [vmem:[#allocation2 + $0xb0] ss:$0 sps:$4 sm:$0x11]   ;;  %v2565_v7 = vrot.slane %v4694_v14, 1 }
 0x107   : > { %v861_v13 = vsel %vm4789_vm3, %v689_v53, %v860_v50  ;;  %v4703_v25 = vld [vmem:[#allocation2 + $0xb0] ss:$0 sps:$4 sm:$0x11]   ;;  %v2258_v3 = vrot.slane %v2256_v23, 1  ;;  %v3142_v26 = vor.u32 %v3141_v12, %v3137_v1  ;;  %v3144_v28 = vshll.u32 %v4699_v24, 16 }
 0x108   : > { %v2764_v45 = vpop.permute.xlu0 %2763  ;;  %862 = vst [vmem:[#allocation2 + $0xbc] sm:$0x1] %v861_v13  ;;  %v3462_v29 = vrot.slane %v4703_v25, 1  ;;  %v1365_v15 = vrot.slane %v1363_v5, 1  ;;  %v2566_v43 = vsel %vm1625_vm9, %v2564_v60, %v2565_v7  ;;  %v4416_v50 = vpack.c.bf16 %v336_v56, %v336_v56  ;;  %v243_v25 = vld [vmem:[#allocation2 + $0xc0] sm:$0x1] }
 0x109   : > { %2806 = vst.msk [vmem:[#allocation3 + $0x30] sm:$0xff] %vm2799_vm2, %v2764_v45  ;;  %v2259_v32 = vsel %vm1191_vm10, %v2254_v20, %v2258_v3  ;;  %v3146_v33 = vrot.slane %v3144_v28, 1  ;;  %v4700_v35 = vld [vmem:[#allocation2 + $0xb4] sm:$0xff]   ;;  %v4705_v34 = vld [vmem:[#allocation2 + $0xb0] ss:$0 sps:$4 sm:$0x11]  }
 0x10a   : > { %2310 = vrot.lane.b32.xlu1 %v2259_v32, %s4757_s24  ;;  %v4708_v42 = vld [vmem:[#allocation2 + $0xb4] sm:$0xff]   ;;  %v3149_v37 = vshrl.u32 %v4700_v35, 16  ;;  %v3151_v41 = vshll.u32 %v4700_v35, 16  ;;  %v1368_v46 = vshll.u32 %v4705_v34, 16  ;;  %v3463_v8 = vsel %vm1625_vm9, %v3461_v9, %v3462_v29  ;;  %v4720_v32 = vld [vmem:[#allocation2 + $0x60] sm:$0xff]  }
 0x10b   : > { %v3147_v45 = vsel %vm1191_vm10, %v3142_v26, %v3146_v33  ;;  %v4706_v52 = vld [vmem:[#allocation2 + $0xb4] sm:$0xfe]   ;;  %v1375_v39 = vshll.u32 %v4708_v42, 16  ;;  %v1373_v63 = vshrl.u32 %v4708_v42, 16  ;;  %v1366_v11 = vor.u32 %v1365_v15, %v1361_v21  ;;  %1007 = vst.msk [vmem:[#allocation3 + $0x40] sm:$0xff] %vm998_vm11, %v4720_v32 }
 0x10c   : > { %v3197_v19 = vpop.permute.xlu0 %3196  ;;  %3208 = vrot.lane.b32.xlu0 %v3147_v45, %s4758_s25  ;;  %v4697_v22 = vld [vmem:[#allocation2 + $0xb4] sm:$0xff]   ;;  %v3153_v30 = vrot.slane %v3151_v41, 1  ;;  %v1370_v58 = vrot.slane %v1368_v46, 1  ;;  %v3464_v17 = vrot.slane %v4706_v52, 1  ;;  %v697_v3 = vrot.slane %v5419_v10, 4 }
 0x10d   : > { %3239 = vst.msk [vmem:[#allocation3 + $0x30] sm:$0xff] %vm3232_vm4, %v3197_v19  ;;  %v4711_v1 = vld [vmem:[#allocation2 + $0xb0] ss:$0 sps:$4 sm:$0x11]   ;;  %v1377_v4 = vrot.slane %v1375_v39, 1  ;;  %v4714_v21 = vld [vmem:[#allocation2 + $0xb4] sm:$0xff]  }
 0x10e   : > { %2599 = vrot.lane.b32.xlu1 %v2566_v43, %s4755_s22  ;;  %v3154_v2 = vor.u32 %v3153_v30, %v3149_v37  ;;  %v1669_v13 = vrot.slane %v4711_v1, 1  ;;  %v5444_v14 = vld [vmem:[#allocation2 + $0xb4] sm:$0xfe]   ;;  %v244_v26 = vsel %vm4789_vm3, 0, %v243_v25  ;;  %v699_v28 = vshrl.u32 %v4416_v50, 16 }
 0x10f   : > { %v4701_v44 = vld [vmem:[#allocation2 + $0xbc] ss:$0 sps:$4 sm:$0x11]   ;;  %v1671_v7 = vrot.slane %v5444_v14, 1  ;;  %v4716_v29 = vld [vmem:[#allocation2 + $0xb4] sm:$0xff]   ;;  %v1371_v15 = vsel %vm1191_vm10, %v1366_v11, %v1370_v58 }
 0x110   : > { %v3156_v54 = vshll.u32 %v4701_v44, 16  ;;  %v4707_v55 = vld [vmem:[#allocation2 + $0xbc] ss:$0 sps:$4 sm:$0x11]   ;;  %3497 = vrot.lane.b32.xlu0 %v3463_v8, %s4756_s23  ;;  %245 = vst [vmem:[#allocation2 + $0xc0] sm:$0x1] %v244_v26  ;;  %v696_v8 = vor.u32 %v694_v18, %v5419_v10 }
 0x111   : > { %v3465_v38 = vrot.slane %v4707_v55, 1  ;;  %v4709_v53 = vld [vmem:[#allocation2 + $0xbc] ss:$0 sps:$4 sm:$0x11]   ;;  %v5458_v33 = vrot.slane %v699_v28, 7  ;;  %v2261_v34 = vshrl.u32 %v4716_v29, 16 }
 0x112   : > { %v3486_v61 = vpop.permute.xlu0 %3485  ;;  %v3158_v57 = vrot.slane %v3156_v54, 1  ;;  %2777 = vrot.lane.b32.xlu1 %v4697_v22, %s4753_s20  ;;  %v1380_v5 = vshll.u32 %v4709_v53, 16  ;;  %v5447_v19 = vld [vmem:[#allocation2 + $0xbc] ss:$0 sps:$4 sm:$0x11]   ;;  %v2263_v42 = vshll.u32 %v4716_v29, 16 }
 0x113   : > { %3528 = vst.msk [vmem:[#allocation3 + $0x30] sm:$0xff] %vm5750_vm6, %v3486_v61  ;;  %v3466_v62 = vsel %vm1625_vm9, %v3464_v17, %v3465_v38  ;;  %v1672_v59 = vrot.slane %v5447_v19, 1  ;;  %v702_v61 = vshll.u32 %v4416_v50, 16  ;;  %v4717_v35 = vld [vmem:[#allocation2 + $0xbc] ss:$0 sps:$4 sm:$0x11]  }
 0x114   : > { %v3159_v9 = vsel %vm1191_vm10, %v3154_v2, %v3158_v57  ;;  %3499 = vrot.lane.b32.xlu0 %v3466_v62, %s4756_s23  ;;  %v299_v44 = vld [vmem:[#allocation2 + $0xc8] sm:$0x1]  ;;  %v2265_v41 = vrot.slane %v2263_v42, 1  ;;  %v2268_v46 = vshll.u32 %v4717_v35, 16  ;;  %vm5752_vm6 = vcmask 64544   ;;  %v4736_v1 = vld [vmem:[#allocation2 + $0x78] sm:$0xff]  }
 0x115   : > { %v704_v37 = vor.u32 %v702_v61, %v5458_v33  ;;  %v706_v52 = vrot.slane %v5458_v33, 4  ;;  %v4721_v57 = vld [vmem:[#allocation2 + $0xb4] sm:$0xfe]   ;;  %v4722_v58 = vld [vmem:[#allocation2 + $0xbc] ss:$0 sps:$4 sm:$0x11]  }
 0x116   : > { %3210 = vrot.lane.b32.xlu1 %v3159_v9, %s4758_s25  ;;  %v2266_v22 = vor.u32 %v2265_v41, %v2261_v34  ;;  %v2270_v30 = vrot.slane %v2268_v46, 1  ;;  %v246_v18 = vld [vmem:[#allocation2 + $0xcc] sm:$0x1]  ;;  %v2567_v38 = vrot.slane %v4721_v57, 1  ;;  %v2568_v2 = vrot.slane %v4722_v58, 1  ;;  %1009 = vst.msk [vmem:[#allocation3 + $0x50] sm:$0xff] %vm998_vm11, %v4736_v1 }
 0x117   : > { %v705_v56 = vsel %vm4834_vm7, %v697_v3, %v704_v37  ;;  %v863_v31 = vld [vmem:[#allocation2 + $0xc0] sm:$0xf]  ;;  %v247_v53 = vsel %vm4789_vm3, 0, %v246_v18  ;;  %v302_v62 = vld [vmem:[#allocation2 + $0xd4] sm:$0x1]  ;;  %v4737_v50 = vld [vmem:[#allocation2 + $0x84] sm:$0xff]  }
 0x118   : > { %v2299_v49 = vpop.permute.xlu1 %2298  ;;  %v3488_v51 = vpop.permute.xlu0 %3487  ;;  %866 = vst.msk [vmem:[#allocation2 + $0xc4] sm:$0xf] %vm183_vm0, %v705_v56  ;;  %v2271_v17 = vsel %vm1191_vm10, %v2266_v22, %v2270_v30  ;;  %248 = vst [vmem:[#allocation2 + $0xcc] sm:$0x1] %v247_v53  ;;  %vm5755_vm0 = vcmask 294144   ;;  %v4738_v41 = vld [vmem:[#allocation2 + $0x90] sm:$0xff]  }
 0x119   : > { %2340 = vst.msk [vmem:[#allocation3 + $0x38] sm:$0xff] %vm2332_vm15, %v2299_v49  ;;  %v4710_v49 = vld [vmem:[#allocation2 + $0xa8] sm:$0xfe]   ;;  %v4739_v22 = vld [vmem:[#allocation2 + $0x9c] sm:$0xff]  }
 0x11a   : > { %v1668_v12 = vrot.slane %v4710_v49, 1  ;;  %1412 = vrot.lane.b32.xlu1 %v1371_v15, %s4754_s21  ;;  %v3544_v55 = vld [vmem:[#allocation3 + $0x30] sm:$0xff]  ;;  %1010 = vst.msk [vmem:[#allocation3 + $0x58] sm:$0xff] %vm998_vm11, %v4737_v50  ;;  %1011 = vst.msk [vmem:[#allocation3 + $0x60] sm:$0xff] %vm998_vm11, %v4738_v41 }
 0x11b   : > { %4454 = vmatprep.mubr.msk.bf16.mxu0 %vm3574_vm12, %v3544_v55  ;;  %v4740_v30 = vld [vmem:[#allocation2 + $0xa8] sm:$0xff]   ;;  %1012 = vst.msk [vmem:[#allocation3 + $0x68] sm:$0xff] %vm998_vm11, %v4739_v22 }
 0x11c   : > { %v2588_v27 = vpop.permute.xlu1 %2587  ;;  %v1670_v24 = vsel %vm1625_vm9, %v1668_v12, %v1669_v13  ;;  %1013 = vst.msk [vmem:[#allocation3 + $0x70] sm:$0xff] %vm998_vm11, %v4740_v30 }
 0x11d   : > { %2629 = vst.msk [vmem:[#allocation3 + $0x38] sm:$0xff] %vm2621_vm1, %v2588_v27  ;;  %v1382_v27 = vrot.slane %v1380_v5, 1  ;;  %1702 = vrot.lane.b32.xlu0 %v1670_v24, %s4751_s18 }
 0x11f   : > { %v4727_v57 = vld [vmem:[#allocation2 + $0xcc] sm:$0xff]  }
 0x120   : > { %v2766_v40 = vpop.permute.xlu1 %2765 }
 0x121   : > { %2807 = vst.msk [vmem:[#allocation3 + $0x38] sm:$0xff] %vm2799_vm2, %v2766_v40  ;;  %v1378_v40 = vor.u32 %v1377_v4, %v1373_v63  ;;  %1879 = vrot.lane.b32.xlu0 %v4714_v21, %s4752_s19  ;;  %v303_v63 = vsel %vm4808_vm5, 0, %v302_v62  ;;  %v2569_v4 = vsel %vm1625_vm9, %v2567_v38, %v2568_v2 }
 0x122   : > { %304 = vst [vmem:[#allocation2 + $0xd4] sm:$0x1] %v303_v63 }
 0x123   : > { %v1383_v54 = vsel %vm1191_vm10, %v1378_v40, %v1382_v27 }
 0x124   : > { %v3199_v48 = vpop.permute.xlu1 %3198  ;;  %1414 = vrot.lane.b32.xlu1 %v1383_v54, %s4754_s21 }
 0x125   : > { %3240 = vst.msk [vmem:[#allocation3 + $0x38] sm:$0xff] %vm3232_vm4, %v3199_v48  ;;  %v1691_v16 = vpop.permute.xlu0 %1690  ;;  %v300_v48 = vsel %vm4808_vm5, 0, %v299_v44  ;;  %2312 = vrot.lane.b32.xlu0 %v2271_v17, %s4757_s24  ;;  %v4734_v17 = vld [vmem:[#allocation2 + $0xcc] sm:$0xfe]   ;;  %vm5757_vm5 = vmmov %vm5752_vm6 }
 0x126   : > { %3529 = vst.msk [vmem:[#allocation3 + $0x38] sm:$0xff] %vm5751_vm13, %v3488_v51  ;;  %v4725_v51 = vld [vmem:[#allocation2 + $0x6c] sm:$0xff]   ;;  %301 = vst [vmem:[#allocation2 + $0xc8] sm:$0x1] %v300_v48  ;;  %vm5753_vm13 = vcmask 97344  }
 0x127   : > { %1008 = vst.msk [vmem:[#allocation3 + $0x48] sm:$0xff] %vm998_vm11, %v4725_v51  ;;  %vm5754_vm7 = vmmov %vm5753_vm13 }
 0x128   : > { %v1401_v60 = vpop.permute.xlu1 %1400 }
 0x129   : > { %v1868_v23 = vpop.permute.xlu0 %1867  ;;  %1441 = vst.msk [vmem:[#allocation3 + $0x40] sm:$0xff] %vm5752_vm6, %v1401_v60  ;;  %v1673_v60 = vsel %vm1625_vm9, %v1671_v7, %v1672_v59  ;;  %2601 = vrot.lane.b32.xlu0 %v2569_v4, %s4755_s22  ;;  %v4731_v15 = vld [vmem:[#allocation2 + $0xd4] ss:$0 sps:$4 sm:$0x11]  }
 0x12a   : > { %1731 = vst.msk [vmem:[#allocation3 + $0x40] sm:$0xff] %vm5753_vm13, %v1691_v16  ;;  %v864_v16 = vsel %vm4842_vm8, %v696_v8, %v863_v31  ;;  %1704 = vrot.lane.b32.xlu1 %v1673_v60, %s4751_s18  ;;  %v4735_v38 = vld [vmem:[#allocation2 + $0xd4] ss:$0 sps:$4 sm:$0x11]   ;;  %vm5758_vm8 = vmmov %vm5754_vm7 }
 0x12b   : > { %1908 = vst.msk [vmem:[#allocation3 + $0x40] sm:$0xff] %vm1899_vm14, %v1868_v23  ;;  %865 = vst [vmem:[#allocation2 + $0xc0] sm:$0xf] %v864_v16  ;;  %v3470_v16 = vrot.slane %v4734_v17, 1  ;;  %v3471_v62 = vrot.slane %v4735_v38, 1 }
 0x12c   : > { %v1403_v20 = vpop.permute.xlu1 %1402  ;;  %vm5759_vm13 = vmmov %vm5757_vm5 }
 0x12d   : > { %v2301_v45 = vpop.permute.xlu0 %2300  ;;  %1442 = vst.msk [vmem:[#allocation3 + $0x48] sm:$0xff] %vm5752_vm6, %v1403_v20  ;;  %v3545_v39 = vld [vmem:[#allocation3 + $0x38] sm:$0xff]  ;;  %v867_v36 = vld [vmem:[#allocation2 + $0xc8] sm:$0x1]  ;;  %v3472_v1 = vsel %vm1625_vm9, %v3470_v16, %v3471_v62  ;;  %vm5762_vm6 = vmmov %vm5755_vm0 }
 0x12e   : > { %2341 = vst.msk [vmem:[#allocation3 + $0x40] sm:$0xff] %vm2332_vm15, %v2301_v45  ;;  %4455 = vmatmul.mubr.msk.bf16.gmra.mrb[12].mxu0 %vm3574_vm12, %v3545_v39  ;;  %v868_v5 = vsel %vm4789_vm3, %v706_v52, %v867_v36  ;;  %v4730_v20 = vld [vmem:[#allocation2 + $0xcc] sm:$0xff]   ;;  %v3180_v52 = vshll.u32 %v4731_v15, 16  ;;  %vm5756_vm3 = vmmov %vm5755_vm0 }
 0x12f   : > { %869 = vst [vmem:[#allocation2 + $0xc8] sm:$0x1] %v868_v5  ;;  %v3175_v33 = vshll.u32 %v4730_v20, 16  ;;  %v3173_v48 = vshrl.u32 %v4730_v20, 16 }
 0x130   : > { %v1693_v43 = vpop.permute.xlu1 %1692  ;;  %v3182_v31 = vrot.slane %v3180_v52, 1 }
 0x131   : > { %v2590_v10 = vpop.permute.xlu0 %2589  ;;  %1732 = vst.msk [vmem:[#allocation3 + $0x48] sm:$0xff] %vm5754_vm7, %v1693_v43  ;;  %v3177_v8 = vrot.slane %v3175_v33, 1 }
 0x132   : > { %2630 = vst.msk [vmem:[#allocation3 + $0x40] sm:$0xff] %vm2621_vm1, %v2590_v10  ;;  %v4715_v6 = vld [vmem:[#allocation2 + $0xc0] sm:$0xff]   ;;  %v4741_v10 = vld [vmem:[#allocation2 + $0xb4] sm:$0xff]  }
 0x133   : > { %v4718_v9 = vld [vmem:[#allocation2 + $0xc0] sm:$0xff]   ;;  %1881 = vrot.lane.b32.xlu1 %v4715_v6, %s4752_s19  ;;  %v3178_v18 = vor.u32 %v3177_v8, %v3173_v48  ;;  %1014 = vst.msk [vmem:[#allocation3 + $0x78] sm:$0xff] %vm998_vm11, %v4741_v10 }
 0x134   : > { %v1870_v47 = vpop.permute.xlu1 %1869  ;;  %v4723_v11 = vld [vmem:[#allocation2 + $0xc0] sm:$0xfe]   ;;  %v2273_v14 = vshrl.u32 %v4718_v9, 16  ;;  %v2275_v27 = vshll.u32 %v4718_v9, 16 }
 0x135   : > { %1909 = vst.msk [vmem:[#allocation3 + $0x48] sm:$0xff] %vm1899_vm14, %v1870_v47  ;;  %v2768_v49 = vpop.permute.xlu0 %2767  ;;  %v4726_v12 = vld [vmem:[#allocation2 + $0xc0] sm:$0xff]   ;;  %v2570_v26 = vrot.slane %v4723_v11, 1  ;;  %v3183_v60 = vsel %vm1191_vm10, %v3178_v18, %v3182_v31 }
 0x136   : > { %2808 = vst.msk [vmem:[#allocation3 + $0x40] sm:$0xff] %vm2799_vm2, %v2768_v49  ;;  %v4728_v19 = vld [vmem:[#allocation2 + $0xc0] sm:$0xff]   ;;  %v4719_v0 = vld [vmem:[#allocation2 + $0xc8] ss:$0 sps:$4 sm:$0x11]   ;;  %2779 = vrot.lane.b32.xlu0 %v4726_v12, %s4753_s20  ;;  %v2277_v23 = vrot.slane %v2275_v27, 1 }
 0x137   : > { %v4724_v24 = vld [vmem:[#allocation2 + $0xc8] ss:$0 sps:$4 sm:$0x11]   ;;  %v2280_v25 = vshll.u32 %v4719_v0, 16  ;;  %v3161_v28 = vshrl.u32 %v4728_v19, 16  ;;  %v3163_v29 = vshll.u32 %v4728_v19, 16 }
 0x138   : > { %v2303_v13 = vpop.permute.xlu1 %2302  ;;  %v4729_v3 = vld [vmem:[#allocation2 + $0xc8] ss:$0 sps:$4 sm:$0x11]   ;;  %v2278_v21 = vor.u32 %v2277_v23, %v2273_v14  ;;  %v2571_v61 = vrot.slane %v4724_v24, 1  ;;  %v4732_v34 = vld [vmem:[#allocation2 + $0xc0] sm:$0xfe]  }
 0x139   : > { %2342 = vst.msk [vmem:[#allocation3 + $0x48] sm:$0xff] %vm2332_vm15, %v2303_v13  ;;  %v3201_v7 = vpop.permute.xlu0 %3200  ;;  %v2282_v40 = vrot.slane %v2280_v25, 1  ;;  %v3168_v32 = vshll.u32 %v4729_v3, 16  ;;  %v3165_v35 = vrot.slane %v3163_v29, 1  ;;  %v3467_v51 = vrot.slane %v4732_v34, 1 }
 0x13a   : > { %3241 = vst.msk [vmem:[#allocation3 + $0x40] sm:$0xff] %vm3232_vm4, %v3201_v7  ;;  %v4733_v44 = vld [vmem:[#allocation2 + $0xc8] ss:$0 sps:$4 sm:$0x11]   ;;  %v2572_v54 = vsel %vm1625_vm9, %v2570_v26, %v2571_v61 }
 0x13b   : > { %v2283_v43 = vsel %vm1191_vm10, %v2278_v21, %v2282_v40  ;;  %v3170_v45 = vrot.slane %v3168_v32, 1  ;;  %v3166_v46 = vor.u32 %v3165_v35, %v3161_v28  ;;  %v3468_v55 = vrot.slane %v4733_v44, 1 }
 0x13c   : > { %v2592_v59 = vpop.permute.xlu1 %2591  ;;  %2314 = vrot.lane.b32.xlu1 %v2283_v43, %s4757_s24 }
 0x13d   : > { %2631 = vst.msk [vmem:[#allocation3 + $0x48] sm:$0xff] %vm2621_vm1, %v2592_v59  ;;  %v3490_v42 = vpop.permute.xlu0 %3489  ;;  %v3171_v56 = vsel %vm1191_vm10, %v3166_v46, %v3170_v45  ;;  %v3469_v58 = vsel %vm1625_vm9, %v3467_v51, %v3468_v55  ;;  %vm5760_vm10 = vmmov %vm5754_vm7 }
 0x13e   : > { %3530 = vst.msk [vmem:[#allocation3 + $0x40] sm:$0xff] %vm5755_vm0, %v3490_v42  ;;  %3212 = vrot.lane.b32.xlu0 %v3171_v56, %s4758_s25  ;;  %vm5761_vm9 = vmmov %vm5755_vm0 }
 0x13f   : > { %vm5763_vm7 = vmmov %vm5757_vm5 }
 0x140   : > { %v2770_v37 = vpop.permute.xlu1 %2769  ;;  %2603 = vrot.lane.b32.xlu1 %v2572_v54, %s4755_s22  ;;  %vm5764_vm0 = vmmov %vm5758_vm8 }
 0x141   : > { %2809 = vst.msk [vmem:[#allocation3 + $0x48] sm:$0xff] %vm2799_vm2, %v2770_v37  ;;  %v3492_v47 = vpop.permute.xlu0 %3491 }
 0x142   : > { %3501 = vrot.lane.b32.xlu0 %v3469_v58, %s4756_s23 }
 0x144   : > { %v3203_v2 = vpop.permute.xlu1 %3202  ;;  %2781 = vrot.lane.b32.xlu1 %v4727_v57, %s4753_s20 }
 0x145   : > { %v3546_v53 = vld [vmem:[#allocation3 + $0x40] sm:$0xff]  ;;  %3242 = vst.msk [vmem:[#allocation3 + $0x48] sm:$0xff] %vm3232_vm4, %v3203_v2  ;;  %v1695_v39 = vpop.permute.xlu0 %1694 }
 0x146   : > { %4458 = vmatprep.mubr.msk.bf16.mxu1 %vm3574_vm12, %v3546_v53  ;;  %3531 = vst.msk [vmem:[#allocation3 + $0x48] sm:$0xff] %vm5756_vm3, %v3492_v47  ;;  %vm5765_vm3 = vmmov %vm5757_vm5 }
 0x148   : > { %v1405_v63 = vpop.permute.xlu1 %1404  ;;  %3214 = vrot.lane.b32.xlu1 %v3183_v60, %s4758_s25 }
 0x149   : > { %1443 = vst.msk [vmem:[#allocation3 + $0x50] sm:$0xff] %vm5757_vm5, %v1405_v63  ;;  %v1872_v49 = vpop.permute.xlu0 %1871  ;;  %vm5766_vm5 = vmmov %vm5764_vm0 }
 0x14a   : > { %1733 = vst.msk [vmem:[#allocation3 + $0x50] sm:$0xff] %vm5758_vm8, %v1695_v39  ;;  %vm5767_vm8 = vmmov %vm5762_vm6 }
 0x14b   : > { %1910 = vst.msk [vmem:[#allocation3 + $0x50] sm:$0xff] %vm1899_vm14, %v1872_v49 }
 0x14c   : > { %v1407_v4 = vpop.permute.xlu1 %1406  ;;  %3503 = vrot.lane.b32.xlu1 %v3472_v1, %s4756_s23 }
 0x14d   : > { %1444 = vst.msk [vmem:[#allocation3 + $0x58] sm:$0xff] %vm5759_vm13, %v1407_v4  ;;  %v3547_v36 = vld [vmem:[#allocation3 + $0x48] sm:$0xff]  ;;  %v2305_v5 = vpop.permute.xlu0 %2304  ;;  %vm5768_vm13 = vmmov %vm5762_vm6 }
 0x14e   : > { %4459 = vmatmul.mubr.msk.bf16.vlgmr.msra.gmra.mrb[0].mxu1 %vm3574_vm12, %v3547_v36  ;;  %2343 = vst.msk [vmem:[#allocation3 + $0x50] sm:$0xff] %vm2332_vm15, %v2305_v5 }
 0x150   : > { %v1697_v50 = vpop.permute.xlu1 %1696 }
 0x151   : > { %1734 = vst.msk [vmem:[#allocation3 + $0x58] sm:$0xff] %vm5760_vm10, %v1697_v50  ;;  %v2594_v6 = vpop.permute.xlu0 %2593  ;;  %vm5769_vm10 = vmmov %vm5765_vm3 }
 0x152   : > { %2632 = vst.msk [vmem:[#allocation3 + $0x50] sm:$0xff] %vm2621_vm1, %v2594_v6 }
 0x154   : > { %v1874_v9 = vpop.permute.xlu1 %1873 }
 0x155   : > { %1911 = vst.msk [vmem:[#allocation3 + $0x58] sm:$0xff] %vm1899_vm14, %v1874_v9  ;;  %v2772_v11 = vpop.permute.xlu0 %2771 }
 0x156   : > { %2810 = vst.msk [vmem:[#allocation3 + $0x50] sm:$0xff] %vm2799_vm2, %v2772_v11 }
 0x159   : > { %v2307_v12 = vpop.permute.xlu1 %2306 }
 0x15a   : > { %2344 = vst.msk [vmem:[#allocation3 + $0x58] sm:$0xff] %vm2332_vm15, %v2307_v12 }
 0x15b   : > { %v3205_v13 = vpop.permute.xlu0 %3204 }
 0x15c   : > { %3243 = vst.msk [vmem:[#allocation3 + $0x50] sm:$0xff] %vm3232_vm4, %v3205_v13 }
 0x15d   : > { %v2596_v14 = vpop.permute.xlu1 %2595 }
 0x15e   : > { %2633 = vst.msk [vmem:[#allocation3 + $0x58] sm:$0xff] %vm2621_vm1, %v2596_v14 }
 0x15f   : > { %v3494_v27 = vpop.permute.xlu0 %3493 }
 0x160   : > { %3532 = vst.msk [vmem:[#allocation3 + $0x50] sm:$0xff] %vm5761_vm9, %v3494_v27  ;;  %vm5770_vm9 = vmmov %vm5764_vm0 }
 0x161   : > { %v2774_v19 = vpop.permute.xlu1 %2773 }
 0x162   : > { %2811 = vst.msk [vmem:[#allocation3 + $0x58] sm:$0xff] %vm2799_vm2, %v2774_v19 }
 0x163   : > { %v3496_v0 = vpop.permute.xlu0 %3495 }
 0x165   : > { %v3207_v20 = vpop.permute.xlu1 %3206 }
 0x166   : > { %3244 = vst.msk [vmem:[#allocation3 + $0x58] sm:$0xff] %vm3232_vm4, %v3207_v20 }
 0x167   : > { %3533 = vst.msk [vmem:[#allocation3 + $0x58] sm:$0xff] %vm5762_vm6, %v3496_v0  ;;  %v1699_v23 = vpop.permute.xlu0 %1698  ;;  %v3548_v24 = vld [vmem:[#allocation3 + $0x50] sm:$0xff]  ;;  %vm5771_vm6 = vmmov %vm5765_vm3 }
 0x168   : > { %4462 = vmatprep.mubr.msk.bf16.mxu1 %vm3574_vm12, %v3548_v24 }
 0x169   : > { %v1409_v7 = vpop.permute.xlu1 %1408 }
 0x16a   : > { %1445 = vst.msk [vmem:[#allocation3 + $0x60] sm:$0xff] %vm5763_vm7, %v1409_v7  ;;  %vm5772_vm7 = vmmov %vm5764_vm0 }
 0x16b   : > { %1735 = vst.msk [vmem:[#allocation3 + $0x60] sm:$0xff] %vm5764_vm0, %v1699_v23  ;;  %v1876_v25 = vpop.permute.xlu0 %1875 }
 0x16c   : > { %1912 = vst.msk [vmem:[#allocation3 + $0x60] sm:$0xff] %vm1899_vm14, %v1876_v25 }
 0x16d   : > { %v1411_v3 = vpop.permute.xlu1 %1410 }
 0x16e   : > { %1446 = vst.msk [vmem:[#allocation3 + $0x68] sm:$0xff] %vm5765_vm3, %v1411_v3  ;;  %v3549_v59 = vld [vmem:[#allocation3 + $0x58] sm:$0xff] }
 0x16f   : > { %4463 = vmatmul.mubr.msk.bf16.gmra.mrb[4].mxu1 %vm3574_vm12, %v3549_v59  ;;  %v2309_v26 = vpop.permute.xlu0 %2308 }
 0x170   : > { %2345 = vst.msk [vmem:[#allocation3 + $0x60] sm:$0xff] %vm2332_vm15, %v2309_v26 }
 0x171   : > { %v1701_v21 = vpop.permute.xlu1 %1700 }
 0x172   : > { %1736 = vst.msk [vmem:[#allocation3 + $0x68] sm:$0xff] %vm5766_vm5, %v1701_v21 }
 0x173   : > { %v2598_v28 = vpop.permute.xlu0 %2597 }
 0x174   : > { %2634 = vst.msk [vmem:[#allocation3 + $0x60] sm:$0xff] %vm2621_vm1, %v2598_v28 }
 0x175   : > { %v1878_v29 = vpop.permute.xlu1 %1877 }
 0x176   : > { %1913 = vst.msk [vmem:[#allocation3 + $0x68] sm:$0xff] %vm1899_vm14, %v1878_v29 }
 0x177   : > { %v2776_v15 = vpop.permute.xlu0 %2775 }
 0x178   : > { %2812 = vst.msk [vmem:[#allocation3 + $0x60] sm:$0xff] %vm2799_vm2, %v2776_v15 }
 0x17c   : > { %v2311_v40 = vpop.permute.xlu1 %2310 }
 0x17d   : > { %2346 = vst.msk [vmem:[#allocation3 + $0x68] sm:$0xff] %vm2332_vm15, %v2311_v40 }
 0x17e   : > { %v3209_v61 = vpop.permute.xlu0 %3208 }
 0x17f   : > { %3245 = vst.msk [vmem:[#allocation3 + $0x60] sm:$0xff] %vm3232_vm4, %v3209_v61 }
 0x180   : > { %v2600_v32 = vpop.permute.xlu1 %2599 }
 0x181   : > { %2635 = vst.msk [vmem:[#allocation3 + $0x68] sm:$0xff] %vm2621_vm1, %v2600_v32 }
 0x182   : > { %v3498_v33 = vpop.permute.xlu0 %3497 }
 0x183   : > { %3534 = vst.msk [vmem:[#allocation3 + $0x60] sm:$0xff] %vm5767_vm8, %v3498_v33 }
 0x184   : > { %v2778_v35 = vpop.permute.xlu1 %2777 }
 0x185   : > { %2813 = vst.msk [vmem:[#allocation3 + $0x68] sm:$0xff] %vm2799_vm2, %v2778_v35 }
 0x186   : > { %v3500_v34 = vpop.permute.xlu0 %3499 }
 0x188   : > { %v3211_v42 = vpop.permute.xlu1 %3210 }
 0x189   : > { %3246 = vst.msk [vmem:[#allocation3 + $0x68] sm:$0xff] %vm3232_vm4, %v3211_v42 }
 0x18a   : > { %3535 = vst.msk [vmem:[#allocation3 + $0x68] sm:$0xff] %vm5768_vm13, %v3500_v34  ;;  %v3550_v45 = vld [vmem:[#allocation3 + $0x60] sm:$0xff] }
 0x18b   : > { %4466 = vmatprep.mubr.msk.bf16.mxu1 %vm3574_vm12, %v3550_v45 }
 0x18c   : > { %v1413_v41 = vpop.permute.xlu1 %1412 }
 0x18d   : > { %1447 = vst.msk [vmem:[#allocation3 + $0x70] sm:$0xff] %vm5769_vm10, %v1413_v41 }
 0x18f   : > { %v1703_v43 = vpop.permute.xlu0 %1702 }
 0x190   : > { %1737 = vst.msk [vmem:[#allocation3 + $0x70] sm:$0xff] %vm5770_vm9, %v1703_v43 }
 0x191   : > { %v3551_v18 = vld [vmem:[#allocation3 + $0x68] sm:$0xff] }
 0x192   : > { %4467 = vmatmul.mubr.msk.bf16.gmra.mrb[8].mxu1 %vm3574_vm12, %v3551_v18 }
 0x193   : > { %v1880_v54 = vpop.permute.xlu0 %1879 }
 0x194   : > { %1914 = vst.msk [vmem:[#allocation3 + $0x70] sm:$0xff] %vm1899_vm14, %v1880_v54 }
 0x195   : > { %v4444_v44 = vpop.f32.mrb[0].mxu0 }
 0x196   : > { %3790 = vst.msk [vmem:[%s5568_s7 + $0x10] sm:$0xff] %vm998_vm11, %v4444_v44  ;;  %v3661_v37 = vpop.f32.mrb[1].mxu0  ;;  %v3891_v8 = vmul.f32 %v4444_v44, %v4444_v44  ;;  %v1415_v30 = vpop.permute.xlu1 %1414  ;;  %v3823_v57 = vsel %vm998_vm11, %v4444_v44, 0.0 }
 0x197   : > { %3788 = vst.msk [vmem:[%s5568_s7] sm:$0xff] %vm998_vm11, %v3661_v37  ;;  %v3889_v46 = vmul.f32 %v3661_v37, %v3661_v37  ;;  %v4445_v48 = vpop.f32.mrb[2].mxu0  ;;  %v3820_v52 = vsel %vm998_vm11, %v3661_v37, 0.0  ;;  %v2313_v38 = vpop.permute.xlu0 %2312 }
 0x198   : > { %3791 = vst.msk [vmem:[%s5568_s7 + $0x18] sm:$0xff] %vm998_vm11, %v4445_v48  ;;  %v3664_v51 = vpop.f32.mrb[3].mxu0  ;;  %v3892_v47 = vmul.f32 %v4445_v48, %v4445_v48  ;;  %v3924_v2 = vsel %vm998_vm11, %v3891_v8, 0.0  ;;  %v3825_v53 = vsel %vm998_vm11, %v4445_v48, 0.0 }
 0x199   : > { %3789 = vst.msk [vmem:[%s5568_s7 + $0x8] sm:$0xff] %vm998_vm11, %v3664_v51  ;;  %v3821_v55 = vsel %vm998_vm11, %v3664_v51, 0.0  ;;  %v3890_v56 = vmul.f32 %v3664_v51, %v3664_v51  ;;  %v3921_v58 = vsel %vm998_vm11, %v3889_v46, 0.0 }
 0x19a   : > { %v3822_v22 = vadd.f32 %v3821_v55, %v3820_v52  ;;  %1448 = vst.msk [vmem:[#allocation3 + $0x78] sm:$0xff] %vm5771_vm6, %v1415_v30  ;;  %v3926_v62 = vsel %vm998_vm11, %v3892_v47, 0.0 }
 0x19b   : > { %v3922_v10 = vsel %vm998_vm11, %v3890_v56, 0.0  ;;  %2347 = vst.msk [vmem:[#allocation3 + $0x70] sm:$0xff] %vm2332_vm15, %v2313_v38  ;;  %v2602_v49 = vpop.permute.xlu0 %2601 }
 0x19c   : > { %v3824_v31 = vadd.f32 %v3823_v57, %v3822_v22  ;;  %v3923_v17 = vadd.f32 %v3922_v10, %v3921_v58  ;;  %v1705_v16 = vpop.permute.xlu1 %1704  ;;  %2636 = vst.msk [vmem:[#allocation3 + $0x70] sm:$0xff] %vm2621_vm1, %v2602_v49 }
 0x19d   : > { %1738 = vst.msk [vmem:[#allocation3 + $0x78] sm:$0xff] %vm5772_vm7, %v1705_v16 }
 0x19e   : > { %v3925_v39 = vadd.f32 %v3924_v2, %v3923_v17  ;;  %v3826_v60 = vadd.f32 %v3825_v53, %v3824_v31 }
 0x1a0   : > { %v3927_v63 = vadd.f32 %v3926_v62, %v3925_v39 }
 0x1a5   : > { %v1882_v1 = vpop.permute.xlu1 %1881 }
 0x1a6   : > { %1915 = vst.msk [vmem:[#allocation3 + $0x78] sm:$0xff] %vm1899_vm14, %v1882_v1  ;;  %vm5773_vm14 = vmmov %vm5767_vm8 }
 0x1a8   : > { %v2780_v4 = vpop.permute.xlu0 %2779 }
 0x1a9   : > { %2814 = vst.msk [vmem:[#allocation3 + $0x70] sm:$0xff] %vm2799_vm2, %v2780_v4 }
 0x1ae   : > { %v2315_v36 = vpop.permute.xlu1 %2314 }
 0x1af   : > { %2348 = vst.msk [vmem:[#allocation3 + $0x78] sm:$0xff] %vm2332_vm15, %v2315_v36  ;;  %vm5774_vm15 = vmmov %vm5767_vm8 }
 0x1b0   : > { %v4448_v5 = vpop.f32.mrb[4].mxu0  ;;  %v3213_v12 = vpop.permute.xlu0 %3212 }
 0x1b1   : > { %3794 = vst.msk [vmem:[%s5568_s7 + $0x30] sm:$0xff] %vm998_vm11, %v4448_v5  ;;  %v3677_v50 = vpop.f32.mrb[5].mxu0  ;;  %v3895_v19 = vmul.f32 %v4448_v5, %v4448_v5  ;;  %v3831_v25 = vsel %vm998_vm11, %v4448_v5, 0.0 }
 0x1b2   : > { %3792 = vst.msk [vmem:[%s5568_s7 + $0x20] sm:$0xff] %vm998_vm11, %v3677_v50  ;;  %v3827_v6 = vsel %vm998_vm11, %v3677_v50, 0.0  ;;  %v3893_v9 = vmul.f32 %v3677_v50, %v3677_v50  ;;  %v4449_v11 = vpop.f32.mrb[6].mxu0  ;;  %v2604_v27 = vpop.permute.xlu1 %2603 }
 0x1b3   : > { %v3828_v13 = vadd.f32 %v3827_v6, %v3826_v60  ;;  %3795 = vst.msk [vmem:[%s5568_s7 + $0x38] sm:$0xff] %vm998_vm11, %v4449_v11  ;;  %v3680_v14 = vpop.f32.mrb[7].mxu0  ;;  %v3896_v3 = vmul.f32 %v4449_v11, %v4449_v11  ;;  %v3932_v15 = vsel %vm998_vm11, %v3895_v19, 0.0  ;;  %v3833_v40 = vsel %vm998_vm11, %v4449_v11, 0.0 }
 0x1b4   : > { %3247 = vst.msk [vmem:[#allocation3 + $0x70] sm:$0xff] %vm3232_vm4, %v3213_v12  ;;  %v3928_v0 = vsel %vm998_vm11, %v3893_v9, 0.0  ;;  %v3829_v20 = vsel %vm998_vm11, %v3680_v14, 0.0  ;;  %v3894_v23 = vmul.f32 %v3680_v14, %v3680_v14  ;;  %v3502_v21 = vpop.permute.xlu0 %3501 }
 0x1b5   : > { %3793 = vst.msk [vmem:[%s5568_s7 + $0x28] sm:$0xff] %vm998_vm11, %v3680_v14  ;;  %v3929_v24 = vadd.f32 %v3928_v0, %v3927_v63  ;;  %v3830_v7 = vadd.f32 %v3829_v20, %v3828_v13  ;;  %v3934_v33 = vsel %vm998_vm11, %v3896_v3, 0.0 }
 0x1b6   : > { %2637 = vst.msk [vmem:[#allocation3 + $0x78] sm:$0xff] %vm2621_vm1, %v2604_v27  ;;  %v3930_v59 = vsel %vm998_vm11, %v3894_v23, 0.0  ;;  %v2782_v29 = vpop.permute.xlu1 %2781 }
 0x1b7   : > { %v3832_v26 = vadd.f32 %v3831_v25, %v3830_v7  ;;  %v3931_v28 = vadd.f32 %v3930_v59, %v3929_v24  ;;  %3536 = vst.msk [vmem:[#allocation3 + $0x70] sm:$0xff] %vm5773_vm14, %v3502_v21 }
 0x1b8   : > { %2815 = vst.msk [vmem:[#allocation3 + $0x78] sm:$0xff] %vm2799_vm2, %v2782_v29 }
 0x1b9   : > { %v3933_v61 = vadd.f32 %v3932_v15, %v3931_v28  ;;  %v3834_v32 = vadd.f32 %v3833_v40, %v3832_v26 }
 0x1ba   : > { %v3215_v34 = vpop.permute.xlu1 %3214 }
 0x1bb   : > { %v3935_v35 = vadd.f32 %v3934_v33, %v3933_v61  ;;  %3248 = vst.msk [vmem:[#allocation3 + $0x78] sm:$0xff] %vm3232_vm4, %v3215_v34 }
 0x1be   : > { %v3552_v42 = vld [vmem:[#allocation3 + $0x70] sm:$0xff]  ;;  %v3504_v43 = vpop.permute.xlu1 %3503 }
 0x1bf   : > { %4470 = vmatprep.mubr.msk.bf16.mxu1 %vm3574_vm12, %v3552_v42  ;;  %3537 = vst.msk [vmem:[#allocation3 + $0x78] sm:$0xff] %vm5774_vm15, %v3504_v43 }
 0x1c6   : > { %v3553_v45 = vld [vmem:[#allocation3 + $0x78] sm:$0xff] }
 0x1c7   : > { %4471 = vmatmul.mubr.msk.bf16.gmra.mrb[12].mxu1 %vm3574_vm12, %v3553_v45  ;;  %vm3990_vm12 = vcmask 1040384  }
 0x1d0   : > { %v4452_v44 = vpop.f32.mrb[8].mxu0 }
 0x1d1   : > { %3798 = vst.msk [vmem:[%s5568_s7 + $0x50] sm:$0xff] %vm998_vm11, %v4452_v44  ;;  %v3693_v37 = vpop.f32.mrb[9].mxu0  ;;  %v3899_v8 = vmul.f32 %v4452_v44, %v4452_v44  ;;  %v3839_v57 = vsel %vm998_vm11, %v4452_v44, 0.0 }
 0x1d2   : > { %3796 = vst.msk [vmem:[%s5568_s7 + $0x40] sm:$0xff] %vm998_vm11, %v3693_v37  ;;  %v3835_v41 = vsel %vm998_vm11, %v3693_v37, 0.0  ;;  %v3897_v46 = vmul.f32 %v3693_v37, %v3693_v37  ;;  %v4453_v48 = vpop.f32.mrb[10].mxu0 }
 0x1d3   : > { %v3836_v51 = vadd.f32 %v3835_v41, %v3834_v32  ;;  %3799 = vst.msk [vmem:[%s5568_s7 + $0x58] sm:$0xff] %vm998_vm11, %v4453_v48  ;;  %v3696_v54 = vpop.f32.mrb[11].mxu0  ;;  %v3900_v58 = vmul.f32 %v4453_v48, %v4453_v48  ;;  %v3940_v31 = vsel %vm998_vm11, %v3899_v8, 0.0  ;;  %v3841_v17 = vsel %vm998_vm11, %v4453_v48, 0.0 }
 0x1d4   : > { %v3936_v52 = vsel %vm998_vm11, %v3897_v46, 0.0  ;;  %3797 = vst.msk [vmem:[%s5568_s7 + $0x48] sm:$0xff] %vm998_vm11, %v3696_v54  ;;  %v3837_v55 = vsel %vm998_vm11, %v3696_v54, 0.0  ;;  %v3898_v56 = vmul.f32 %v3696_v54, %v3696_v54 }
 0x1d5   : > { %v3937_v22 = vadd.f32 %v3936_v52, %v3935_v35  ;;  %v3838_v30 = vadd.f32 %v3837_v55, %v3836_v51  ;;  %v3942_v53 = vsel %vm998_vm11, %v3900_v58, 0.0 }
 0x1d6   : > { %v3938_v47 = vsel %vm998_vm11, %v3898_v56, 0.0 }
 0x1d7   : > { %v3840_v10 = vadd.f32 %v3839_v57, %v3838_v30  ;;  %v3939_v18 = vadd.f32 %v3938_v47, %v3937_v22 }
 0x1d9   : > { %v3941_v38 = vadd.f32 %v3940_v31, %v3939_v18  ;;  %v3842_v2 = vadd.f32 %v3841_v17, %v3840_v10 }
 0x1db   : > { %v3943_v39 = vadd.f32 %v3942_v53, %v3941_v38 }
 0x201   : > { %v4456_v60 = vpop.f32.mrb[12].mxu0 }
 0x202   : > { %3802 = vst.msk [vmem:[%s5568_s7 + $0x70] sm:$0xff] %vm998_vm11, %v4456_v60  ;;  %v3709_v16 = vpop.f32.mrb[13].mxu0  ;;  %v3903_v36 = vmul.f32 %v4456_v60, %v4456_v60  ;;  %v3847_v12 = vsel %vm998_vm11, %v4456_v60, 0.0 }
 0x203   : > { %3800 = vst.msk [vmem:[%s5568_s7 + $0x60] sm:$0xff] %vm998_vm11, %v3709_v16  ;;  %v3843_v62 = vsel %vm998_vm11, %v3709_v16, 0.0  ;;  %v3901_v63 = vmul.f32 %v3709_v16, %v3709_v16  ;;  %v4457_v49 = vpop.f32.mrb[14].mxu0 }
 0x204   : > { %v3844_v1 = vadd.f32 %v3843_v62, %v3842_v2  ;;  %3803 = vst.msk [vmem:[%s5568_s7 + $0x78] sm:$0xff] %vm998_vm11, %v4457_v49  ;;  %v3712_v4 = vpop.f32.mrb[15].mxu0  ;;  %v3904_v13 = vmul.f32 %v4457_v49, %v4457_v49  ;;  %v3948_v0 = vsel %vm998_vm11, %v3903_v36, 0.0  ;;  %v3849_v20 = vsel %vm998_vm11, %v4457_v49, 0.0 }
 0x205   : > { %v3944_v5 = vsel %vm998_vm11, %v3901_v63, 0.0  ;;  %3801 = vst.msk [vmem:[%s5568_s7 + $0x68] sm:$0xff] %vm998_vm11, %v3712_v4  ;;  %v3845_v50 = vsel %vm998_vm11, %v3712_v4, 0.0  ;;  %v3902_v6 = vmul.f32 %v3712_v4, %v3712_v4 }
 0x206   : > { %v3945_v9 = vadd.f32 %v3944_v5, %v3943_v39  ;;  %v3846_v11 = vadd.f32 %v3845_v50, %v3844_v1  ;;  %v3950_v7 = vsel %vm998_vm11, %v3904_v13, 0.0 }
 0x207   : > { %v3946_v14 = vsel %vm998_vm11, %v3902_v6, 0.0 }
 0x208   : > { %v3848_v27 = vadd.f32 %v3847_v12, %v3846_v11  ;;  %v3947_v19 = vadd.f32 %v3946_v14, %v3945_v9 }
 0x20a   : > { %v3949_v23 = vadd.f32 %v3948_v0, %v3947_v19  ;;  %v3850_v24 = vadd.f32 %v3849_v20, %v3848_v27 }
 0x20c   : > { %v3951_v25 = vadd.f32 %v3950_v7, %v3949_v23 }
 0x221   : > { %v4460_v3 = vpop.f32.mrb[0].mxu1 }
 0x222   : > { %3806 = vst.msk [vmem:[%s5568_s7 + $0x90] sm:$0xff] %vm998_vm11, %v4460_v3  ;;  %v3725_v59 = vpop.f32.mrb[1].mxu1  ;;  %v3907_v40 = vmul.f32 %v4460_v3, %v4460_v3  ;;  %v3855_v42 = vsel %vm998_vm11, %v4460_v3, 0.0 }
 0x223   : > { %3804 = vst.msk [vmem:[%s5568_s7 + $0x80] sm:$0xff] %vm998_vm11, %v3725_v59  ;;  %v3851_v21 = vsel %vm998_vm11, %v3725_v59, 0.0  ;;  %v3905_v26 = vmul.f32 %v3725_v59, %v3725_v59  ;;  %v4461_v28 = vpop.f32.mrb[2].mxu1 }
 0x224   : > { %v3852_v29 = vadd.f32 %v3851_v21, %v3850_v24  ;;  %3807 = vst.msk [vmem:[%s5568_s7 + $0x98] sm:$0xff] %vm998_vm11, %v4461_v28  ;;  %v3728_v15 = vpop.f32.mrb[3].mxu1  ;;  %v3908_v43 = vmul.f32 %v4461_v28, %v4461_v28  ;;  %v3956_v41 = vsel %vm998_vm11, %v3907_v40, 0.0  ;;  %v3857_v46 = vsel %vm998_vm11, %v4461_v28, 0.0 }
 0x225   : > { %v3952_v61 = vsel %vm998_vm11, %v3905_v26, 0.0  ;;  %3805 = vst.msk [vmem:[%s5568_s7 + $0x88] sm:$0xff] %vm998_vm11, %v3728_v15  ;;  %v3853_v32 = vsel %vm998_vm11, %v3728_v15, 0.0  ;;  %v3906_v33 = vmul.f32 %v3728_v15, %v3728_v15 }
 0x226   : > { %v3953_v35 = vadd.f32 %v3952_v61, %v3951_v25  ;;  %v3854_v34 = vadd.f32 %v3853_v32, %v3852_v29  ;;  %v3958_v54 = vsel %vm998_vm11, %v3908_v43, 0.0 }
 0x227   : > { %v3954_v45 = vsel %vm998_vm11, %v3906_v33, 0.0 }
 0x228   : > { %v3856_v44 = vadd.f32 %v3855_v42, %v3854_v34  ;;  %v3955_v37 = vadd.f32 %v3954_v45, %v3953_v35 }
 0x22a   : > { %v3957_v48 = vadd.f32 %v3956_v41, %v3955_v37  ;;  %v3858_v51 = vadd.f32 %v3857_v46, %v3856_v44 }
 0x22c   : > { %v3959_v8 = vadd.f32 %v3958_v54, %v3957_v48 }
 0x242   : > { %v4464_v52 = vpop.f32.mrb[4].mxu1 }
 0x243   : > { %3810 = vst.msk [vmem:[%s5568_s7 + $0xb0] sm:$0xff] %vm998_vm11, %v4464_v52  ;;  %v3741_v55 = vpop.f32.mrb[5].mxu1  ;;  %v3911_v47 = vmul.f32 %v4464_v52, %v4464_v52  ;;  %v3863_v2 = vsel %vm998_vm11, %v4464_v52, 0.0 }
 0x244   : > { %3808 = vst.msk [vmem:[%s5568_s7 + $0xa0] sm:$0xff] %vm998_vm11, %v3741_v55  ;;  %v3859_v56 = vsel %vm998_vm11, %v3741_v55, 0.0  ;;  %v3909_v22 = vmul.f32 %v3741_v55, %v3741_v55  ;;  %v4465_v30 = vpop.f32.mrb[6].mxu1 }
 0x245   : > { %v3860_v57 = vadd.f32 %v3859_v56, %v3858_v51  ;;  %3811 = vst.msk [vmem:[%s5568_s7 + $0xb8] sm:$0xff] %vm998_vm11, %v4465_v30  ;;  %v3744_v58 = vpop.f32.mrb[7].mxu1  ;;  %v3912_v53 = vmul.f32 %v4465_v30, %v4465_v30  ;;  %v3964_v62 = vsel %vm998_vm11, %v3911_v47, 0.0  ;;  %v3865_v63 = vsel %vm998_vm11, %v4465_v30, 0.0 }
 0x246   : > { %v3960_v10 = vsel %vm998_vm11, %v3909_v22, 0.0  ;;  %3809 = vst.msk [vmem:[%s5568_s7 + $0xa8] sm:$0xff] %vm998_vm11, %v3744_v58  ;;  %v3861_v18 = vsel %vm998_vm11, %v3744_v58, 0.0  ;;  %v3910_v31 = vmul.f32 %v3744_v58, %v3744_v58 }
 0x247   : > { %v3961_v17 = vadd.f32 %v3960_v10, %v3959_v8  ;;  %v3862_v38 = vadd.f32 %v3861_v18, %v3860_v57  ;;  %v3966_v4 = vsel %vm998_vm11, %v3912_v53, 0.0 }
 0x248   : > { %v3962_v39 = vsel %vm998_vm11, %v3910_v31, 0.0 }
 0x249   : > { %v3864_v60 = vadd.f32 %v3863_v2, %v3862_v38  ;;  %v3963_v16 = vadd.f32 %v3962_v39, %v3961_v17 }
 0x24b   : > { %v3965_v49 = vadd.f32 %v3964_v62, %v3963_v16  ;;  %v3866_v1 = vadd.f32 %v3865_v63, %v3864_v60 }
 0x24d   : > { %v3967_v36 = vadd.f32 %v3966_v4, %v3965_v49 }
 0x265   : > { %v4468_v5 = vpop.f32.mrb[8].mxu1 }
 0x266   : > { %3814 = vst.msk [vmem:[%s5568_s7 + $0xd0] sm:$0xff] %vm998_vm11, %v4468_v5  ;;  %v3757_v50 = vpop.f32.mrb[9].mxu1  ;;  %v3915_v14 = vmul.f32 %v4468_v5, %v4468_v5  ;;  %v3871_v24 = vsel %vm998_vm11, %v4468_v5, 0.0 }
 0x267   : > { %3812 = vst.msk [vmem:[%s5568_s7 + $0xc0] sm:$0xff] %vm998_vm11, %v3757_v50  ;;  %v3867_v6 = vsel %vm998_vm11, %v3757_v50, 0.0  ;;  %v3913_v9 = vmul.f32 %v3757_v50, %v3757_v50  ;;  %v4469_v11 = vpop.f32.mrb[10].mxu1 }
 0x268   : > { %v3868_v12 = vadd.f32 %v3867_v6, %v3866_v1  ;;  %3815 = vst.msk [vmem:[%s5568_s7 + $0xd8] sm:$0xff] %vm998_vm11, %v4469_v11  ;;  %v3760_v13 = vpop.f32.mrb[11].mxu1  ;;  %v3916_v7 = vmul.f32 %v4469_v11, %v4469_v11  ;;  %v3972_v21 = vsel %vm998_vm11, %v3915_v14, 0.0  ;;  %v3873_v26 = vsel %vm998_vm11, %v4469_v11, 0.0 }
 0x269   : > { %v3968_v27 = vsel %vm998_vm11, %v3913_v9, 0.0  ;;  %3813 = vst.msk [vmem:[%s5568_s7 + $0xc8] sm:$0xff] %vm998_vm11, %v3760_v13  ;;  %v3869_v19 = vsel %vm998_vm11, %v3760_v13, 0.0  ;;  %v3914_v0 = vmul.f32 %v3760_v13, %v3760_v13 }
 0x26a   : > { %v3969_v20 = vadd.f32 %v3968_v27, %v3967_v36  ;;  %v3870_v23 = vadd.f32 %v3869_v19, %v3868_v12  ;;  %v3974_v15 = vsel %vm998_vm11, %v3916_v7, 0.0 }
 0x26b   : > { %v3970_v25 = vsel %vm998_vm11, %v3914_v0, 0.0 }
 0x26c   : > { %v3872_v3 = vadd.f32 %v3871_v24, %v3870_v23  ;;  %v3971_v59 = vadd.f32 %v3970_v25, %v3969_v20 }
 0x26e   : > { %v3973_v28 = vadd.f32 %v3972_v21, %v3971_v59  ;;  %v3874_v29 = vadd.f32 %v3873_v26, %v3872_v3 }
 0x270   : > { %v3975_v40 = vadd.f32 %v3974_v15, %v3973_v28 }
 0x29a   : > { %v4472_v61 = vpop.f32.mrb[12].mxu1 }
 0x29b   : > { %3818 = vst.msk [vmem:[%s5568_s7 + $0xf0] sm:$0xff] %vm998_vm11, %v4472_v61  ;;  %v3773_v32 = vpop.f32.mrb[13].mxu1  ;;  %v3919_v45 = vmul.f32 %v4472_v61, %v4472_v61  ;;  %v3879_v51 = vsel %vm998_vm11, %v4472_v61, 0.0 }
 0x29c   : > { %3816 = vst.msk [vmem:[%s5568_s7 + $0xe0] sm:$0xff] %vm998_vm11, %v3773_v32  ;;  %v3875_v33 = vsel %vm998_vm11, %v3773_v32, 0.0  ;;  %v3917_v35 = vmul.f32 %v3773_v32, %v3773_v32  ;;  %v4473_v34 = vpop.f32.mrb[14].mxu1 }
 0x29d   : > { %v3876_v42 = vadd.f32 %v3875_v33, %v3874_v29  ;;  %3819 = vst.msk [vmem:[%s5568_s7 + $0xf8] sm:$0xff] %vm998_vm11, %v4473_v34  ;;  %v3776_v43 = vpop.f32.mrb[15].mxu1  ;;  %v3920_v54 = vmul.f32 %v4473_v34, %v4473_v34  ;;  %v3980_v56 = vsel %vm998_vm11, %v3919_v45, 0.0  ;;  %v3881_v22 = vsel %vm998_vm11, %v4473_v34, 0.0 }
 0x29e   : > { %v3976_v44 = vsel %vm998_vm11, %v3917_v35, 0.0  ;;  %3817 = vst.msk [vmem:[%s5568_s7 + $0xe8] sm:$0xff] %vm998_vm11, %v3776_v43  ;;  %v3877_v37 = vsel %vm998_vm11, %v3776_v43, 0.0  ;;  %v3918_v41 = vmul.f32 %v3776_v43, %v3776_v43 }
 0x29f   : > { %v3977_v46 = vadd.f32 %v3976_v44, %v3975_v40  ;;  %v3878_v48 = vadd.f32 %v3877_v37, %v3876_v42  ;;  %v3982_v58 = vsel %vm998_vm11, %v3920_v54, 0.0 }
 0x2a0   : > { %v3978_v8 = vsel %vm998_vm11, %v3918_v41, 0.0  ;;  %vm3992_vm11 = vcmask 25600  }
 0x2a1   : > { %v3880_v52 = vadd.f32 %v3879_v51, %v3878_v48  ;;  %v3979_v55 = vadd.f32 %v3978_v8, %v3977_v46 }
 0x2a3   : > { %v3882_v30 = vadd.f32 %v3881_v22, %v3880_v52  ;;  %v3981_v57 = vadd.f32 %v3980_v56, %v3979_v55 }
 0x2a5   : > { %v3883_v47 = vrot.slane %v3882_v30, 4  ;;  %v3983_v10 = vadd.f32 %v3982_v58, %v3981_v57 }
 0x2a7   : > { %v3884_v18 = vadd.f32 %v3883_v47, %v3882_v30  ;;  %v3984_v31 = vrot.slane %v3983_v10, 4 }
 0x2a9   : > { %v3885_v17 = vrot.slane %v3884_v18, 2  ;;  %v3985_v38 = vadd.f32 %v3984_v31, %v3983_v10 }
 0x2ab   : > { %v3886_v2 = vadd.f32 %v3885_v17, %v3884_v18  ;;  %v3986_v53 = vrot.slane %v3985_v38, 2 }
 0x2ad   : > { %v3887_v39 = vrot.slane %v3886_v2, 1  ;;  %v3987_v60 = vadd.f32 %v3986_v53, %v3985_v38 }
 0x2af   : > { %v3988_v16 = vrot.slane %v3987_v60, 1  ;;  %v3888_v62 = vadd.f32 %v3887_v39, %v3886_v2 }
 0x2b1   : > { %v3989_v63 = vadd.f32 %v3988_v16, %v3987_v60 }
 0x2b3   : > { %v3991_v49 = vsel %vm3990_vm12, %v3888_v62, %v3989_v63 }
 0x2b4   : > { %3993 = vst.msk [vmem:[%s181_s11] sm:$0x3] %vm3992_vm11, %v3991_v49 }
 0x2b5 PF: > { %s14_s12 = sadd.s32 1, %s4748_s12  }
 0x2b6   : > { %p11_p4 = scmp.ge.s32.totalorder %s14_s12, 4  }
 0x2b8   :  { %13 = sbr.rel (!%p11_p4) target bundleno = 1 (0x1), region = 73 }

</bundles_post_ra>
